<compile_context>
chip_gen: v7x
topology: tpu7x:2x2x1
jax: 0.10.0
libtpu: 0.0.40
codegen_flags: <defaults>
</compile_context>

<pallas_src>
import functools

import numpy as np
import jax
import jax.numpy as jnp
from jax import lax
from jax.experimental import pallas as pl
from jax.experimental.pallas import tpu as pltpu

_BN_EPS = 1e-5


# ----------------------------- fused decoder-block kernel --------------------
def _decoder_block_kernel(
    xup_ref,    # [1, Np_alloc, Cin]  bf16  NN-upsampled + padded + flattened x
    skip_ref,   # [1, Np_alloc, Cskip] bf16 padded + flattened skip
    masks_ref,  # [Np_alloc, 6] f32: cols 0..3 parity masks, 4 interior, 5 col-valid
    wup_ref,    # [4, Cin, Cout] bf16 (parity k = di*2 + dj)
    bup_ref,    # [1, Cout] f32
    w1_ref,     # [9, Ct, Cout] f32 (tap t = dy*3 + dx)
    sb1_ref,    # [2, Cout] f32 (row 0 scale, row 1 bias; BN folded)
    w2_ref,     # [9, Cout, Cout] f32
    sb2_ref,    # [2, Cout] f32
    o_ref,      # [1, M, Cout] f32  (M = Ho*Wp; cols >= Wo of each row are junk->0)
    pcat_scr,   # VMEM [Np_alloc, Ct]  f32 padded concat(up, skip)
    py1_scr,    # VMEM [Np_alloc, Cout] f32 padded conv1 output
    acc_scr,    # VMEM [M, Cout] f32 shared conv accumulator
    *, Wp,
):
    Np_alloc, Ct = pcat_scr.shape
    M, Cout = acc_scr.shape

    # ---- 1) ConvTranspose2d(k=2, s=2): 4 parity matmuls on the shared
    #         NN-upsampled LHS, parity-selected by precomputed masks ----------
    xv = xup_ref[0]                                          # bf16 [Np_alloc, Cin]
    pcat_scr[:, 0:Cout] = masks_ref[:, 4:5] * bup_ref[...]   # bias on interior only
    for k in range(4):
        pcat_scr[:, 0:Cout] += masks_ref[:, k:k + 1] * jnp.dot(
            xv, wup_ref[k], preferred_element_type=jnp.float32)

    # ---- 2) channel concat with skip (already padded/flattened, zeros on halo)
    pcat_scr[:, Cout:Ct] = skip_ref[0].astype(jnp.float32)

    # ---- zero only the halo of the conv1-output staging buffer --------------
    py1_scr[0:Wp + 1, :] = jnp.zeros((Wp + 1, Cout), jnp.float32)
    py1_scr[Wp + 1 + M:Np_alloc, :] = jnp.zeros(
        (Np_alloc - Wp - 1 - M, Cout), jnp.float32)

    colmask = masks_ref[0:M, 5:6]                            # 0 on wrap-around cols

    # ---- 3) conv1 3x3 (+ folded BN1 + ReLU): 9 sublane-shifted matmuls ------
    for t in range(9):
        off = (t // 3) * Wp + (t % 3)
        contrib = jnp.dot(pcat_scr[pl.ds(off, M), :], w1_ref[t],
                          preferred_element_type=jnp.float32)
        if t == 0:
            acc_scr[...] = contrib
        else:
            acc_scr[...] += contrib
    y1 = jnp.maximum(acc_scr[...] * sb1_ref[0:1, :] + sb1_ref[1:2, :], 0.0)
    py1_scr[pl.ds(Wp + 1, M), :] = y1 * colmask              # re-pad for conv2

    # ---- 4) conv2 3x3 (+ folded BN2 + ReLU) ---------------------------------
    for t in range(9):
        off = (t // 3) * Wp + (t % 3)
        contrib = jnp.dot(py1_scr[pl.ds(off, M), :], w2_ref[t],
                          preferred_element_type=jnp.float32)
        if t == 0:
            acc_scr[...] = contrib
        else:
            acc_scr[...] += contrib
    y2 = jnp.maximum(acc_scr[...] * sb2_ref[0:1, :] + sb2_ref[1:2, :], 0.0)
    o_ref[0] = y2 * colmask


# ----------------------------- wrapper ---------------------------------------
def decoder_block_pallas(x_nchw, skip_nchw, params):
    x = jnp.transpose(x_nchw, (0, 2, 3, 1)).astype(jnp.float32)       # [B,H,W,Cin]
    skip = jnp.transpose(skip_nchw, (0, 2, 3, 1)).astype(jnp.float32)
    B, H, W, Cin = x.shape
    Cskip = skip.shape[-1]
    Cout = params["up_b"].shape[0]
    Ct = Cout + Cskip
    Ho, Wo = 2 * H, 2 * W
    Hp, Wp = Ho + 2, Wo + 2
    Np = Hp * Wp                       # padded pixel count
    M = Ho * Wp                        # rows of the flat conv output grid
    Np_alloc = ((Np + 2 + 7) // 8) * 8  # >= M + 2*Wp + 2 (max tap offset)

    # NN-upsampled (2x) x, zero-padded 1px, flattened row-major; bf16 over HBM.
    xup = jnp.repeat(jnp.repeat(x, 2, axis=1), 2, axis=2)
    xup = jnp.pad(xup, ((0, 0), (1, 1), (1, 1), (0, 0))).reshape(B, Np, Cin)
    xup = jnp.pad(xup, ((0, 0), (0, Np_alloc - Np), (0, 0))).astype(jnp.bfloat16)

    skip_p = jnp.pad(skip, ((0, 0), (1, 1), (1, 1), (0, 0))).reshape(B, Np, Cskip)
    skip_p = jnp.pad(skip_p, ((0, 0), (0, Np_alloc - Np), (0, 0))).astype(jnp.bfloat16)

    # Static parity / interior / column-validity masks (built on host once).
    p = np.arange(Np_alloc)
    r, s = p // Wp, p % Wp
    interior = (r >= 1) & (r <= Ho) & (s >= 1) & (s <= Wo)
    masks_np = np.zeros((Np_alloc, 6), np.float32)
    for k in range(4):
        masks_np[:, k] = (interior
                          & ((r - 1) % 2 == k // 2)
                          & ((s - 1) % 2 == k % 2)).astype(np.float32)
    masks_np[:, 4] = interior.astype(np.float32)
    masks_np[:, 5] = (s < Wo).astype(np.float32)
    masks = jnp.asarray(masks_np)

    # ConvTranspose2d weight [Cin, Cout, 2, 2] -> [4, Cin, Cout] (k = di*2+dj).
    wup = jnp.transpose(params["up_w"], (2, 3, 0, 1)).reshape(4, Cin, Cout)
    wup = wup.astype(jnp.bfloat16)
    bup = params["up_b"].reshape(1, Cout).astype(jnp.float32)

    # Fold eval-mode BatchNorm into per-channel scale / bias.
    s1 = params["bn1_g"] / jnp.sqrt(params["bn1_v"] + _BN_EPS)
    b1 = (params["c1_b"] - params["bn1_m"]) * s1 + params["bn1_b"]
    s2 = params["bn2_g"] / jnp.sqrt(params["bn2_v"] + _BN_EPS)
    b2 = (params["c2_b"] - params["bn2_m"]) * s2 + params["bn2_b"]
    sb1 = jnp.stack([s1, b1], axis=0).astype(jnp.float32)
    sb2 = jnp.stack([s2, b2], axis=0).astype(jnp.float32)

    # PyTorch conv weight [Cout, Cin, 3, 3] -> [9, Cin, Cout] (cross-correlation).
    w1 = jnp.transpose(params["c1_w"], (2, 3, 1, 0)).reshape(9, Ct, Cout)
    w1 = w1.astype(jnp.float32)
    w2 = jnp.transpose(params["c2_w"], (2, 3, 1, 0)).reshape(9, Cout, Cout)
    w2 = w2.astype(jnp.float32)

    kernel = functools.partial(_decoder_block_kernel, Wp=Wp)

    out_flat = pl.pallas_call(
        kernel,
        out_shape=jax.ShapeDtypeStruct((B, M, Cout), jnp.float32),
        grid_spec=pltpu.PrefetchScalarGridSpec(
            num_scalar_prefetch=0,
            grid=(B,),
            in_specs=[
                pl.BlockSpec((1, Np_alloc, Cin), lambda b: (b, 0, 0)),
                pl.BlockSpec((1, Np_alloc, Cskip), lambda b: (b, 0, 0)),
                pl.BlockSpec((Np_alloc, 6), lambda b: (0, 0)),
                pl.BlockSpec((4, Cin, Cout), lambda b: (0, 0, 0)),
                pl.BlockSpec((1, Cout), lambda b: (0, 0)),
                pl.BlockSpec((9, Ct, Cout), lambda b: (0, 0, 0)),
                pl.BlockSpec((2, Cout), lambda b: (0, 0)),
                pl.BlockSpec((9, Cout, Cout), lambda b: (0, 0, 0)),
                pl.BlockSpec((2, Cout), lambda b: (0, 0)),
            ],
            out_specs=pl.BlockSpec((1, M, Cout), lambda b: (b, 0, 0)),
            scratch_shapes=[
                pltpu.VMEM((Np_alloc, Ct), jnp.float32),    # padded concat
                pltpu.VMEM((Np_alloc, Cout), jnp.float32),  # padded conv1 out
                pltpu.VMEM((M, Cout), jnp.float32),         # conv accumulator
            ],
        ),
        compiler_params=pltpu.CompilerParams(
            dimension_semantics=("parallel",),
            vmem_limit_bytes=32 * 1024 * 1024,
        ),
    )(xup, skip_p, masks, wup, bup, w1, sb1, w2, sb2)

    out = out_flat.reshape(B, Ho, Wp, Cout)[:, :, :Wo, :]
    return jnp.transpose(out, (0, 3, 1, 2))  # back to NCHW


# ----------------------------- deterministic parameter init ------------------
def init_params(key, in_channels, out_channels):
    ks = jax.random.split(key, 14)
    n = lambda k, s: 0.1 * jax.random.normal(k, s, jnp.float32)
    return {
        "up_w": n(ks[0], (in_channels, out_channels, 2, 2)),
        "up_b": n(ks[1], (out_channels,)),
        "c1_w": n(ks[2], (out_channels, in_channels, 3, 3)),
        "c1_b": n(ks[3], (out_channels,)),
        "c2_w": n(ks[4], (out_channels, out_channels, 3, 3)),
        "c2_b": n(ks[5], (out_channels,)),
        "bn1_g": 1.0 + n(ks[6], (out_channels,)),
        "bn1_b": n(ks[7], (out_channels,)),
        "bn1_m": n(ks[8], (out_channels,)),
        "bn1_v": 1.0 + 0.1 * jnp.abs(jax.random.normal(ks[9], (out_channels,), jnp.float32)),
        "bn2_g": 1.0 + n(ks[10], (out_channels,)),
        "bn2_b": n(ks[11], (out_channels,)),
        "bn2_m": n(ks[12], (out_channels,)),
        "bn2_v": 1.0 + 0.1 * jnp.abs(jax.random.normal(ks[13], (out_channels,), jnp.float32)),
    }


# ----------------------------- pure-JAX reference (for sanity check) ---------
def ref_forward(x_nchw, skip_nchw, p):
    x = jnp.transpose(x_nchw, (0, 2, 3, 1))
    skip = jnp.transpose(skip_nchw, (0, 2, 3, 1))
    B, H, W, Cin = x.shape
    Cout = p["up_b"].shape[0]

    up = jnp.zeros((B, 2 * H, 2 * W, Cout), jnp.float32)
    for di in range(2):
        for dj in range(2):
            contrib = jnp.einsum("bhwi,io->bhwo", x, p["up_w"][:, :, di, dj]) + p["up_b"]
            up = up.at[:, di::2, dj::2, :].set(contrib)
    cat = jnp.concatenate([up, skip], axis=-1)

    def conv3x3(inp, w_oihw, b):
        w = jnp.transpose(w_oihw, (2, 3, 1, 0))
        y = lax.conv_general_dilated(
            inp, w, (1, 1), ((1, 1), (1, 1)),
            dimension_numbers=("NHWC", "HWIO", "NHWC"),
        )
        return y + b

    def bn(y, g, bb, m, v):
        return (y - m) / jnp.sqrt(v + _BN_EPS) * g + bb

    y = jax.nn.relu(bn(conv3x3(cat, p["c1_w"], p["c1_b"]),
                       p["bn1_g"], p["bn1_b"], p["bn1_m"], p["bn1_v"]))
    y = jax.nn.relu(bn(conv3x3(y, p["c2_w"], p["c2_b"]),
                       p["bn2_g"], p["bn2_b"], p["bn2_m"], p["bn2_v"]))
    return jnp.transpose(y, (0, 3, 1, 2))


if __name__ == "__main__":
    key = jax.random.PRNGKey(0)
    k_x, k_skip, k_p = jax.random.split(key, 3)

    B, Cin, H, W = 2, 8, 8, 8      # DecoderBlock(in_channels=8, out_channels=4)
    Cout = 4
    x = jax.random.normal(k_x, (B, Cin, H, W), jnp.float32)
    skip = jax.random.normal(k_skip, (B, Cin - Cout, 2 * H, 2 * W), jnp.float32)
    params = init_params(k_p, Cin, Cout)

    # Round the activations / up-conv weight through bf16 so the f32 reference
    # and the (bf16-over-HBM) kernel consume numerically identical values and
    # the comparison tolerance can stay tight.
    x = x.astype(jnp.bfloat16).astype(jnp.float32)
    skip = skip.astype(jnp.bfloat16).astype(jnp.float32)
    params["up_w"] = params["up_w"].astype(jnp.bfloat16).astype(jnp.float32)

    fwd = jax.jit(decoder_block_pallas)
    out = jax.block_until_ready(fwd(x, skip, params))
    assert out.shape == (B, Cout, 2 * H, 2 * W), out.shape

    ref = ref_forward(x, skip, params)
    max_err = float(jnp.max(jnp.abs(out - ref)))
    if max_err > 2e-3:
        raise AssertionError(f"mismatch vs reference: max_err={max_err}")

    print("KERNEL_OK")
</pallas_src>

<mosaic_0001>
module attributes {stable_mosaic.version = 11 : i64} {
  func.func @_decoder_block_kernel(%arg0: i32, %arg1: memref<1x328x8xbf16, #tpu.memory_space<vmem>>, %arg2: memref<1x328x4xbf16, #tpu.memory_space<vmem>>, %arg3: memref<328x6xf32, #tpu.memory_space<vmem>>, %arg4: memref<4x8x4xbf16, #tpu.memory_space<vmem>>, %arg5: memref<1x4xf32, #tpu.memory_space<vmem>>, %arg6: memref<9x8x4xf32, #tpu.memory_space<vmem>>, %arg7: memref<2x4xf32, #tpu.memory_space<vmem>>, %arg8: memref<9x4x4xf32, #tpu.memory_space<vmem>>, %arg9: memref<2x4xf32, #tpu.memory_space<vmem>>, %arg10: memref<1x288x4xf32, #tpu.memory_space<vmem>>, %arg11: memref<328x8xf32, #tpu.memory_space<vmem>>, %arg12: memref<328x4xf32, #tpu.memory_space<vmem>>, %arg13: memref<288x4xf32, #tpu.memory_space<vmem>>) attributes {dimension_semantics = [#tpu.dimension_semantics<parallel>], iteration_bounds = array<i64: 2>, scalar_prefetch = 0 : i64, scratch_operands = 3 : i64, tpu.core_type = #tpu.core_type<tc>, window_params = [{transform_indices = @transform_0, window_bounds = array<i64: 1, 328, 8>}, {transform_indices = @transform_1, window_bounds = array<i64: 1, 328, 4>}, {pipeline_mode = #tpu.pipeline_mode<synchronous>, transform_indices = @transform_2, window_bounds = array<i64: 328, 6>}, {pipeline_mode = #tpu.pipeline_mode<synchronous>, transform_indices = @transform_3, window_bounds = array<i64: 4, 8, 4>}, {pipeline_mode = #tpu.pipeline_mode<synchronous>, transform_indices = @transform_4, window_bounds = array<i64: 1, 4>}, {pipeline_mode = #tpu.pipeline_mode<synchronous>, transform_indices = @transform_5, window_bounds = array<i64: 9, 8, 4>}, {pipeline_mode = #tpu.pipeline_mode<synchronous>, transform_indices = @transform_6, window_bounds = array<i64: 2, 4>}, {pipeline_mode = #tpu.pipeline_mode<synchronous>, transform_indices = @transform_7, window_bounds = array<i64: 9, 4, 4>}, {pipeline_mode = #tpu.pipeline_mode<synchronous>, transform_indices = @transform_8, window_bounds = array<i64: 2, 4>}, {transform_indices = @transform_9, window_bounds = array<i64: 1, 288, 4>}]} {
    %c0 = arith.constant 0 : index
    %c0_0 = arith.constant 0 : index
    %c0_1 = arith.constant 0 : index
    %0 = vector.load %arg1[%c0, %c0_0, %c0_1] : memref<1x328x8xbf16, #tpu.memory_space<vmem>>, vector<1x328x8xbf16>
    %1 = vector.shape_cast %0 : vector<1x328x8xbf16> to vector<328x8xbf16>
    %c0_2 = arith.constant 0 : index
    %c4 = arith.constant 4 : index
    %2 = vector.load %arg3[%c0_2, %c4] : memref<328x6xf32, #tpu.memory_space<vmem>>, vector<328x1xf32>
    %c0_3 = arith.constant 0 : index
    %c0_4 = arith.constant 0 : index
    %3 = vector.load %arg5[%c0_3, %c0_4] : memref<1x4xf32, #tpu.memory_space<vmem>>, vector<1x4xf32>
    %4 = vector.broadcast %2 : vector<328x1xf32> to vector<328x4xf32>
    %5 = vector.broadcast %3 : vector<1x4xf32> to vector<328x4xf32>
    %6 = arith.mulf %4, %5 : vector<328x4xf32>
    %c0_5 = arith.constant 0 : index
    %c0_6 = arith.constant 0 : index
    %7 = vector.load %arg11[%c0_5, %c0_6] : memref<328x8xf32, #tpu.memory_space<vmem>>, vector<328x4xf32>
    tpu.vector_store %arg11[%c0_5, %c0_6], %6 {strides = array<i32>} : memref<328x8xf32, #tpu.memory_space<vmem>>, vector<328x4xf32>,
    %c0_7 = arith.constant 0 : index
    %c0_8 = arith.constant 0 : index
    %8 = vector.load %arg11[%c0_7, %c0_8] : memref<328x8xf32, #tpu.memory_space<vmem>>, vector<328x4xf32>
    %c0_9 = arith.constant 0 : index
    %c0_10 = arith.constant 0 : index
    %9 = vector.load %arg3[%c0_9, %c0_10] : memref<328x6xf32, #tpu.memory_space<vmem>>, vector<328x1xf32>
    %c0_11 = arith.constant 0 : index
    %c0_12 = arith.constant 0 : index
    %c0_13 = arith.constant 0 : index
    %10 = vector.load %arg4[%c0_11, %c0_12, %c0_13] : memref<4x8x4xbf16, #tpu.memory_space<vmem>>, vector<1x8x4xbf16>
    %11 = vector.shape_cast %10 : vector<1x8x4xbf16> to vector<8x4xbf16>
    %cst = arith.constant dense<0.000000e+00> : vector<328x4xf32>
    %12 = tpu.matmul %1, %11, %cst {dimension_numbers = #tpu.dot_dimension_numbers<[1], [0], [0], [1], [0, 0, 1, 1], [], []>} : vector<328x8xbf16>, vector<8x4xbf16>, vector<328x4xf32> -> vector<328x4xf32>
    %13 = vector.broadcast %9 : vector<328x1xf32> to vector<328x4xf32>
    %14 = arith.mulf %13, %12 : vector<328x4xf32>
    %15 = arith.addf %8, %14 : vector<328x4xf32>
    %c0_14 = arith.constant 0 : index
    %c0_15 = arith.constant 0 : index
    %16 = vector.load %arg11[%c0_14, %c0_15] : memref<328x8xf32, #tpu.memory_space<vmem>>, vector<328x4xf32>
    tpu.vector_store %arg11[%c0_14, %c0_15], %15 {strides = array<i32>} : memref<328x8xf32, #tpu.memory_space<vmem>>, vector<328x4xf32>,
    %c0_16 = arith.constant 0 : index
    %c0_17 = arith.constant 0 : index
    %17 = vector.load %arg11[%c0_16, %c0_17] : memref<328x8xf32, #tpu.memory_space<vmem>>, vector<328x4xf32>
    %c0_18 = arith.constant 0 : index
    %c1 = arith.constant 1 : index
    %18 = vector.load %arg3[%c0_18, %c1] : memref<328x6xf32, #tpu.memory_space<vmem>>, vector<328x1xf32>
    %c1_19 = arith.constant 1 : index
    %c0_20 = arith.constant 0 : index
    %c0_21 = arith.constant 0 : index
    %19 = vector.load %arg4[%c1_19, %c0_20, %c0_21] : memref<4x8x4xbf16, #tpu.memory_space<vmem>>, vector<1x8x4xbf16>
    %20 = vector.shape_cast %19 : vector<1x8x4xbf16> to vector<8x4xbf16>
    %cst_22 = arith.constant dense<0.000000e+00> : vector<328x4xf32>
    %21 = tpu.matmul %1, %20, %cst_22 {dimension_numbers = #tpu.dot_dimension_numbers<[1], [0], [0], [1], [0, 0, 1, 1], [], []>} : vector<328x8xbf16>, vector<8x4xbf16>, vector<328x4xf32> -> vector<328x4xf32>
    %22 = vector.broadcast %18 : vector<328x1xf32> to vector<328x4xf32>
    %23 = arith.mulf %22, %21 : vector<328x4xf32>
    %24 = arith.addf %17, %23 : vector<328x4xf32>
    %c0_23 = arith.constant 0 : index
    %c0_24 = arith.constant 0 : index
    %25 = vector.load %arg11[%c0_23, %c0_24] : memref<328x8xf32, #tpu.memory_space<vmem>>, vector<328x4xf32>
    tpu.vector_store %arg11[%c0_23, %c0_24], %24 {strides = array<i32>} : memref<328x8xf32, #tpu.memory_space<vmem>>, vector<328x4xf32>,
    %c0_25 = arith.constant 0 : index
    %c0_26 = arith.constant 0 : index
    %26 = vector.load %arg11[%c0_25, %c0_26] : memref<328x8xf32, #tpu.memory_space<vmem>>, vector<328x4xf32>
    %c0_27 = arith.constant 0 : index
    %c2 = arith.constant 2 : index
    %27 = vector.load %arg3[%c0_27, %c2] : memref<328x6xf32, #tpu.memory_space<vmem>>, vector<328x1xf32>
    %c2_28 = arith.constant 2 : index
    %c0_29 = arith.constant 0 : index
    %c0_30 = arith.constant 0 : index
    %28 = vector.load %arg4[%c2_28, %c0_29, %c0_30] : memref<4x8x4xbf16, #tpu.memory_space<vmem>>, vector<1x8x4xbf16>
    %29 = vector.shape_cast %28 : vector<1x8x4xbf16> to vector<8x4xbf16>
    %cst_31 = arith.constant dense<0.000000e+00> : vector<328x4xf32>
    %30 = tpu.matmul %1, %29, %cst_31 {dimension_numbers = #tpu.dot_dimension_numbers<[1], [0], [0], [1], [0, 0, 1, 1], [], []>} : vector<328x8xbf16>, vector<8x4xbf16>, vector<328x4xf32> -> vector<328x4xf32>
    %31 = vector.broadcast %27 : vector<328x1xf32> to vector<328x4xf32>
    %32 = arith.mulf %31, %30 : vector<328x4xf32>
    %33 = arith.addf %26, %32 : vector<328x4xf32>
    %c0_32 = arith.constant 0 : index
    %c0_33 = arith.constant 0 : index
    %34 = vector.load %arg11[%c0_32, %c0_33] : memref<328x8xf32, #tpu.memory_space<vmem>>, vector<328x4xf32>
    tpu.vector_store %arg11[%c0_32, %c0_33], %33 {strides = array<i32>} : memref<328x8xf32, #tpu.memory_space<vmem>>, vector<328x4xf32>,
    %c0_34 = arith.constant 0 : index
    %c0_35 = arith.constant 0 : index
    %35 = vector.load %arg11[%c0_34, %c0_35] : memref<328x8xf32, #tpu.memory_space<vmem>>, vector<328x4xf32>
    %c0_36 = arith.constant 0 : index
    %c3 = arith.constant 3 : index
    %36 = vector.load %arg3[%c0_36, %c3] : memref<328x6xf32, #tpu.memory_space<vmem>>, vector<328x1xf32>
    %c3_37 = arith.constant 3 : index
    %c0_38 = arith.constant 0 : index
    %c0_39 = arith.constant 0 : index
    %37 = vector.load %arg4[%c3_37, %c0_38, %c0_39] : memref<4x8x4xbf16, #tpu.memory_space<vmem>>, vector<1x8x4xbf16>
    %38 = vector.shape_cast %37 : vector<1x8x4xbf16> to vector<8x4xbf16>
    %cst_40 = arith.constant dense<0.000000e+00> : vector<328x4xf32>
    %39 = tpu.matmul %1, %38, %cst_40 {dimension_numbers = #tpu.dot_dimension_numbers<[1], [0], [0], [1], [0, 0, 1, 1], [], []>} : vector<328x8xbf16>, vector<8x4xbf16>, vector<328x4xf32> -> vector<328x4xf32>
    %40 = vector.broadcast %36 : vector<328x1xf32> to vector<328x4xf32>
    %41 = arith.mulf %40, %39 : vector<328x4xf32>
    %42 = arith.addf %35, %41 : vector<328x4xf32>
    %c0_41 = arith.constant 0 : index
    %c0_42 = arith.constant 0 : index
    %43 = vector.load %arg11[%c0_41, %c0_42] : memref<328x8xf32, #tpu.memory_space<vmem>>, vector<328x4xf32>
    tpu.vector_store %arg11[%c0_41, %c0_42], %42 {strides = array<i32>} : memref<328x8xf32, #tpu.memory_space<vmem>>, vector<328x4xf32>,
    %c0_43 = arith.constant 0 : index
    %c0_44 = arith.constant 0 : index
    %c0_45 = arith.constant 0 : index
    %44 = vector.load %arg2[%c0_43, %c0_44, %c0_45] : memref<1x328x4xbf16, #tpu.memory_space<vmem>>, vector<1x328x4xbf16>
    %45 = vector.shape_cast %44 : vector<1x328x4xbf16> to vector<328x4xbf16>
    %46 = arith.extf %45 : vector<328x4xbf16> to vector<328x4xf32>
    %c0_46 = arith.constant 0 : index
    %c4_47 = arith.constant 4 : index
    %47 = vector.load %arg11[%c0_46, %c4_47] : memref<328x8xf32, #tpu.memory_space<vmem>>, vector<328x4xf32>
    tpu.vector_store %arg11[%c0_46, %c4_47], %46 {strides = array<i32>} : memref<328x8xf32, #tpu.memory_space<vmem>>, vector<328x4xf32>,
    %cst_48 = arith.constant 0.000000e+00 : f32
    %48 = vector.broadcast %cst_48 : f32 to vector<19x4xf32>
    %c0_49 = arith.constant 0 : index
    %c0_50 = arith.constant 0 : index
    %49 = vector.load %arg12[%c0_49, %c0_50] : memref<328x4xf32, #tpu.memory_space<vmem>>, vector<19x4xf32>
    tpu.vector_store %arg12[%c0_49, %c0_50], %48 {strides = array<i32>} : memref<328x4xf32, #tpu.memory_space<vmem>>, vector<19x4xf32>,
    %cst_51 = arith.constant 0.000000e+00 : f32
    %50 = vector.broadcast %cst_51 : f32 to vector<21x4xf32>
    %c307 = arith.constant 307 : index
    %c0_52 = arith.constant 0 : index
    %51 = vector.load %arg12[%c307, %c0_52] : memref<328x4xf32, #tpu.memory_space<vmem>>, vector<21x4xf32>
    tpu.vector_store %arg12[%c307, %c0_52], %50 {strides = array<i32>} : memref<328x4xf32, #tpu.memory_space<vmem>>, vector<21x4xf32>,
    %c0_53 = arith.constant 0 : index
    %c5 = arith.constant 5 : index
    %52 = vector.load %arg3[%c0_53, %c5] : memref<328x6xf32, #tpu.memory_space<vmem>>, vector<288x1xf32>
    %c0_54 = arith.constant 0 : index
    %c0_55 = arith.constant 0 : index
    %53 = vector.load %arg11[%c0_54, %c0_55] : memref<328x8xf32, #tpu.memory_space<vmem>>, vector<288x8xf32>
    %c0_56 = arith.constant 0 : index
    %c0_57 = arith.constant 0 : index
    %c0_58 = arith.constant 0 : index
    %54 = vector.load %arg6[%c0_56, %c0_57, %c0_58] : memref<9x8x4xf32, #tpu.memory_space<vmem>>, vector<1x8x4xf32>
    %55 = vector.shape_cast %54 : vector<1x8x4xf32> to vector<8x4xf32>
    %cst_59 = arith.constant dense<0.000000e+00> : vector<288x4xf32>
    %56 = tpu.matmul %53, %55, %cst_59 {dimension_numbers = #tpu.dot_dimension_numbers<[1], [0], [0], [1], [0, 0, 1, 1], [], []>} : vector<288x8xf32>, vector<8x4xf32>, vector<288x4xf32> -> vector<288x4xf32>
    %c0_60 = arith.constant 0 : index
    %c0_61 = arith.constant 0 : index
    %57 = vector.load %arg13[%c0_60, %c0_61] : memref<288x4xf32, #tpu.memory_space<vmem>>, vector<288x4xf32>
    tpu.vector_store %arg13[%c0_60, %c0_61], %56 {strides = array<i32>} : memref<288x4xf32, #tpu.memory_space<vmem>>, vector<288x4xf32>,
    %c1_62 = arith.constant 1 : index
    %c0_63 = arith.constant 0 : index
    %58 = vector.load %arg11[%c1_62, %c0_63] : memref<328x8xf32, #tpu.memory_space<vmem>>, vector<288x8xf32>
    %c1_64 = arith.constant 1 : index
    %c0_65 = arith.constant 0 : index
    %c0_66 = arith.constant 0 : index
    %59 = vector.load %arg6[%c1_64, %c0_65, %c0_66] : memref<9x8x4xf32, #tpu.memory_space<vmem>>, vector<1x8x4xf32>
    %60 = vector.shape_cast %59 : vector<1x8x4xf32> to vector<8x4xf32>
    %cst_67 = arith.constant dense<0.000000e+00> : vector<288x4xf32>
    %61 = tpu.matmul %58, %60, %cst_67 {dimension_numbers = #tpu.dot_dimension_numbers<[1], [0], [0], [1], [0, 0, 1, 1], [], []>} : vector<288x8xf32>, vector<8x4xf32>, vector<288x4xf32> -> vector<288x4xf32>
    %c0_68 = arith.constant 0 : index
    %c0_69 = arith.constant 0 : index
    %62 = vector.load %arg13[%c0_68, %c0_69] : memref<288x4xf32, #tpu.memory_space<vmem>>, vector<288x4xf32>
    %63 = arith.addf %62, %61 : vector<288x4xf32>
    %c0_70 = arith.constant 0 : index
    %c0_71 = arith.constant 0 : index
    %64 = vector.load %arg13[%c0_70, %c0_71] : memref<288x4xf32, #tpu.memory_space<vmem>>, vector<288x4xf32>
    tpu.vector_store %arg13[%c0_70, %c0_71], %63 {strides = array<i32>} : memref<288x4xf32, #tpu.memory_space<vmem>>, vector<288x4xf32>,
    %c2_72 = arith.constant 2 : index
    %c0_73 = arith.constant 0 : index
    %65 = vector.load %arg11[%c2_72, %c0_73] : memref<328x8xf32, #tpu.memory_space<vmem>>, vector<288x8xf32>
    %c2_74 = arith.constant 2 : index
    %c0_75 = arith.constant 0 : index
    %c0_76 = arith.constant 0 : index
    %66 = vector.load %arg6[%c2_74, %c0_75, %c0_76] : memref<9x8x4xf32, #tpu.memory_space<vmem>>, vector<1x8x4xf32>
    %67 = vector.shape_cast %66 : vector<1x8x4xf32> to vector<8x4xf32>
    %cst_77 = arith.constant dense<0.000000e+00> : vector<288x4xf32>
    %68 = tpu.matmul %65, %67, %cst_77 {dimension_numbers = #tpu.dot_dimension_numbers<[1], [0], [0], [1], [0, 0, 1, 1], [], []>} : vector<288x8xf32>, vector<8x4xf32>, vector<288x4xf32> -> vector<288x4xf32>
    %c0_78 = arith.constant 0 : index
    %c0_79 = arith.constant 0 : index
    %69 = vector.load %arg13[%c0_78, %c0_79] : memref<288x4xf32, #tpu.memory_space<vmem>>, vector<288x4xf32>
    %70 = arith.addf %69, %68 : vector<288x4xf32>
    %c0_80 = arith.constant 0 : index
    %c0_81 = arith.constant 0 : index
    %71 = vector.load %arg13[%c0_80, %c0_81] : memref<288x4xf32, #tpu.memory_space<vmem>>, vector<288x4xf32>
    tpu.vector_store %arg13[%c0_80, %c0_81], %70 {strides = array<i32>} : memref<288x4xf32, #tpu.memory_space<vmem>>, vector<288x4xf32>,
    %c18 = arith.constant 18 : index
    %c0_82 = arith.constant 0 : index
    %72 = vector.load %arg11[%c18, %c0_82] : memref<328x8xf32, #tpu.memory_space<vmem>>, vector<288x8xf32>
    %c3_83 = arith.constant 3 : index
    %c0_84 = arith.constant 0 : index
    %c0_85 = arith.constant 0 : index
    %73 = vector.load %arg6[%c3_83, %c0_84, %c0_85] : memref<9x8x4xf32, #tpu.memory_space<vmem>>, vector<1x8x4xf32>
    %74 = vector.shape_cast %73 : vector<1x8x4xf32> to vector<8x4xf32>
    %cst_86 = arith.constant dense<0.000000e+00> : vector<288x4xf32>
    %75 = tpu.matmul %72, %74, %cst_86 {dimension_numbers = #tpu.dot_dimension_numbers<[1], [0], [0], [1], [0, 0, 1, 1], [], []>} : vector<288x8xf32>, vector<8x4xf32>, vector<288x4xf32> -> vector<288x4xf32>
    %c0_87 = arith.constant 0 : index
    %c0_88 = arith.constant 0 : index
    %76 = vector.load %arg13[%c0_87, %c0_88] : memref<288x4xf32, #tpu.memory_space<vmem>>, vector<288x4xf32>
    %77 = arith.addf %76, %75 : vector<288x4xf32>
    %c0_89 = arith.constant 0 : index
    %c0_90 = arith.constant 0 : index
    %78 = vector.load %arg13[%c0_89, %c0_90] : memref<288x4xf32, #tpu.memory_space<vmem>>, vector<288x4xf32>
    tpu.vector_store %arg13[%c0_89, %c0_90], %77 {strides = array<i32>} : memref<288x4xf32, #tpu.memory_space<vmem>>, vector<288x4xf32>,
    %c19 = arith.constant 19 : index
    %c0_91 = arith.constant 0 : index
    %79 = vector.load %arg11[%c19, %c0_91] : memref<328x8xf32, #tpu.memory_space<vmem>>, vector<288x8xf32>
    %c4_92 = arith.constant 4 : index
    %c0_93 = arith.constant 0 : index
    %c0_94 = arith.constant 0 : index
    %80 = vector.load %arg6[%c4_92, %c0_93, %c0_94] : memref<9x8x4xf32, #tpu.memory_space<vmem>>, vector<1x8x4xf32>
    %81 = vector.shape_cast %80 : vector<1x8x4xf32> to vector<8x4xf32>
    %cst_95 = arith.constant dense<0.000000e+00> : vector<288x4xf32>
    %82 = tpu.matmul %79, %81, %cst_95 {dimension_numbers = #tpu.dot_dimension_numbers<[1], [0], [0], [1], [0, 0, 1, 1], [], []>} : vector<288x8xf32>, vector<8x4xf32>, vector<288x4xf32> -> vector<288x4xf32>
    %c0_96 = arith.constant 0 : index
    %c0_97 = arith.constant 0 : index
    %83 = vector.load %arg13[%c0_96, %c0_97] : memref<288x4xf32, #tpu.memory_space<vmem>>, vector<288x4xf32>
    %84 = arith.addf %83, %82 : vector<288x4xf32>
    %c0_98 = arith.constant 0 : index
    %c0_99 = arith.constant 0 : index
    %85 = vector.load %arg13[%c0_98, %c0_99] : memref<288x4xf32, #tpu.memory_space<vmem>>, vector<288x4xf32>
    tpu.vector_store %arg13[%c0_98, %c0_99], %84 {strides = array<i32>} : memref<288x4xf32, #tpu.memory_space<vmem>>, vector<288x4xf32>,
    %c20 = arith.constant 20 : index
    %c0_100 = arith.constant 0 : index
    %86 = vector.load %arg11[%c20, %c0_100] : memref<328x8xf32, #tpu.memory_space<vmem>>, vector<288x8xf32>
    %c5_101 = arith.constant 5 : index
    %c0_102 = arith.constant 0 : index
    %c0_103 = arith.constant 0 : index
    %87 = vector.load %arg6[%c5_101, %c0_102, %c0_103] : memref<9x8x4xf32, #tpu.memory_space<vmem>>, vector<1x8x4xf32>
    %88 = vector.shape_cast %87 : vector<1x8x4xf32> to vector<8x4xf32>
    %cst_104 = arith.constant dense<0.000000e+00> : vector<288x4xf32>
    %89 = tpu.matmul %86, %88, %cst_104 {dimension_numbers = #tpu.dot_dimension_numbers<[1], [0], [0], [1], [0, 0, 1, 1], [], []>} : vector<288x8xf32>, vector<8x4xf32>, vector<288x4xf32> -> vector<288x4xf32>
    %c0_105 = arith.constant 0 : index
    %c0_106 = arith.constant 0 : index
    %90 = vector.load %arg13[%c0_105, %c0_106] : memref<288x4xf32, #tpu.memory_space<vmem>>, vector<288x4xf32>
    %91 = arith.addf %90, %89 : vector<288x4xf32>
    %c0_107 = arith.constant 0 : index
    %c0_108 = arith.constant 0 : index
    %92 = vector.load %arg13[%c0_107, %c0_108] : memref<288x4xf32, #tpu.memory_space<vmem>>, vector<288x4xf32>
    tpu.vector_store %arg13[%c0_107, %c0_108], %91 {strides = array<i32>} : memref<288x4xf32, #tpu.memory_space<vmem>>, vector<288x4xf32>,
    %c36 = arith.constant 36 : index
    %c0_109 = arith.constant 0 : index
    %93 = vector.load %arg11[%c36, %c0_109] : memref<328x8xf32, #tpu.memory_space<vmem>>, vector<288x8xf32>
    %c6 = arith.constant 6 : index
    %c0_110 = arith.constant 0 : index
    %c0_111 = arith.constant 0 : index
    %94 = vector.load %arg6[%c6, %c0_110, %c0_111] : memref<9x8x4xf32, #tpu.memory_space<vmem>>, vector<1x8x4xf32>
    %95 = vector.shape_cast %94 : vector<1x8x4xf32> to vector<8x4xf32>
    %cst_112 = arith.constant dense<0.000000e+00> : vector<288x4xf32>
    %96 = tpu.matmul %93, %95, %cst_112 {dimension_numbers = #tpu.dot_dimension_numbers<[1], [0], [0], [1], [0, 0, 1, 1], [], []>} : vector<288x8xf32>, vector<8x4xf32>, vector<288x4xf32> -> vector<288x4xf32>
    %c0_113 = arith.constant 0 : index
    %c0_114 = arith.constant 0 : index
    %97 = vector.load %arg13[%c0_113, %c0_114] : memref<288x4xf32, #tpu.memory_space<vmem>>, vector<288x4xf32>
    %98 = arith.addf %97, %96 : vector<288x4xf32>
    %c0_115 = arith.constant 0 : index
    %c0_116 = arith.constant 0 : index
    %99 = vector.load %arg13[%c0_115, %c0_116] : memref<288x4xf32, #tpu.memory_space<vmem>>, vector<288x4xf32>
    tpu.vector_store %arg13[%c0_115, %c0_116], %98 {strides = array<i32>} : memref<288x4xf32, #tpu.memory_space<vmem>>, vector<288x4xf32>,
    %c37 = arith.constant 37 : index
    %c0_117 = arith.constant 0 : index
    %100 = vector.load %arg11[%c37, %c0_117] : memref<328x8xf32, #tpu.memory_space<vmem>>, vector<288x8xf32>
    %c7 = arith.constant 7 : index
    %c0_118 = arith.constant 0 : index
    %c0_119 = arith.constant 0 : index
    %101 = vector.load %arg6[%c7, %c0_118, %c0_119] : memref<9x8x4xf32, #tpu.memory_space<vmem>>, vector<1x8x4xf32>
    %102 = vector.shape_cast %101 : vector<1x8x4xf32> to vector<8x4xf32>
    %cst_120 = arith.constant dense<0.000000e+00> : vector<288x4xf32>
    %103 = tpu.matmul %100, %102, %cst_120 {dimension_numbers = #tpu.dot_dimension_numbers<[1], [0], [0], [1], [0, 0, 1, 1], [], []>} : vector<288x8xf32>, vector<8x4xf32>, vector<288x4xf32> -> vector<288x4xf32>
    %c0_121 = arith.constant 0 : index
    %c0_122 = arith.constant 0 : index
    %104 = vector.load %arg13[%c0_121, %c0_122] : memref<288x4xf32, #tpu.memory_space<vmem>>, vector<288x4xf32>
    %105 = arith.addf %104, %103 : vector<288x4xf32>
    %c0_123 = arith.constant 0 : index
    %c0_124 = arith.constant 0 : index
    %106 = vector.load %arg13[%c0_123, %c0_124] : memref<288x4xf32, #tpu.memory_space<vmem>>, vector<288x4xf32>
    tpu.vector_store %arg13[%c0_123, %c0_124], %105 {strides = array<i32>} : memref<288x4xf32, #tpu.memory_space<vmem>>, vector<288x4xf32>,
    %c38 = arith.constant 38 : index
    %c0_125 = arith.constant 0 : index
    %107 = vector.load %arg11[%c38, %c0_125] : memref<328x8xf32, #tpu.memory_space<vmem>>, vector<288x8xf32>
    %c8 = arith.constant 8 : index
    %c0_126 = arith.constant 0 : index
    %c0_127 = arith.constant 0 : index
    %108 = vector.load %arg6[%c8, %c0_126, %c0_127] : memref<9x8x4xf32, #tpu.memory_space<vmem>>, vector<1x8x4xf32>
    %109 = vector.shape_cast %108 : vector<1x8x4xf32> to vector<8x4xf32>
    %cst_128 = arith.constant dense<0.000000e+00> : vector<288x4xf32>
    %110 = tpu.matmul %107, %109, %cst_128 {dimension_numbers = #tpu.dot_dimension_numbers<[1], [0], [0], [1], [0, 0, 1, 1], [], []>} : vector<288x8xf32>, vector<8x4xf32>, vector<288x4xf32> -> vector<288x4xf32>
    %c0_129 = arith.constant 0 : index
    %c0_130 = arith.constant 0 : index
    %111 = vector.load %arg13[%c0_129, %c0_130] : memref<288x4xf32, #tpu.memory_space<vmem>>, vector<288x4xf32>
    %112 = arith.addf %111, %110 : vector<288x4xf32>
    %c0_131 = arith.constant 0 : index
    %c0_132 = arith.constant 0 : index
    %113 = vector.load %arg13[%c0_131, %c0_132] : memref<288x4xf32, #tpu.memory_space<vmem>>, vector<288x4xf32>
    tpu.vector_store %arg13[%c0_131, %c0_132], %112 {strides = array<i32>} : memref<288x4xf32, #tpu.memory_space<vmem>>, vector<288x4xf32>,
    %c0_133 = arith.constant 0 : index
    %c0_134 = arith.constant 0 : index
    %114 = vector.load %arg13[%c0_133, %c0_134] : memref<288x4xf32, #tpu.memory_space<vmem>>, vector<288x4xf32>
    %c0_135 = arith.constant 0 : index
    %c0_136 = arith.constant 0 : index
    %115 = vector.load %arg7[%c0_135, %c0_136] : memref<2x4xf32, #tpu.memory_space<vmem>>, vector<1x4xf32>
    %116 = vector.broadcast %115 : vector<1x4xf32> to vector<288x4xf32>
    %117 = arith.mulf %114, %116 : vector<288x4xf32>
    %c1_137 = arith.constant 1 : index
    %c0_138 = arith.constant 0 : index
    %118 = vector.load %arg7[%c1_137, %c0_138] : memref<2x4xf32, #tpu.memory_space<vmem>>, vector<1x4xf32>
    %119 = vector.broadcast %118 : vector<1x4xf32> to vector<288x4xf32>
    %120 = arith.addf %117, %119 : vector<288x4xf32>
    %cst_139 = arith.constant 0.000000e+00 : f32
    %121 = vector.broadcast %cst_139 : f32 to vector<288x4xf32>
    %122 = arith.maximumf %120, %121 : vector<288x4xf32>
    %123 = vector.broadcast %52 : vector<288x1xf32> to vector<288x4xf32>
    %124 = arith.mulf %122, %123 : vector<288x4xf32>
    %c19_140 = arith.constant 19 : index
    %c0_141 = arith.constant 0 : index
    %125 = vector.load %arg12[%c19_140, %c0_141] : memref<328x4xf32, #tpu.memory_space<vmem>>, vector<288x4xf32>
    tpu.vector_store %arg12[%c19_140, %c0_141], %124 {strides = array<i32>} : memref<328x4xf32, #tpu.memory_space<vmem>>, vector<288x4xf32>,
    %c0_142 = arith.constant 0 : index
    %c0_143 = arith.constant 0 : index
    %126 = vector.load %arg12[%c0_142, %c0_143] : memref<328x4xf32, #tpu.memory_space<vmem>>, vector<288x4xf32>
    %c0_144 = arith.constant 0 : index
    %c0_145 = arith.constant 0 : index
    %c0_146 = arith.constant 0 : index
    %127 = vector.load %arg8[%c0_144, %c0_145, %c0_146] : memref<9x4x4xf32, #tpu.memory_space<vmem>>, vector<1x4x4xf32>
    %128 = vector.shape_cast %127 : vector<1x4x4xf32> to vector<4x4xf32>
    %cst_147 = arith.constant dense<0.000000e+00> : vector<288x4xf32>
    %129 = tpu.matmul %126, %128, %cst_147 {dimension_numbers = #tpu.dot_dimension_numbers<[1], [0], [0], [1], [0, 0, 1, 1], [], []>} : vector<288x4xf32>, vector<4x4xf32>, vector<288x4xf32> -> vector<288x4xf32>
    %c0_148 = arith.constant 0 : index
    %c0_149 = arith.constant 0 : index
    %130 = vector.load %arg13[%c0_148, %c0_149] : memref<288x4xf32, #tpu.memory_space<vmem>>, vector<288x4xf32>
    tpu.vector_store %arg13[%c0_148, %c0_149], %129 {strides = array<i32>} : memref<288x4xf32, #tpu.memory_space<vmem>>, vector<288x4xf32>,
    %c1_150 = arith.constant 1 : index
    %c0_151 = arith.constant 0 : index
    %131 = vector.load %arg12[%c1_150, %c0_151] : memref<328x4xf32, #tpu.memory_space<vmem>>, vector<288x4xf32>
    %c1_152 = arith.constant 1 : index
    %c0_153 = arith.constant 0 : index
    %c0_154 = arith.constant 0 : index
    %132 = vector.load %arg8[%c1_152, %c0_153, %c0_154] : memref<9x4x4xf32, #tpu.memory_space<vmem>>, vector<1x4x4xf32>
    %133 = vector.shape_cast %132 : vector<1x4x4xf32> to vector<4x4xf32>
    %cst_155 = arith.constant dense<0.000000e+00> : vector<288x4xf32>
    %134 = tpu.matmul %131, %133, %cst_155 {dimension_numbers = #tpu.dot_dimension_numbers<[1], [0], [0], [1], [0, 0, 1, 1], [], []>} : vector<288x4xf32>, vector<4x4xf32>, vector<288x4xf32> -> vector<288x4xf32>
    %c0_156 = arith.constant 0 : index
    %c0_157 = arith.constant 0 : index
    %135 = vector.load %arg13[%c0_156, %c0_157] : memref<288x4xf32, #tpu.memory_space<vmem>>, vector<288x4xf32>
    %136 = arith.addf %135, %134 : vector<288x4xf32>
    %c0_158 = arith.constant 0 : index
    %c0_159 = arith.constant 0 : index
    %137 = vector.load %arg13[%c0_158, %c0_159] : memref<288x4xf32, #tpu.memory_space<vmem>>, vector<288x4xf32>
    tpu.vector_store %arg13[%c0_158, %c0_159], %136 {strides = array<i32>} : memref<288x4xf32, #tpu.memory_space<vmem>>, vector<288x4xf32>,
    %c2_160 = arith.constant 2 : index
    %c0_161 = arith.constant 0 : index
    %138 = vector.load %arg12[%c2_160, %c0_161] : memref<328x4xf32, #tpu.memory_space<vmem>>, vector<288x4xf32>
    %c2_162 = arith.constant 2 : index
    %c0_163 = arith.constant 0 : index
    %c0_164 = arith.constant 0 : index
    %139 = vector.load %arg8[%c2_162, %c0_163, %c0_164] : memref<9x4x4xf32, #tpu.memory_space<vmem>>, vector<1x4x4xf32>
    %140 = vector.shape_cast %139 : vector<1x4x4xf32> to vector<4x4xf32>
    %cst_165 = arith.constant dense<0.000000e+00> : vector<288x4xf32>
    %141 = tpu.matmul %138, %140, %cst_165 {dimension_numbers = #tpu.dot_dimension_numbers<[1], [0], [0], [1], [0, 0, 1, 1], [], []>} : vector<288x4xf32>, vector<4x4xf32>, vector<288x4xf32> -> vector<288x4xf32>
    %c0_166 = arith.constant 0 : index
    %c0_167 = arith.constant 0 : index
    %142 = vector.load %arg13[%c0_166, %c0_167] : memref<288x4xf32, #tpu.memory_space<vmem>>, vector<288x4xf32>
    %143 = arith.addf %142, %141 : vector<288x4xf32>
    %c0_168 = arith.constant 0 : index
    %c0_169 = arith.constant 0 : index
    %144 = vector.load %arg13[%c0_168, %c0_169] : memref<288x4xf32, #tpu.memory_space<vmem>>, vector<288x4xf32>
    tpu.vector_store %arg13[%c0_168, %c0_169], %143 {strides = array<i32>} : memref<288x4xf32, #tpu.memory_space<vmem>>, vector<288x4xf32>,
    %c18_170 = arith.constant 18 : index
    %c0_171 = arith.constant 0 : index
    %145 = vector.load %arg12[%c18_170, %c0_171] : memref<328x4xf32, #tpu.memory_space<vmem>>, vector<288x4xf32>
    %c3_172 = arith.constant 3 : index
    %c0_173 = arith.constant 0 : index
    %c0_174 = arith.constant 0 : index
    %146 = vector.load %arg8[%c3_172, %c0_173, %c0_174] : memref<9x4x4xf32, #tpu.memory_space<vmem>>, vector<1x4x4xf32>
    %147 = vector.shape_cast %146 : vector<1x4x4xf32> to vector<4x4xf32>
    %cst_175 = arith.constant dense<0.000000e+00> : vector<288x4xf32>
    %148 = tpu.matmul %145, %147, %cst_175 {dimension_numbers = #tpu.dot_dimension_numbers<[1], [0], [0], [1], [0, 0, 1, 1], [], []>} : vector<288x4xf32>, vector<4x4xf32>, vector<288x4xf32> -> vector<288x4xf32>
    %c0_176 = arith.constant 0 : index
    %c0_177 = arith.constant 0 : index
    %149 = vector.load %arg13[%c0_176, %c0_177] : memref<288x4xf32, #tpu.memory_space<vmem>>, vector<288x4xf32>
    %150 = arith.addf %149, %148 : vector<288x4xf32>
    %c0_178 = arith.constant 0 : index
    %c0_179 = arith.constant 0 : index
    %151 = vector.load %arg13[%c0_178, %c0_179] : memref<288x4xf32, #tpu.memory_space<vmem>>, vector<288x4xf32>
    tpu.vector_store %arg13[%c0_178, %c0_179], %150 {strides = array<i32>} : memref<288x4xf32, #tpu.memory_space<vmem>>, vector<288x4xf32>,
    %c19_180 = arith.constant 19 : index
    %c0_181 = arith.constant 0 : index
    %152 = vector.load %arg12[%c19_180, %c0_181] : memref<328x4xf32, #tpu.memory_space<vmem>>, vector<288x4xf32>
    %c4_182 = arith.constant 4 : index
    %c0_183 = arith.constant 0 : index
    %c0_184 = arith.constant 0 : index
    %153 = vector.load %arg8[%c4_182, %c0_183, %c0_184] : memref<9x4x4xf32, #tpu.memory_space<vmem>>, vector<1x4x4xf32>
    %154 = vector.shape_cast %153 : vector<1x4x4xf32> to vector<4x4xf32>
    %cst_185 = arith.constant dense<0.000000e+00> : vector<288x4xf32>
    %155 = tpu.matmul %152, %154, %cst_185 {dimension_numbers = #tpu.dot_dimension_numbers<[1], [0], [0], [1], [0, 0, 1, 1], [], []>} : vector<288x4xf32>, vector<4x4xf32>, vector<288x4xf32> -> vector<288x4xf32>
    %c0_186 = arith.constant 0 : index
    %c0_187 = arith.constant 0 : index
    %156 = vector.load %arg13[%c0_186, %c0_187] : memref<288x4xf32, #tpu.memory_space<vmem>>, vector<288x4xf32>
    %157 = arith.addf %156, %155 : vector<288x4xf32>
    %c0_188 = arith.constant 0 : index
    %c0_189 = arith.constant 0 : index
    %158 = vector.load %arg13[%c0_188, %c0_189] : memref<288x4xf32, #tpu.memory_space<vmem>>, vector<288x4xf32>
    tpu.vector_store %arg13[%c0_188, %c0_189], %157 {strides = array<i32>} : memref<288x4xf32, #tpu.memory_space<vmem>>, vector<288x4xf32>,
    %c20_190 = arith.constant 20 : index
    %c0_191 = arith.constant 0 : index
    %159 = vector.load %arg12[%c20_190, %c0_191] : memref<328x4xf32, #tpu.memory_space<vmem>>, vector<288x4xf32>
    %c5_192 = arith.constant 5 : index
    %c0_193 = arith.constant 0 : index
    %c0_194 = arith.constant 0 : index
    %160 = vector.load %arg8[%c5_192, %c0_193, %c0_194] : memref<9x4x4xf32, #tpu.memory_space<vmem>>, vector<1x4x4xf32>
    %161 = vector.shape_cast %160 : vector<1x4x4xf32> to vector<4x4xf32>
    %cst_195 = arith.constant dense<0.000000e+00> : vector<288x4xf32>
    %162 = tpu.matmul %159, %161, %cst_195 {dimension_numbers = #tpu.dot_dimension_numbers<[1], [0], [0], [1], [0, 0, 1, 1], [], []>} : vector<288x4xf32>, vector<4x4xf32>, vector<288x4xf32> -> vector<288x4xf32>
    %c0_196 = arith.constant 0 : index
    %c0_197 = arith.constant 0 : index
    %163 = vector.load %arg13[%c0_196, %c0_197] : memref<288x4xf32, #tpu.memory_space<vmem>>, vector<288x4xf32>
    %164 = arith.addf %163, %162 : vector<288x4xf32>
    %c0_198 = arith.constant 0 : index
    %c0_199 = arith.constant 0 : index
    %165 = vector.load %arg13[%c0_198, %c0_199] : memref<288x4xf32, #tpu.memory_space<vmem>>, vector<288x4xf32>
    tpu.vector_store %arg13[%c0_198, %c0_199], %164 {strides = array<i32>} : memref<288x4xf32, #tpu.memory_space<vmem>>, vector<288x4xf32>,
    %c36_200 = arith.constant 36 : index
    %c0_201 = arith.constant 0 : index
    %166 = vector.load %arg12[%c36_200, %c0_201] : memref<328x4xf32, #tpu.memory_space<vmem>>, vector<288x4xf32>
    %c6_202 = arith.constant 6 : index
    %c0_203 = arith.constant 0 : index
    %c0_204 = arith.constant 0 : index
    %167 = vector.load %arg8[%c6_202, %c0_203, %c0_204] : memref<9x4x4xf32, #tpu.memory_space<vmem>>, vector<1x4x4xf32>
    %168 = vector.shape_cast %167 : vector<1x4x4xf32> to vector<4x4xf32>
    %cst_205 = arith.constant dense<0.000000e+00> : vector<288x4xf32>
    %169 = tpu.matmul %166, %168, %cst_205 {dimension_numbers = #tpu.dot_dimension_numbers<[1], [0], [0], [1], [0, 0, 1, 1], [], []>} : vector<288x4xf32>, vector<4x4xf32>, vector<288x4xf32> -> vector<288x4xf32>
    %c0_206 = arith.constant 0 : index
    %c0_207 = arith.constant 0 : index
    %170 = vector.load %arg13[%c0_206, %c0_207] : memref<288x4xf32, #tpu.memory_space<vmem>>, vector<288x4xf32>
    %171 = arith.addf %170, %169 : vector<288x4xf32>
    %c0_208 = arith.constant 0 : index
    %c0_209 = arith.constant 0 : index
    %172 = vector.load %arg13[%c0_208, %c0_209] : memref<288x4xf32, #tpu.memory_space<vmem>>, vector<288x4xf32>
    tpu.vector_store %arg13[%c0_208, %c0_209], %171 {strides = array<i32>} : memref<288x4xf32, #tpu.memory_space<vmem>>, vector<288x4xf32>,
    %c37_210 = arith.constant 37 : index
    %c0_211 = arith.constant 0 : index
    %173 = vector.load %arg12[%c37_210, %c0_211] : memref<328x4xf32, #tpu.memory_space<vmem>>, vector<288x4xf32>
    %c7_212 = arith.constant 7 : index
    %c0_213 = arith.constant 0 : index
    %c0_214 = arith.constant 0 : index
    %174 = vector.load %arg8[%c7_212, %c0_213, %c0_214] : memref<9x4x4xf32, #tpu.memory_space<vmem>>, vector<1x4x4xf32>
    %175 = vector.shape_cast %174 : vector<1x4x4xf32> to vector<4x4xf32>
    %cst_215 = arith.constant dense<0.000000e+00> : vector<288x4xf32>
    %176 = tpu.matmul %173, %175, %cst_215 {dimension_numbers = #tpu.dot_dimension_numbers<[1], [0], [0], [1], [0, 0, 1, 1], [], []>} : vector<288x4xf32>, vector<4x4xf32>, vector<288x4xf32> -> vector<288x4xf32>
    %c0_216 = arith.constant 0 : index
    %c0_217 = arith.constant 0 : index
    %177 = vector.load %arg13[%c0_216, %c0_217] : memref<288x4xf32, #tpu.memory_space<vmem>>, vector<288x4xf32>
    %178 = arith.addf %177, %176 : vector<288x4xf32>
    %c0_218 = arith.constant 0 : index
    %c0_219 = arith.constant 0 : index
    %179 = vector.load %arg13[%c0_218, %c0_219] : memref<288x4xf32, #tpu.memory_space<vmem>>, vector<288x4xf32>
    tpu.vector_store %arg13[%c0_218, %c0_219], %178 {strides = array<i32>} : memref<288x4xf32, #tpu.memory_space<vmem>>, vector<288x4xf32>,
    %c38_220 = arith.constant 38 : index
    %c0_221 = arith.constant 0 : index
    %180 = vector.load %arg12[%c38_220, %c0_221] : memref<328x4xf32, #tpu.memory_space<vmem>>, vector<288x4xf32>
    %c8_222 = arith.constant 8 : index
    %c0_223 = arith.constant 0 : index
    %c0_224 = arith.constant 0 : index
    %181 = vector.load %arg8[%c8_222, %c0_223, %c0_224] : memref<9x4x4xf32, #tpu.memory_space<vmem>>, vector<1x4x4xf32>
    %182 = vector.shape_cast %181 : vector<1x4x4xf32> to vector<4x4xf32>
    %cst_225 = arith.constant dense<0.000000e+00> : vector<288x4xf32>
    %183 = tpu.matmul %180, %182, %cst_225 {dimension_numbers = #tpu.dot_dimension_numbers<[1], [0], [0], [1], [0, 0, 1, 1], [], []>} : vector<288x4xf32>, vector<4x4xf32>, vector<288x4xf32> -> vector<288x4xf32>
    %c0_226 = arith.constant 0 : index
    %c0_227 = arith.constant 0 : index
    %184 = vector.load %arg13[%c0_226, %c0_227] : memref<288x4xf32, #tpu.memory_space<vmem>>, vector<288x4xf32>
    %185 = arith.addf %184, %183 : vector<288x4xf32>
    %c0_228 = arith.constant 0 : index
    %c0_229 = arith.constant 0 : index
    %186 = vector.load %arg13[%c0_228, %c0_229] : memref<288x4xf32, #tpu.memory_space<vmem>>, vector<288x4xf32>
    tpu.vector_store %arg13[%c0_228, %c0_229], %185 {strides = array<i32>} : memref<288x4xf32, #tpu.memory_space<vmem>>, vector<288x4xf32>,
    %c0_230 = arith.constant 0 : index
    %c0_231 = arith.constant 0 : index
    %187 = vector.load %arg13[%c0_230, %c0_231] : memref<288x4xf32, #tpu.memory_space<vmem>>, vector<288x4xf32>
    %c0_232 = arith.constant 0 : index
    %c0_233 = arith.constant 0 : index
    %188 = vector.load %arg9[%c0_232, %c0_233] : memref<2x4xf32, #tpu.memory_space<vmem>>, vector<1x4xf32>
    %189 = vector.broadcast %188 : vector<1x4xf32> to vector<288x4xf32>
    %190 = arith.mulf %187, %189 : vector<288x4xf32>
    %c1_234 = arith.constant 1 : index
    %c0_235 = arith.constant 0 : index
    %191 = vector.load %arg9[%c1_234, %c0_235] : memref<2x4xf32, #tpu.memory_space<vmem>>, vector<1x4xf32>
    %192 = vector.broadcast %191 : vector<1x4xf32> to vector<288x4xf32>
    %193 = arith.addf %190, %192 : vector<288x4xf32>
    %cst_236 = arith.constant 0.000000e+00 : f32
    %194 = vector.broadcast %cst_236 : f32 to vector<288x4xf32>
    %195 = arith.maximumf %193, %194 : vector<288x4xf32>
    %196 = vector.broadcast %52 : vector<288x1xf32> to vector<288x4xf32>
    %197 = arith.mulf %195, %196 : vector<288x4xf32>
    %c0_237 = arith.constant 0 : index
    %c0_238 = arith.constant 0 : index
    %c0_239 = arith.constant 0 : index
    %198 = vector.load %arg10[%c0_237, %c0_238, %c0_239] : memref<1x288x4xf32, #tpu.memory_space<vmem>>, vector<1x288x4xf32>
    %199 = vector.shape_cast %198 : vector<1x288x4xf32> to vector<288x4xf32>
    %200 = vector.shape_cast %197 : vector<288x4xf32> to vector<1x288x4xf32>
    tpu.vector_store %arg10[%c0_237, %c0_238, %c0_239], %200 {strides = array<i32>} : memref<1x288x4xf32, #tpu.memory_space<vmem>>, vector<1x288x4xf32>,
    return
  }
  func.func @transform_0(%arg0: i32) -> (i32, i32, i32) {
    %c0_i32 = arith.constant 0 : i32
    %c0_i32_0 = arith.constant 0 : i32
    %c0_i32_1 = arith.constant 0 : i32
    return %arg0, %c0_i32, %c0_i32_0 : i32, i32, i32
  }
  func.func @transform_1(%arg0: i32) -> (i32, i32, i32) {
    %c0_i32 = arith.constant 0 : i32
    %c0_i32_0 = arith.constant 0 : i32
    %c0_i32_1 = arith.constant 0 : i32
    return %arg0, %c0_i32, %c0_i32_0 : i32, i32, i32
  }
  func.func @transform_2(%arg0: i32) -> (i32, i32) {
    %c0_i32 = arith.constant 0 : i32
    %c0_i32_0 = arith.constant 0 : i32
    %c0_i32_1 = arith.constant 0 : i32
    return %c0_i32, %c0_i32_0 : i32, i32
  }
  func.func @transform_3(%arg0: i32) -> (i32, i32, i32) {
    %c0_i32 = arith.constant 0 : i32
    %c0_i32_0 = arith.constant 0 : i32
    %c0_i32_1 = arith.constant 0 : i32
    %c0_i32_2 = arith.constant 0 : i32
    return %c0_i32, %c0_i32_0, %c0_i32_1 : i32, i32, i32
  }
  func.func @transform_4(%arg0: i32) -> (i32, i32) {
    %c0_i32 = arith.constant 0 : i32
    %c0_i32_0 = arith.constant 0 : i32
    %c0_i32_1 = arith.constant 0 : i32
    return %c0_i32, %c0_i32_0 : i32, i32
  }
  func.func @transform_5(%arg0: i32) -> (i32, i32, i32) {
    %c0_i32 = arith.constant 0 : i32
    %c0_i32_0 = arith.constant 0 : i32
    %c0_i32_1 = arith.constant 0 : i32
    %c0_i32_2 = arith.constant 0 : i32
    return %c0_i32, %c0_i32_0, %c0_i32_1 : i32, i32, i32
  }
  func.func @transform_6(%arg0: i32) -> (i32, i32) {
    %c0_i32 = arith.constant 0 : i32
    %c0_i32_0 = arith.constant 0 : i32
    %c0_i32_1 = arith.constant 0 : i32
    return %c0_i32, %c0_i32_0 : i32, i32
  }
  func.func @transform_7(%arg0: i32) -> (i32, i32, i32) {
    %c0_i32 = arith.constant 0 : i32
    %c0_i32_0 = arith.constant 0 : i32
    %c0_i32_1 = arith.constant 0 : i32
    %c0_i32_2 = arith.constant 0 : i32
    return %c0_i32, %c0_i32_0, %c0_i32_1 : i32, i32, i32
  }
  func.func @transform_8(%arg0: i32) -> (i32, i32) {
    %c0_i32 = arith.constant 0 : i32
    %c0_i32_0 = arith.constant 0 : i32
    %c0_i32_1 = arith.constant 0 : i32
    return %c0_i32, %c0_i32_0 : i32, i32
  }
  func.func @transform_9(%arg0: i32) -> (i32, i32, i32) {
    %c0_i32 = arith.constant 0 : i32
    %c0_i32_0 = arith.constant 0 : i32
    %c0_i32_1 = arith.constant 0 : i32
    return %arg0, %c0_i32, %c0_i32_0 : i32, i32, i32
  }
}

</mosaic_0001>

<bundles_post_ra>
// kernel: decoder_block_pallas.1
= control target key start
LH: loop header
LB: loop body
LE: loop exit
PB: predicated region body
PF: predicated region fallthrough
CT: control target
= control target key end

     0   :  { %s16593_s30 = smov 0   ;;  %s20917_s0 = inlined_call_operand.vmem [shape: bf16[2,328,8], index: 0, kind: input, shape index: {}]   ;;  %s20918_s1 = inlined_call_operand.vmem [shape: bf16[2,328,4], index: 1, kind: input, shape index: {}]   ;;  %s20919_s2 = inlined_call_operand.vmem [shape: f32[328,6], index: 2, kind: input, shape index: {}]   ;;  %s20920_s3 = inlined_call_operand.vmem [shape: bf16[4,8,4], index: 3, kind: input, shape index: {}]   ;;  %s20921_s4 = inlined_call_operand.vmem [shape: f32[1,4], index: 4, kind: input, shape index: {}]   ;;  %s20922_s5 = inlined_call_operand.vmem [shape: f32[9,8,4], index: 5, kind: input, shape index: {}]   ;;  %s20923_s6 = inlined_call_operand.vmem [shape: f32[2,4], index: 6, kind: input, shape index: {}]   ;;  %s20924_s7 = inlined_call_operand.vmem [shape: f32[9,4,4], index: 7, kind: input, shape index: {}]   ;;  %s20925_s8 = inlined_call_operand.vmem [shape: f32[2,4], index: 8, kind: input, shape index: {}]   ;;  %s20926_s9 = inlined_call_operand.vmem [shape: f32[2,288,4], index: 9, kind: output, shape index: {}]  }
   0x1 LB: > { %s13252_s10 = sadd.s32 4294967295, %s16532_s30   ;;  %p13256_p0 = scmp.ge.s32.totalorder %s16532_s30, 1  ;;  %s16532_s30 = sphi %s16593_s30, %s19_s30  }
   0x2   : > { %p297_p1 = scmp.lt.s32.totalorder %s16532_s30, 3 }
   0x4   : > { %p298_p2 = pnand %p13256_p0, %p297_p1 }
   0x6   : > { %301 = sbr.rel (%p298_p2) target bundleno = 1763 (0x6e3), region = 56 }
   0xd   : > { %v16604_v0 = vld [vmem:[%s20919_s2 + $0x10] sm:$0xff]  ;;  %v16609_v1 = vld [vmem:[%s20919_s2] sm:$0xff]  ;;  %vm981_vm0 = vcmask 1043456   ;;  %v20937_v2 = vmov 4   ;;  %p338_p3 = scmp.lt.s32.totalorder %s13252_s10, 1  ;;  %v20935_v7 = vmov 0.0  }
   0xe   : > { %16273 = vset.pattern.permute.xlu1 %v20937_v2  ;;  %16272 = vset.pattern.permute.xlu0 %v20937_v2  ;;  %v813_v3 = vld [vmem:[%s20920_s3] sm:$0xf]  ;;  %v13303_v4 = vld [vmem:[%s20920_s3 + $0x4] sm:$0xf]  ;;  %v16628_v8 = vld [vmem:[%s20919_s2 + $0x18] sm:$0xff]  ;;  %vm689_vm1 = vcmask 31744  }
   0xf   : > { %449 = vperm.xlu1 %16273, %v16604_v0   ;;  %439 = vperm.xlu0 %16272, %v16609_v1   ;;  %v983_v5 = vsel %vm981_vm0, %v813_v3, 0  ;;  %v1598_v6 = vsel %vm981_vm0, %v13303_v4, 0  ;;  %v16633_v9 = vld [vmem:[%s20919_s2 + $0x8] sm:$0xff]  ;;  %s21090_s10 = smov (!%p338_p3, %s13252_s10), 1  ;;  %vm16536_vm2 = vmmov 0   ;;  %3646 = vst.msk [vmem:[#allocation3] sm:$0xff] %vm689_vm1, %v20935_v7 }
  0x10   : > { %14901 = vmatprep.subr.bf16.mxu0 %v20935_v7  ;;  %14987 = vmatprep.subr.bf16.mxu1 %v20935_v7  ;;  %3647 = vst.msk [vmem:[#allocation3 + $0x8] sm:$0xff] %vm689_vm1, %v20935_v7  ;;  %3650 = vst.msk [vmem:[#allocation3 + $0x133] sm:$0xff] %vm689_vm1, %v20935_v7  ;;  %s16253_s23 = smul.u32 164, %s21090_s10  ;;  %v16655_v10 = vld [vmem:[%s20919_s2 + $0x20] sm:$0xff]  ;;  %vm917_vm3 = vcmask 64512   ;;  %v20931_v12 = vmov 0  }
  0x11   : > { %14902 = vmatpush3.bf16.msra.mxu0 %v983_v5  ;;  %14988 = vmatpush3.bf16.msra.mxu1 %v1598_v6  ;;  %3651 = vst.msk [vmem:[#allocation3 + $0x13b] sm:$0xff] %vm689_vm1, %v20935_v7  ;;  %v16678_v13 = vld [vmem:[%s20919_s2 + $0x28] sm:$0xff]  ;;  %v16689_v14 = vld [vmem:[%s20919_s2 + $0x30] sm:$0xff]  ;;  %v16703_v16 = vld [vmem:[%s20919_s2 + $0x38] sm:$0xff]  ;;  %v20927_v23 = vmov 1   ;;  %s16539_s21 = smov 4  }
  0x12   : > { %14903 = vmatprep.mubr.msk.bf16.mxu0 %vm16536_vm2, %v20935_v7  ;;  %14989 = vmatprep.mubr.msk.bf16.mxu1 %vm16536_vm2, %v20935_v7  ;;  %s16664_s28 = scalar_lea.vmem %s20917_s0, %s16253_s23  ;;  %v16714_v17 = vld [vmem:[%s20919_s2 + $0x40] sm:$0xff]  ;;  %v16728_v19 = vld [vmem:[%s20919_s2 + $0x48] sm:$0xff]  ;;  %v16738_v20 = vld [vmem:[%s20919_s2 + $0xb0] sm:$0xff]  ;;  %s16763_s27 = scalar_lea.vmem %s20918_s1, %s16253_s23  ;;  %v20933_v47 = vmov 2   ;;  %vm3604_vm4 = vcmask 64544   ;;  %vm3648_vm5 = vcmask 26624  }
  0x13   : > { %454 = vperm.xlu1 %16273, %v16628_v8   ;;  %444 = vperm.xlu0 %16272, %v16633_v9   ;;  %v16667_v11 = vld [vmem:[%s16664_s28] sm:$0xff]   ;;  %v16692_v15 = vld [vmem:[%s16664_s28 + $0x8] sm:$0xff]   ;;  %v16717_v18 = vld [vmem:[%s16664_s28 + $0x10] sm:$0xff]   ;;  %vm3652_vm6 = vcmask 28672  }
  0x14   : > { %15073 = vmatprep.subr.bf16.mxu0 %v20935_v7  ;;  %15159 = vmatprep.subr.bf16.mxu1 %v20935_v7  ;;  %v16742_v21 = vld [vmem:[%s16664_s28 + $0x18] sm:$0xff]   ;;  %v13325_v24 = vld [vmem:[%s20920_s3 + $0x8] sm:$0xf]  ;;  %v16776_v26 = vld [vmem:[%s20919_s2 + $0x50] sm:$0xff] }
  0x15   : > { %14904 = vmatmul.mubr.msk.bf16.vlgmr.msra.gmra.mrb[0].mxu0 %vm917_vm3, %v16667_v11  ;;  %14990 = vmatmul.mubr.msk.bf16.vlgmr.msra.gmra.mrb[0].mxu1 %vm917_vm3, %v16667_v11  ;;  %v16753_v22 = vld [vmem:[%s20919_s2 + $0xb8] sm:$0xff]  ;;  %v2213_v25 = vsel %vm981_vm0, %v13325_v24, 0  ;;  %v16781_v27 = vld [vmem:[%s20919_s2 + $0xd0] sm:$0xff]  ;;  %v16784_v28 = vld [vmem:[%s16664_s28 + $0x20] sm:$0xff]  }
  0x16   : > { %14907 = vmatprep.mubr.msk.bf16.mxu0 %vm16536_vm2, %v20935_v7  ;;  %14993 = vmatprep.mubr.msk.bf16.mxu1 %vm16536_vm2, %v20935_v7  ;;  %v14128_v29 = vld [vmem:[%s16763_s27 + $0x8] sm:$0xff]   ;;  %v16797_v32 = vld [vmem:[%s20919_s2 + $0x58] sm:$0xff]  ;;  %v16825_v38 = vld [vmem:[%s20919_s2 + $0x100] sm:$0xff] }
  0x17   : > { %16274 = vset.pattern.permute.xlu1 %v20931_v12  ;;  %459 = vperm.xlu0 %16272, %v16655_v10   ;;  %v14054_v30 = vunpack.c.l.bf16 %v14128_v29  ;;  %v14055_v31 = vunpack.c.h.bf16 %v14128_v29  ;;  %v16802_v33 = vld [vmem:[%s20919_s2 + $0xd8] sm:$0xff]  ;;  %v16811_v35 = vld [vmem:[%s16664_s28 + $0x28] sm:$0xff]   ;;  %v16841_v40 = vld [vmem:[%s16664_s28 + $0x30] sm:$0xff]  }
  0x18   : > { %1187 = vperm.xlu1 %16274, %v16609_v1   ;;  %15074 = vmatpush3.bf16.msra.mxu0 %v2213_v25  ;;  %v13347_v36 = vld [vmem:[%s20920_s3 + $0xc] sm:$0xf]  ;;  %v16848_v41 = vld [vmem:[%s20919_s2 + $0x60] sm:$0xff]  ;;  %v16868_v43 = vld [vmem:[%s16664_s28 + $0x38] sm:$0xff]  }
  0x19   : > { %v16324_v34 = vpack.i.bf16 %v14055_v31, %v14054_v30  ;;  %v2828_v37 = vsel %vm981_vm0, %v13347_v36, 0  ;;  %v16838_v39 = vld [vmem:[%s20919_s2 + $0x108] sm:$0xff]  ;;  %v16884_v44 = vld [vmem:[%s16664_s28 + $0x40] sm:$0xff]   ;;  %v16896_v45 = vld [vmem:[%s20919_s2 + $0x70] sm:$0xff] }
  0x1a   : > { %15160 = vmatpush3.bf16.msra.mxu1 %v2828_v37  ;;  %v16862_v42 = vld [vmem:[%s20919_s2 + $0x68] sm:$0xff]  ;;  %v16922_v48 = vld [vmem:[%s20919_s2 + $0x78] sm:$0xff]  ;;  %v16925_v49 = vld [vmem:[%s16664_s28 + $0x50] sm:$0xff]  }
  0x1b   : > { %464 = vperm.xlu0 %16272, %v16678_v13   ;;  %v16904_v46 = vld [vmem:[%s16664_s28 + $0x48] sm:$0xff]   ;;  %v16943_v50 = vld [vmem:[%s20919_s2 + $0xa0] sm:$0xff]  ;;  %v16947_v51 = vld [vmem:[%s16664_s28 + $0x58] sm:$0xff]  }
  0x1c   : > { %1192 = vperm.xlu1 %16274, %v16633_v9   ;;  %v16953_v52 = vld [vmem:[%s20919_s2 + $0xa8] sm:$0xff]  ;;  %v16967_v53 = vld [vmem:[%s20919_s2 + $0x80] sm:$0xff]  ;;  %v806_v61 = vld [vmem:[%s20919_s2 + $0x110] sm:$0xff] }
  0x1d   : > { %14908 = vmatmul.mubr.msk.bf16.gmra.mrb[4].mxu0 %vm917_vm3, %v16692_v15  ;;  %14994 = vmatmul.mubr.msk.bf16.gmra.mrb[4].mxu1 %vm917_vm3, %v16692_v15  ;;  %v14131_v54 = vld [vmem:[%s16763_s27 + $0x20] sm:$0xff]   ;;  %v16497_v59 = vld [vmem:[%s16664_s28 + $0x68] sm:$0xff]   ;;  %v16498_v62 = vld [vmem:[%s16664_s28 + $0x70] sm:$0xff]  }
  0x1e   : > { %14911 = vmatprep.mubr.msk.bf16.mxu0 %vm16536_vm2, %v20935_v7  ;;  %14997 = vmatprep.mubr.msk.bf16.mxu1 %vm16536_vm2, %v20935_v7  ;;  %v16973_v55 = vld [vmem:[%s16664_s28 + $0x60] sm:$0xff]   ;;  %v14066_v56 = vunpack.c.l.bf16 %v14131_v54  ;;  %v14067_v57 = vunpack.c.h.bf16 %v14131_v54  ;;  %v16993_v60 = vld [vmem:[%s20919_s2 + $0x88] sm:$0xff]  ;;  %v17024_v63 = vld [vmem:[%s20919_s2 + $0x90] sm:$0xff] }
  0x1f   : > { %469 = vperm.xlu0 %16272, %v16689_v14   ;;  %v17029_v3 = vld [vmem:[%s20921_s4] ss:$0 sm:$0xff]  ;;  %v16499_v4 = vld [vmem:[%s16664_s28 + $0x78] sm:$0xff]  }
  0x20   : > { %1197 = vperm.xlu1 %16274, %v16604_v0   ;;  %v16356_v58 = vpack.i.bf16 %v14067_v57, %v14066_v56  ;;  %v16500_v30 = vld [vmem:[%s16664_s28 + $0x80] sm:$0xff]   ;;  %v17056_v31 = vld [vmem:[%s20919_s2 + $0x98] sm:$0xff]  ;;  %v16501_v57 = vld [vmem:[%s16664_s28 + $0x88] sm:$0xff]  }
  0x23   : > { %474 = vperm.xlu0 %16272, %v16703_v16  }
  0x24   : > { %1202 = vperm.xlu1 %16274, %v16628_v8  }
  0x25   : > { %14912 = vmatmul.mubr.msk.bf16.gmra.mrb[8].mxu0 %vm917_vm3, %v16717_v18  ;;  %14998 = vmatmul.mubr.msk.bf16.gmra.mrb[8].mxu1 %vm917_vm3, %v16717_v18 }
  0x26   : > { %14915 = vmatprep.mubr.msk.bf16.mxu0 %vm16536_vm2, %v20935_v7  ;;  %15001 = vmatprep.mubr.msk.bf16.mxu1 %vm16536_vm2, %v20935_v7 }
  0x27   : > { %479 = vperm.xlu0 %16272, %v16714_v17  }
  0x28   : > { %1207 = vperm.xlu1 %16274, %v16655_v10  }
  0x2b   : > { %484 = vperm.xlu0 %16272, %v16728_v19  }
  0x2c   : > { %1212 = vperm.xlu1 %16274, %v16678_v13  }
  0x2d   : > { %14916 = vmatmul.mubr.msk.bf16.gmra.mrb[12].mxu0 %vm917_vm3, %v16742_v21  ;;  %15002 = vmatmul.mubr.msk.bf16.gmra.mrb[12].mxu1 %vm917_vm3, %v16742_v21 }
  0x2e   : > { %14919 = vmatprep.mubr.msk.bf16.mxu0 %vm16536_vm2, %v20935_v7  ;;  %15005 = vmatprep.mubr.msk.bf16.mxu1 %vm16536_vm2, %v20935_v7 }
  0x2f   : > { %549 = vperm.xlu0 %16272, %v16738_v20  }
  0x30   : > { %16275 = vset.pattern.permute.xlu1 %v20927_v23 }
  0x31   : > { %1807 = vperm.xlu1 %16275, %v16633_v9  }
  0x33   : > { %554 = vperm.xlu0 %16272, %v16753_v22  }
  0x35   : > { %16276 = vset.pattern.permute.xlu1 %v20937_v2  ;;  %14920 = vmatmul.mubr.msk.bf16.gmra.mrb[16].mxu0 %vm917_vm3, %v16784_v28 }
  0x36   : > { %489 = vperm.xlu1 %16276, %v16776_v26   ;;  %15006 = vmatmul.mubr.msk.bf16.gmra.mrb[16].mxu1 %vm917_vm3, %v16784_v28 }
  0x37   : > { %569 = vperm.xlu0 %16272, %v16781_v27   ;;  %14923 = vmatprep.mubr.msk.bf16.mxu0 %vm16536_vm2, %v20935_v7 }
  0x38   : > { %15009 = vmatprep.mubr.msk.bf16.mxu1 %vm16536_vm2, %v20935_v7 }
  0x3a   : > { %494 = vperm.xlu1 %16276, %v16797_v32  }
  0x3b   : > { %574 = vperm.xlu0 %16272, %v16802_v33  }
  0x3d   : > { %14924 = vmatmul.mubr.msk.bf16.gmra.mrb[20].mxu0 %vm917_vm3, %v16811_v35 }
  0x3e   : > { %16277 = vset.pattern.permute.xlu1 %v20931_v12  ;;  %15010 = vmatmul.mubr.msk.bf16.gmra.mrb[20].mxu1 %vm917_vm3, %v16811_v35 }
  0x3f   : > { %16325 = vrot.lane.b32.xlu0 %v16324_v34, %s16539_s21  ;;  %1222 = vperm.xlu1 %16277, %v16703_v16  }
  0x40   : > { %14927 = vmatprep.mubr.msk.bf16.mxu0 %vm16536_vm2, %v20935_v7  ;;  %15013 = vmatprep.mubr.msk.bf16.mxu1 %vm16536_vm2, %v20935_v7 }
  0x43   : > { %599 = vperm.xlu0 %16272, %v16825_v38   ;;  %16278 = vset.pattern.permute.xlu1 %v20927_v23 }
  0x44   : > { %1817 = vperm.xlu1 %16278, %v16628_v8  }
  0x45   : > { %14928 = vmatmul.mubr.msk.bf16.gmra.mrb[24].mxu0 %vm917_vm3, %v16841_v40 }
  0x46   : > { %15014 = vmatmul.mubr.msk.bf16.gmra.mrb[24].mxu1 %vm917_vm3, %v16841_v40  ;;  %14931 = vmatprep.mubr.msk.bf16.mxu0 %vm16536_vm2, %v20935_v7 }
  0x47   : > { %604 = vperm.xlu0 %16272, %v16838_v39   ;;  %15017 = vmatprep.mubr.msk.bf16.mxu1 %vm16536_vm2, %v20935_v7 }
  0x48   : > { %16279 = vset.pattern.permute.xlu1 %v20937_v2 }
  0x49   : > { %499 = vperm.xlu1 %16279, %v16848_v41  }
  0x4b   : > { %16352 = vset.pattern.permute.xlu0 %v20931_v12 }
  0x4c   : > { %1217 = vperm.xlu0 %16352, %v16689_v14  }
  0x4d   : > { %504 = vperm.xlu1 %16279, %v16862_v42   ;;  %14932 = vmatmul.mubr.msk.bf16.gmra.mrb[28].mxu0 %vm917_vm3, %v16868_v43 }
  0x4e   : > { %15018 = vmatmul.mubr.msk.bf16.gmra.mrb[28].mxu1 %vm917_vm3, %v16868_v43  ;;  %14935 = vmatprep.mubr.msk.bf16.mxu0 %vm16536_vm2, %v20935_v7 }
  0x4f   : > { %15021 = vmatprep.mubr.msk.bf16.mxu1 %vm16536_vm2, %v20935_v7 }
  0x50   : > { %1227 = vperm.xlu0 %16352, %v16714_v17  }
  0x51   : > { %16280 = vset.pattern.permute.xlu1 %v20931_v12 }
  0x52   : > { %1232 = vperm.xlu1 %16280, %v16728_v19  }
  0x54   : > { %1237 = vperm.xlu0 %16352, %v16776_v26  }
  0x55   : > { %14936 = vmatmul.mubr.msk.bf16.gmra.mrb[32].mxu0 %vm917_vm3, %v16884_v44 }
  0x56   : > { %16281 = vset.pattern.permute.xlu1 %v20927_v23  ;;  %15022 = vmatmul.mubr.msk.bf16.gmra.mrb[32].mxu1 %vm917_vm3, %v16884_v44 }
  0x57   : > { %1827 = vperm.xlu1 %16281, %v16678_v13   ;;  %14939 = vmatprep.mubr.msk.bf16.mxu0 %vm16536_vm2, %v20935_v7 }
  0x58   : > { %1242 = vperm.xlu0 %16352, %v16797_v32   ;;  %15025 = vmatprep.mubr.msk.bf16.mxu1 %vm16536_vm2, %v20935_v7 }
  0x5b   : > { %16282 = vset.pattern.permute.xlu1 %v20937_v2 }
  0x5c   : > { %509 = vperm.xlu1 %16282, %v16896_v45   ;;  %1247 = vperm.xlu0 %16352, %v16848_v41  }
  0x5d   : > { %14940 = vmatmul.mubr.msk.bf16.gmra.mrb[36].mxu0 %vm917_vm3, %v16904_v46 }
  0x5e   : > { %15026 = vmatmul.mubr.msk.bf16.gmra.mrb[36].mxu1 %vm917_vm3, %v16904_v46  ;;  %14943 = vmatprep.mubr.msk.bf16.mxu0 %vm16536_vm2, %v20935_v7 }
  0x5f   : > { %15029 = vmatprep.mubr.msk.bf16.mxu1 %vm16536_vm2, %v20935_v7 }
  0x60   : > { %16283 = vset.pattern.permute.xlu1 %v20933_v47  ;;  %1252 = vperm.xlu0 %16352, %v16862_v42  }
  0x61   : > { %2417 = vperm.xlu1 %16283, %v16609_v1  }
  0x64   : > { %1257 = vperm.xlu0 %16352, %v16896_v45  }
  0x65   : > { %16284 = vset.pattern.permute.xlu1 %v20937_v2  ;;  %14944 = vmatmul.mubr.msk.bf16.gmra.mrb[40].mxu0 %vm917_vm3, %v16925_v49 }
  0x66   : > { %514 = vperm.xlu1 %16284, %v16922_v48   ;;  %15030 = vmatmul.mubr.msk.bf16.gmra.mrb[40].mxu1 %vm917_vm3, %v16925_v49 }
  0x67   : > { %14947 = vmatprep.mubr.msk.bf16.mxu0 %vm16536_vm2, %v20935_v7  ;;  %15033 = vmatprep.mubr.msk.bf16.mxu1 %vm16536_vm2, %v20935_v7 }
  0x68   : > { %1262 = vperm.xlu0 %16352, %v16922_v48  }
  0x6a   : > { %16285 = vset.pattern.permute.xlu1 %v20933_v47 }
  0x6b   : > { %2422 = vperm.xlu1 %16285, %v16633_v9  }
  0x6c   : > { %1287 = vperm.xlu0 %16352, %v16943_v50  }
  0x6d   : > { %14948 = vmatmul.mubr.msk.bf16.gmra.mrb[44].mxu0 %vm917_vm3, %v16947_v51 }
  0x6e   : > { %15034 = vmatmul.mubr.msk.bf16.gmra.mrb[44].mxu1 %vm917_vm3, %v16947_v51  ;;  %14951 = vmatprep.mubr.msk.bf16.mxu0 %vm16536_vm2, %v20935_v7 }
  0x6f   : > { %16286 = vset.pattern.permute.xlu1 %v20927_v23  ;;  %15037 = vmatprep.mubr.msk.bf16.mxu1 %vm16536_vm2, %v20935_v7 }
  0x70   : > { %1837 = vperm.xlu1 %16286, %v16703_v16   ;;  %1292 = vperm.xlu0 %16352, %v16953_v52  }
  0x74   : > { %16287 = vset.pattern.permute.xlu1 %v20937_v2  ;;  %1317 = vperm.xlu0 %16352, %v16781_v27  }
  0x75   : > { %519 = vperm.xlu1 %16287, %v16967_v53   ;;  %14952 = vmatmul.mubr.msk.bf16.gmra.mrb[48].mxu0 %vm917_vm3, %v16973_v55 }
  0x76   : > { %15038 = vmatmul.mubr.msk.bf16.gmra.mrb[48].mxu1 %vm917_vm3, %v16973_v55  ;;  %14955 = vmatprep.mubr.msk.bf16.mxu0 %vm16536_vm2, %v20935_v7 }
  0x77   : > { %15041 = vmatprep.mubr.msk.bf16.mxu1 %vm16536_vm2, %v20935_v7 }
  0x78   : > { %1322 = vperm.xlu0 %16352, %v16802_v33  }
  0x79   : > { %16288 = vset.pattern.permute.xlu1 %v20933_v47 }
  0x7a   : > { %2427 = vperm.xlu1 %16288, %v16604_v0  }
  0x7c   : > { %16357 = vrot.lane.b32.xlu0 %v16356_v58, %s16539_s21 }
  0x7d   : > { %14956 = vmatmul.mubr.msk.bf16.gmra.mrb[52].mxu0 %vm917_vm3, %v16497_v59 }
  0x7e   : > { %16289 = vset.pattern.permute.xlu1 %v20937_v2  ;;  %15042 = vmatmul.mubr.msk.bf16.gmra.mrb[52].mxu1 %vm917_vm3, %v16497_v59 }
  0x7f   : > { %524 = vperm.xlu1 %16289, %v16993_v60   ;;  %14959 = vmatprep.mubr.msk.bf16.mxu0 %vm16536_vm2, %v20935_v7 }
  0x80   : > { %1357 = vperm.xlu0 %16352, %v806_v61   ;;  %15045 = vmatprep.mubr.msk.bf16.mxu1 %vm16536_vm2, %v20935_v7 }
  0x83   : > { %16290 = vset.pattern.permute.xlu1 %v20933_v47 }
  0x84   : > { %2432 = vperm.xlu1 %16290, %v16628_v8   ;;  %16380 = vset.pattern.permute.xlu0 %v20927_v23 }
  0x85   : > { %1802 = vperm.xlu0 %16380, %v16609_v1   ;;  %14960 = vmatmul.mubr.msk.bf16.gmra.mrb[56].mxu0 %vm917_vm3, %v16498_v62 }
  0x86   : > { %15046 = vmatmul.mubr.msk.bf16.gmra.mrb[56].mxu1 %vm917_vm3, %v16498_v62  ;;  %14963 = vmatprep.mubr.msk.bf16.mxu0 %vm16536_vm2, %v20935_v7  ;;  %v20929_v62 = vmov 3  }
  0x87   : > { %15049 = vmatprep.mubr.msk.bf16.mxu1 %vm16536_vm2, %v20935_v7 }
  0x88   : > { %16291 = vset.pattern.permute.xlu1 %v20927_v23 }
  0x89   : > { %1847 = vperm.xlu1 %16291, %v16728_v19   ;;  %1812 = vperm.xlu0 %16380, %v16604_v0  }
  0x8d   : > { %16292 = vset.pattern.permute.xlu1 %v20937_v2  ;;  %1822 = vperm.xlu0 %16380, %v16655_v10  }
  0x8e   : > { %v450_v5 = vpop.permute.xlu1 %449  ;;  %v440_v6 = vpop.permute.xlu0 %439  ;;  %529 = vperm.xlu1 %16292, %v17024_v63   ;;  %14964 = vmatmul.mubr.msk.bf16.gmra.mrb[60].mxu0 %vm917_vm3, %v16499_v4 }
  0x8f   : > { %v650_v0 = vmul.f32 %v17029_v3, %v450_v5  ;;  %v648_v9 = vmul.f32 %v17029_v3, %v440_v6  ;;  %15050 = vmatmul.mubr.msk.bf16.gmra.mrb[60].mxu1 %vm917_vm3, %v16499_v4  ;;  %14967 = vmatprep.mubr.msk.bf16.mxu0 %vm16536_vm2, %v20935_v7 }
  0x90   : > { %15053 = vmatprep.mubr.msk.bf16.mxu1 %vm16536_vm2, %v20935_v7 }
  0x91   : > { %692 = vst.msk [vmem:[#allocation2 + $0x10] sm:$0xff] %vm689_vm1, %v650_v0  ;;  %690 = vst.msk [vmem:[#allocation2] sm:$0xff] %vm689_vm1, %v648_v9  ;;  %1832 = vperm.xlu0 %16380, %v16689_v14   ;;  %v16502_v0 = vld [vmem:[%s16664_s28 + $0x90] sm:$0xff]  }
  0x92   : > { %v455_v24 = vpop.permute.xlu1 %454  ;;  %v445_v25 = vpop.permute.xlu0 %444  ;;  %16293 = vset.pattern.permute.xlu1 %v20933_v47 }
  0x93   : > { %v651_v27 = vmul.f32 %v17029_v3, %v455_v24  ;;  %v649_v29 = vmul.f32 %v17029_v3, %v445_v25  ;;  %2437 = vperm.xlu1 %16293, %v16655_v10  }
  0x95   : > { %693 = vst.msk [vmem:[#allocation2 + $0x18] sm:$0xff] %vm689_vm1, %v651_v27  ;;  %691 = vst.msk [vmem:[#allocation2 + $0x8] sm:$0xff] %vm689_vm1, %v649_v29  ;;  %1842 = vperm.xlu0 %16380, %v16714_v17  }
  0x96   : > { %v460_v33 = vpop.permute.xlu0 %459  ;;  %14968 = vmatmul.mubr.msk.bf16.gmra.mrb[64].mxu0 %vm917_vm3, %v16500_v30 }
  0x97   : > { %v652_v34 = vmul.f32 %v17029_v3, %v460_v33  ;;  %16294 = vset.pattern.permute.xlu1 %v20937_v2  ;;  %v17061_v36 = vpop.permute.xlu1 %1187  ;;  %15054 = vmatmul.mubr.msk.bf16.gmra.mrb[64].mxu1 %vm917_vm3, %v16500_v30  ;;  %v16503_v30 = vld [vmem:[%s16664_s28 + $0x98] sm:$0xff]  }
  0x98   : > { %534 = vperm.xlu1 %16294, %v17056_v31   ;;  %14971 = vmatprep.mubr.msk.bf16.mxu0 %vm16536_vm2, %v20935_v7 }
  0x99   : > { %694 = vst.msk [vmem:[#allocation2 + $0x20] sm:$0xff] %vm689_vm1, %v652_v34  ;;  %15057 = vmatprep.mubr.msk.bf16.mxu1 %vm16536_vm2, %v20935_v7  ;;  %1852 = vperm.xlu0 %16380, %v16776_v26  }
  0x9a   : > { %v465_v37 = vpop.permute.xlu0 %464 }
  0x9b   : > { %v653_v54 = vmul.f32 %v17029_v3, %v465_v37  ;;  %v17073_v56 = vpop.permute.xlu1 %1192  ;;  %v14134_v37 = vld [vmem:[%s16763_s27 + $0x38] sm:$0xff]  }
  0x9c   : > { %16295 = vset.pattern.permute.xlu1 %v20933_v47 }
  0x9d   : > { %695 = vst.msk [vmem:[#allocation2 + $0x28] sm:$0xff] %vm689_vm1, %v653_v54  ;;  %2442 = vperm.xlu1 %16295, %v16678_v13   ;;  %1877 = vperm.xlu0 %16380, %v16922_v48  }
  0x9e   : > { %v470_v58 = vpop.permute.xlu0 %469  ;;  %14972 = vmatmul.mubr.msk.bf16.gmra.mrb[68].mxu0 %vm917_vm3, %v16501_v57 }
  0x9f   : > { %v654_v59 = vmul.f32 %v17029_v3, %v470_v58  ;;  %v17081_v61 = vpop.permute.xlu1 %1197  ;;  %15058 = vmatmul.mubr.msk.bf16.gmra.mrb[68].mxu1 %vm917_vm3, %v16501_v57  ;;  %14975 = vmatprep.mubr.msk.bf16.mxu0 %vm16536_vm2, %v20935_v7  ;;  %v14078_v58 = vunpack.c.l.bf16 %v14134_v37 }
  0xa0   : > { %15061 = vmatprep.mubr.msk.bf16.mxu1 %vm16536_vm2, %v20935_v7 }
  0xa1   : > { %696 = vst.msk [vmem:[#allocation2 + $0x30] sm:$0xff] %vm689_vm1, %v654_v59  ;;  %16296 = vset.pattern.permute.xlu1 %v20929_v62  ;;  %1882 = vperm.xlu0 %16380, %v16967_v53   ;;  %v14079_v59 = vunpack.c.h.bf16 %v14134_v37 }
  0xa2   : > { %v475_v4 = vpop.permute.xlu0 %474  ;;  %3032 = vperm.xlu1 %16296, %v16609_v1  }
  0xa3   : > { %v655_v5 = vmul.f32 %v17029_v3, %v475_v4  ;;  %v17094_v6 = vpop.permute.xlu1 %1202  ;;  %v16504_v4 = vld [vmem:[%s16664_s28 + $0xa0] ss:$0 sps:$4 sm:$0xff]  }
  0xa5   : > { %697 = vst.msk [vmem:[#allocation2 + $0x38] sm:$0xff] %vm689_vm1, %v655_v5  ;;  %1887 = vperm.xlu0 %16380, %v16993_v60   ;;  %v17144_v5 = vld [vmem:[%s20919_s2 + $0xe8] sm:$0xff] }
  0xa6   : > { %v480_v9 = vpop.permute.xlu0 %479  ;;  %16297 = vset.pattern.permute.xlu1 %v20927_v23  ;;  %14976 = vmatmul.mubr.msk.bf16.gmra.mrb[72].mxu0 %vm917_vm3, %v16502_v0 }
  0xa7   : > { %v656_v24 = vmul.f32 %v17029_v3, %v480_v9  ;;  %1857 = vperm.xlu1 %16297, %v16797_v32   ;;  %v17102_v1 = vpop.permute.xlu1 %1207  ;;  %15062 = vmatmul.mubr.msk.bf16.gmra.mrb[72].mxu1 %vm917_vm3, %v16502_v0 }
  0xa8   : > { %14979 = vmatprep.mubr.msk.bf16.mxu0 %vm16536_vm2, %v20935_v7  ;;  %15065 = vmatprep.mubr.msk.bf16.mxu1 %vm16536_vm2, %v20935_v7 }
  0xa9   : > { %698 = vst.msk [vmem:[#allocation2 + $0x40] sm:$0xff] %vm689_vm1, %v656_v24  ;;  %1912 = vperm.xlu0 %16380, %v16738_v20   ;;  %v17125_v20 = vld [vmem:[%s20919_s2 + $0xe0] sm:$0xff] }
  0xaa   : > { %v485_v25 = vpop.permute.xlu0 %484 }
  0xab   : > { %v657_v27 = vmul.f32 %v17029_v3, %v485_v25  ;;  %16298 = vset.pattern.permute.xlu1 %v20937_v2  ;;  %v17114_v29 = vpop.permute.xlu1 %1212  ;;  %v16385_v25 = vpack.i.bf16 %v14079_v59, %v14078_v58 }
  0xac   : > { %539 = vperm.xlu1 %16298, %v16943_v50  }
  0xad   : > { %699 = vst.msk [vmem:[#allocation2 + $0x48] sm:$0xff] %vm689_vm1, %v657_v27  ;;  %1917 = vperm.xlu0 %16380, %v16753_v22  }
  0xae   : > { %v550_v33 = vpop.permute.xlu0 %549  ;;  %14980 = vmatmul.mubr.msk.bf16.gmra.mrb[76].mxu0 %vm917_vm3, %v16503_v30 }
  0xaf   : > { %v670_v34 = vmul.f32 %v17029_v3, %v550_v33  ;;  %15066 = vmatmul.mubr.msk.bf16.gmra.mrb[76].mxu1 %vm917_vm3, %v16503_v30  ;;  %14983 = vmatprep.mubr.msk.bf16.mxu0 %vm16536_vm2, %v20935_v7 }
  0xb0   : > { %16299 = vset.pattern.permute.xlu1 %v20931_v12  ;;  %v17130_v54 = vpop.permute.xlu1 %1807  ;;  %15069 = vmatprep.mubr.msk.bf16.mxu1 %vm16536_vm2, %v20935_v7 }
  0xb1   : > { %712 = vst.msk [vmem:[#allocation2 + $0xb0] sm:$0xff] %vm689_vm1, %v670_v34  ;;  %1267 = vperm.xlu1 %16299, %v16967_v53   ;;  %1942 = vperm.xlu0 %16380, %v17125_v20  }
  0xb2   : > { %v555_v22 = vpop.permute.xlu0 %554 }
  0xb3   : > { %v671_v57 = vmul.f32 %v17029_v3, %v555_v22 }
  0xb5   : > { %713 = vst.msk [vmem:[#allocation2 + $0xb8] sm:$0xff] %vm689_vm1, %v671_v57  ;;  %16300 = vset.pattern.permute.xlu1 %v20937_v2  ;;  %v490_v53 = vpop.permute.xlu1 %489  ;;  %1947 = vperm.xlu0 %16380, %v17144_v5  }
  0xb6   : > { %v570_v0 = vpop.permute.xlu0 %569  ;;  %v658_v9 = vmul.f32 %v17029_v3, %v490_v53  ;;  %544 = vperm.xlu1 %16300, %v16953_v52   ;;  %14984 = vmatmul.mubr.msk.bf16.gmra.mrb[80].mxu0 %vm917_vm3, %v16504_v4 }
  0xb7   : > { %v674_v24 = vmul.f32 %v17029_v3, %v570_v0  ;;  %15070 = vmatmul.mubr.msk.bf16.gmra.mrb[80].mxu1 %vm917_vm3, %v16504_v4  ;;  %15075 = vmatprep.mubr.msk.bf16.mxu0 %vm16536_vm2, %v20935_v7 }
  0xb8   : > { %700 = vst.msk [vmem:[#allocation2 + $0x50] sm:$0xff] %vm689_vm1, %v658_v9  ;;  %15161 = vmatprep.mubr.msk.bf16.mxu1 %vm16536_vm2, %v20935_v7 }
  0xb9   : > { %716 = vst.msk [vmem:[#allocation2 + $0xd0] sm:$0xff] %vm689_vm1, %v674_v24  ;;  %v495_v27 = vpop.permute.xlu1 %494  ;;  %16386 = vrot.lane.b32.xlu0 %v16385_v25, %s16539_s21 }
  0xba   : > { %v575_v30 = vpop.permute.xlu0 %574  ;;  %v659_v33 = vmul.f32 %v17029_v3, %v495_v27  ;;  %16301 = vset.pattern.permute.xlu1 %v20931_v12 }
  0xbb   : > { %v675_v34 = vmul.f32 %v17029_v3, %v575_v30  ;;  %1272 = vperm.xlu1 %16301, %v16993_v60  }
  0xbc   : > { %701 = vst.msk [vmem:[#allocation2 + $0x58] sm:$0xff] %vm689_vm1, %v659_v33 }
  0xbd   : > { %717 = vst.msk [vmem:[#allocation2 + $0xd8] sm:$0xff] %vm689_vm1, %v675_v34  ;;  %1962 = vperm.xlu0 %16380, %v16825_v38  }
  0xbe   : > { %v17167_v37 = vpop.permute.xlu0 %16325  ;;  %v17169_v22 = vpop.permute.xlu1 %1222  ;;  %15076 = vmatmul.mubr.msk.bf16.vlgmr.msra.gmra.mrb[84].mxu0 %vm917_vm3, %v16667_v11 }
  0xbf   : > { %16302 = vset.pattern.permute.xlu1 %v20927_v23  ;;  %15162 = vmatmul.mubr.msk.bf16.vlgmr.msra.gmra.mrb[84].mxu1 %vm917_vm3, %v16667_v11 }
  0xc0   : > { %1862 = vperm.xlu1 %16302, %v16848_v41   ;;  %15079 = vmatprep.mubr.msk.bf16.mxu0 %vm16536_vm2, %v20935_v7 }
  0xc1   : > { %15165 = vmatprep.mubr.msk.bf16.mxu1 %vm16536_vm2, %v20935_v7  ;;  %1967 = vperm.xlu0 %16380, %v16838_v39  }
  0xc2   : > { %v600_v60 = vpop.permute.xlu0 %599 }
  0xc3   : > { %v680_v57 = vmul.f32 %v17029_v3, %v600_v60  ;;  %v17184_v38 = vpop.permute.xlu1 %1817 }
  0xc4   : > { %1867 = vperm.xlu1 %16302, %v16862_v42  }
  0xc5   : > { %722 = vst.msk [vmem:[#allocation2 + $0x100] sm:$0xff] %vm689_vm1, %v680_v57  ;;  %16398 = vset.pattern.permute.xlu0 %v20933_v47  ;;  %v732_v57 = vld [vmem:[#allocation2 + $0x8] sm:$0xff] }
  0xc6   : > { %v605_v11 = vpop.permute.xlu0 %604  ;;  %15080 = vmatmul.mubr.msk.bf16.gmra.mrb[88].mxu0 %vm917_vm3, %v16692_v15  ;;  %2447 = vperm.xlu0 %16398, %v16689_v14  }
  0xc7   : > { %v681_v41 = vmul.f32 %v17029_v3, %v605_v11  ;;  %15166 = vmatmul.mubr.msk.bf16.gmra.mrb[88].mxu1 %vm917_vm3, %v16692_v15  ;;  %15083 = vmatprep.mubr.msk.bf16.mxu0 %vm16536_vm2, %v20935_v7 }
  0xc8   : > { %16303 = vset.pattern.permute.xlu1 %v20929_v62  ;;  %v500_v39 = vpop.permute.xlu1 %499  ;;  %15169 = vmatprep.mubr.msk.bf16.mxu1 %vm16536_vm2, %v20935_v7 }
  0xc9   : > { %723 = vst.msk [vmem:[#allocation2 + $0x108] sm:$0xff] %vm689_vm1, %v681_v41  ;;  %v660_v58 = vmul.f32 %v17029_v3, %v500_v39  ;;  %3047 = vperm.xlu1 %16303, %v16628_v8  }
  0xca   : > { %2452 = vperm.xlu0 %16398, %v16703_v16  }
  0xcb   : > { %v17201_v59 = vpop.permute.xlu0 %1217  ;;  %702 = vst.msk [vmem:[#allocation2 + $0x60] sm:$0xff] %vm689_vm1, %v660_v58 }
  0xcc   : > { %v505_v14 = vpop.permute.xlu1 %504 }
  0xcd   : > { %v661_v15 = vmul.f32 %v17029_v3, %v505_v14  ;;  %16304 = vset.pattern.permute.xlu1 %v20931_v12 }
  0xce   : > { %1277 = vperm.xlu1 %16304, %v17024_v63   ;;  %15084 = vmatmul.mubr.msk.bf16.gmra.mrb[92].mxu0 %vm917_vm3, %v16717_v18 }
  0xcf   : > { %v17210_v8 = vpop.permute.xlu0 %1227  ;;  %703 = vst.msk [vmem:[#allocation2 + $0x68] sm:$0xff] %vm689_vm1, %v661_v15  ;;  %2462 = vperm.xlu0 %16398, %v16728_v19   ;;  %15170 = vmatmul.mubr.msk.bf16.gmra.mrb[92].mxu1 %vm917_vm3, %v16717_v18 }
  0xd0   : > { %15087 = vmatprep.mubr.msk.bf16.mxu0 %vm16536_vm2, %v20935_v7  ;;  %15173 = vmatprep.mubr.msk.bf16.mxu1 %vm16536_vm2, %v20935_v7 }
  0xd1   : > { %v17220_v16 = vpop.permute.xlu1 %1232 }
  0xd2   : > { %16305 = vset.pattern.permute.xlu1 %v20933_v47 }
  0xd3   : > { %v17225_v4 = vpop.permute.xlu0 %1237  ;;  %2457 = vperm.xlu1 %16305, %v16714_v17   ;;  %2482 = vperm.xlu0 %16398, %v16862_v42  }
  0xd6   : > { %v17229_v19 = vpop.permute.xlu1 %1827  ;;  %15088 = vmatmul.mubr.msk.bf16.gmra.mrb[96].mxu0 %vm917_vm3, %v16742_v21 }
  0xd7   : > { %16306 = vset.pattern.permute.xlu1 %v20931_v12  ;;  %v17234_v18 = vpop.permute.xlu0 %1242  ;;  %15174 = vmatmul.mubr.msk.bf16.gmra.mrb[96].mxu1 %vm917_vm3, %v16742_v21 }
  0xd8   : > { %1282 = vperm.xlu1 %16306, %v17056_v31   ;;  %15091 = vmatprep.mubr.msk.bf16.mxu0 %vm16536_vm2, %v20935_v7 }
  0xd9   : > { %15177 = vmatprep.mubr.msk.bf16.mxu1 %vm16536_vm2, %v20935_v7  ;;  %2487 = vperm.xlu0 %16398, %v16896_v45  }
  0xdb   : > { %v510_v17 = vpop.permute.xlu1 %509  ;;  %v17244_v42 = vpop.permute.xlu0 %1247 }
  0xdc   : > { %v662_v53 = vmul.f32 %v17029_v3, %v510_v17  ;;  %16307 = vset.pattern.permute.xlu1 %v20927_v23 }
  0xdd   : > { %1872 = vperm.xlu1 %16307, %v16896_v45   ;;  %2492 = vperm.xlu0 %16398, %v16922_v48  }
  0xde   : > { %704 = vst.msk [vmem:[#allocation2 + $0x70] sm:$0xff] %vm689_vm1, %v662_v53  ;;  %15092 = vmatmul.mubr.msk.bf16.gmra.mrb[100].mxu0 %vm917_vm3, %v16784_v28 }
  0xdf   : > { %15178 = vmatmul.mubr.msk.bf16.gmra.mrb[100].mxu1 %vm917_vm3, %v16784_v28  ;;  %v17257_v0 = vpop.permute.xlu0 %1252  ;;  %15095 = vmatprep.mubr.msk.bf16.mxu0 %vm16536_vm2, %v20935_v7 }
  0xe0   : > { %v17255_v21 = vpop.permute.xlu1 %2417  ;;  %15181 = vmatprep.mubr.msk.bf16.mxu1 %vm16536_vm2, %v20935_v7 }
  0xe1   : > { %16308 = vset.pattern.permute.xlu1 %v20929_v62  ;;  %2512 = vperm.xlu0 %16398, %v17056_v31  }
  0xe2   : > { %3052 = vperm.xlu1 %16308, %v16655_v10   ;;  %v17279_v10 = vld [vmem:[%s20919_s2 + $0xc0] sm:$0xff] }
  0xe3   : > { %v17266_v45 = vpop.permute.xlu0 %1257 }
  0xe5   : > { %v515_v48 = vpop.permute.xlu1 %514  ;;  %2517 = vperm.xlu0 %16398, %v16943_v50   ;;  %v731_v50 = vld [vmem:[#allocation2] sm:$0xff] }
  0xe6   : > { %v663_v28 = vmul.f32 %v17029_v3, %v515_v48  ;;  %3057 = vperm.xlu1 %16308, %v16678_v13   ;;  %15096 = vmatmul.mubr.msk.bf16.gmra.mrb[104].mxu0 %vm917_vm3, %v16811_v35 }
  0xe7   : > { %v17274_v9 = vpop.permute.xlu0 %1262  ;;  %15099 = vmatprep.mubr.msk.bf16.mxu0 %vm16536_vm2, %v20935_v7  ;;  %15182 = vmatmul.mubr.msk.bf16.gmra.mrb[104].mxu1 %vm917_vm3, %v16811_v35  ;;  %v17298_v35 = vld [vmem:[%s20919_s2 + $0xb0] sm:$0xff] }
  0xe8   : > { %705 = vst.msk [vmem:[#allocation2 + $0x78] sm:$0xff] %vm689_vm1, %v663_v28  ;;  %15185 = vmatprep.mubr.msk.bf16.mxu1 %vm16536_vm2, %v20935_v7  ;;  %v1019_v24 = vpop.f32.mrb[0].mxu0  ;;  %v17292_v27 = vpop.f32.mrb[0].mxu1 }
  0xe9   : > { %2522 = vperm.xlu0 %16398, %v16953_v52   ;;  %v1390_v25 = vmul.f32 %v17061_v36, %v1019_v24  ;;  %v14905_v30 = vpop.f32.mrb[1].mxu0  ;;  %v14991_v33 = vpop.f32.mrb[1].mxu1 }
  0xea   : > { %16309 = vset.pattern.permute.xlu1 %v20937_v2  ;;  %v17288_v13 = vpop.permute.xlu1 %2422  ;;  %v1022_v11 = vpop.f32.mrb[2].mxu0 }
  0xeb   : > { %559 = vperm.xlu1 %16309, %v17279_v10   ;;  %v17300_v34 = vpop.permute.xlu0 %1287  ;;  %v1431_v60 = vadd.f32 %v1390_v25, %v731_v50  ;;  %v1637_v41 = vpop.f32.mrb[2].mxu1  ;;  %v1391_v52 = vmul.f32 %v17073_v56, %v1022_v11  ;;  %v17318_v56 = vld [vmem:[%s20919_s2 + $0xc8] sm:$0xff]  ;;  %v733_v50 = vld [vmem:[#allocation2 + $0x10] sm:$0xff] }
  0xec   : > { %v14906_v36 = vpop.f32.mrb[3].mxu0  ;;  %v14992_v39 = vpop.f32.mrb[3].mxu1 }
  0xed   : > { %2527 = vperm.xlu0 %16398, %v17298_v35   ;;  %1472 = vst.msk [vmem:[#allocation2] sm:$0xff] %vm689_vm1, %v1431_v60  ;;  %v1432_v14 = vadd.f32 %v1391_v52, %v732_v57  ;;  %v734_v52 = vld [vmem:[#allocation2 + $0x18] sm:$0xff]  ;;  %v2006_v36 = vmul.f32 %v17130_v54, %v1637_v41  ;;  %v735_v41 = vld [vmem:[#allocation2 + $0x20] sm:$0xff] }
  0xee   : > { %15100 = vmatmul.mubr.msk.bf16.gmra.mrb[108].mxu0 %vm917_vm3, %v16841_v40 }
  0xef   : > { %16310 = vset.pattern.permute.xlu1 %v20933_v47  ;;  %v17306_v58 = vpop.permute.xlu1 %1837  ;;  %v17311_v15 = vpop.permute.xlu0 %1292  ;;  %15103 = vmatprep.mubr.msk.bf16.mxu0 %vm16536_vm2, %v20935_v7  ;;  %1473 = vst.msk [vmem:[#allocation2 + $0x8] sm:$0xff] %vm689_vm1, %v1432_v14 }
  0xf0   : > { %2467 = vperm.xlu1 %16310, %v16776_v26   ;;  %15186 = vmatmul.mubr.msk.bf16.gmra.mrb[108].mxu1 %vm917_vm3, %v16841_v40  ;;  %v1027_v17 = vpop.f32.mrb[4].mxu0  ;;  %v17323_v53 = vpop.f32.mrb[4].mxu1 }
  0xf1   : > { %15189 = vmatprep.mubr.msk.bf16.mxu1 %vm16536_vm2, %v20935_v7  ;;  %2542 = vperm.xlu0 %16398, %v17318_v56   ;;  %v1392_v26 = vmul.f32 %v17081_v61, %v1027_v17  ;;  %v14909_v48 = vpop.f32.mrb[5].mxu0  ;;  %v14995_v28 = vpop.f32.mrb[5].mxu1  ;;  %v17349_v17 = vld [vmem:[%s20919_s2 + $0xf8] sm:$0xff] }
  0xf2   : > { %v1030_v33 = vpop.f32.mrb[6].mxu0  ;;  %v1645_v60 = vpop.f32.mrb[6].mxu1 }
  0xf3   : > { %v17330_v25 = vpop.permute.xlu0 %1317  ;;  %v1433_v40 = vadd.f32 %v1392_v26, %v733_v50  ;;  %v1393_v57 = vmul.f32 %v17094_v6, %v1030_v33  ;;  %v14910_v11 = vpop.f32.mrb[7].mxu0  ;;  %v14049_v6 = vld [vmem:[%s16763_s27] sm:$0xff]  }
  0xf4   : > { %16311 = vset.pattern.permute.xlu1 %v20937_v2  ;;  %v520_v24 = vpop.permute.xlu1 %519  ;;  %v14996_v61 = vpop.f32.mrb[7].mxu1  ;;  %v14050_v33 = vunpack.c.l.bf16 %v14049_v6 }
  0xf5   : > { %v664_v30 = vmul.f32 %v17029_v3, %v520_v24  ;;  %564 = vperm.xlu1 %16311, %v17318_v56   ;;  %2557 = vperm.xlu0 %16398, %v17125_v20   ;;  %1474 = vst.msk [vmem:[#allocation2 + $0x10] sm:$0xff] %vm689_vm1, %v1433_v40  ;;  %v1434_v39 = vadd.f32 %v1393_v57, %v734_v52  ;;  %v14051_v57 = vunpack.c.h.bf16 %v14049_v6  ;;  %v2790_v61 = vld [vmem:[%s20919_s2 + $0x30] sm:$0xff]  ;;  %v2204_v6 = vld [vmem:[%s20919_s2 + $0x118] sm:$0xff] }
  0xf6   : > { %15104 = vmatmul.mubr.msk.bf16.gmra.mrb[112].mxu0 %vm917_vm3, %v16868_v43  ;;  %v1514_v26 = vld [vmem:[#allocation2 + $0x8] sm:$0xff] }
  0xf7   : > { %706 = vst.msk [vmem:[#allocation2 + $0x80] sm:$0xff] %vm689_vm1, %v664_v30  ;;  %v17341_v14 = vpop.permute.xlu0 %1322  ;;  %15107 = vmatprep.mubr.msk.bf16.mxu0 %vm16536_vm2, %v20935_v7  ;;  %v2047_v54 = vadd.f32 %v2006_v36, %v1514_v26  ;;  %1475 = vst.msk [vmem:[#allocation2 + $0x18] sm:$0xff] %vm689_vm1, %v1434_v39 }
  0xf8   : > { %15190 = vmatmul.mubr.msk.bf16.gmra.mrb[112].mxu1 %vm917_vm3, %v16868_v43  ;;  %v1035_v28 = vpop.f32.mrb[8].mxu0  ;;  %v17358_v50 = vpop.f32.mrb[8].mxu1 }
  0xf9   : > { %16312 = vset.pattern.permute.xlu1 %v20933_v47  ;;  %v17352_v48 = vpop.permute.xlu1 %2427  ;;  %15193 = vmatprep.mubr.msk.bf16.mxu1 %vm16536_vm2, %v20935_v7  ;;  %v1394_v24 = vmul.f32 %v17102_v1, %v1035_v28  ;;  %v14913_v40 = vpop.f32.mrb[9].mxu0  ;;  %2088 = vst.msk [vmem:[#allocation2 + $0x8] sm:$0xff] %vm689_vm1, %v2047_v54 }
  0xfa   : > { %2472 = vperm.xlu1 %16312, %v16797_v32   ;;  %v14999_v30 = vpop.f32.mrb[9].mxu1  ;;  %2572 = vperm.xlu0 %16398, %v17349_v17   ;;  %v736_v32 = vld [vmem:[#allocation2 + $0x28] sm:$0xff]  ;;  %v1038_v11 = vpop.f32.mrb[10].mxu0 }
  0xfb   : > { %v17365_v43 = vpop.permute.xlu0 %16357  ;;  %v1435_v52 = vadd.f32 %v1394_v24, %v735_v41  ;;  %v1395_v36 = vmul.f32 %v17114_v29, %v1038_v11  ;;  %v1653_v1 = vpop.f32.mrb[10].mxu1  ;;  %v16314_v29 = vpack.i.bf16 %v14051_v57, %v14050_v33  ;;  %v2008_v41 = vmul.f32 %v17184_v38, %v1645_v60  ;;  %v737_v11 = vld [vmem:[#allocation2 + $0x30] sm:$0xff]  ;;  %v2785_v38 = vld [vmem:[%s20919_s2 + $0x8] sm:$0xff] }
  0xfc   : > { %v14914_v39 = vpop.f32.mrb[11].mxu0  ;;  %v15000_v54 = vpop.f32.mrb[11].mxu1 }
  0xfd   : > { %1476 = vst.msk [vmem:[#allocation2 + $0x20] sm:$0xff] %vm689_vm1, %v1435_v52  ;;  %v1436_v28 = vadd.f32 %v1395_v36, %v736_v32  ;;  %v738_v36 = vld [vmem:[#allocation2 + $0x38] sm:$0xff] }
  0xfe   : > { %16313 = vset.pattern.permute.xlu1 %v20929_v62  ;;  %v525_v26 = vpop.permute.xlu1 %524  ;;  %15108 = vmatmul.mubr.msk.bf16.gmra.mrb[116].mxu0 %vm917_vm3, %v16884_v44  ;;  %v1516_v30 = vld [vmem:[#allocation2 + $0x18] sm:$0xff] }
  0xff   : > { %v665_v40 = vmul.f32 %v17029_v3, %v525_v26  ;;  %3062 = vperm.xlu1 %16313, %v2790_v61   ;;  %v17380_v24 = vpop.permute.xlu0 %1357  ;;  %15111 = vmatprep.mubr.msk.bf16.mxu0 %vm16536_vm2, %v20935_v7  ;;  %1477 = vst.msk [vmem:[#allocation2 + $0x28] sm:$0xff] %vm689_vm1, %v1436_v28  ;;  %v2049_v32 = vadd.f32 %v2008_v41, %v1516_v30  ;;  %v2786_v30 = vld [vmem:[%s20919_s2 + $0x10] sm:$0xff] }
 0x100   : > { %20958 = vst [vmem:[#allocation5_spill] sm:$0xff] %v17380_v24  ;;  %2592 = vperm.xlu0 %16398, %v2204_v6   ;;  %15194 = vmatmul.mubr.msk.bf16.gmra.mrb[116].mxu1 %vm917_vm3, %v16884_v44  ;;  %v1043_v61 = vpop.f32.mrb[12].mxu0  ;;  %v17388_v33 = vpop.f32.mrb[12].mxu1  ;;  %v2791_v6 = vld [vmem:[%s20919_s2 + $0x38] sm:$0xff] }
 0x101   : > { %707 = vst.msk [vmem:[#allocation2 + $0x88] sm:$0xff] %vm689_vm1, %v665_v40  ;;  %15197 = vmatprep.mubr.msk.bf16.mxu1 %vm16536_vm2, %v20935_v7  ;;  %v1396_v60 = vmul.f32 %v17201_v59, %v1043_v61  ;;  %v14917_v52 = vpop.f32.mrb[13].mxu0  ;;  %2090 = vst.msk [vmem:[#allocation2 + $0x18] sm:$0xff] %vm689_vm1, %v2049_v32  ;;  %v15003_v44 = vpop.f32.mrb[13].mxu1  ;;  %v2010_v32 = vmul.f32 %v17229_v19, %v1653_v1  ;;  %v1513_v61 = vld [vmem:[#allocation2] sm:$0xff] }
 0x102   : > { %v1046_v39 = vpop.f32.mrb[14].mxu0  ;;  %v1661_v28 = vpop.f32.mrb[14].mxu1  ;;  %v739_v1 = vld [vmem:[#allocation2 + $0x40] sm:$0xff] }
 0x103   : > { %v17396_v57 = vpop.permute.xlu1 %2432  ;;  %16315 = vrot.lane.b32.xlu1 %v16314_v29, %s16539_s21  ;;  %v1437_v26 = vadd.f32 %v1396_v60, %v737_v11  ;;  %v1397_v59 = vmul.f32 %v17169_v22, %v1046_v39  ;;  %v14918_v29 = vpop.f32.mrb[15].mxu0  ;;  %v2793_v39 = vld [vmem:[%s20919_s2 + $0x48] sm:$0xff] }
 0x104   : > { %16419 = vset.pattern.permute.xlu0 %v20929_v62  ;;  %v1803_v54 = vpop.permute.xlu0 %1802  ;;  %v15004_v41 = vpop.f32.mrb[15].mxu1 }
 0x105   : > { %3037 = vperm.xlu0 %16419, %v2785_v38   ;;  %v2005_v40 = vmul.f32 %v1803_v54, %v17292_v27  ;;  %1478 = vst.msk [vmem:[#allocation2 + $0x30] sm:$0xff] %vm689_vm1, %v1437_v26  ;;  %v1438_v52 = vadd.f32 %v1397_v59, %v738_v36  ;;  %v740_v59 = vld [vmem:[#allocation2 + $0x48] sm:$0xff] }
 0x106   : > { %15112 = vmatmul.mubr.msk.bf16.gmra.mrb[120].mxu0 %vm917_vm3, %v16904_v46  ;;  %v1518_v22 = vld [vmem:[#allocation2 + $0x28] sm:$0xff] }
 0x107   : > { %3067 = vperm.xlu1 %16313, %v2791_v6   ;;  %v2046_v11 = vadd.f32 %v2005_v40, %v1513_v61  ;;  %15115 = vmatprep.mubr.msk.bf16.mxu0 %vm16536_vm2, %v20935_v7  ;;  %v2051_v27 = vadd.f32 %v2010_v32, %v1518_v22  ;;  %1479 = vst.msk [vmem:[#allocation2 + $0x38] sm:$0xff] %vm689_vm1, %v1438_v52  ;;  %v1515_v6 = vld [vmem:[#allocation2 + $0x10] sm:$0xff]  ;;  %v17440_v22 = vld [vmem:[%s20919_s2 + $0x60] sm:$0xff] }
 0x108   : > { %v17413_v38 = vpop.permute.xlu1 %1847  ;;  %v1813_v60 = vpop.permute.xlu0 %1812  ;;  %15198 = vmatmul.mubr.msk.bf16.gmra.mrb[120].mxu1 %vm917_vm3, %v16904_v46 }
 0x109   : > { %3042 = vperm.xlu0 %16419, %v2786_v30   ;;  %2087 = vst.msk [vmem:[#allocation2] sm:$0xff] %vm689_vm1, %v2046_v11  ;;  %v2007_v19 = vmul.f32 %v1813_v60, %v17323_v53  ;;  %v1051_v44 = vpop.f32.mrb[16].mxu0  ;;  %v17422_v36 = vpop.f32.mrb[16].mxu1  ;;  %15201 = vmatprep.mubr.msk.bf16.mxu1 %vm16536_vm2, %v20935_v7  ;;  %2092 = vst.msk [vmem:[#allocation2 + $0x28] sm:$0xff] %vm689_vm1, %v2051_v27  ;;  %v2012_v27 = vmul.f32 %v17306_v58, %v1661_v28 }
 0x10a   : > { %v1398_v46 = vmul.f32 %v17210_v8, %v1051_v44  ;;  %v14921_v26 = vpop.f32.mrb[17].mxu0  ;;  %v15007_v53 = vpop.f32.mrb[17].mxu1 }
 0x10b   : > { %16319 = vset.pattern.permute.xlu1 %v20931_v12  ;;  %v2048_v54 = vadd.f32 %v2007_v19, %v1515_v6  ;;  %v1054_v40 = vpop.f32.mrb[18].mxu0  ;;  %v1669_v29 = vpop.f32.mrb[18].mxu1 }
 0x10c   : > { %1297 = vperm.xlu1 %16319, %v17298_v35   ;;  %v1439_v41 = vadd.f32 %v1398_v46, %v739_v1  ;;  %v1823_v30 = vpop.permute.xlu0 %1822  ;;  %v1399_v32 = vmul.f32 %v17220_v16, %v1054_v40  ;;  %v14922_v35 = vpop.f32.mrb[19].mxu0  ;;  %v1517_v16 = vld [vmem:[#allocation2 + $0x20] sm:$0xff]  ;;  %v1519_v44 = vld [vmem:[#allocation2 + $0x30] sm:$0xff] }
 0x10d   : > { %v530_v61 = vpop.permute.xlu1 %529  ;;  %3077 = vperm.xlu0 %16419, %v2793_v39   ;;  %2089 = vst.msk [vmem:[#allocation2 + $0x10] sm:$0xff] %vm689_vm1, %v2048_v54  ;;  %v2009_v8 = vmul.f32 %v1823_v30, %v17358_v50  ;;  %v15008_v11 = vpop.f32.mrb[19].mxu1  ;;  %v2794_v50 = vld [vmem:[%s20919_s2 + $0x50] sm:$0xff] }
 0x10e   : > { %v666_v52 = vmul.f32 %v17029_v3, %v530_v61  ;;  %1480 = vst.msk [vmem:[#allocation2 + $0x40] sm:$0xff] %vm689_vm1, %v1439_v41  ;;  %v1440_v60 = vadd.f32 %v1399_v32, %v740_v59  ;;  %15116 = vmatmul.mubr.msk.bf16.gmra.mrb[124].mxu0 %vm917_vm3, %v16925_v49  ;;  %v1520_v19 = vld [vmem:[#allocation2 + $0x38] sm:$0xff]  ;;  %v741_v40 = vld [vmem:[#allocation2 + $0x50] sm:$0xff] }
 0x10f   : > { %v2050_v1 = vadd.f32 %v2009_v8, %v1517_v16  ;;  %15119 = vmatprep.mubr.msk.bf16.mxu0 %vm16536_vm2, %v20935_v7  ;;  %v2053_v58 = vadd.f32 %v2012_v27, %v1520_v19  ;;  %v2795_v59 = vld [vmem:[%s20919_s2 + $0x58] sm:$0xff]  ;;  %v2014_v16 = vmul.f32 %v17413_v38, %v1669_v29 }
 0x110   : > { %708 = vst.msk [vmem:[#allocation2 + $0x90] sm:$0xff] %vm689_vm1, %v666_v52  ;;  %16320 = vset.pattern.permute.xlu1 %v20933_v47  ;;  %1481 = vst.msk [vmem:[#allocation2 + $0x48] sm:$0xff] %vm689_vm1, %v1440_v60  ;;  %v1833_v28 = vpop.permute.xlu0 %1832  ;;  %15202 = vmatmul.mubr.msk.bf16.gmra.mrb[124].mxu1 %vm917_vm3, %v16925_v49  ;;  %v1059_v6 = vpop.f32.mrb[20].mxu0  ;;  %v795_v49 = vld [vmem:[%s20919_s2 + $0xb8] sm:$0xff] }
 0x111   : > { %2477 = vperm.xlu1 %16320, %v17440_v22   ;;  %2091 = vst.msk [vmem:[#allocation2 + $0x20] sm:$0xff] %vm689_vm1, %v2050_v1  ;;  %v2011_v46 = vmul.f32 %v1833_v28, %v17388_v33  ;;  %15205 = vmatprep.mubr.msk.bf16.mxu1 %vm16536_vm2, %v20935_v7  ;;  %2094 = vst.msk [vmem:[#allocation2 + $0x38] sm:$0xff] %vm689_vm1, %v2053_v58  ;;  %v1400_v26 = vmul.f32 %v17225_v4, %v1059_v6  ;;  %v14925_v53 = vpop.f32.mrb[21].mxu0  ;;  %v1674_v54 = vpop.f32.mrb[20].mxu1  ;;  %v742_v52 = vld [vmem:[#allocation2 + $0x58] sm:$0xff] }
 0x112   : > { %v17458_v39 = vpop.permute.xlu1 %2437  ;;  %3082 = vperm.xlu0 %16419, %v2794_v50   ;;  %v1062_v41 = vpop.f32.mrb[22].mxu0 }
 0x113   : > { %v2052_v33 = vadd.f32 %v2011_v46, %v1519_v44  ;;  %v15011_v30 = vpop.f32.mrb[21].mxu1  ;;  %v1441_v32 = vadd.f32 %v1400_v26, %v741_v40  ;;  %v1401_v61 = vmul.f32 %v17234_v18, %v1062_v41  ;;  %v14926_v8 = vpop.f32.mrb[23].mxu0  ;;  %v2792_v40 = vld [vmem:[%s20919_s2 + $0x40] sm:$0xff]  ;;  %v744_v41 = vld [vmem:[#allocation2 + $0x68] sm:$0xff] }
 0x114   : > { %v1843_v4 = vpop.permute.xlu0 %1842  ;;  %v17475_v27 = vpop.f32.mrb[22].mxu1 }
 0x115   : > { %16321 = vset.pattern.permute.xlu1 %v20931_v12  ;;  %2093 = vst.msk [vmem:[#allocation2 + $0x30] sm:$0xff] %vm689_vm1, %v2052_v33  ;;  %v1521_v35 = vld [vmem:[#allocation2 + $0x40] sm:$0xff]  ;;  %v2013_v11 = vmul.f32 %v1843_v4, %v17422_v36  ;;  %1482 = vst.msk [vmem:[#allocation2 + $0x50] sm:$0xff] %vm689_vm1, %v1441_v32  ;;  %v1442_v60 = vadd.f32 %v1401_v61, %v742_v52  ;;  %v15012_v50 = vpop.f32.mrb[23].mxu1  ;;  %v2799_v36 = vld [vmem:[%s20919_s2 + $0x78] sm:$0xff] }
 0x116   : > { %1302 = vperm.xlu1 %16321, %v795_v49   ;;  %3087 = vperm.xlu0 %16419, %v2795_v59   ;;  %v17513_v32 = vld [vmem:[%s20919_s2 + $0x80] sm:$0xff]  ;;  %v745_v50 = vld [vmem:[#allocation2 + $0x70] sm:$0xff] }
 0x117   : > { %v535_v18 = vpop.permute.xlu1 %534  ;;  %15120 = vmatmul.mubr.msk.bf16.gmra.mrb[128].mxu0 %vm917_vm3, %v16947_v51  ;;  %v1522_v19 = vld [vmem:[#allocation2 + $0x48] sm:$0xff]  ;;  %v2054_v58 = vadd.f32 %v2013_v11, %v1521_v35  ;;  %1483 = vst.msk [vmem:[#allocation2 + $0x58] sm:$0xff] %vm689_vm1, %v1442_v60  ;;  %v16505_v52 = vld [vmem:[%s16664_s28 + $0x60] sm:$0xff]  }
 0x118   : > { %v667_v1 = vmul.f32 %v17029_v3, %v535_v18  ;;  %15123 = vmatprep.mubr.msk.bf16.mxu0 %vm16536_vm2, %v20935_v7  ;;  %v2055_v38 = vadd.f32 %v2014_v16, %v1522_v19  ;;  %v1853_v29 = vpop.permute.xlu0 %1852  ;;  %15206 = vmatmul.mubr.msk.bf16.gmra.mrb[128].mxu1 %vm917_vm3, %v16947_v51  ;;  %v1067_v3 = vpop.f32.mrb[24].mxu0  ;;  %v743_v51 = vld [vmem:[#allocation2 + $0x60] sm:$0xff]  ;;  %v17535_v11 = vld [vmem:[%s20919_s2 + $0x88] sm:$0xff] }
 0x119   : > { %2095 = vst.msk [vmem:[#allocation2 + $0x40] sm:$0xff] %vm689_vm1, %v2054_v58  ;;  %15209 = vmatprep.mubr.msk.bf16.mxu1 %vm16536_vm2, %v20935_v7  ;;  %v1402_v28 = vmul.f32 %v17244_v42, %v1067_v3  ;;  %v14929_v44 = vpop.f32.mrb[25].mxu0  ;;  %v2015_v6 = vmul.f32 %v1853_v29, %v1674_v54  ;;  %v17498_v46 = vpop.f32.mrb[24].mxu1  ;;  %v746_v3 = vld [vmem:[#allocation2 + $0x78] sm:$0xff] }
 0x11a   : > { %709 = vst.msk [vmem:[#allocation2 + $0x98] sm:$0xff] %vm689_vm1, %v667_v1  ;;  %16322 = vset.pattern.permute.xlu1 %v20927_v23  ;;  %2096 = vst.msk [vmem:[#allocation2 + $0x48] sm:$0xff] %vm689_vm1, %v2055_v38  ;;  %3107 = vperm.xlu0 %16419, %v2799_v36   ;;  %v1070_v53 = vpop.f32.mrb[26].mxu0  ;;  %v15015_v42 = vpop.f32.mrb[25].mxu1 }
 0x11b   : > { %1892 = vperm.xlu1 %16322, %v17024_v63   ;;  %v1443_v49 = vadd.f32 %v1402_v28, %v743_v51  ;;  %v1403_v59 = vmul.f32 %v17257_v0, %v1070_v53  ;;  %v14930_v33 = vpop.f32.mrb[27].mxu0  ;;  %v17506_v54 = vpop.f32.mrb[26].mxu1  ;;  %v16506_v51 = vld [vmem:[%s16664_s28 + $0x68] sm:$0xff]  }
 0x11c   : > { %v17500_v26 = vpop.permute.xlu1 %2442  ;;  %v1523_v63 = vld [vmem:[#allocation2 + $0x50] sm:$0xff]  ;;  %v17508_v30 = vpop.permute.xlu0 %1877 }
 0x11d   : > { %1484 = vst.msk [vmem:[#allocation2 + $0x60] sm:$0xff] %vm689_vm1, %v1443_v49  ;;  %v1444_v0 = vadd.f32 %v1403_v59, %v744_v41  ;;  %v2056_v61 = vadd.f32 %v2015_v6, %v1523_v63  ;;  %v15016_v4 = vpop.f32.mrb[27].mxu1  ;;  %v3726_v59 = vld [vmem:[%s20922_s5] sm:$0xff] }
 0x11e   : > { %3112 = vperm.xlu0 %16419, %v17513_v32   ;;  %v1524_v53 = vld [vmem:[#allocation2 + $0x58] sm:$0xff]  ;;  %15245 = vmatprep.subr.mxu0 %v3726_v59 }
 0x11f   : > { %16323 = vset.pattern.permute.xlu1 %v20929_v62  ;;  %15124 = vmatmul.mubr.msk.bf16.gmra.mrb[132].mxu0 %vm917_vm3, %v16973_v55  ;;  %1485 = vst.msk [vmem:[#allocation2 + $0x68] sm:$0xff] %vm689_vm1, %v1444_v0  ;;  %2097 = vst.msk [vmem:[#allocation2 + $0x50] sm:$0xff] %vm689_vm1, %v2056_v61 }
 0x120   : > { %3072 = vperm.xlu1 %16323, %v2792_v40   ;;  %15127 = vmatprep.mubr.msk.bf16.mxu0 %vm16536_vm2, %v20935_v7  ;;  %v1075_v35 = vpop.f32.mrb[28].mxu0  ;;  %v17530_v55 = vpop.permute.xlu0 %1882 }
 0x121   : > { %v17523_v8 = vpop.permute.xlu1 %3032  ;;  %15210 = vmatmul.mubr.msk.bf16.gmra.mrb[132].mxu1 %vm917_vm3, %v16505_v52  ;;  %v1404_v16 = vmul.f32 %v17266_v45, %v1075_v35  ;;  %v14933_v60 = vpop.f32.mrb[29].mxu0  ;;  %15246 = vmatpush3.msra.mxu0 %v3726_v59 }
 0x122   : > { %15213 = vmatprep.mubr.msk.bf16.mxu1 %vm16536_vm2, %v20935_v7  ;;  %v17538_v18 = vpop.f32.mrb[28].mxu1  ;;  %v1078_v19 = vpop.f32.mrb[30].mxu0  ;;  %3117 = vperm.xlu0 %16419, %v17535_v11  }
 0x123   : > { %v15019_v1 = vpop.f32.mrb[29].mxu1  ;;  %v1445_v58 = vadd.f32 %v1404_v16, %v745_v50  ;;  %v1405_v36 = vmul.f32 %v17274_v9, %v1078_v19  ;;  %v14934_v29 = vpop.f32.mrb[31].mxu0  ;;  %v16508_v16 = vld [vmem:[%s16664_s28 + $0x70] sm:$0xff]  }
 0x124   : > { %16329 = vset.pattern.permute.xlu1 %v20927_v23  ;;  %v1693_v38 = vpop.f32.mrb[30].mxu1 }
 0x125   : > { %1897 = vperm.xlu1 %16329, %v17056_v31   ;;  %v15020_v28 = vpop.f32.mrb[31].mxu1  ;;  %1486 = vst.msk [vmem:[#allocation2 + $0x70] sm:$0xff] %vm689_vm1, %v1445_v58  ;;  %v1446_v44 = vadd.f32 %v1405_v36, %v746_v3  ;;  %v17550_v31 = vpop.permute.xlu0 %1887  ;;  %v2020_v0 = vmul.f32 %v17508_v30, %v1693_v38  ;;  %v13405_v30 = vld [vmem:[%s20922_s5 + $0x8] sm:$0xff]  ;;  %v747_v36 = vld [vmem:[#allocation2 + $0x80] sm:$0xff] }
 0x126   : > { %v1858_v45 = vpop.permute.xlu1 %1857  ;;  %15301 = vmatprep.subr.mxu1 %v13405_v30 }
 0x127   : > { %v2016_v6 = vmul.f32 %v1858_v45, %v17475_v27  ;;  %15128 = vmatmul.mubr.msk.bf16.gmra.mrb[136].mxu0 %vm917_vm3, %v16506_v51  ;;  %1487 = vst.msk [vmem:[#allocation2 + $0x78] sm:$0xff] %vm689_vm1, %v1446_v44  ;;  %v17561_v27 = vld [vmem:[%s20919_s2 + $0xa8] sm:$0xff]  ;;  %15302 = vmatpush3.msra.mxu1 %v13405_v30  ;;  %v1574_v30 = vld [vmem:[%s20919_s2 + $0xa0] sm:$0xff] }
 0x128   : > { %15131 = vmatprep.mubr.msk.bf16.mxu0 %vm16536_vm2, %v20935_v7  ;;  %v1083_v49 = vpop.f32.mrb[32].mxu0  ;;  %3137 = vperm.xlu0 %16419, %v17561_v27  }
 0x129   : > { %v2057_v9 = vadd.f32 %v2016_v6, %v1524_v53  ;;  %16330 = vset.pattern.permute.xlu1 %v20937_v2  ;;  %15214 = vmatmul.mubr.msk.bf16.gmra.mrb[136].mxu1 %vm917_vm3, %v16506_v51  ;;  %v14937_v33 = vpop.f32.mrb[33].mxu0  ;;  %v1698_v63 = vpop.f32.mrb[32].mxu1 }
 0x12a   : > { %579 = vperm.xlu1 %16330, %v17125_v20   ;;  %15217 = vmatprep.mubr.msk.bf16.mxu1 %vm16536_vm2, %v20935_v7  ;;  %v17571_v20 = vld [vmem:[%s20921_s4] ss:$0 sm:$0xff]  ;;  %v1086_v41 = vpop.f32.mrb[34].mxu0  ;;  %v15023_v4 = vpop.f32.mrb[33].mxu1 }
 0x12b   : > { %2098 = vst.msk [vmem:[#allocation2 + $0x58] sm:$0xff] %vm689_vm1, %v2057_v9  ;;  %v540_v40 = vpop.permute.xlu1 %539  ;;  %v14938_v61 = vpop.f32.mrb[35].mxu0 }
 0x12c   : > { %v668_v42 = vmul.f32 %v17571_v20, %v540_v40  ;;  %v17577_v52 = vpop.f32.mrb[34].mxu1  ;;  %v17579_v35 = vpop.permute.xlu0 %1912  ;;  %3152 = vperm.xlu0 %16419, %v17279_v10   ;;  %v16509_v40 = vld [vmem:[%s16664_s28 + $0x78] sm:$0xff]  }
 0x12d   : > { %v15024_v60 = vpop.f32.mrb[35].mxu1 }
 0x12e   : > { %710 = vst.msk [vmem:[#allocation2 + $0xa0] sm:$0xff] %vm689_vm1, %v668_v42  ;;  %16331 = vset.pattern.permute.xlu1 %v20931_v12  ;;  %v1528_v50 = vld [vmem:[#allocation2 + $0x78] sm:$0xff]  ;;  %v2021_v42 = vmul.f32 %v17530_v55, %v1698_v63  ;;  %v748_v55 = vld [vmem:[#allocation2 + $0x88] sm:$0xff] }
 0x12f   : > { %1307 = vperm.xlu1 %16331, %v17279_v10   ;;  %15132 = vmatmul.mubr.msk.bf16.gmra.mrb[140].mxu0 %vm917_vm3, %v16508_v16  ;;  %v2061_v1 = vadd.f32 %v2020_v0, %v1528_v50 }
 0x130   : > { %v1268_v19 = vpop.permute.xlu1 %1267  ;;  %15135 = vmatprep.mubr.msk.bf16.mxu0 %vm16536_vm2, %v20935_v7  ;;  %v17591_v38 = vpop.f32.mrb[36].mxu0  ;;  %3157 = vperm.xlu0 %16419, %v17318_v56  }
 0x131   : > { %v1406_v58 = vmul.f32 %v1268_v19, %v1083_v49  ;;  %15218 = vmatmul.mubr.msk.bf16.gmra.mrb[140].mxu1 %vm917_vm3, %v16508_v16  ;;  %v17593_v29 = vpop.permute.xlu0 %1917  ;;  %2102 = vst.msk [vmem:[#allocation2 + $0x78] sm:$0xff] %vm689_vm1, %v2061_v1  ;;  %v14941_v3 = vpop.f32.mrb[37].mxu0  ;;  %v17612_v49 = vld [vmem:[%s20919_s2 + $0xd8] sm:$0xff] }
 0x132   : > { %15221 = vmatprep.mubr.msk.bf16.mxu1 %vm16536_vm2, %v20935_v7  ;;  %v17599_v45 = vpop.f32.mrb[36].mxu1  ;;  %v17602_v28 = vpop.f32.mrb[38].mxu0 }
 0x133   : > { %v1447_v10 = vadd.f32 %v1406_v58, %v747_v36  ;;  %16332 = vset.pattern.permute.xlu1 %v20937_v2  ;;  %v15027_v44 = vpop.f32.mrb[37].mxu1  ;;  %v14942_v51 = vpop.f32.mrb[39].mxu0 }
 0x134   : > { %584 = vperm.xlu1 %16332, %v17144_v5   ;;  %v17614_v59 = vpop.f32.mrb[38].mxu1  ;;  %v14129_v5 = vld [vmem:[%s16763_s27 + $0x10] sm:$0xff]   ;;  %3167 = vperm.xlu0 %16419, %v17612_v49  }
 0x135   : > { %1488 = vst.msk [vmem:[#allocation2 + $0x80] sm:$0xff] %vm689_vm1, %v1447_v10  ;;  %v545_v6 = vpop.permute.xlu1 %544  ;;  %v17607_v9 = vpop.permute.xlu0 %1942  ;;  %v14058_v4 = vunpack.c.l.bf16 %v14129_v5  ;;  %v14059_v16 = vunpack.c.h.bf16 %v14129_v5  ;;  %v751_v63 = vld [vmem:[#allocation2 + $0xa0] sm:$0xff] }
 0x136   : > { %v669_v53 = vmul.f32 %v17571_v20, %v545_v6  ;;  %20959 = vst [vmem:[#allocation6_spill] sm:$0xff] %v17607_v9  ;;  %v15028_v33 = vpop.f32.mrb[39].mxu1  ;;  %v429_v9 = vld [vmem:[%s20919_s2 + $0x110] sm:$0xff] }
 0x137   : > { %15136 = vmatmul.mubr.msk.bf16.gmra.mrb[144].mxu0 %vm917_vm3, %v16509_v40 }
 0x138   : > { %711 = vst.msk [vmem:[#allocation2 + $0xa8] sm:$0xff] %vm689_vm1, %v669_v53  ;;  %16333 = vset.pattern.permute.xlu1 %v20931_v12  ;;  %15139 = vmatprep.mubr.msk.bf16.mxu0 %vm16536_vm2, %v20935_v7  ;;  %v1099_v61 = vpop.f32.mrb[40].mxu0  ;;  %v16335_v53 = vpack.i.bf16 %v14059_v16, %v14058_v4 }
 0x139   : > { %1312 = vperm.xlu1 %16333, %v17318_v56   ;;  %15222 = vmatmul.mubr.msk.bf16.gmra.mrb[144].mxu1 %vm917_vm3, %v16509_v40  ;;  %v1410_v50 = vmul.f32 %v17300_v34, %v1099_v61  ;;  %v14945_v19 = vpop.f32.mrb[41].mxu0  ;;  %v17631_v1 = vpop.permute.xlu0 %1947  ;;  %v17636_v56 = vld [vmem:[%s20919_s2 + $0xe0] sm:$0xff] }
 0x13a   : > { %v1273_v0 = vpop.permute.xlu1 %1272  ;;  %20960 = vst [vmem:[#allocation7_spill] sm:$0xff] %v17631_v1  ;;  %15225 = vmatprep.mubr.msk.bf16.mxu1 %vm16536_vm2, %v20935_v7  ;;  %v1102_v58 = vpop.f32.mrb[42].mxu0  ;;  %3172 = vperm.xlu0 %16419, %v17636_v56  }
 0x13b   : > { %v1407_v60 = vmul.f32 %v1273_v0, %v1086_v41  ;;  %v17640_v34 = vpop.f32.mrb[40].mxu1  ;;  %v1451_v10 = vadd.f32 %v1410_v50, %v751_v63  ;;  %v1411_v44 = vmul.f32 %v17311_v15, %v1102_v58  ;;  %v14946_v51 = vpop.f32.mrb[43].mxu0  ;;  %v16510_v0 = vld [vmem:[%s16664_s28 + $0x80] sm:$0xff]   ;;  %v17657_v15 = vld [vmem:[%s20919_s2 + $0xe8] sm:$0xff] }
 0x13c   : > { %v1529_v41 = vld [vmem:[#allocation2 + $0x80] sm:$0xff]  ;;  %v15031_v6 = vpop.f32.mrb[41].mxu1 }
 0x13d   : > { %v1448_v36 = vadd.f32 %v1407_v60, %v748_v55  ;;  %v2062_v3 = vadd.f32 %v2021_v42, %v1529_v41  ;;  %16334 = vset.pattern.permute.xlu1 %v20927_v23  ;;  %v17645_v5 = vpop.f32.mrb[42].mxu1  ;;  %1492 = vst.msk [vmem:[#allocation2 + $0xa0] sm:$0xff] %vm689_vm1, %v1451_v10  ;;  %v17650_v42 = vpop.permute.xlu0 %16386  ;;  %v1525_v60 = vld [vmem:[#allocation2 + $0x60] sm:$0xff]  ;;  %v2022_v55 = vmul.f32 %v17550_v31, %v17577_v52  ;;  %v1526_v10 = vld [vmem:[#allocation2 + $0x68] sm:$0xff] }
 0x13e   : > { %1902 = vperm.xlu1 %16334, %v1574_v30   ;;  %v15032_v16 = vpop.f32.mrb[43].mxu1  ;;  %3177 = vperm.xlu0 %16419, %v17657_v15  }
 0x13f   : > { %1489 = vst.msk [vmem:[#allocation2 + $0x88] sm:$0xff] %vm689_vm1, %v1448_v36  ;;  %2103 = vst.msk [vmem:[#allocation2 + $0x80] sm:$0xff] %vm689_vm1, %v2062_v3  ;;  %v752_v40 = vld [vmem:[#allocation2 + $0xa8] sm:$0xff]  ;;  %v1863_v33 = vpop.permute.xlu1 %1862  ;;  %15140 = vmatmul.mubr.msk.bf16.gmra.mrb[148].mxu0 %vm917_vm3, %v16510_v0 }
 0x140   : > { %v1452_v61 = vadd.f32 %v1411_v44, %v752_v40  ;;  %v2017_v4 = vmul.f32 %v1863_v33, %v17498_v46  ;;  %15143 = vmatprep.mubr.msk.bf16.mxu0 %vm16536_vm2, %v20935_v7  ;;  %v17664_v19 = vpop.f32.mrb[44].mxu0  ;;  %v14141_v46 = vld [vmem:[%s16763_s27 + $0x70] sm:$0xff]  }
 0x141   : > { %v17669_v63 = vpop.permute.xlu0 %1962  ;;  %15226 = vmatmul.mubr.msk.bf16.gmra.mrb[148].mxu1 %vm917_vm3, %v16510_v0  ;;  %v17675_v58 = vpop.f32.mrb[44].mxu1  ;;  %v16511_v0 = vld [vmem:[%s16664_s28 + $0x88] sm:$0xff]  }
 0x142   : > { %1493 = vst.msk [vmem:[#allocation2 + $0xa8] sm:$0xff] %vm689_vm1, %v1452_v61  ;;  %v2058_v50 = vadd.f32 %v2017_v4, %v1525_v60  ;;  %16336 = vrot.lane.b32.xlu1 %v16335_v53, %s16539_s21  ;;  %20961 = vst [vmem:[#allocation8_spill] sm:$0xff] %v17669_v63  ;;  %v14949_v36 = vpop.f32.mrb[45].mxu0  ;;  %15229 = vmatprep.mubr.msk.bf16.mxu1 %vm16536_vm2, %v20935_v7  ;;  %v15035_v3 = vpop.f32.mrb[45].mxu1  ;;  %v14107_v53 = vunpack.c.h.bf16 %v14141_v46  ;;  %v17692_v4 = vld [vmem:[%s20919_s2 + $0x108] sm:$0xff]  ;;  %v17701_v60 = vld [vmem:[%s20919_s2 + $0xf0] sm:$0xff] }
 0x143   : > { %v1868_v30 = vpop.permute.xlu1 %1867  ;;  %v17679_v31 = vpop.f32.mrb[46].mxu0  ;;  %3187 = vperm.xlu0 %16419, %v17349_v17  }
 0x144   : > { %2099 = vst.msk [vmem:[#allocation2 + $0x60] sm:$0xff] %vm689_vm1, %v2058_v50  ;;  %v2018_v41 = vmul.f32 %v1868_v30, %v17506_v54  ;;  %v17682_v6 = vpop.f32.mrb[46].mxu1  ;;  %v14950_v51 = vpop.f32.mrb[47].mxu0  ;;  %v14106_v54 = vunpack.c.l.bf16 %v14141_v46 }
 0x145   : > { %v17685_v33 = vpop.permute.xlu0 %1967  ;;  %v15036_v61 = vpop.f32.mrb[47].mxu1 }
 0x146   : > { %v2059_v52 = vadd.f32 %v2018_v41, %v1526_v10  ;;  %v1530_v44 = vld [vmem:[#allocation2 + $0x88] sm:$0xff]  ;;  %1907 = vperm.xlu1 %16334, %v17561_v27   ;;  %20962 = vst [vmem:[#allocation9_spill] sm:$0xff] %v17685_v33  ;;  %v14142_v27 = vld [vmem:[%s16763_s27 + $0x78] sm:$0xff]   ;;  %v16431_v30 = vpack.i.bf16 %v14107_v53, %v14106_v54 }
 0x147   : > { %v2063_v40 = vadd.f32 %v2022_v55, %v1530_v44  ;;  %15144 = vmatmul.mubr.msk.bf16.gmra.mrb[152].mxu0 %vm917_vm3, %v16511_v0  ;;  %3197 = vperm.xlu0 %16419, %v17692_v4   ;;  %v14110_v55 = vunpack.c.l.bf16 %v14142_v27  ;;  %v14111_v46 = vunpack.c.h.bf16 %v14142_v27  ;;  %v14144_v10 = vld [vmem:[%s16763_s27 + $0x88] sm:$0xff]  }
 0x148   : > { %2100 = vst.msk [vmem:[#allocation2 + $0x68] sm:$0xff] %vm689_vm1, %v2059_v52  ;;  %v17696_v16 = vpop.permute.xlu1 %3047  ;;  %15147 = vmatprep.mubr.msk.bf16.mxu0 %vm16536_vm2, %v20935_v7  ;;  %v17707_v50 = vpop.f32.mrb[48].mxu0  ;;  %v14118_v27 = vunpack.c.l.bf16 %v14144_v10  ;;  %v14119_v23 = vunpack.c.h.bf16 %v14144_v10 }
 0x149   : > { %2104 = vst.msk [vmem:[#allocation2 + $0x88] sm:$0xff] %vm689_vm1, %v2063_v40  ;;  %v17711_v41 = vpop.permute.xlu0 %2447  ;;  %v17713_v36 = vpop.f32.mrb[48].mxu1  ;;  %15230 = vmatmul.mubr.msk.bf16.gmra.mrb[152].mxu1 %vm917_vm3, %v16511_v0  ;;  %v16436_v61 = vpack.i.bf16 %v14111_v46, %v14110_v55  ;;  %v749_v0 = vld [vmem:[#allocation2 + $0x90] sm:$0xff] }
 0x14a   : > { %16340 = vset.pattern.permute.xlu1 %v20937_v2  ;;  %20963 = vst [vmem:[#allocation10_spill] sm:$0xff] %v17713_v36  ;;  %v14953_v3 = vpop.f32.mrb[49].mxu0  ;;  %v15039_v52 = vpop.f32.mrb[49].mxu1  ;;  %15233 = vmatprep.mubr.msk.bf16.mxu1 %vm16536_vm2, %v20935_v7  ;;  %v757_v55 = vld [vmem:[#allocation2 + $0xd0] sm:$0xff]  ;;  %v16446_v10 = vpack.i.bf16 %v14119_v23, %v14118_v27 }
 0x14b   : > { %589 = vperm.xlu1 %16340, %v17701_v60   ;;  %v17719_v51 = vpop.f32.mrb[50].mxu0  ;;  %v17722_v53 = vpop.f32.mrb[50].mxu1  ;;  %16432 = vrot.lane.b32.xlu0 %v16431_v30, %s16539_s21 }
 0x14c   : > { %20964 = vst [vmem:[#allocation11_spill] sm:$0xff] %v17722_v53  ;;  %v14954_v40 = vpop.f32.mrb[51].mxu0  ;;  %v15040_v52 = vpop.f32.mrb[51].mxu1  ;;  %16452 = vset.pattern.permute.xlu0 %v20931_v12  ;;  %v16513_v12 = vld [vmem:[%s16664_s28 + $0x98] sm:$0xff]  }
 0x14d   : > { %v1278_v44 = vpop.permute.xlu1 %1277  ;;  %v17726_v3 = vpop.permute.xlu0 %2452 }
 0x14e   : > { %v1408_v54 = vmul.f32 %v1278_v44, %v17591_v38  ;;  %v16512_v38 = vld [vmem:[%s16664_s28 + $0x90] sm:$0xff]  }
 0x14f   : > { %16341 = vset.pattern.permute.xlu1 %v20933_v47  ;;  %15148 = vmatmul.mubr.msk.bf16.gmra.mrb[156].mxu0 %vm917_vm3, %v16512_v38 }
 0x150   : > { %v1449_v62 = vadd.f32 %v1408_v54, %v749_v0  ;;  %2497 = vperm.xlu1 %16341, %v17513_v32   ;;  %15151 = vmatprep.mubr.msk.bf16.mxu0 %vm16536_vm2, %v20935_v7  ;;  %v1123_v46 = vpop.f32.mrb[52].mxu0 }
 0x151   : > { %16437 = vrot.lane.b32.xlu0 %v16436_v61, %s16539_s21  ;;  %v17738_v44 = vpop.permute.xlu0 %2462  ;;  %v1416_v54 = vmul.f32 %v17330_v25, %v1123_v46  ;;  %v17741_v32 = vpop.f32.mrb[52].mxu1  ;;  %15234 = vmatmul.mubr.msk.bf16.gmra.mrb[156].mxu1 %vm917_vm3, %v16512_v38 }
 0x152   : > { %1490 = vst.msk [vmem:[#allocation2 + $0x90] sm:$0xff] %vm689_vm1, %v1449_v62  ;;  %v17735_v30 = vpop.permute.xlu1 %2457  ;;  %20965 = vst [vmem:[#allocation12_spill] sm:$0xff] %v17741_v32  ;;  %v14957_v40 = vpop.f32.mrb[53].mxu0  ;;  %15237 = vmatprep.mubr.msk.bf16.mxu1 %vm16536_vm2, %v20935_v7  ;;  %v758_v62 = vld [vmem:[#allocation2 + $0xd8] sm:$0xff] }
 0x153   : > { %v15043_v0 = vpop.f32.mrb[53].mxu1  ;;  %v1457_v23 = vadd.f32 %v1416_v54, %v757_v55  ;;  %v1126_v61 = vpop.f32.mrb[54].mxu0  ;;  %v14130_v54 = vld [vmem:[%s16763_s27 + $0x18] sm:$0xff]  }
 0x154   : > { %16342 = vset.pattern.permute.xlu1 %v20937_v2  ;;  %v17748_v27 = vpop.f32.mrb[54].mxu1  ;;  %v1417_v25 = vmul.f32 %v17341_v14, %v1126_v61  ;;  %v14958_v52 = vpop.f32.mrb[55].mxu0  ;;  %v750_v14 = vld [vmem:[#allocation2 + $0x98] sm:$0xff]  ;;  %v14063_v61 = vunpack.c.h.bf16 %v14130_v54 }
 0x155   : > { %594 = vperm.xlu1 %16342, %v17349_v17   ;;  %20966 = vst [vmem:[#allocation13_spill] sm:$0xff] %v17748_v27  ;;  %v15044_v38 = vpop.f32.mrb[55].mxu1  ;;  %16447 = vrot.lane.b32.xlu0 %v16446_v10, %s16539_s21  ;;  %v17752_v40 = vpop.permute.xlu0 %2482  ;;  %1498 = vst.msk [vmem:[#allocation2 + $0xd0] sm:$0xff] %vm689_vm1, %v1457_v23  ;;  %v808_v17 = vld [vmem:[%s20919_s2 + $0x120] sm:$0xff] }
 0x156   : > { %v1458_v0 = vadd.f32 %v1417_v25, %v758_v62 }
 0x157   : > { %v1283_v46 = vpop.permute.xlu1 %1282  ;;  %15152 = vmatmul.mubr.msk.bf16.gmra.mrb[160].mxu0 %vm917_vm3, %v16513_v12 }
 0x158   : > { %v1409_v55 = vmul.f32 %v1283_v46, %v17602_v28  ;;  %15155 = vmatprep.mubr.msk.bf16.mxu0 %vm16536_vm2, %v20935_v7  ;;  %1499 = vst.msk [vmem:[#allocation2 + $0xd8] sm:$0xff] %vm689_vm1, %v1458_v0  ;;  %v17767_v23 = vpop.f32.mrb[56].mxu0  ;;  %v14062_v28 = vunpack.c.l.bf16 %v14130_v54  ;;  %v1527_v54 = vld [vmem:[#allocation2 + $0x70] sm:$0xff]  ;;  %v20970_v0 = vmov 3  }
 0x159   : > { %16343 = vset.pattern.permute.xlu1 %v20933_v47  ;;  %20967 = vst [vmem:[#allocation14_spill] sm:$0xff] %v17767_v23  ;;  %1367 = vperm.xlu0 %16452, %v808_v17   ;;  %v17769_v62 = vpop.permute.xlu0 %2487  ;;  %v17771_v25 = vpop.f32.mrb[56].mxu1 }
 0x15a   : > { %v1450_v10 = vadd.f32 %v1409_v55, %v750_v14  ;;  %2502 = vperm.xlu1 %16343, %v17535_v11   ;;  %20968 = vst [vmem:[#allocation15_spill] sm:$0xff] %v17771_v25  ;;  %15238 = vmatmul.mubr.msk.bf16.gmra.mrb[160].mxu1 %vm917_vm3, %v16513_v12  ;;  %v14961_v38 = vpop.f32.mrb[57].mxu0  ;;  %v15047_v46 = vpop.f32.mrb[57].mxu1 }
 0x15b   : > { %15241 = vmatprep.mubr.msk.bf16.mxu1 %vm16536_vm2, %v20935_v7  ;;  %v17778_v55 = vpop.f32.mrb[58].mxu0  ;;  %v17781_v14 = vpop.f32.mrb[58].mxu1  ;;  %v16514_v7 = vld [vmem:[%s16664_s28 + $0xa0] ss:$0 sps:$4 sm:$0xff]   ;;  %s16254_s28 = smul.u32 288, %s21090_s10 }
 0x15c   : > { %1491 = vst.msk [vmem:[#allocation2 + $0x98] sm:$0xff] %vm689_vm1, %v1450_v10  ;;  %v1873_v52 = vpop.permute.xlu1 %1872  ;;  %20969 = vst [vmem:[#allocation16_spill] sm:$0xff] %v17778_v55  ;;  %v14962_v47 = vpop.f32.mrb[59].mxu0  ;;  %v16345_v10 = vpack.i.bf16 %v14063_v61, %v14062_v28  ;;  %v2797_v28 = vld [vmem:[%s20919_s2 + $0x68] sm:$0xff] }
 0x15d   : > { %v2019_v11 = vmul.f32 %v1873_v52, %v17538_v18  ;;  %20971 = vst [vmem:[#allocation17_spill] sm:$0xff] %v17781_v14  ;;  %16455 = vset.pattern.permute.xlu0 %v20970_v0  ;;  %v15048_v38 = vpop.f32.mrb[59].mxu1  ;;  %v433_v52 = vld [vmem:[%s20919_s2 + $0x130] sm:$0xff]  ;;  %v17793_v47 = vpop.permute.xlu0 %2492  ;;  %s20708_s18 = scalar_lea.vmem %s20926_s9, %s16254_s28 }
 0x15e   : > { %16344 = vset.pattern.permute.xlu1 %v20970_v0  ;;  %3212 = vperm.xlu0 %16455, %v808_v17  }
 0x15f   : > { %v2060_v12 = vadd.f32 %v2019_v11, %v1527_v54  ;;  %3092 = vperm.xlu1 %16344, %v17440_v22   ;;  %15156 = vmatmul.mubr.msk.bf16.gmra.mrb[164].mxu0 %vm917_vm3, %v16514_v7 }
 0x161   : > { %2101 = vst.msk [vmem:[#allocation2 + $0x70] sm:$0xff] %vm689_vm1, %v2060_v12  ;;  %v17788_v18 = vpop.permute.xlu1 %3052  ;;  %v17795_v46 = vpop.f32.mrb[60].mxu0 }
 0x162   : > { %20972 = vst [vmem:[#allocation18_spill] sm:$0xff] %v17795_v46  ;;  %v17798_v22 = vpop.f32.mrb[60].mxu1  ;;  %v14965_v17 = vpop.f32.mrb[61].mxu0  ;;  %16457 = vset.pattern.permute.xlu0 %v20937_v2  ;;  %15242 = vmatmul.mubr.msk.bf16.gmra.mrb[164].mxu1 %vm917_vm3, %v16514_v7  ;;  %v14145_v2 = vld [vmem:[%s16763_s27 + $0x90] sm:$0xff]  }
 0x163   : > { %16346 = vrot.lane.b32.xlu1 %v16345_v10, %s16539_s21  ;;  %20973 = vst [vmem:[#allocation19_spill] sm:$0xff] %v17798_v22  ;;  %v15051_v61 = vpop.f32.mrb[61].mxu1  ;;  %v17804_v11 = vpop.f32.mrb[62].mxu0  ;;  %629 = vperm.xlu0 %16457, %v433_v52   ;;  %v1591_v17 = vld [vmem:[%s20919_s2 + $0x128] sm:$0xff]  ;;  %v14146_v22 = vld [vmem:[%s16763_s27 + $0x98] sm:$0xff]   ;;  %v14123_v27 = vunpack.c.h.bf16 %v14145_v2  ;;  %v17835_v2 = vld [vmem:[%s20919_s2 + $0x90] sm:$0xff] }
 0x164   : > { %20974 = vst [vmem:[#allocation20_spill] sm:$0xff] %v17804_v11  ;;  %v17809_v12 = vpop.f32.mrb[62].mxu1  ;;  %v14966_v10 = vpop.f32.mrb[63].mxu0  ;;  %v20976_v61 = vmov 1   ;;  %v14126_v32 = vunpack.c.l.bf16 %v14146_v22 }
 0x165   : > { %v17807_v54 = vpop.permute.xlu1 %3057  ;;  %20975 = vst [vmem:[#allocation21_spill] sm:$0xff] %v17809_v12  ;;  %v15052_v38 = vpop.f32.mrb[63].mxu1 }
 0x166   : > { %v17816_v33 = vpop.permute.xlu0 %2512  ;;  %v20978_v38 = vmov 0  }
 0x167   : > { %3097 = vperm.xlu1 %16344, %v2797_v28   ;;  %16459 = vset.pattern.permute.xlu0 %v20976_v61 }
 0x168   : > { %1987 = vperm.xlu0 %16459, %v1591_v17  }
 0x169   : > { %v17819_v7 = vpop.f32.mrb[64].mxu0 }
 0x16a   : > { %v560_v63 = vpop.permute.xlu1 %559  ;;  %20977 = vst [vmem:[#allocation22_spill] sm:$0xff] %v17819_v7  ;;  %v17823_v12 = vpop.f32.mrb[64].mxu1  ;;  %v20982_v7 = vmov 2  }
 0x16b   : > { %v672_v10 = vmul.f32 %v17571_v20, %v560_v63  ;;  %16350 = vset.pattern.permute.xlu1 %v20978_v38  ;;  %20979 = vst [vmem:[#allocation23_spill] sm:$0xff] %v17823_v12  ;;  %v14969_v11 = vpop.f32.mrb[65].mxu0  ;;  %v15055_v28 = vpop.f32.mrb[65].mxu1 }
 0x16c   : > { %1327 = vperm.xlu1 %16350, %v17636_v56   ;;  %v17826_v24 = vpop.f32.mrb[66].mxu0  ;;  %v17829_v17 = vpop.f32.mrb[66].mxu1  ;;  %16462 = vset.pattern.permute.xlu0 %v20982_v7  ;;  %v16464_v56 = vpack.i.bf16 %v14126_v32, %v14123_v27  ;;  %v435_v32 = vld [vmem:[%s20919_s2 + $0x140] sm:$0xff] }
 0x16d   : > { %20980 = vst [vmem:[#allocation24_spill] sm:$0xff] %v17826_v24  ;;  %714 = vst.msk [vmem:[#allocation2 + $0xc0] sm:$0xff] %vm689_vm1, %v672_v10  ;;  %v14970_v46 = vpop.f32.mrb[67].mxu0  ;;  %v15056_v63 = vpop.f32.mrb[67].mxu1  ;;  %2607 = vperm.xlu0 %16462, %v433_v52  }
 0x16e   : > { %20981 = vst [vmem:[#allocation25_spill] sm:$0xff] %v17829_v17  ;;  %v17837_v22 = vpop.permute.xlu0 %2517  ;;  %v20987_v63 = vmov 4  }
 0x16f   : > { %20983 = vst [vmem:[#allocation26_spill] sm:$0xff] %v17837_v22  ;;  %v17839_v11 = vpop.permute.xlu1 %2467 }
 0x170   : > { %16351 = vset.pattern.permute.xlu1 %v20982_v7 }
 0x171   : > { %2507 = vperm.xlu1 %16351, %v17835_v2   ;;  %v17843_v10 = vpop.f32.mrb[68].mxu0  ;;  %16465 = vrot.lane.b32.xlu0 %v16464_v56, %s16539_s21 }
 0x172   : > { %20984 = vst [vmem:[#allocation27_spill] sm:$0xff] %v17843_v10  ;;  %v17845_v46 = vpop.permute.xlu0 %2522  ;;  %v17848_v28 = vpop.f32.mrb[68].mxu1  ;;  %16470 = vset.pattern.permute.xlu0 %v20987_v63 }
 0x173   : > { %20985 = vst [vmem:[#allocation28_spill] sm:$0xff] %v17845_v46  ;;  %20986 = vst [vmem:[#allocation29_spill] sm:$0xff] %v17848_v28  ;;  %v14973_v17 = vpop.f32.mrb[69].mxu0  ;;  %v15059_v52 = vpop.f32.mrb[69].mxu1  ;;  %v17865_v28 = vld [vmem:[%s20919_s2 + $0xc0] sm:$0xff] }
 0x174   : > { %v565_v27 = vpop.permute.xlu1 %564  ;;  %v17856_v24 = vpop.f32.mrb[70].mxu0 }
 0x175   : > { %v673_v12 = vmul.f32 %v17571_v20, %v565_v27  ;;  %16353 = vset.pattern.permute.xlu1 %v20978_v38  ;;  %20988 = vst [vmem:[#allocation30_spill] sm:$0xff] %v17856_v24  ;;  %v17858_v10 = vpop.f32.mrb[70].mxu1  ;;  %v14974_v56 = vpop.f32.mrb[71].mxu0  ;;  %639 = vperm.xlu0 %16470, %v435_v32   ;;  %v1593_v27 = vld [vmem:[%s20919_s2 + $0x138] sm:$0xff]  ;;  %v2798_v24 = vld [vmem:[%s20919_s2 + $0x70] sm:$0xff] }
 0x176   : > { %20989 = vst [vmem:[#allocation31_spill] sm:$0xff] %v17858_v10  ;;  %1332 = vperm.xlu1 %16353, %v17657_v15   ;;  %v15060_v17 = vpop.f32.mrb[71].mxu1  ;;  %v17875_v15 = vpop.permute.xlu0 %2527 }
 0x177   : > { %715 = vst.msk [vmem:[#allocation2 + $0xc8] sm:$0xff] %vm689_vm1, %v673_v12  ;;  %20991 = vst [vmem:[#allocation33_spill] sm:$0xff] %v17875_v15 }
 0x179   : > { %v17870_v52 = vpop.permute.xlu1 %2472  ;;  %v17873_v10 = vpop.f32.mrb[72].mxu0  ;;  %16472 = vset.pattern.permute.xlu0 %v20976_v61 }
 0x17a   : > { %16354 = vset.pattern.permute.xlu1 %v20976_v61  ;;  %20990 = vst [vmem:[#allocation32_spill] sm:$0xff] %v17873_v10  ;;  %v17879_v12 = vpop.f32.mrb[72].mxu1  ;;  %v14977_v32 = vpop.f32.mrb[73].mxu0  ;;  %1997 = vperm.xlu0 %16472, %v1593_v27  }
 0x17b   : > { %1922 = vperm.xlu1 %16354, %v17865_v28   ;;  %20992 = vst [vmem:[#allocation34_spill] sm:$0xff] %v17879_v12  ;;  %v15063_v56 = vpop.f32.mrb[73].mxu1  ;;  %v17881_v17 = vpop.f32.mrb[74].mxu0 }
 0x17c   : > { %20993 = vst [vmem:[#allocation35_spill] sm:$0xff] %v17881_v17  ;;  %v17886_v53 = vpop.f32.mrb[74].mxu1  ;;  %v14978_v1 = vpop.f32.mrb[75].mxu0  ;;  %v1579_v56 = vld [vmem:[%s20919_s2 + $0xc8] sm:$0xff] }
 0x17d   : > { %20994 = vst [vmem:[#allocation36_spill] sm:$0xff] %v17886_v53  ;;  %v15064_v10 = vpop.f32.mrb[75].mxu1  ;;  %v17892_v32 = vpop.permute.xlu0 %2542 }
 0x17e   : > { %v17888_v14 = vpop.permute.xlu1 %3062  ;;  %16475 = vset.pattern.permute.xlu0 %v20982_v7  ;;  %20995 = vst [vmem:[#allocation37_spill] sm:$0xff] %v17892_v32 }
 0x17f   : > { %16355 = vset.pattern.permute.xlu1 %v20970_v0 }
 0x180   : > { %3102 = vperm.xlu1 %16355, %v2798_v24  }
 0x181   : > { %v17899_v17 = vpop.f32.mrb[76].mxu0 }
 0x182   : > { %v17894_v27 = vpop.permute.xlu1 %16315  ;;  %20996 = vst [vmem:[#allocation38_spill] sm:$0xff] %v17899_v17  ;;  %v17901_v12 = vpop.f32.mrb[76].mxu1 }
 0x183   : > { %20997 = vst [vmem:[#allocation39_spill] sm:$0xff] %v17901_v12  ;;  %v14981_v1 = vpop.f32.mrb[77].mxu0  ;;  %v15067_v10 = vpop.f32.mrb[77].mxu1 }
 0x184   : > { %16361 = vset.pattern.permute.xlu1 %v20976_v61  ;;  %v17904_v53 = vpop.f32.mrb[78].mxu0  ;;  %v17906_v24 = vpop.f32.mrb[78].mxu1  ;;  %v753_v10 = vld [vmem:[#allocation2 + $0xb0] sm:$0xff] }
 0x185   : > { %20998 = vst [vmem:[#allocation40_spill] sm:$0xff] %v17904_v53  ;;  %1927 = vperm.xlu1 %16361, %v1579_v56   ;;  %20999 = vst [vmem:[#allocation41_spill] sm:$0xff] %v17906_v24  ;;  %v14982_v32 = vpop.f32.mrb[79].mxu0  ;;  %v15068_v55 = vpop.f32.mrb[79].mxu1 }
 0x186   : > { %v17908_v36 = vpop.permute.xlu1 %3067  ;;  %v17916_v12 = vpop.permute.xlu0 %2557 }
 0x187   : > { %21001 = vst [vmem:[#allocation43_spill] sm:$0xff] %v17916_v12 }
 0x189   : > { %16362 = vset.pattern.permute.xlu1 %v20987_v63  ;;  %v17914_v1 = vpop.f32.mrb[80].mxu0 }
 0x18a   : > { %609 = vperm.xlu1 %16362, %v429_v9   ;;  %21000 = vst [vmem:[#allocation42_spill] sm:$0xff] %v17914_v1  ;;  %v17918_v56 = vpop.f32.mrb[80].mxu1  ;;  %v14985_v24 = vpop.f32.mrb[81].mxu0 }
 0x18b   : > { %v1298_v53 = vpop.permute.xlu1 %1297  ;;  %21002 = vst [vmem:[#allocation44_spill] sm:$0xff] %v17918_v56  ;;  %v15071_v17 = vpop.f32.mrb[81].mxu1 }
 0x18c   : > { %v1412_v32 = vmul.f32 %v1298_v53, %v17664_v19  ;;  %v1182_v55 = vpop.f32.mrb[82].mxu0  ;;  %v1797_v25 = vpop.f32.mrb[82].mxu1  ;;  %v2027_v17 = vmul.f32 %v17579_v35, %v17675_v58 }
 0x18d   : > { %v14986_v15 = vpop.f32.mrb[83].mxu0  ;;  %v15072_v46 = vpop.f32.mrb[83].mxu1 }
 0x18e   : > { %v1453_v23 = vadd.f32 %v1412_v32, %v753_v10  ;;  %16363 = vset.pattern.permute.xlu1 %v20978_v38  ;;  %v17926_v1 = vpop.permute.xlu0 %2572  ;;  %v2128_v15 = vld [vmem:[#allocation2] sm:$0xff]  ;;  %v2129_v32 = vld [vmem:[#allocation2 + $0x8] sm:$0xff] }
 0x18f   : > { %1337 = vperm.xlu1 %16363, %v17701_v60   ;;  %21003 = vst [vmem:[#allocation45_spill] sm:$0xff] %v17926_v1  ;;  %v16515_v60 = vld [vmem:[%s20919_s2 + $0x118] sm:$0xff] }
 0x190   : > { %1494 = vst.msk [vmem:[#allocation2 + $0xb0] sm:$0xff] %vm689_vm1, %v1453_v23  ;;  %v17924_v9 = vpop.permute.xlu1 %2477 }
 0x191   : > { %v2249_v56 = vpop.f32.mrb[84].mxu0 }
 0x192   : > { %v2620_v19 = vmul.f32 %v17255_v21, %v2249_v56  ;;  %v2864_v53 = vpop.f32.mrb[84].mxu1  ;;  %v15077_v25 = vpop.f32.mrb[85].mxu0 }
 0x193   : > { %16364 = vset.pattern.permute.xlu1 %v20987_v63  ;;  %v2252_v23 = vpop.f32.mrb[86].mxu0  ;;  %v15163_v46 = vpop.f32.mrb[85].mxu1  ;;  %v754_v63 = vld [vmem:[#allocation2 + $0xb8] sm:$0xff] }
 0x194   : > { %614 = vperm.xlu1 %16364, %v16515_v60   ;;  %v2661_v24 = vadd.f32 %v2620_v19, %v2128_v15  ;;  %v2621_v10 = vmul.f32 %v17288_v13, %v2252_v23  ;;  %v2867_v56 = vpop.f32.mrb[86].mxu1  ;;  %v15078_v25 = vpop.f32.mrb[87].mxu0  ;;  %v14132_v60 = vld [vmem:[%s16763_s27 + $0x28] sm:$0xff]   ;;  %v16516_v13 = vld [vmem:[%s20919_s2 + $0xf8] sm:$0xff] }
 0x195   : > { %v1303_v21 = vpop.permute.xlu1 %1302  ;;  %v15164_v1 = vpop.f32.mrb[87].mxu1  ;;  %v14070_v19 = vunpack.c.l.bf16 %v14132_v60  ;;  %v14071_v15 = vunpack.c.h.bf16 %v14132_v60  ;;  %v3235_v25 = vmul.f32 %v17523_v8, %v2864_v53 }
 0x196   : > { %v1413_v55 = vmul.f32 %v1303_v21, %v17679_v31  ;;  %2702 = vst.msk [vmem:[#allocation2] sm:$0xff] %vm689_vm1, %v2661_v24  ;;  %v2662_v58 = vadd.f32 %v2621_v10, %v2129_v32  ;;  %v17938_v12 = vpop.permute.xlu0 %2592  ;;  %v17953_v10 = vld [vmem:[%s20919_s2 + $0xd0] sm:$0xff] }
 0x197   : > { %v1535_v35 = vld [vmem:[#allocation2 + $0xb0] sm:$0xff]  ;;  %21004 = vst [vmem:[#allocation46_spill] sm:$0xff] %v17938_v12  ;;  %v16367_v12 = vpack.i.bf16 %v14071_v15, %v14070_v19  ;;  %v16318_v19 = vunpack.i.h.bf16 %v17894_v27 }
 0x198   : > { %v2068_v22 = vadd.f32 %v2027_v17, %v1535_v35  ;;  %v1454_v46 = vadd.f32 %v1413_v55, %v754_v63  ;;  %16365 = vset.pattern.permute.xlu1 %v20978_v38  ;;  %2703 = vst.msk [vmem:[#allocation2 + $0x8] sm:$0xff] %vm689_vm1, %v2662_v58  ;;  %v1531_v21 = vld [vmem:[#allocation2 + $0x90] sm:$0xff] }
 0x199   : > { %1342 = vperm.xlu1 %16365, %v16516_v13   ;;  %v2257_v1 = vpop.f32.mrb[88].mxu0  ;;  %v2130_v32 = vld [vmem:[#allocation2 + $0x10] sm:$0xff] }
 0x19a   : > { %2109 = vst.msk [vmem:[#allocation2 + $0xb0] sm:$0xff] %vm689_vm1, %v2068_v22  ;;  %1495 = vst.msk [vmem:[#allocation2 + $0xb8] sm:$0xff] %vm689_vm1, %v1454_v46  ;;  %v1893_v31 = vpop.permute.xlu1 %1892  ;;  %v2622_v63 = vmul.f32 %v17352_v48, %v2257_v1  ;;  %v2872_v23 = vpop.f32.mrb[88].mxu1  ;;  %v2028_v46 = vmul.f32 %v17593_v29, %v17682_v6 }
 0x19b   : > { %v2023_v17 = vmul.f32 %v1893_v31, %v17599_v45  ;;  %v15081_v24 = vpop.f32.mrb[89].mxu0  ;;  %v15167_v22 = vpop.f32.mrb[89].mxu1  ;;  %v2131_v31 = vld [vmem:[#allocation2 + $0x18] sm:$0xff] }
 0x19c   : > { %v2260_v55 = vpop.f32.mrb[90].mxu0  ;;  %v2663_v58 = vadd.f32 %v2622_v63, %v2130_v32  ;;  %v2875_v45 = vpop.f32.mrb[90].mxu1 }
 0x19d   : > { %v2064_v35 = vadd.f32 %v2023_v17, %v1531_v21  ;;  %v2623_v60 = vmul.f32 %v17396_v57, %v2260_v55  ;;  %16366 = vset.pattern.permute.xlu1 %v20976_v61  ;;  %v3038_v48 = vpop.permute.xlu0 %3037  ;;  %v2743_v13 = vld [vmem:[#allocation2] sm:$0xff]  ;;  %v15082_v24 = vpop.f32.mrb[91].mxu0  ;;  %v16317_v17 = vunpack.i.l.bf16 %v17894_v27 }
 0x19e   : > { %v3236_v1 = vmul.f32 %v3038_v48, %v2867_v56  ;;  %1932 = vperm.xlu1 %16366, %v17953_v10   ;;  %v15168_v22 = vpop.f32.mrb[91].mxu1  ;;  %v3276_v8 = vadd.f32 %v3235_v25, %v2743_v13  ;;  %2704 = vst.msk [vmem:[#allocation2 + $0x10] sm:$0xff] %vm689_vm1, %v2663_v58  ;;  %v2132_v58 = vld [vmem:[#allocation2 + $0x20] sm:$0xff]  ;;  %v1532_v24 = vld [vmem:[#allocation2 + $0x98] sm:$0xff] }
 0x19f   : > { %2105 = vst.msk [vmem:[#allocation2 + $0x90] sm:$0xff] %vm689_vm1, %v2064_v35  ;;  %v2664_v57 = vadd.f32 %v2623_v60, %v2131_v31  ;;  %v17963_v53 = vpop.permute.xlu1 %3072  ;;  %v2744_v29 = vld [vmem:[#allocation2 + $0x8] sm:$0xff] }
 0x1a0   : > { %3317 = vst.msk [vmem:[#allocation2] sm:$0xff] %vm689_vm1, %v3276_v8  ;;  %v3277_v6 = vadd.f32 %v3236_v1, %v2744_v29  ;;  %v3238_v8 = vmul.f32 %v17696_v16, %v2875_v45  ;;  %v2133_v29 = vld [vmem:[#allocation2 + $0x28] sm:$0xff] }
 0x1a1   : > { %2705 = vst.msk [vmem:[#allocation2 + $0x18] sm:$0xff] %vm689_vm1, %v2664_v57  ;;  %v3043_v56 = vpop.permute.xlu0 %3042  ;;  %v1536_v63 = vld [vmem:[#allocation2 + $0xb8] sm:$0xff]  ;;  %v2265_v15 = vpop.f32.mrb[92].mxu0 }
 0x1a2   : > { %3605 = vst.msk [vmem:[#allocation2] sm:$0xff] %vm3604_vm4, %v16317_v17  ;;  %16368 = vrot.lane.b32.xlu1 %v16367_v12, %s16539_s21  ;;  %v2069_v21 = vadd.f32 %v2028_v46, %v1536_v63  ;;  %v2624_v32 = vmul.f32 %v17458_v39, %v2265_v15  ;;  %v2880_v55 = vpop.f32.mrb[92].mxu1  ;;  %v15085_v25 = vpop.f32.mrb[93].mxu0  ;;  %v3237_v35 = vmul.f32 %v3043_v56, %v2872_v23  ;;  %v16327_v46 = vunpack.i.l.bf16 %v17167_v37  ;;  %v17985_v63 = vld [vmem:[%s20919_s2 + $0x100] sm:$0xff] }
 0x1a3   : > { %3318 = vst.msk [vmem:[#allocation2 + $0x8] sm:$0xff] %vm689_vm1, %v3277_v6  ;;  %v15171_v60 = vpop.f32.mrb[93].mxu1  ;;  %v2268_v12 = vpop.f32.mrb[94].mxu0 }
 0x1a4   : > { %3606 = vst.msk [vmem:[#allocation2 + $0x8] sm:$0xff] %vm3604_vm4, %v16318_v19  ;;  %v1898_v48 = vpop.permute.xlu1 %1897  ;;  %v2665_v27 = vadd.f32 %v2624_v32, %v2132_v58  ;;  %v2883_v31 = vpop.f32.mrb[94].mxu1  ;;  %v2625_v39 = vmul.f32 %v17500_v26, %v2268_v12 }
 0x1a5   : > { %2110 = vst.msk [vmem:[#allocation2 + $0xb8] sm:$0xff] %vm689_vm1, %v2069_v21  ;;  %v2024_v13 = vmul.f32 %v1898_v48, %v17614_v59  ;;  %v2745_v1 = vld [vmem:[#allocation2 + $0x10] sm:$0xff]  ;;  %v15086_v23 = vpop.f32.mrb[95].mxu0  ;;  %v15172_v22 = vpop.f32.mrb[95].mxu1  ;;  %v16328_v59 = vunpack.i.h.bf16 %v17167_v37  ;;  %v3239_v48 = vmul.f32 %v17788_v18, %v2880_v55  ;;  %v3240_v18 = vmul.f32 %v17807_v54, %v2883_v31  ;;  %v755_v55 = vld [vmem:[#allocation2 + $0xc0] sm:$0xff] }
 0x1a6   : > { %1937 = vperm.xlu1 %16366, %v17612_v49   ;;  %2706 = vst.msk [vmem:[#allocation2 + $0x20] sm:$0xff] %vm689_vm1, %v2665_v27  ;;  %v3278_v57 = vadd.f32 %v3237_v35, %v2745_v1  ;;  %v2666_v56 = vadd.f32 %v2625_v39, %v2133_v29  ;;  %v17994_v19 = vpop.permute.xlu0 %3077  ;;  %v2135_v1 = vld [vmem:[#allocation2 + $0x38] sm:$0xff] }
 0x1a7   : > { %v2065_v17 = vadd.f32 %v2024_v13, %v1532_v24 }
 0x1a8   : > { %v2746_v6 = vld [vmem:[#allocation2 + $0x18] sm:$0xff]  ;;  %3319 = vst.msk [vmem:[#allocation2 + $0x10] sm:$0xff] %vm689_vm1, %v3278_v57  ;;  %2707 = vst.msk [vmem:[#allocation2 + $0x28] sm:$0xff] %vm689_vm1, %v2666_v56 }
 0x1a9   : > { %v3279_v26 = vadd.f32 %v3238_v8, %v2746_v6  ;;  %2106 = vst.msk [vmem:[#allocation2 + $0x98] sm:$0xff] %vm689_vm1, %v2065_v17  ;;  %v580_v49 = vpop.permute.xlu1 %579  ;;  %v3690_v16 = vld [vmem:[#allocation2] sm:$0xff]  ;;  %v2273_v45 = vpop.f32.mrb[96].mxu0 }
 0x1aa   : > { %3607 = vst.msk [vmem:[#allocation2 + $0x10] sm:$0xff] %vm3604_vm4, %v16327_v46  ;;  %v676_v37 = vmul.f32 %v17571_v20, %v580_v49  ;;  %16372 = vset.pattern.permute.xlu1 %v20978_v38  ;;  %15247 = vmatprep.mubr.msk.f32.mxu0 %vm917_vm3, %v3690_v16  ;;  %v2626_v15 = vmul.f32 %v17711_v41, %v2273_v45  ;;  %v2888_v21 = vpop.f32.mrb[96].mxu1  ;;  %v15089_v32 = vpop.f32.mrb[97].mxu0  ;;  %v2134_v20 = vld [vmem:[#allocation2 + $0x30] sm:$0xff]  ;;  %v18028_v45 = vld [vmem:[%s20921_s4] ss:$0 sm:$0xff] }
 0x1ab   : > { %3320 = vst.msk [vmem:[#allocation2 + $0x18] sm:$0xff] %vm689_vm1, %v3279_v26  ;;  %1347 = vperm.xlu1 %16372, %v17985_v63   ;;  %v3691_v25 = vld [vmem:[#allocation2 + $0x8] sm:$0xff]  ;;  %v15175_v58 = vpop.f32.mrb[97].mxu1  ;;  %v2276_v60 = vpop.f32.mrb[98].mxu0 }
 0x1ac   : > { %v4116_v35 = vld [vmem:[#allocation2 + $0x1] sm:$0xff]  ;;  %3608 = vst.msk [vmem:[#allocation2 + $0x18] sm:$0xff] %vm3604_vm4, %v16328_v59  ;;  %15248 = vmatmul.mubr.msk.f32.vlgmr.msra.gmra.mrb[168].mxu0 %vm917_vm3, %v3691_v25  ;;  %v2667_v41 = vadd.f32 %v2626_v15, %v2134_v20  ;;  %v2627_v27 = vmul.f32 %v17726_v3, %v2276_v60  ;;  %v2891_v13 = vpop.f32.mrb[98].mxu1  ;;  %v15090_v12 = vpop.f32.mrb[99].mxu0  ;;  %v18012_v3 = vld [vmem:[%s20919_s2 + $0xb8] sm:$0xff]  ;;  %v3241_v25 = vmul.f32 %v17888_v14, %v2888_v21 }
 0x1ad   : > { %718 = vst.msk [vmem:[#allocation2 + $0xe0] sm:$0xff] %vm689_vm1, %v676_v37  ;;  %15303 = vmatprep.mubr.msk.f32.mxu1 %vm917_vm3, %v4116_v35  ;;  %v2747_v46 = vld [vmem:[#allocation2 + $0x20] sm:$0xff]  ;;  %v15176_v39 = vpop.f32.mrb[99].mxu1  ;;  %v18019_v54 = vpop.permute.xlu0 %3082  ;;  %v2137_v14 = vld [vmem:[#allocation2 + $0x48] sm:$0xff] }
 0x1ae   : > { %v1308_v24 = vpop.permute.xlu1 %1307  ;;  %v3280_v23 = vadd.f32 %v3239_v48, %v2747_v46  ;;  %2708 = vst.msk [vmem:[#allocation2 + $0x30] sm:$0xff] %vm689_vm1, %v2667_v41  ;;  %v2668_v22 = vadd.f32 %v2627_v27, %v2135_v1  ;;  %v2136_v37 = vld [vmem:[#allocation2 + $0x40] sm:$0xff] }
 0x1af   : > { %v1414_v8 = vmul.f32 %v1308_v24, %v17707_v50  ;;  %1352 = vperm.xlu1 %16372, %v17692_v4   ;;  %v2748_v57 = vld [vmem:[#allocation2 + $0x28] sm:$0xff]  ;;  %v14133_v4 = vld [vmem:[%s16763_s27 + $0x30] sm:$0xff]   ;;  %v3242_v24 = vmul.f32 %v17908_v36, %v2891_v13 }
 0x1b0   : > { %3321 = vst.msk [vmem:[#allocation2 + $0x20] sm:$0xff] %vm689_vm1, %v3280_v23  ;;  %2709 = vst.msk [vmem:[#allocation2 + $0x38] sm:$0xff] %vm689_vm1, %v2668_v22  ;;  %v3281_v6 = vadd.f32 %v3240_v18, %v2748_v57  ;;  %v14074_v58 = vunpack.c.l.bf16 %v14133_v4  ;;  %v14075_v60 = vunpack.c.h.bf16 %v14133_v4  ;;  %v756_v18 = vld [vmem:[#allocation2 + $0xc8] sm:$0xff] }
 0x1b1   : > { %v1455_v17 = vadd.f32 %v1414_v8, %v755_v55  ;;  %v3692_v29 = vld [vmem:[#allocation2 + $0x10] sm:$0xff]  ;;  %v2281_v50 = vpop.f32.mrb[100].mxu0  ;;  %v3088_v13 = vpop.permute.xlu0 %3087 }
 0x1b2   : > { %v4117_v59 = vld [vmem:[#allocation2 + $0x9] sm:$0xff]  ;;  %15250 = vmatprep.mubr.msk.f32.mxu0 %vm917_vm3, %v3692_v29  ;;  %v2628_v31 = vmul.f32 %v17735_v30, %v2281_v50  ;;  %v2896_v56 = vpop.f32.mrb[100].mxu1  ;;  %3322 = vst.msk [vmem:[#allocation2 + $0x28] sm:$0xff] %vm689_vm1, %v3281_v6  ;;  %v15093_v32 = vpop.f32.mrb[101].mxu0 }
 0x1b3   : > { %15304 = vmatmul.mubr.msk.f32.vlgmr.msra.gmra.mrb[168].mxu1 %vm917_vm3, %v4117_v59  ;;  %1496 = vst.msk [vmem:[#allocation2 + $0xc0] sm:$0xff] %vm689_vm1, %v1455_v17  ;;  %16373 = vset.pattern.permute.xlu1 %v20982_v7  ;;  %v585_v26 = vpop.permute.xlu1 %584  ;;  %v3693_v49 = vld [vmem:[#allocation2 + $0x18] sm:$0xff]  ;;  %v15179_v30 = vpop.f32.mrb[101].mxu1  ;;  %v2138_v59 = vld [vmem:[#allocation2 + $0x50] sm:$0xff] }
 0x1b4   : > { %v4118_v16 = vld [vmem:[#allocation2 + $0x11] sm:$0xff]  ;;  %v677_v15 = vmul.f32 %v18028_v45, %v585_v26  ;;  %2532 = vperm.xlu1 %16373, %v18012_v3   ;;  %15251 = vmatmul.mubr.msk.f32.gmra.mrb[170].mxu0 %vm917_vm3, %v3693_v49  ;;  %v2669_v35 = vadd.f32 %v2628_v31, %v2136_v37  ;;  %v2284_v20 = vpop.f32.mrb[102].mxu0  ;;  %v2899_v48 = vpop.f32.mrb[102].mxu1  ;;  %v16359_v49 = vunpack.i.l.bf16 %v17365_v43 }
 0x1b5   : > { %15306 = vmatprep.mubr.msk.f32.mxu1 %vm917_vm3, %v4118_v16  ;;  %v2749_v41 = vld [vmem:[#allocation2 + $0x30] sm:$0xff]  ;;  %v2629_v27 = vmul.f32 %v17738_v44, %v2284_v20  ;;  %v15094_v12 = vpop.f32.mrb[103].mxu0  ;;  %v15180_v46 = vpop.f32.mrb[103].mxu1  ;;  %v16375_v44 = vpack.i.bf16 %v14075_v60, %v14074_v58  ;;  %v16360_v58 = vunpack.i.h.bf16 %v17365_v43 }
 0x1b6   : > { %719 = vst.msk [vmem:[#allocation2 + $0xe8] sm:$0xff] %vm689_vm1, %v677_v15  ;;  %v3282_v1 = vadd.f32 %v3241_v25, %v2749_v41  ;;  %2710 = vst.msk [vmem:[#allocation2 + $0x40] sm:$0xff] %vm689_vm1, %v2669_v35  ;;  %v3244_v15 = vmul.f32 %v17994_v19, %v2899_v48  ;;  %v18056_v32 = vpop.permute.xlu0 %3107  ;;  %v1533_v25 = vld [vmem:[#allocation2 + $0xa0] sm:$0xff] }
 0x1b7   : > { %v2750_v21 = vld [vmem:[#allocation2 + $0x38] sm:$0xff]  ;;  %v2670_v39 = vadd.f32 %v2629_v27, %v2137_v14 }
 0x1b8   : > { %16374 = vset.pattern.permute.xlu1 %v20970_v0  ;;  %v1313_v23 = vpop.permute.xlu1 %1312  ;;  %3323 = vst.msk [vmem:[#allocation2 + $0x30] sm:$0xff] %vm689_vm1, %v3282_v1  ;;  %v3283_v22 = vadd.f32 %v3242_v24, %v2750_v21  ;;  %v2140_v24 = vld [vmem:[#allocation2 + $0x60] sm:$0xff] }
 0x1b9   : > { %v1415_v8 = vmul.f32 %v1313_v23, %v17719_v51  ;;  %3122 = vperm.xlu1 %16374, %v17835_v2   ;;  %2711 = vst.msk [vmem:[#allocation2 + $0x48] sm:$0xff] %vm689_vm1, %v2670_v39  ;;  %v2289_v36 = vpop.f32.mrb[104].mxu0  ;;  %v3243_v51 = vmul.f32 %v17963_v53, %v2896_v56  ;;  %v2803_v53 = vld [vmem:[%s20919_s2 + $0x98] sm:$0xff] }
 0x1ba   : > { %3324 = vst.msk [vmem:[#allocation2 + $0x38] sm:$0xff] %vm689_vm1, %v3283_v22  ;;  %v2630_v57 = vmul.f32 %v17839_v11, %v2289_v36  ;;  %v15097_v17 = vpop.f32.mrb[105].mxu0  ;;  %v2904_v29 = vpop.f32.mrb[104].mxu1  ;;  %v2139_v11 = vld [vmem:[#allocation2 + $0x58] sm:$0xff] }
 0x1bb   : > { %v1456_v55 = vadd.f32 %v1415_v8, %v756_v18  ;;  %v2292_v6 = vpop.f32.mrb[106].mxu0  ;;  %v15183_v50 = vpop.f32.mrb[105].mxu1  ;;  %v3245_v1 = vmul.f32 %v18019_v54, %v2904_v29  ;;  %v2141_v8 = vld [vmem:[#allocation2 + $0x68] sm:$0xff] }
 0x1bc   : > { %v2671_v2 = vadd.f32 %v2630_v57, %v2138_v59  ;;  %v2631_v4 = vmul.f32 %v17870_v52, %v2292_v6  ;;  %v15098_v26 = vpop.f32.mrb[107].mxu0  ;;  %v2907_v56 = vpop.f32.mrb[106].mxu1  ;;  %v1534_v29 = vld [vmem:[#allocation2 + $0xa8] sm:$0xff] }
 0x1bd   : > { %1497 = vst.msk [vmem:[#allocation2 + $0xc8] sm:$0xff] %vm689_vm1, %v1456_v55  ;;  %16376 = vrot.lane.b32.xlu1 %v16375_v44, %s16539_s21  ;;  %v1903_v31 = vpop.permute.xlu1 %1902  ;;  %v2751_v16 = vld [vmem:[#allocation2 + $0x40] sm:$0xff]  ;;  %v15184_v35 = vpop.f32.mrb[107].mxu1  ;;  %v3246_v22 = vmul.f32 %v3088_v13, %v2907_v56  ;;  %v18086_v13 = vld [vmem:[%s20919_s2 + $0x118] sm:$0xff] }
 0x1be   : > { %v2025_v37 = vmul.f32 %v1903_v31, %v17640_v34  ;;  %v3284_v52 = vadd.f32 %v3243_v51, %v2751_v16  ;;  %2712 = vst.msk [vmem:[#allocation2 + $0x50] sm:$0xff] %vm689_vm1, %v2671_v2  ;;  %v2672_v30 = vadd.f32 %v2631_v4, %v2139_v11  ;;  %v18064_v12 = vpop.permute.xlu0 %3112 }
 0x1c0   : > { %v2066_v20 = vadd.f32 %v2025_v37, %v1533_v25  ;;  %3325 = vst.msk [vmem:[#allocation2 + $0x40] sm:$0xff] %vm689_vm1, %v3284_v52  ;;  %2713 = vst.msk [vmem:[#allocation2 + $0x58] sm:$0xff] %vm689_vm1, %v2672_v30  ;;  %v2752_v34 = vld [vmem:[#allocation2 + $0x48] sm:$0xff]  ;;  %v2142_v37 = vld [vmem:[#allocation2 + $0x70] sm:$0xff] }
 0x1c1   : > { %3127 = vperm.xlu1 %16374, %v2803_v53   ;;  %v16337_v19 = vpop.permute.xlu1 %16336  ;;  %3613 = vst.msk [vmem:[#allocation2 + $0x40] sm:$0xff] %vm3604_vm4, %v16359_v49  ;;  %v3285_v60 = vadd.f32 %v3244_v15, %v2752_v34  ;;  %v2297_v27 = vpop.f32.mrb[108].mxu0  ;;  %v18109_v30 = vld [vmem:[%s20919_s2 + $0xf0] sm:$0xff] }
 0x1c2   : > { %2107 = vst.msk [vmem:[#allocation2 + $0xa0] sm:$0xff] %vm689_vm1, %v2066_v20  ;;  %v16339_v48 = vunpack.i.h.bf16 %v16337_v19  ;;  %v16338_v41 = vunpack.i.l.bf16 %v16337_v19  ;;  %v2632_v46 = vmul.f32 %v17924_v9, %v2297_v27  ;;  %v15101_v43 = vpop.f32.mrb[109].mxu0  ;;  %v18078_v55 = vpop.permute.xlu0 %3117  ;;  %v2143_v20 = vld [vmem:[#allocation2 + $0x78] sm:$0xff] }
 0x1c3   : > { %3326 = vst.msk [vmem:[#allocation2 + $0x48] sm:$0xff] %vm689_vm1, %v3285_v60  ;;  %v2300_v14 = vpop.f32.mrb[110].mxu0  ;;  %v18071_v21 = vpop.f32.mrb[108].mxu1  ;;  %v2144_v43 = vld [vmem:[#allocation2 + $0x80] sm:$0xff] }
 0x1c4   : > { %3609 = vst.msk [vmem:[#allocation2 + $0x20] sm:$0xff] %vm3604_vm4, %v16338_v41  ;;  %3610 = vst.msk [vmem:[#allocation2 + $0x28] sm:$0xff] %vm3604_vm4, %v16339_v48  ;;  %v2673_v39 = vadd.f32 %v2632_v46, %v2140_v24  ;;  %v2633_v23 = vmul.f32 %v17752_v40, %v2300_v14  ;;  %v15102_v54 = vpop.f32.mrb[111].mxu0  ;;  %v15187_v36 = vpop.f32.mrb[109].mxu1  ;;  %v2804_v41 = vld [vmem:[%s20919_s2 + $0xa0] sm:$0xff] }
 0x1c5   : > { %3614 = vst.msk [vmem:[#allocation2 + $0x48] sm:$0xff] %vm3604_vm4, %v16360_v58  ;;  %16381 = vset.pattern.permute.xlu1 %v20982_v7  ;;  %v1908_v9 = vpop.permute.xlu1 %1907  ;;  %v2753_v44 = vld [vmem:[#allocation2 + $0x50] sm:$0xff]  ;;  %v18081_v40 = vpop.f32.mrb[110].mxu1  ;;  %v16389_v36 = vunpack.i.h.bf16 %v17650_v42 }
 0x1c6   : > { %v2026_v18 = vmul.f32 %v1908_v9, %v17645_v5  ;;  %2537 = vperm.xlu1 %16381, %v17865_v28   ;;  %2714 = vst.msk [vmem:[#allocation2 + $0x60] sm:$0xff] %vm689_vm1, %v2673_v39  ;;  %v2674_v57 = vadd.f32 %v2633_v23, %v2141_v8  ;;  %v3286_v17 = vadd.f32 %v3245_v1, %v2753_v44  ;;  %v15188_v5 = vpop.f32.mrb[111].mxu1  ;;  %v18096_v11 = vpop.permute.xlu0 %3137  ;;  %v1585_v44 = vld [vmem:[%s20919_s2 + $0xf8] sm:$0xff] }
 0x1c7   : > { %v2754_v6 = vld [vmem:[#allocation2 + $0x58] sm:$0xff] }
 0x1c8   : > { %v2067_v59 = vadd.f32 %v2026_v18, %v1534_v29  ;;  %2715 = vst.msk [vmem:[#allocation2 + $0x68] sm:$0xff] %vm689_vm1, %v2674_v57  ;;  %3327 = vst.msk [vmem:[#allocation2 + $0x50] sm:$0xff] %vm689_vm1, %v3286_v17  ;;  %v3287_v28 = vadd.f32 %v3246_v22, %v2754_v6 }
 0x1c9   : > { %v2305_v51 = vpop.f32.mrb[112].mxu0 }
 0x1ca   : > { %2108 = vst.msk [vmem:[#allocation2 + $0xa8] sm:$0xff] %vm689_vm1, %v2067_v59  ;;  %16382 = vset.pattern.permute.xlu1 %v20978_v38  ;;  %v590_v50 = vpop.permute.xlu1 %589  ;;  %3328 = vst.msk [vmem:[#allocation2 + $0x58] sm:$0xff] %vm689_vm1, %v3287_v28  ;;  %v2634_v4 = vmul.f32 %v17769_v62, %v2305_v51  ;;  %v15105_v31 = vpop.f32.mrb[113].mxu0  ;;  %v2145_v28 = vld [vmem:[#allocation2 + $0x88] sm:$0xff] }
 0x1cb   : > { %v678_v2 = vmul.f32 %v18028_v45, %v590_v50  ;;  %1362 = vperm.xlu1 %16382, %v18086_v13   ;;  %v3694_v26 = vld [vmem:[#allocation2 + $0x20] sm:$0xff]  ;;  %v3695_v16 = vld [vmem:[#allocation2 + $0x28] sm:$0xff]  ;;  %v2308_v15 = vpop.f32.mrb[114].mxu0  ;;  %v18100_v56 = vpop.f32.mrb[112].mxu1 }
 0x1cc   : > { %v4119_v49 = vld [vmem:[#allocation2 + $0x19] sm:$0xff]  ;;  %15253 = vmatprep.mubr.msk.f32.mxu0 %vm917_vm3, %v3694_v26  ;;  %v4120_v53 = vld [vmem:[#allocation2 + $0x21] sm:$0xff]  ;;  %v2675_v62 = vadd.f32 %v2634_v4, %v2142_v37  ;;  %v2635_v52 = vmul.f32 %v17793_v47, %v2308_v15  ;;  %v15106_v25 = vpop.f32.mrb[115].mxu0  ;;  %v15191_v35 = vpop.f32.mrb[113].mxu1 }
 0x1cd   : > { %15307 = vmatmul.mubr.msk.f32.gmra.mrb[170].mxu1 %vm917_vm3, %v4119_v49  ;;  %720 = vst.msk [vmem:[#allocation2 + $0xf0] sm:$0xff] %vm689_vm1, %v678_v2  ;;  %15254 = vmatmul.mubr.msk.f32.gmra.mrb[172].mxu0 %vm917_vm3, %v3695_v16  ;;  %v2923_v58 = vpop.f32.mrb[114].mxu1  ;;  %v18114_v60 = vpop.permute.xlu0 %3152  ;;  %v2147_v37 = vld [vmem:[#allocation2 + $0x98] sm:$0xff] }
 0x1ce   : > { %15309 = vmatprep.mubr.msk.f32.mxu1 %vm917_vm3, %v4120_v53  ;;  %2716 = vst.msk [vmem:[#allocation2 + $0x70] sm:$0xff] %vm689_vm1, %v2675_v62  ;;  %v2676_v34 = vadd.f32 %v2635_v52, %v2143_v20  ;;  %v15192_v47 = vpop.f32.mrb[115].mxu1  ;;  %v3250_v23 = vmul.f32 %v18056_v32, %v2923_v58  ;;  %v2755_v20 = vld [vmem:[#allocation2 + $0x60] sm:$0xff]  ;;  %v2196_v58 = vld [vmem:[%s20919_s2 + $0xd8] sm:$0xff] }
 0x1cf   : > { %16383 = vset.pattern.permute.xlu1 %v20976_v61  ;;  %v2498_v19 = vpop.permute.xlu1 %2497 }
 0x1d0   : > { %1952 = vperm.xlu1 %16383, %v18109_v30   ;;  %2717 = vst.msk [vmem:[#allocation2 + $0x78] sm:$0xff] %vm689_vm1, %v2676_v34 }
 0x1d1   : > { %v2313_v48 = vpop.f32.mrb[116].mxu0  ;;  %v18123_v8 = vpop.permute.xlu0 %3157 }
 0x1d2   : > { %v2636_v27 = vmul.f32 %v2498_v19, %v2313_v48  ;;  %v15109_v46 = vpop.f32.mrb[117].mxu0  ;;  %v14135_v19 = vld [vmem:[%s16763_s27 + $0x40] sm:$0xff]  }
 0x1d3   : > { %v2316_v24 = vpop.f32.mrb[118].mxu0  ;;  %v2928_v22 = vpop.f32.mrb[116].mxu1 }
 0x1d4   : > { %16384 = vset.pattern.permute.xlu1 %v20970_v0  ;;  %v595_v1 = vpop.permute.xlu1 %594  ;;  %v2677_v14 = vadd.f32 %v2636_v27, %v2144_v43  ;;  %v15110_v9 = vpop.f32.mrb[119].mxu0  ;;  %v3251_v51 = vmul.f32 %v18064_v12, %v2928_v22  ;;  %v21005_v27 = vld [vmem:[#allocation26_spill] sm:$0xff] }
 0x1d5   : > { %v679_v39 = vmul.f32 %v18028_v45, %v595_v1  ;;  %3132 = vperm.xlu1 %16384, %v2804_v41   ;;  %v15195_v54 = vpop.f32.mrb[117].mxu1  ;;  %v18134_v5 = vpop.permute.xlu0 %3167 }
 0x1d6   : > { %2718 = vst.msk [vmem:[#allocation2 + $0x80] sm:$0xff] %vm689_vm1, %v2677_v14  ;;  %v2931_v18 = vpop.f32.mrb[118].mxu1  ;;  %v21006_v54 = vld [vmem:[#allocation28_spill] sm:$0xff] }
 0x1d7   : > { %721 = vst.msk [vmem:[#allocation2 + $0xf8] sm:$0xff] %vm689_vm1, %v679_v39  ;;  %v2758_v57 = vld [vmem:[#allocation2 + $0x78] sm:$0xff]  ;;  %v15196_v17 = vpop.f32.mrb[119].mxu1  ;;  %v14082_v39 = vunpack.c.l.bf16 %v14135_v19 }
 0x1d8   : > { %v3291_v29 = vadd.f32 %v3250_v23, %v2758_v57  ;;  %v14083_v23 = vunpack.c.h.bf16 %v14135_v19 }
 0x1d9   : > { %16390 = vset.pattern.permute.xlu1 %v20976_v61  ;;  %v2503_v32 = vpop.permute.xlu1 %2502  ;;  %v18132_v6 = vpop.f32.mrb[120].mxu0 }
 0x1da   : > { %v2637_v59 = vmul.f32 %v2503_v32, %v2316_v24  ;;  %1957 = vperm.xlu1 %16390, %v1585_v44   ;;  %3332 = vst.msk [vmem:[#allocation2 + $0x78] sm:$0xff] %vm689_vm1, %v3291_v29  ;;  %v15113_v50 = vpop.f32.mrb[121].mxu0  ;;  %v2148_v24 = vld [vmem:[#allocation2 + $0xa0] sm:$0xff]  ;;  %v2149_v29 = vld [vmem:[#allocation2 + $0xa8] sm:$0xff] }
 0x1db   : > { %3620 = vst.msk [vmem:[#allocation2 + $0x78] sm:$0xff] %vm3604_vm4, %v16389_v36  ;;  %v2324_v4 = vpop.f32.mrb[122].mxu0  ;;  %v18139_v31 = vpop.f32.mrb[120].mxu1 }
 0x1dc   : > { %v2678_v2 = vadd.f32 %v2637_v59, %v2145_v28  ;;  %v2639_v26 = vmul.f32 %v17816_v33, %v2324_v4  ;;  %v15114_v49 = vpop.f32.mrb[123].mxu0  ;;  %v15199_v16 = vpop.f32.mrb[121].mxu1  ;;  %v2756_v4 = vld [vmem:[#allocation2 + $0x68] sm:$0xff] }
 0x1dd   : > { %v2759_v15 = vld [vmem:[#allocation2 + $0x80] sm:$0xff]  ;;  %v18144_v62 = vpop.f32.mrb[122].mxu1  ;;  %v18148_v33 = vpop.permute.xlu0 %3172 }
 0x1de   : > { %2719 = vst.msk [vmem:[#allocation2 + $0x88] sm:$0xff] %vm689_vm1, %v2678_v2  ;;  %16391 = vset.pattern.permute.xlu1 %v20982_v7  ;;  %v3093_v53 = vpop.permute.xlu1 %3092  ;;  %v2680_v12 = vadd.f32 %v2639_v26, %v2147_v37  ;;  %v3292_v52 = vadd.f32 %v3251_v51, %v2759_v15  ;;  %v15200_v35 = vpop.f32.mrb[123].mxu1  ;;  %v16393_v26 = vpack.i.bf16 %v14083_v23, %v14082_v39  ;;  %v2150_v37 = vld [vmem:[#allocation2 + $0xb0] sm:$0xff] }
 0x1df   : > { %v3247_v25 = vmul.f32 %v3093_v53, %v18071_v21  ;;  %2547 = vperm.xlu1 %16391, %v17953_v10   ;;  %v3252_v21 = vmul.f32 %v18078_v55, %v2931_v18  ;;  %v2806_v18 = vld [vmem:[%s20919_s2 + $0xb0] sm:$0xff] }
 0x1e0   : > { %2721 = vst.msk [vmem:[#allocation2 + $0x98] sm:$0xff] %vm689_vm1, %v2680_v12  ;;  %3333 = vst.msk [vmem:[#allocation2 + $0x80] sm:$0xff] %vm689_vm1, %v3292_v52  ;;  %v21007_v15 = vld [vmem:[#allocation33_spill] sm:$0xff]  ;;  %v3698_v12 = vld [vmem:[#allocation2 + $0x40] sm:$0xff] }
 0x1e1   : > { %v3288_v34 = vadd.f32 %v3247_v25, %v2755_v20  ;;  %v2329_v48 = vpop.f32.mrb[124].mxu0  ;;  %v18159_v1 = vpop.permute.xlu0 %3177  ;;  %v21008_v25 = vld [vmem:[#allocation14_spill] sm:$0xff] }
 0x1e2   : > { %v16347_v47 = vpop.permute.xlu1 %16346  ;;  %v2640_v46 = vmul.f32 %v21005_v27, %v2329_v48  ;;  %v15117_v43 = vpop.f32.mrb[125].mxu0 }
 0x1e3   : > { %3329 = vst.msk [vmem:[#allocation2 + $0x60] sm:$0xff] %vm689_vm1, %v3288_v34  ;;  %v16349_v10 = vunpack.i.h.bf16 %v16347_v47  ;;  %v16348_v41 = vunpack.i.l.bf16 %v16347_v47  ;;  %2552 = vperm.xlu1 %16391, %v2196_v58   ;;  %v2332_v14 = vpop.f32.mrb[126].mxu0  ;;  %v18161_v9 = vpop.f32.mrb[124].mxu1 }
 0x1e4   : > { %v2681_v55 = vadd.f32 %v2640_v46, %v2148_v24  ;;  %v2641_v44 = vmul.f32 %v21006_v54, %v2332_v14  ;;  %v15118_v36 = vpop.f32.mrb[127].mxu0  ;;  %v15203_v57 = vpop.f32.mrb[125].mxu1 }
 0x1e5   : > { %3611 = vst.msk [vmem:[#allocation2 + $0x30] sm:$0xff] %vm3604_vm4, %v16348_v41  ;;  %3612 = vst.msk [vmem:[#allocation2 + $0x38] sm:$0xff] %vm3604_vm4, %v16349_v10  ;;  %v2760_v22 = vld [vmem:[#allocation2 + $0x88] sm:$0xff]  ;;  %v2947_v59 = vpop.f32.mrb[126].mxu1  ;;  %v18172_v51 = vpop.permute.xlu0 %3187  ;;  %v2146_v57 = vld [vmem:[#allocation2 + $0x90] sm:$0xff] }
 0x1e6   : > { %v3293_v17 = vadd.f32 %v3252_v21, %v2760_v22  ;;  %v3098_v32 = vpop.permute.xlu1 %3097  ;;  %2722 = vst.msk [vmem:[#allocation2 + $0xa0] sm:$0xff] %vm689_vm1, %v2681_v55  ;;  %v2682_v28 = vadd.f32 %v2641_v44, %v2149_v29  ;;  %v15204_v2 = vpop.f32.mrb[127].mxu1  ;;  %v759_v21 = vld [vmem:[#allocation2 + $0xe0] sm:$0xff]  ;;  %v3256_v10 = vmul.f32 %v18096_v11, %v2947_v59  ;;  %v3699_v44 = vld [vmem:[#allocation2 + $0x48] sm:$0xff] }
 0x1e7   : > { %v3248_v50 = vmul.f32 %v3098_v32, %v18081_v40  ;;  %16392 = vset.pattern.permute.xlu1 %v20970_v0  ;;  %v14136_v32 = vld [vmem:[%s16763_s27 + $0x48] sm:$0xff]   ;;  %v21009_v59 = vld [vmem:[#allocation15_spill] sm:$0xff] }
 0x1e8   : > { %3334 = vst.msk [vmem:[#allocation2 + $0x88] sm:$0xff] %vm689_vm1, %v3293_v17  ;;  %3142 = vperm.xlu1 %16392, %v2806_v18   ;;  %2723 = vst.msk [vmem:[#allocation2 + $0xa8] sm:$0xff] %vm689_vm1, %v2682_v28  ;;  %v4124_v18 = vld [vmem:[#allocation2 + $0x41] sm:$0xff]  ;;  %v21010_v28 = vld [vmem:[#allocation6_spill] sm:$0xff] }
 0x1e9   : > { %v3289_v49 = vadd.f32 %v3248_v50, %v2756_v4  ;;  %v18180_v19 = vpop.permute.xlu0 %3197  ;;  %v2033_v50 = vmul.f32 %v21010_v28, %v21009_v59  ;;  %v21014_v59 = vld [vmem:[#allocation17_spill] sm:$0xff]  ;;  %v21015_v28 = vld [vmem:[#allocation7_spill] sm:$0xff] }
 0x1ea   : > { %v2337_v16 = vpop.f32.mrb[128].mxu0 }
 0x1eb   : > { %3330 = vst.msk [vmem:[#allocation2 + $0x68] sm:$0xff] %vm689_vm1, %v3289_v49  ;;  %v2642_v53 = vmul.f32 %v21007_v15, %v2337_v16  ;;  %v1328_v40 = vpop.permute.xlu1 %1327  ;;  %v15121_v52 = vpop.f32.mrb[129].mxu0  ;;  %v21011_v16 = vld [vmem:[#allocation16_spill] sm:$0xff]  ;;  %v14086_v15 = vunpack.c.l.bf16 %v14136_v32 }
 0x1ec   : > { %v1418_v35 = vmul.f32 %v1328_v40, %v21008_v25  ;;  %16394 = vrot.lane.b32.xlu1 %v16393_v26, %s16539_s21  ;;  %v3696_v20 = vld [vmem:[#allocation2 + $0x30] sm:$0xff]  ;;  %v3697_v34 = vld [vmem:[#allocation2 + $0x38] sm:$0xff]  ;;  %v18182_v47 = vpop.f32.mrb[130].mxu0  ;;  %v18187_v46 = vpop.f32.mrb[128].mxu1  ;;  %v760_v52 = vld [vmem:[#allocation2 + $0xe8] sm:$0xff] }
 0x1ed   : > { %v4121_v58 = vld [vmem:[#allocation2 + $0x29] sm:$0xff]  ;;  %v2683_v48 = vadd.f32 %v2642_v53, %v2150_v37  ;;  %15256 = vmatprep.mubr.msk.f32.mxu0 %vm917_vm3, %v3696_v20  ;;  %v4122_v41 = vld [vmem:[#allocation2 + $0x31] sm:$0xff]  ;;  %v15122_v27 = vpop.f32.mrb[131].mxu0  ;;  %v15207_v24 = vpop.f32.mrb[129].mxu1  ;;  %v4123_v23 = vld [vmem:[#allocation2 + $0x39] sm:$0xff]  ;;  %v14087_v53 = vunpack.c.h.bf16 %v14136_v32 }
 0x1ee   : > { %15310 = vmatmul.mubr.msk.f32.gmra.mrb[172].mxu1 %vm917_vm3, %v4121_v58  ;;  %v1459_v43 = vadd.f32 %v1418_v35, %v759_v21  ;;  %15257 = vmatmul.mubr.msk.f32.gmra.mrb[174].mxu0 %vm917_vm3, %v3697_v34  ;;  %v18193_v14 = vpop.f32.mrb[130].mxu1  ;;  %v18197_v55 = vpop.permute.xlu0 %16432  ;;  %v18222_v25 = vld [vmem:[%s20919_s2 + $0x110] sm:$0xff] }
 0x1ef   : > { %15312 = vmatprep.mubr.msk.f32.mxu1 %vm917_vm3, %v4122_v41  ;;  %2724 = vst.msk [vmem:[#allocation2 + $0xb0] sm:$0xff] %vm689_vm1, %v2683_v48  ;;  %15259 = vmatprep.mubr.msk.f32.mxu0 %vm917_vm3, %v3698_v12  ;;  %v2764_v39 = vld [vmem:[#allocation2 + $0xa8] sm:$0xff]  ;;  %v15208_v36 = vpop.f32.mrb[131].mxu1  ;;  %v16401_v27 = vpack.i.bf16 %v14087_v53, %v14086_v15  ;;  %v16388_v15 = vunpack.i.l.bf16 %v17650_v42  ;;  %v2757_v53 = vld [vmem:[#allocation2 + $0x70] sm:$0xff] }
 0x1f0   : > { %1500 = vst.msk [vmem:[#allocation2 + $0xe0] sm:$0xff] %vm689_vm1, %v1459_v43  ;;  %3147 = vperm.xlu1 %16392, %v18012_v3   ;;  %v2508_v11 = vpop.permute.xlu1 %2507  ;;  %v3297_v22 = vadd.f32 %v3256_v10, %v2764_v39  ;;  %v2198_v3 = vld [vmem:[%s20919_s2 + $0xe8] sm:$0xff]  ;;  %v21012_v43 = vld [vmem:[#allocation10_spill] sm:$0xff] }
 0x1f1   : > { %v2638_v54 = vmul.f32 %v2508_v11, %v18132_v6  ;;  %v1537_v11 = vld [vmem:[#allocation2 + $0xc0] sm:$0xff] }
 0x1f2   : > { %15313 = vmatmul.mubr.msk.f32.gmra.mrb[174].mxu1 %vm917_vm3, %v4123_v23  ;;  %15260 = vmatmul.mubr.msk.f32.gmra.mrb[176].mxu0 %vm917_vm3, %v3699_v44  ;;  %v18206_v17 = vpop.f32.mrb[132].mxu0  ;;  %3338 = vst.msk [vmem:[#allocation2 + $0xa8] sm:$0xff] %vm689_vm1, %v3297_v22  ;;  %v18215_v4 = vpop.permute.xlu0 %16437 }
 0x1f3   : > { %15315 = vmatprep.mubr.msk.f32.mxu1 %vm917_vm3, %v4124_v18  ;;  %v2679_v29 = vadd.f32 %v2638_v54, %v2146_v57  ;;  %v15125_v6 = vpop.f32.mrb[133].mxu0  ;;  %v21013_v18 = vld [vmem:[#allocation32_spill] sm:$0xff] }
 0x1f4   : > { %16399 = vset.pattern.permute.xlu1 %v20982_v7  ;;  %v18213_v2 = vpop.f32.mrb[134].mxu0  ;;  %v2960_v40 = vpop.f32.mrb[132].mxu1 }
 0x1f5   : > { %2720 = vst.msk [vmem:[#allocation2 + $0x90] sm:$0xff] %vm689_vm1, %v2679_v29  ;;  %2562 = vperm.xlu1 %16399, %v2198_v3   ;;  %v1333_v26 = vpop.permute.xlu1 %1332  ;;  %v15126_v49 = vpop.f32.mrb[135].mxu0  ;;  %v18225_v35 = vmul.f32 %v18114_v60, %v2960_v40  ;;  %v18249_v29 = vld [vmem:[%s20919_s2 + $0x140] sm:$0xff] }
 0x1f6   : > { %v1419_v37 = vmul.f32 %v1333_v26, %v21011_v16  ;;  %v15211_v20 = vpop.f32.mrb[133].mxu1  ;;  %v18227_v48 = vpop.permute.xlu0 %16447  ;;  %2617 = vperm.xlu0 %16475, %v18249_v29  }
 0x1f7   : > { %v1541_v12 = vld [vmem:[#allocation2 + $0xe0] sm:$0xff]  ;;  %v18229_v21 = vpop.f32.mrb[134].mxu1 }
 0x1f8   : > { %v2074_v58 = vadd.f32 %v2033_v50, %v1541_v12  ;;  %v1460_v34 = vadd.f32 %v1419_v37, %v760_v52  ;;  %v15212_v10 = vpop.f32.mrb[135].mxu1  ;;  %v2034_v50 = vmul.f32 %v21015_v28, %v21014_v59 }
 0x1f9   : > { %16400 = vset.pattern.permute.xlu1 %v20976_v61 }
 0x1fa   : > { %2115 = vst.msk [vmem:[#allocation2 + $0xe0] sm:$0xff] %vm689_vm1, %v2074_v58  ;;  %1501 = vst.msk [vmem:[#allocation2 + $0xe8] sm:$0xff] %vm689_vm1, %v1460_v34  ;;  %1972 = vperm.xlu1 %16400, %v18222_v25   ;;  %v1923_v41 = vpop.permute.xlu1 %1922  ;;  %v18235_v60 = vpop.f32.mrb[136].mxu0  ;;  %v21016_v58 = vld [vmem:[#allocation43_spill] sm:$0xff] }
 0x1fb   : > { %v2029_v24 = vmul.f32 %v1923_v41, %v21012_v43  ;;  %v15129_v39 = vpop.f32.mrb[137].mxu0  ;;  %v1368_v22 = vpop.permute.xlu0 %1367 }
 0x1fc   : > { %v18238_v23 = vpop.f32.mrb[138].mxu0  ;;  %v18241_v36 = vmul.f32 %v1368_v22, %v21013_v18  ;;  %v18243_v57 = vpop.f32.mrb[136].mxu1  ;;  %v14137_v39 = vld [vmem:[%s16763_s27 + $0x50] sm:$0xff]   ;;  %v1538_v22 = vld [vmem:[#allocation2 + $0xc8] sm:$0xff] }
 0x1fd   : > { %v2070_v54 = vadd.f32 %v2029_v24, %v1537_v11  ;;  %v15130_v44 = vpop.f32.mrb[139].mxu0  ;;  %v15215_v3 = vpop.f32.mrb[137].mxu1  ;;  %v14091_v59 = vunpack.c.h.bf16 %v14137_v39 }
 0x1fe   : > { %16402 = vrot.lane.b32.xlu1 %v16401_v27, %s16539_s21  ;;  %v2971_v32 = vpop.f32.mrb[138].mxu1  ;;  %v21017_v27 = vld [vmem:[#allocation11_spill] sm:$0xff] }
 0x1ff   : > { %2111 = vst.msk [vmem:[#allocation2 + $0xc0] sm:$0xff] %vm689_vm1, %v2070_v54  ;;  %v3103_v6 = vpop.permute.xlu1 %3102  ;;  %v18257_v49 = vmul.f32 %v18134_v5, %v2971_v32  ;;  %v15216_v16 = vpop.f32.mrb[139].mxu1  ;;  %v14090_v32 = vunpack.c.l.bf16 %v14137_v39 }
 0x200   : > { %v3249_v26 = vmul.f32 %v3103_v6, %v18100_v56  ;;  %v18259_v37 = vpop.permute.xlu0 %3212 }
 0x201   : > { %v1542_v40 = vld [vmem:[#allocation2 + $0xe8] sm:$0xff]  ;;  %v2156_v56 = vld [vmem:[#allocation2 + $0xe0] sm:$0xff] }
 0x202   : > { %v3290_v12 = vadd.f32 %v3249_v26, %v2757_v53  ;;  %1977 = vperm.xlu1 %16400, %v18086_v13   ;;  %v2361_v52 = vpop.f32.mrb[140].mxu0  ;;  %v2075_v20 = vadd.f32 %v2034_v50, %v1542_v40  ;;  %v21018_v53 = vld [vmem:[#allocation36_spill] sm:$0xff] }
 0x203   : > { %v2648_v34 = vmul.f32 %v21016_v58, %v2361_v52  ;;  %v15133_v10 = vpop.f32.mrb[141].mxu0  ;;  %v16518_v58 = vld [vmem:[%s20919_s2 + $0xd0] sm:$0xff] }
 0x204   : > { %3331 = vst.msk [vmem:[#allocation2 + $0x70] sm:$0xff] %vm689_vm1, %v3290_v12  ;;  %v1928_v5 = vpop.permute.xlu1 %1927  ;;  %v2976_v41 = vpop.f32.mrb[140].mxu1  ;;  %2116 = vst.msk [vmem:[#allocation2 + $0xe8] sm:$0xff] %vm689_vm1, %v2075_v20 }
 0x205   : > { %3619 = vst.msk [vmem:[#allocation2 + $0x70] sm:$0xff] %vm3604_vm4, %v16388_v15  ;;  %v2689_v42 = vadd.f32 %v2648_v34, %v2156_v56  ;;  %v2030_v43 = vmul.f32 %v1928_v5, %v21017_v27  ;;  %v630_v24 = vpop.permute.xlu0 %629  ;;  %v18269_v11 = vpop.f32.mrb[142].mxu0  ;;  %v3263_v52 = vmul.f32 %v18148_v33, %v2976_v41  ;;  %v16408_v34 = vpack.i.bf16 %v14091_v59, %v14090_v32  ;;  %v21019_v56 = vld [vmem:[#allocation37_spill] sm:$0xff] }
 0x206   : > { %16406 = vset.pattern.permute.xlu1 %v20982_v7  ;;  %v686_v54 = vmul.f32 %v18028_v45, %v630_v24  ;;  %v15134_v44 = vpop.f32.mrb[143].mxu0  ;;  %v15219_v18 = vpop.f32.mrb[141].mxu1  ;;  %v2645_v5 = vmul.f32 %v21019_v56, %v18213_v2 }
 0x207   : > { %2730 = vst.msk [vmem:[#allocation2 + $0xe0] sm:$0xff] %vm689_vm1, %v2689_v42  ;;  %v2071_v3 = vadd.f32 %v2030_v43, %v1538_v22  ;;  %2567 = vperm.xlu1 %16406, %v18109_v30   ;;  %v2979_v6 = vpop.f32.mrb[142].mxu1  ;;  %v16434_v42 = vunpack.i.l.bf16 %v18197_v55  ;;  %v21020_v22 = vld [vmem:[#allocation18_spill] sm:$0xff] }
 0x208   : > { %728 = vst.msk [vmem:[#allocation2 + $0x130] sm:$0xff] %vm689_vm1, %v686_v54  ;;  %v18277_v28 = vmul.f32 %v18159_v1, %v2979_v6  ;;  %v15220_v50 = vpop.f32.mrb[143].mxu1  ;;  %v13442_v1 = vld [vmem:[%s20922_s5 + $0x10] sm:$0xff] }
 0x209   : > { %2112 = vst.msk [vmem:[#allocation2 + $0xc8] sm:$0xff] %vm689_vm1, %v2071_v3  ;;  %v610_v26 = vpop.permute.xlu1 %609  ;;  %v1988_v16 = vpop.permute.xlu0 %1987  ;;  %15357 = vmatprep.subr.mxu0 %v13442_v1  ;;  %v761_v3 = vld [vmem:[#allocation2 + $0xf0] sm:$0xff]  ;;  %v14138_v50 = vld [vmem:[%s16763_s27 + $0x58] sm:$0xff]  }
 0x20a   : > { %v682_v15 = vmul.f32 %v18028_v45, %v610_v26  ;;  %v18282_v40 = vmul.f32 %v1988_v16, %v21018_v53  ;;  %v18284_v12 = vpop.f32.mrb[144].mxu0  ;;  %15358 = vmatpush3.msra.mxu0 %v13442_v1  ;;  %v21022_v53 = vld [vmem:[#allocation5_spill] sm:$0xff] }
 0x20b   : > { %16407 = vset.pattern.permute.xlu1 %v20970_v0  ;;  %v15137_v20 = vpop.f32.mrb[145].mxu0 }
 0x20c   : > { %724 = vst.msk [vmem:[#allocation2 + $0x110] sm:$0xff] %vm689_vm1, %v682_v15  ;;  %3162 = vperm.xlu1 %16407, %v16518_v58   ;;  %v18295_v10 = vpop.f32.mrb[146].mxu0  ;;  %v18302_v24 = vpop.f32.mrb[144].mxu1  ;;  %v21021_v15 = vld [vmem:[#allocation27_spill] sm:$0xff] }
 0x20d   : > { %v18299_v33 = vpop.permute.xlu0 %2607  ;;  %v15138_v41 = vpop.f32.mrb[147].mxu0 }
 0x20e   : > { %v2771_v27 = vld [vmem:[#allocation2 + $0xe0] sm:$0xff]  ;;  %v1338_v43 = vpop.permute.xlu1 %1337  ;;  %v15223_v44 = vpop.f32.mrb[145].mxu1  ;;  %v14095_v41 = vunpack.c.h.bf16 %v14138_v50 }
 0x20f   : > { %v3304_v39 = vadd.f32 %v3263_v52, %v2771_v27  ;;  %v1420_v54 = vmul.f32 %v1338_v43, %v21020_v22  ;;  %v2987_v2 = vpop.f32.mrb[146].mxu1  ;;  %v1424_v52 = vmul.f32 %v21022_v53, %v21021_v15  ;;  %v762_v15 = vld [vmem:[#allocation2 + $0xf8] sm:$0xff] }
 0x210   : > { %v2153_v18 = vld [vmem:[#allocation2 + $0xc8] sm:$0xff]  ;;  %16409 = vrot.lane.b32.xlu1 %v16408_v34, %s16539_s21  ;;  %v18312_v26 = vmul.f32 %v18172_v51, %v2987_v2  ;;  %v15224_v16 = vpop.f32.mrb[147].mxu1  ;;  %v14094_v51 = vunpack.c.l.bf16 %v14138_v50 }
 0x211   : > { %v2686_v6 = vadd.f32 %v2645_v5, %v2153_v18  ;;  %3345 = vst.msk [vmem:[#allocation2 + $0xe0] sm:$0xff] %vm689_vm1, %v3304_v39  ;;  %v1461_v32 = vadd.f32 %v1420_v54, %v761_v3  ;;  %16413 = vset.pattern.permute.xlu1 %v20982_v7  ;;  %v18308_v59 = vpop.permute.xlu0 %16465 }
 0x212   : > { %3633 = vst.msk [vmem:[#allocation2 + $0xe0] sm:$0xff] %vm3604_vm4, %v16434_v42  ;;  %v18317_v20 = vpop.f32.mrb[148].mxu0  ;;  %v2202_v42 = vld [vmem:[%s20919_s2 + $0x108] sm:$0xff]  ;;  %v16414_v3 = vpack.i.bf16 %v14095_v41, %v14094_v51  ;;  %v1539_v41 = vld [vmem:[#allocation2 + $0xd0] sm:$0xff] }
 0x213   : > { %2727 = vst.msk [vmem:[#allocation2 + $0xc8] sm:$0xff] %vm689_vm1, %v2686_v6  ;;  %v765_v1 = vld [vmem:[#allocation2 + $0x110] sm:$0xff]  ;;  %1502 = vst.msk [vmem:[#allocation2 + $0xf0] sm:$0xff] %vm689_vm1, %v1461_v32  ;;  %v615_v58 = vpop.permute.xlu1 %614  ;;  %v15141_v34 = vpop.f32.mrb[149].mxu0  ;;  %v21023_v6 = vld [vmem:[#allocation20_spill] sm:$0xff] }
 0x214   : > { %v1465_v56 = vadd.f32 %v1424_v52, %v765_v1  ;;  %v683_v5 = vmul.f32 %v18028_v45, %v615_v58  ;;  %2577 = vperm.xlu1 %16413, %v17985_v63   ;;  %v18323_v27 = vpop.f32.mrb[150].mxu0  ;;  %v18331_v54 = vpop.f32.mrb[148].mxu1  ;;  %v3260_v63 = vmul.f32 %v18123_v8, %v18229_v21 }
 0x215   : > { %v640_v43 = vpop.permute.xlu0 %639  ;;  %v15142_v39 = vpop.f32.mrb[151].mxu0 }
 0x216   : > { %1506 = vst.msk [vmem:[#allocation2 + $0x110] sm:$0xff] %vm689_vm1, %v1465_v56  ;;  %725 = vst.msk [vmem:[#allocation2 + $0x118] sm:$0xff] %vm689_vm1, %v683_v5  ;;  %v688_v22 = vmul.f32 %v18028_v45, %v640_v43  ;;  %v15227_v44 = vpop.f32.mrb[149].mxu1  ;;  %v14139_v5 = vld [vmem:[%s16763_s27 + $0x60] sm:$0xff]  }
 0x217   : > { %v2995_v2 = vpop.f32.mrb[150].mxu1  ;;  %v14099_v44 = vunpack.c.h.bf16 %v14139_v5 }
 0x218   : > { %2582 = vperm.xlu1 %16413, %v2202_v42   ;;  %v1343_v18 = vpop.permute.xlu1 %1342  ;;  %730 = vst.msk [vmem:[#allocation2 + $0x140] sm:$0xff] %vm689_vm1, %v688_v22  ;;  %v18338_v50 = vmul.f32 %v18180_v19, %v2995_v2  ;;  %v15228_v16 = vpop.f32.mrb[151].mxu1  ;;  %v21024_v19 = vld [vmem:[#allocation12_spill] sm:$0xff] }
 0x219   : > { %v1421_v32 = vmul.f32 %v1343_v18, %v21023_v6 }
 0x21a   : > { %v2768_v45 = vld [vmem:[#allocation2 + $0xc8] sm:$0xff]  ;;  %v18340_v53 = vpop.f32.mrb[152].mxu0 }
 0x21b   : > { %v3301_v52 = vadd.f32 %v3260_v63, %v2768_v45  ;;  %v1462_v8 = vadd.f32 %v1421_v32, %v762_v15  ;;  %v15145_v21 = vpop.f32.mrb[153].mxu0  ;;  %v14098_v63 = vunpack.c.l.bf16 %v14139_v5 }
 0x21c   : > { %16415 = vrot.lane.b32.xlu1 %v16414_v3, %s16539_s21  ;;  %v18343_v1 = vpop.f32.mrb[154].mxu0  ;;  %v18349_v51 = vpop.f32.mrb[152].mxu1  ;;  %v14140_v21 = vld [vmem:[%s16763_s27 + $0x68] sm:$0xff]  }
 0x21d   : > { %3342 = vst.msk [vmem:[#allocation2 + $0xc8] sm:$0xff] %vm689_vm1, %v3301_v52  ;;  %1503 = vst.msk [vmem:[#allocation2 + $0xf8] sm:$0xff] %vm689_vm1, %v1462_v8  ;;  %v1933_v58 = vpop.permute.xlu1 %1932  ;;  %v15146_v34 = vpop.f32.mrb[155].mxu0  ;;  %v16421_v45 = vpack.i.bf16 %v14099_v44, %v14098_v63  ;;  %v21025_v52 = vld [vmem:[#allocation13_spill] sm:$0xff]  ;;  %v21026_v44 = vld [vmem:[#allocation22_spill] sm:$0xff] }
 0x21e   : > { %v2031_v56 = vmul.f32 %v1933_v58, %v21024_v19  ;;  %v15231_v42 = vpop.f32.mrb[153].mxu1  ;;  %v1540_v19 = vld [vmem:[#allocation2 + $0xd8] sm:$0xff] }
 0x21f   : > { %v18352_v39 = vpop.f32.mrb[154].mxu1 }
 0x220   : > { %v2072_v43 = vadd.f32 %v2031_v56, %v1539_v41  ;;  %2587 = vperm.xlu1 %16413, %v18222_v25   ;;  %v15232_v18 = vpop.f32.mrb[155].mxu1 }
 0x221   : > { %v16369_v22 = vpop.permute.xlu1 %16368 }
 0x222   : > { %2113 = vst.msk [vmem:[#allocation2 + $0xd0] sm:$0xff] %vm689_vm1, %v2072_v43  ;;  %v16371_v3 = vunpack.i.h.bf16 %v16369_v22  ;;  %v16370_v2 = vunpack.i.l.bf16 %v16369_v22  ;;  %v18355_v6 = vpop.f32.mrb[156].mxu0  ;;  %v14103_v43 = vunpack.c.h.bf16 %v14140_v21 }
 0x223   : > { %v15149_v32 = vpop.f32.mrb[157].mxu0 }
 0x224   : > { %3615 = vst.msk [vmem:[#allocation2 + $0x50] sm:$0xff] %vm3604_vm4, %v16370_v2  ;;  %3616 = vst.msk [vmem:[#allocation2 + $0x58] sm:$0xff] %vm3604_vm4, %v16371_v3  ;;  %16420 = vset.pattern.permute.xlu1 %v20970_v0  ;;  %v18361_v15 = vpop.f32.mrb[158].mxu0  ;;  %v3008_v34 = vpop.f32.mrb[156].mxu1 }
 0x225   : > { %3182 = vperm.xlu1 %16420, %v18109_v30   ;;  %v1938_v16 = vpop.permute.xlu1 %1937  ;;  %v15150_v58 = vpop.f32.mrb[159].mxu0  ;;  %v18366_v56 = vmul.f32 %v18259_v37, %v3008_v34  ;;  %v14102_v30 = vunpack.c.l.bf16 %v14140_v21  ;;  %v763_v37 = vld [vmem:[#allocation2 + $0x100] sm:$0xff] }
 0x226   : > { %v2032_v8 = vmul.f32 %v1938_v16, %v21025_v52  ;;  %v15235_v5 = vpop.f32.mrb[157].mxu1  ;;  %v16519_v58 = vld [vmem:[%s20919_s2 + $0x100] sm:$0xff] }
 0x227   : > { %v18368_v42 = vpop.f32.mrb[158].mxu1  ;;  %v16426_v34 = vpack.i.bf16 %v14103_v43, %v14102_v30  ;;  %v14143_v30 = vld [vmem:[%s16763_s27 + $0x80] sm:$0xff]  }
 0x228   : > { %v2073_v41 = vadd.f32 %v2032_v8, %v1540_v19  ;;  %v15236_v22 = vpop.f32.mrb[159].mxu1 }
 0x229   : > { %16422 = vrot.lane.b32.xlu1 %v16421_v45, %s16539_s21 }
 0x22a   : > { %2114 = vst.msk [vmem:[#allocation2 + $0xd8] sm:$0xff] %vm689_vm1, %v2073_v41  ;;  %v1348_v63 = vpop.permute.xlu1 %1347  ;;  %v2401_v16 = vpop.f32.mrb[160].mxu0 }
 0x22b   : > { %v1422_v18 = vmul.f32 %v1348_v63, %v21026_v44  ;;  %v3700_v3 = vld [vmem:[#allocation2 + $0x50] sm:$0xff]  ;;  %v3701_v32 = vld [vmem:[#allocation2 + $0x58] sm:$0xff]  ;;  %v18376_v45 = vmul.f32 %v18299_v33, %v2401_v16  ;;  %v15153_v8 = vpop.f32.mrb[161].mxu0  ;;  %v21027_v33 = vld [vmem:[#allocation24_spill] sm:$0xff] }
 0x22c   : > { %v4125_v2 = vld [vmem:[#allocation2 + $0x49] sm:$0xff]  ;;  %15262 = vmatprep.mubr.msk.f32.mxu0 %vm917_vm3, %v3700_v3  ;;  %v4126_v52 = vld [vmem:[#allocation2 + $0x51] sm:$0xff]  ;;  %v18382_v19 = vpop.f32.mrb[162].mxu0  ;;  %v21030_v8 = vld [vmem:[#allocation23_spill] sm:$0xff] }
 0x22d   : > { %15316 = vmatmul.mubr.msk.f32.gmra.mrb[176].mxu1 %vm917_vm3, %v4125_v2  ;;  %v1463_v21 = vadd.f32 %v1422_v18, %v763_v37  ;;  %3192 = vperm.xlu1 %16420, %v16519_v58   ;;  %v15154_v41 = vpop.f32.mrb[163].mxu0  ;;  %v18387_v63 = vpop.f32.mrb[160].mxu1  ;;  %v764_v44 = vld [vmem:[#allocation2 + $0x108] sm:$0xff] }
 0x22e   : > { %15263 = vmatmul.mubr.msk.f32.gmra.mrb[178].mxu0 %vm917_vm3, %v3701_v32  ;;  %15318 = vmatprep.mubr.msk.f32.mxu1 %vm917_vm3, %v4126_v52  ;;  %v1353_v5 = vpop.permute.xlu1 %1352  ;;  %v15239_v18 = vpop.f32.mrb[161].mxu1  ;;  %v14114_v41 = vunpack.c.l.bf16 %v14143_v30 }
 0x22f   : > { %1504 = vst.msk [vmem:[#allocation2 + $0x100] sm:$0xff] %vm689_vm1, %v1463_v21  ;;  %v1423_v22 = vmul.f32 %v1353_v5, %v21027_v33  ;;  %v18390_v2 = vpop.f32.mrb[162].mxu1  ;;  %v21031_v21 = vld [vmem:[#allocation8_spill] sm:$0xff]  ;;  %v2151_v5 = vld [vmem:[#allocation2 + $0xb8] sm:$0xff] }
 0x230   : > { %21028 = vst [vmem:[#allocation26_spill] sm:$0xff] %v18390_v2  ;;  %v15240_v43 = vpop.f32.mrb[163].mxu1  ;;  %v2037_v58 = vmul.f32 %v21031_v21, %v21030_v8 }
 0x231   : > { %v1464_v3 = vadd.f32 %v1423_v22, %v764_v44  ;;  %16427 = vrot.lane.b32.xlu1 %v16426_v34, %s16539_s21  ;;  %v14115_v34 = vunpack.c.h.bf16 %v14143_v30 }
 0x232   : > { %v18394_v16 = vpop.f32.mrb[164].mxu0 }
 0x233   : > { %1505 = vst.msk [vmem:[#allocation2 + $0x108] sm:$0xff] %vm689_vm1, %v1464_v3  ;;  %v2533_v32 = vpop.permute.xlu1 %2532  ;;  %21029 = vst [vmem:[#allocation28_spill] sm:$0xff] %v18394_v16  ;;  %v15157_v52 = vpop.f32.mrb[165].mxu0 }
 0x234   : > { %v2643_v37 = vmul.f32 %v2533_v32, %v18182_v47  ;;  %v2412_v33 = vpop.f32.mrb[166].mxu0  ;;  %v21032_v32 = vld [vmem:[#allocation25_spill] sm:$0xff] }
 0x235   : > { %3202 = vperm.xlu1 %16420, %v18222_v25   ;;  %v15158_v44 = vpop.f32.mrb[167].mxu0  ;;  %v18400_v43 = vpop.f32.mrb[164].mxu1  ;;  %v21033_v52 = vld [vmem:[#allocation9_spill] sm:$0xff]  ;;  %v16441_v25 = vpack.i.bf16 %v14115_v34, %v14114_v41  ;;  %v2762_v41 = vld [vmem:[#allocation2 + $0x98] sm:$0xff] }
 0x236   : > { %v2684_v22 = vadd.f32 %v2643_v37, %v2151_v5  ;;  %v1545_v18 = vld [vmem:[#allocation2 + $0x100] sm:$0xff]  ;;  %v15243_v47 = vpop.f32.mrb[165].mxu1  ;;  %v2038_v16 = vmul.f32 %v21033_v52, %v21032_v32  ;;  %v2761_v37 = vld [vmem:[#allocation2 + $0x90] sm:$0xff] }
 0x237   : > { %v2078_v3 = vadd.f32 %v2037_v58, %v1545_v18  ;;  %v3027_v30 = vpop.f32.mrb[166].mxu1 }
 0x238   : > { %2725 = vst.msk [vmem:[#allocation2 + $0xb8] sm:$0xff] %vm689_vm1, %v2684_v22  ;;  %v3123_v2 = vpop.permute.xlu1 %3122  ;;  %v15244_v21 = vpop.f32.mrb[167].mxu1 }
 0x239   : > { %v3253_v8 = vmul.f32 %v3123_v2, %v18139_v31  ;;  %3207 = vperm.xlu1 %16420, %v18086_v13   ;;  %2119 = vst.msk [vmem:[#allocation2 + $0x100] sm:$0xff] %vm689_vm1, %v2078_v3  ;;  %v21034_v31 = vmov 4   ;;  %v431_v13 = vld [vmem:[%s20919_s2 + $0x120] sm:$0xff] }
 0x23a   : > { %v1546_v5 = vld [vmem:[#allocation2 + $0x108] sm:$0xff] }
 0x23b   : > { %v3294_v33 = vadd.f32 %v3253_v8, %v2761_v37  ;;  %v2079_v58 = vadd.f32 %v2038_v16, %v1546_v5  ;;  %v3704_v37 = vld [vmem:[#allocation2 + $0x70] sm:$0xff]  ;;  %v21035_v5 = vld [vmem:[#allocation30_spill] sm:$0xff] }
 0x23c   : > { %v16377_v44 = vpop.permute.xlu1 %16376 }
 0x23d   : > { %3335 = vst.msk [vmem:[#allocation2 + $0x90] sm:$0xff] %vm689_vm1, %v3294_v33  ;;  %v16379_v22 = vunpack.i.h.bf16 %v16377_v44  ;;  %v16378_v18 = vunpack.i.l.bf16 %v16377_v44  ;;  %16442 = vrot.lane.b32.xlu1 %v16441_v25, %s16539_s21  ;;  %2120 = vst.msk [vmem:[#allocation2 + $0x108] sm:$0xff] %vm689_vm1, %v2079_v58  ;;  %v2152_v25 = vld [vmem:[#allocation2 + $0xc0] sm:$0xff]  ;;  %v3705_v58 = vld [vmem:[#allocation2 + $0x78] sm:$0xff] }
 0x23e   : > { %16451 = vset.pattern.permute.xlu1 %v21034_v31  ;;  %v4130_v44 = vld [vmem:[#allocation2 + $0x71] sm:$0xff] }
 0x23f   : > { %3617 = vst.msk [vmem:[#allocation2 + $0x60] sm:$0xff] %vm3604_vm4, %v16378_v18  ;;  %3618 = vst.msk [vmem:[#allocation2 + $0x68] sm:$0xff] %vm3604_vm4, %v16379_v22  ;;  %v16520_v22 = vld [vmem:[%s16763_s27 + $0x90] sm:$0xff]  }
 0x240   : > { %v3128_v2 = vpop.permute.xlu1 %3127  ;;  %v14122_v18 = vunpack.c.l.bf16 %v16520_v22  ;;  %v810_v22 = vld [vmem:[%s20919_s2 + $0x130] sm:$0xff] }
 0x241   : > { %v3254_v16 = vmul.f32 %v3128_v2, %v18144_v62  ;;  %619 = vperm.xlu1 %16451, %v431_v13   ;;  %v766_v2 = vld [vmem:[#allocation2 + $0x118] sm:$0xff] }
 0x243   : > { %v3295_v34 = vadd.f32 %v3254_v16, %v2762_v41 }
 0x245   : > { %3336 = vst.msk [vmem:[#allocation2 + $0x98] sm:$0xff] %vm689_vm1, %v3295_v34  ;;  %16453 = vset.pattern.permute.xlu1 %v20976_v61  ;;  %v2538_v3 = vpop.permute.xlu1 %2537 }
 0x246   : > { %v2644_v47 = vmul.f32 %v2538_v3, %v18206_v17  ;;  %1982 = vperm.xlu1 %16453, %v431_v13   ;;  %v3702_v32 = vld [vmem:[#allocation2 + $0x60] sm:$0xff]  ;;  %v3703_v8 = vld [vmem:[#allocation2 + $0x68] sm:$0xff] }
 0x247   : > { %v4127_v52 = vld [vmem:[#allocation2 + $0x59] sm:$0xff]  ;;  %15265 = vmatprep.mubr.msk.f32.mxu0 %vm917_vm3, %v3702_v32  ;;  %v4128_v62 = vld [vmem:[#allocation2 + $0x61] sm:$0xff]  ;;  %v4129_v21 = vld [vmem:[#allocation2 + $0x69] sm:$0xff] }
 0x248   : > { %15319 = vmatmul.mubr.msk.f32.gmra.mrb[178].mxu1 %vm917_vm3, %v4127_v52  ;;  %v2685_v30 = vadd.f32 %v2644_v47, %v2152_v25  ;;  %15266 = vmatmul.mubr.msk.f32.gmra.mrb[180].mxu0 %vm917_vm3, %v3703_v8  ;;  %v432_v3 = vld [vmem:[%s20919_s2 + $0x128] sm:$0xff]  ;;  %v1543_v47 = vld [vmem:[#allocation2 + $0xf0] sm:$0xff]  ;;  %v3398_v52 = vld [vmem:[%s16763_s27 + $0xa0] sm:$0xf] }
 0x249   : > { %15321 = vmatprep.mubr.msk.f32.mxu1 %vm917_vm3, %v4128_v62  ;;  %15268 = vmatprep.mubr.msk.f32.mxu0 %vm917_vm3, %v3704_v37  ;;  %v16521_v62 = vld [vmem:[%s16763_s27 + $0x98] sm:$0xff]   ;;  %v3439_v37 = vunpack.c.l.bf16 %v3398_v52 }
 0x24a   : > { %2726 = vst.msk [vmem:[#allocation2 + $0xc0] sm:$0xff] %vm689_vm1, %v2685_v30  ;;  %16454 = vset.pattern.permute.xlu1 %v20982_v7  ;;  %v1363_v17 = vpop.permute.xlu1 %1362  ;;  %v14127_v30 = vunpack.c.h.bf16 %v16521_v62  ;;  %v2155_v62 = vld [vmem:[#allocation2 + $0xd8] sm:$0xff] }
 0x24b   : > { %v1425_v33 = vmul.f32 %v1363_v17, %v21035_v5  ;;  %2597 = vperm.xlu1 %16454, %v431_v13   ;;  %v21036_v13 = vld [vmem:[#allocation19_spill] sm:$0xff] }
 0x24c   : > { %15322 = vmatmul.mubr.msk.f32.gmra.mrb[180].mxu1 %vm917_vm3, %v4129_v21  ;;  %15269 = vmatmul.mubr.msk.f32.gmra.mrb[182].mxu0 %vm917_vm3, %v3705_v58  ;;  %v16477_v21 = vpack.i.bf16 %v3439_v37, %v14127_v30 }
 0x24d   : > { %15324 = vmatprep.mubr.msk.f32.mxu1 %vm917_vm3, %v4130_v44  ;;  %v1466_v16 = vadd.f32 %v1425_v33, %v766_v2  ;;  %v2763_v33 = vld [vmem:[#allocation2 + $0xa0] sm:$0xff]  ;;  %v1544_v2 = vld [vmem:[#allocation2 + $0xf8] sm:$0xff] }
 0x24e   : > { %16478 = vrot.lane.b32.xlu0 %v16477_v21, %s16539_s21 }
 0x24f   : > { %1507 = vst.msk [vmem:[#allocation2 + $0x118] sm:$0xff] %vm689_vm1, %v1466_v16  ;;  %3553 = vrot.lane.b32.xlu1 %v14122_v18, %s16539_s21  ;;  %v1953_v41 = vpop.permute.xlu1 %1952 }
 0x250   : > { %v2035_v34 = vmul.f32 %v1953_v41, %v21036_v13  ;;  %16456 = vset.pattern.permute.xlu1 %v21034_v31 }
 0x251   : > { %v2767_v32 = vld [vmem:[#allocation2 + $0xc0] sm:$0xff] }
 0x252   : > { %v2076_v8 = vadd.f32 %v2035_v34, %v1543_v47  ;;  %v3300_v25 = vadd.f32 %v18225_v35, %v2767_v32  ;;  %v13479_v35 = vld [vmem:[%s20922_s5 + $0x18] sm:$0xff]  ;;  %v2154_v34 = vld [vmem:[#allocation2 + $0xd0] sm:$0xff] }
 0x253   : > { %624 = vperm.xlu1 %16456, %v432_v3   ;;  %15413 = vmatprep.subr.mxu1 %v13479_v35 }
 0x254   : > { %2117 = vst.msk [vmem:[#allocation2 + $0xf0] sm:$0xff] %vm689_vm1, %v2076_v8  ;;  %v3133_v17 = vpop.permute.xlu1 %3132  ;;  %3341 = vst.msk [vmem:[#allocation2 + $0xc0] sm:$0xff] %vm689_vm1, %v3300_v25  ;;  %15414 = vmatpush3.msra.mxu1 %v13479_v35  ;;  %v21038_v8 = vld [vmem:[#allocation45_spill] sm:$0xff]  ;;  %v18472_v35 = vld [vmem:[%s20922_s5 + $0x20] sm:$0xff] }
 0x255   : > { %v3255_v5 = vmul.f32 %v3133_v17, %v18161_v9  ;;  %v21037_v9 = vld [vmem:[#allocation21_spill] sm:$0xff]  ;;  %v2651_v25 = vmul.f32 %v21038_v8, %v18295_v10  ;;  %15469 = vmatprep.subr.mxu0 %v18472_v35 }
 0x257   : > { %v3296_v58 = vadd.f32 %v3255_v5, %v2763_v33  ;;  %16458 = vset.pattern.permute.xlu1 %v20978_v38  ;;  %v2765_v5 = vld [vmem:[#allocation2 + $0xb0] sm:$0xff] }
 0x258   : > { %1372 = vperm.xlu1 %16458, %v432_v3  }
 0x259   : > { %3337 = vst.msk [vmem:[#allocation2 + $0xa0] sm:$0xff] %vm689_vm1, %v3296_v58  ;;  %v1958_v44 = vpop.permute.xlu1 %1957 }
 0x25a   : > { %v2036_v18 = vmul.f32 %v1958_v44, %v21037_v9  ;;  %v16440_v44 = vunpack.i.h.bf16 %v18215_v4 }
 0x25c   : > { %v2077_v16 = vadd.f32 %v2036_v18, %v1544_v2  ;;  %1377 = vperm.xlu1 %16458, %v810_v22  }
 0x25e   : > { %2118 = vst.msk [vmem:[#allocation2 + $0xf8] sm:$0xff] %vm689_vm1, %v2077_v16  ;;  %v2548_v41 = vpop.permute.xlu1 %2547 }
 0x25f   : > { %v2646_v13 = vmul.f32 %v2548_v41, %v18235_v60  ;;  %v2766_v41 = vld [vmem:[#allocation2 + $0xb8] sm:$0xff] }
 0x260   : > { %16460 = vset.pattern.permute.xlu1 %v20976_v61 }
 0x261   : > { %v2687_v47 = vadd.f32 %v2646_v13, %v2154_v34  ;;  %1992 = vperm.xlu1 %16460, %v810_v22   ;;  %v18484_v13 = vld [vmem:[%s20919_s2 + $0x138] sm:$0xff] }
 0x262   : > { %v2553_v32 = vpop.permute.xlu1 %2552 }
 0x263   : > { %2728 = vst.msk [vmem:[#allocation2 + $0xd0] sm:$0xff] %vm689_vm1, %v2687_v47  ;;  %v2647_v52 = vmul.f32 %v2553_v32, %v18238_v23  ;;  %v2157_v32 = vld [vmem:[#allocation2 + $0xe8] sm:$0xff] }
 0x265   : > { %v2159_v30 = vld [vmem:[#allocation2 + $0xf8] sm:$0xff]  ;;  %v2688_v37 = vadd.f32 %v2647_v52, %v2155_v62  ;;  %16461 = vset.pattern.permute.xlu1 %v20982_v7  ;;  %v1547_v62 = vld [vmem:[#allocation2 + $0x110] sm:$0xff] }
 0x266   : > { %v2692_v17 = vadd.f32 %v2651_v25, %v2159_v30  ;;  %2602 = vperm.xlu1 %16461, %v432_v3  }
 0x267   : > { %2729 = vst.msk [vmem:[#allocation2 + $0xd8] sm:$0xff] %vm689_vm1, %v2688_v37  ;;  %v3143_v60 = vpop.permute.xlu1 %3142 }
 0x268   : > { %2733 = vst.msk [vmem:[#allocation2 + $0xf8] sm:$0xff] %vm689_vm1, %v2692_v17  ;;  %v3257_v21 = vmul.f32 %v3143_v60, %v18187_v46 }
 0x26a   : > { %v3298_v33 = vadd.f32 %v3257_v21, %v2765_v5  ;;  %16463 = vset.pattern.permute.xlu1 %v20970_v0  ;;  %v16435_v5 = vunpack.i.h.bf16 %v18197_v55  ;;  %v1548_v55 = vld [vmem:[#allocation2 + $0x118] sm:$0xff] }
 0x26b   : > { %3217 = vperm.xlu1 %16463, %v432_v3   ;;  %v16395_v23 = vpop.permute.xlu1 %16394 }
 0x26c   : > { %3339 = vst.msk [vmem:[#allocation2 + $0xb0] sm:$0xff] %vm689_vm1, %v3298_v33  ;;  %v16397_v10 = vunpack.i.h.bf16 %v16395_v23  ;;  %v16396_v58 = vunpack.i.l.bf16 %v16395_v23 }
 0x26e   : > { %3621 = vst.msk [vmem:[#allocation2 + $0x80] sm:$0xff] %vm3604_vm4, %v16396_v58  ;;  %3622 = vst.msk [vmem:[#allocation2 + $0x88] sm:$0xff] %vm3604_vm4, %v16397_v10  ;;  %v2770_v46 = vld [vmem:[#allocation2 + $0xd8] sm:$0xff]  ;;  %v21040_v58 = vld [vmem:[#allocation31_spill] sm:$0xff] }
 0x26f   : > { %v2774_v3 = vld [vmem:[#allocation2 + $0xf8] sm:$0xff]  ;;  %3222 = vperm.xlu1 %16463, %v810_v22   ;;  %v3148_v9 = vpop.permute.xlu1 %3147  ;;  %v3303_v18 = vadd.f32 %v18257_v49, %v2770_v46 }
 0x270   : > { %v3307_v2 = vadd.f32 %v18312_v26, %v2774_v3  ;;  %v3258_v16 = vmul.f32 %v3148_v9, %v18193_v14 }
 0x271   : > { %3344 = vst.msk [vmem:[#allocation2 + $0xd8] sm:$0xff] %vm689_vm1, %v3303_v18 }
 0x272   : > { %3348 = vst.msk [vmem:[#allocation2 + $0xf8] sm:$0xff] %vm689_vm1, %v3307_v2  ;;  %v3299_v34 = vadd.f32 %v3258_v16, %v2766_v41 }
 0x273   : > { %3636 = vst.msk [vmem:[#allocation2 + $0xf8] sm:$0xff] %vm3604_vm4, %v16440_v44  ;;  %16469 = vset.pattern.permute.xlu1 %v21034_v31  ;;  %v21039_v31 = vld [vmem:[#allocation29_spill] sm:$0xff] }
 0x274   : > { %3340 = vst.msk [vmem:[#allocation2 + $0xb8] sm:$0xff] %vm689_vm1, %v3299_v34  ;;  %634 = vperm.xlu1 %16469, %v18484_v13   ;;  %v2563_v14 = vpop.permute.xlu1 %2562 }
 0x275   : > { %v2649_v49 = vmul.f32 %v2563_v14, %v18269_v11  ;;  %v3706_v26 = vld [vmem:[#allocation2 + $0x80] sm:$0xff]  ;;  %v3707_v47 = vld [vmem:[#allocation2 + $0x88] sm:$0xff] }
 0x276   : > { %v4131_v22 = vld [vmem:[#allocation2 + $0x79] sm:$0xff]  ;;  %15271 = vmatprep.mubr.msk.f32.mxu0 %vm917_vm3, %v3706_v26  ;;  %v4132_v52 = vld [vmem:[#allocation2 + $0x81] sm:$0xff] }
 0x277   : > { %15325 = vmatmul.mubr.msk.f32.gmra.mrb[182].mxu1 %vm917_vm3, %v4131_v22  ;;  %v2690_v8 = vadd.f32 %v2649_v49, %v2157_v32  ;;  %15272 = vmatmul.mubr.msk.f32.gmra.mrb[184].mxu0 %vm917_vm3, %v3707_v47 }
 0x278   : > { %15327 = vmatprep.mubr.msk.f32.mxu1 %vm917_vm3, %v4132_v52  ;;  %16471 = vset.pattern.permute.xlu1 %v20978_v38  ;;  %v21041_v52 = vld [vmem:[#allocation46_spill] sm:$0xff] }
 0x279   : > { %2731 = vst.msk [vmem:[#allocation2 + $0xe8] sm:$0xff] %vm689_vm1, %v2690_v8  ;;  %1382 = vperm.xlu1 %16471, %v18484_v13   ;;  %v1973_v11 = vpop.permute.xlu1 %1972  ;;  %v2655_v8 = vmul.f32 %v21041_v52, %v18343_v1  ;;  %v16439_v52 = vunpack.i.l.bf16 %v18215_v4 }
 0x27a   : > { %v2039_v25 = vmul.f32 %v1973_v11, %v21039_v31  ;;  %v2769_v31 = vld [vmem:[#allocation2 + $0xd0] sm:$0xff] }
 0x27c   : > { %v2080_v30 = vadd.f32 %v2039_v25, %v1547_v62  ;;  %v18535_v62 = vld [vmem:[%s20922_s5 + $0x28] sm:$0xff] }
 0x27d   : > { %1387 = vperm.xlu1 %16471, %v18249_v29   ;;  %v16403_v37 = vpop.permute.xlu1 %16402  ;;  %15525 = vmatprep.subr.mxu1 %v18535_v62 }
 0x27e   : > { %2121 = vst.msk [vmem:[#allocation2 + $0x110] sm:$0xff] %vm689_vm1, %v2080_v30  ;;  %v16405_v17 = vunpack.i.h.bf16 %v16403_v37  ;;  %v16404_v60 = vunpack.i.l.bf16 %v16403_v37 }
 0x27f   : > { %v15249_v21 = vpop.f32.mrb[168].mxu0 }
 0x280   : > { %v2772_v38 = vld [vmem:[#allocation2 + $0xe8] sm:$0xff]  ;;  %3623 = vst.msk [vmem:[#allocation2 + $0x90] sm:$0xff] %vm3604_vm4, %v16404_v60  ;;  %3624 = vst.msk [vmem:[#allocation2 + $0x98] sm:$0xff] %vm3604_vm4, %v16405_v17  ;;  %v3901_v33 = vpop.f32.mrb[169].mxu0  ;;  %v2160_v60 = vld [vmem:[#allocation2 + $0x100] sm:$0xff] }
 0x281   : > { %4081 = vst.msk [vmem:[#allocation4 + $0x8] sm:$0xff] %vm689_vm1, %v15249_v21  ;;  %v3305_v23 = vadd.f32 %v18277_v28, %v2772_v38  ;;  %4080 = vst.msk [vmem:[#allocation4] sm:$0xff] %vm689_vm1, %v3901_v33  ;;  %16473 = vset.pattern.permute.xlu1 %v20976_v61  ;;  %v1978_v10 = vpop.permute.xlu1 %1977  ;;  %v2158_v28 = vld [vmem:[#allocation2 + $0xf0] sm:$0xff]  ;;  %v2161_v38 = vld [vmem:[#allocation2 + $0x108] sm:$0xff] }
 0x282   : > { %v2040_v46 = vmul.f32 %v1978_v10, %v21040_v58  ;;  %2002 = vperm.xlu1 %16473, %v18249_v29  }
 0x283   : > { %3346 = vst.msk [vmem:[#allocation2 + $0xe8] sm:$0xff] %vm689_vm1, %v3305_v23 }
 0x284   : > { %3634 = vst.msk [vmem:[#allocation2 + $0xe8] sm:$0xff] %vm3604_vm4, %v16435_v5  ;;  %v2081_v44 = vadd.f32 %v2040_v46, %v1548_v55 }
 0x286   : > { %v15305_v3 = vpop.f32.mrb[168].mxu1  ;;  %2122 = vst.msk [vmem:[#allocation2 + $0x118] sm:$0xff] %vm689_vm1, %v2081_v44  ;;  %v2568_v9 = vpop.permute.xlu1 %2567  ;;  %16474 = vset.pattern.permute.xlu1 %v20982_v7 }
 0x287   : > { %v4328_v18 = vpop.f32.mrb[169].mxu1  ;;  %v2650_v2 = vmul.f32 %v2568_v9, %v18284_v12  ;;  %v15252_v16 = vpop.f32.mrb[170].mxu0  ;;  %v3708_v41 = vld [vmem:[#allocation2 + $0x90] sm:$0xff]  ;;  %2612 = vperm.xlu1 %16474, %v18484_v13   ;;  %v3709_v22 = vld [vmem:[#allocation2 + $0x98] sm:$0xff] }
 0x288   : > { %v4508_v61 = vld [vmem:[#allocation4 + $0x8] sm:$0xff]  ;;  %v4133_v34 = vld [vmem:[#allocation2 + $0x89] sm:$0xff]  ;;  %4083 = vst.msk [vmem:[#allocation4 + $0x18] sm:$0xff] %vm689_vm1, %v15252_v16  ;;  %v3911_v26 = vpop.f32.mrb[171].mxu0  ;;  %15274 = vmatprep.mubr.msk.f32.mxu0 %vm917_vm3, %v3708_v41 }
 0x289   : > { %v4544_v14 = vadd.f32 %v15305_v3, %v4508_v61  ;;  %v4507_v49 = vld [vmem:[#allocation4] sm:$0xff]  ;;  %15328 = vmatmul.mubr.msk.f32.gmra.mrb[184].mxu1 %vm917_vm3, %v4133_v34  ;;  %v2691_v7 = vadd.f32 %v2650_v2, %v2158_v28  ;;  %4082 = vst.msk [vmem:[#allocation4 + $0x10] sm:$0xff] %vm689_vm1, %v3911_v26  ;;  %15275 = vmatmul.mubr.msk.f32.gmra.mrb[186].mxu0 %vm917_vm3, %v3709_v22 }
 0x28a   : > { %v4134_v47 = vld [vmem:[#allocation2 + $0x91] sm:$0xff]  ;;  %v4543_v32 = vadd.f32 %v4507_v49, %v4328_v18 }
 0x28b   : > { %15330 = vmatprep.mubr.msk.f32.mxu1 %vm917_vm3, %v4134_v47  ;;  %4580 = vst.msk [vmem:[#allocation4 + $0x8] sm:$0xff] %vm689_vm1, %v4544_v14  ;;  %2732 = vst.msk [vmem:[#allocation2 + $0xf0] sm:$0xff] %vm689_vm1, %v2691_v7  ;;  %v3163_v12 = vpop.permute.xlu1 %3162  ;;  %16476 = vset.pattern.permute.xlu1 %v20970_v0  ;;  %v2162_v41 = vld [vmem:[#allocation2 + $0x110] sm:$0xff] }
 0x28c   : > { %4579 = vst.msk [vmem:[#allocation4] sm:$0xff] %vm689_vm1, %v4543_v32  ;;  %v3261_v11 = vmul.f32 %v3163_v12, %v18243_v57  ;;  %3227 = vperm.xlu1 %16476, %v18484_v13  }
 0x28d   : > { %v2163_v25 = vld [vmem:[#allocation2 + $0x118] sm:$0xff] }
 0x28e   : > { %v3302_v30 = vadd.f32 %v3261_v11, %v2769_v31  ;;  %v2696_v37 = vadd.f32 %v2655_v8, %v2163_v25 }
 0x28f   : > { %v16410_v17 = vpop.permute.xlu1 %16409  ;;  %v4510_v9 = vld [vmem:[#allocation4 + $0x18] sm:$0xff] }
 0x290   : > { %3343 = vst.msk [vmem:[#allocation2 + $0xd0] sm:$0xff] %vm689_vm1, %v3302_v30  ;;  %v16412_v0 = vunpack.i.h.bf16 %v16410_v17  ;;  %v16411_v1 = vunpack.i.l.bf16 %v16410_v17  ;;  %3232 = vperm.xlu1 %16476, %v18249_v29   ;;  %2737 = vst.msk [vmem:[#allocation2 + $0x118] sm:$0xff] %vm689_vm1, %v2696_v37  ;;  %v4509_v16 = vld [vmem:[#allocation4 + $0x10] sm:$0xff] }
 0x292   : > { %3625 = vst.msk [vmem:[#allocation2 + $0xa0] sm:$0xff] %vm3604_vm4, %v16411_v1  ;;  %3626 = vst.msk [vmem:[#allocation2 + $0xa8] sm:$0xff] %vm3604_vm4, %v16412_v0  ;;  %v2773_v8 = vld [vmem:[#allocation2 + $0xf0] sm:$0xff] }
 0x293   : > { %v2578_v57 = vpop.permute.xlu1 %2577 }
 0x294   : > { %v2652_v13 = vmul.f32 %v2578_v57, %v18317_v20 }
 0x296   : > { %v2693_v21 = vadd.f32 %v2652_v13, %v2160_v60 }
 0x297   : > { %v2583_v5 = vpop.permute.xlu1 %2582 }
 0x298   : > { %2734 = vst.msk [vmem:[#allocation2 + $0x100] sm:$0xff] %vm689_vm1, %v2693_v21  ;;  %v2653_v33 = vmul.f32 %v2583_v5, %v18323_v27 }
 0x299   : > { %v3710_v23 = vld [vmem:[#allocation2 + $0xa0] sm:$0xff]  ;;  %v3711_v29 = vld [vmem:[#allocation2 + $0xa8] sm:$0xff] }
 0x29a   : > { %v4135_v10 = vld [vmem:[#allocation2 + $0x99] sm:$0xff]  ;;  %v2694_v58 = vadd.f32 %v2653_v33, %v2161_v38  ;;  %15277 = vmatprep.mubr.msk.f32.mxu0 %vm917_vm3, %v3710_v23  ;;  %v4136_v46 = vld [vmem:[#allocation2 + $0xa1] sm:$0xff]  ;;  %v16449_v33 = vunpack.i.l.bf16 %v18227_v48 }
 0x29b   : > { %15331 = vmatmul.mubr.msk.f32.gmra.mrb[186].mxu1 %vm917_vm3, %v4135_v10  ;;  %v16416_v55 = vpop.permute.xlu1 %16415  ;;  %15278 = vmatmul.mubr.msk.f32.gmra.mrb[188].mxu0 %vm917_vm3, %v3711_v29 }
 0x29c   : > { %15333 = vmatprep.mubr.msk.f32.mxu1 %vm917_vm3, %v4136_v46  ;;  %2735 = vst.msk [vmem:[#allocation2 + $0x108] sm:$0xff] %vm689_vm1, %v2694_v58  ;;  %v16418_v20 = vunpack.i.h.bf16 %v16416_v55  ;;  %v16417_v44 = vunpack.i.l.bf16 %v16416_v55  ;;  %v2778_v58 = vld [vmem:[#allocation2 + $0x118] sm:$0xff]  ;;  %v3718_v55 = vld [vmem:[#allocation2 + $0xe0] sm:$0xff] }
 0x29e   : > { %3627 = vst.msk [vmem:[#allocation2 + $0xb0] sm:$0xff] %vm3604_vm4, %v16417_v44  ;;  %3628 = vst.msk [vmem:[#allocation2 + $0xb8] sm:$0xff] %vm3604_vm4, %v16418_v20  ;;  %v16450_v20 = vunpack.i.h.bf16 %v18227_v48 }
 0x29f   : > { %v2588_v27 = vpop.permute.xlu1 %2587  ;;  %v2775_v37 = vld [vmem:[#allocation2 + $0x100] sm:$0xff] }
 0x2a0   : > { %v15308_v3 = vpop.f32.mrb[170].mxu1  ;;  %v2654_v28 = vmul.f32 %v2588_v27, %v18340_v53  ;;  %v15255_v61 = vpop.f32.mrb[172].mxu0 }
 0x2a1   : > { %v4546_v18 = vadd.f32 %v15308_v3, %v4510_v9  ;;  %v4338_v2 = vpop.f32.mrb[171].mxu1  ;;  %4085 = vst.msk [vmem:[#allocation4 + $0x28] sm:$0xff] %vm689_vm1, %v15255_v61  ;;  %v3921_v14 = vpop.f32.mrb[173].mxu0  ;;  %v4144_v61 = vld [vmem:[#allocation2 + $0xe1] sm:$0xff] }
 0x2a2   : > { %v4545_v34 = vadd.f32 %v4509_v16, %v4338_v2  ;;  %v2695_v49 = vadd.f32 %v2654_v28, %v2162_v41  ;;  %4084 = vst.msk [vmem:[#allocation4 + $0x20] sm:$0xff] %vm689_vm1, %v3921_v14 }
 0x2a3   : > { %4582 = vst.msk [vmem:[#allocation4 + $0x18] sm:$0xff] %vm689_vm1, %v4546_v18  ;;  %v2776_v26 = vld [vmem:[#allocation2 + $0x108] sm:$0xff] }
 0x2a4   : > { %4581 = vst.msk [vmem:[#allocation4 + $0x10] sm:$0xff] %vm689_vm1, %v4545_v34  ;;  %2736 = vst.msk [vmem:[#allocation2 + $0x110] sm:$0xff] %vm689_vm1, %v2695_v49  ;;  %v3183_v53 = vpop.permute.xlu1 %3182  ;;  %v3309_v22 = vadd.f32 %v18338_v50, %v2776_v26  ;;  %v3719_v18 = vld [vmem:[#allocation2 + $0xe8] sm:$0xff]  ;;  %v18600_v49 = vld [vmem:[%s20921_s4] ss:$0 sm:$0xff] }
 0x2a5   : > { %v3265_v47 = vmul.f32 %v3183_v53, %v18302_v24  ;;  %v3712_v7 = vld [vmem:[#allocation2 + $0xb0] sm:$0xff]  ;;  %v3713_v12 = vld [vmem:[#allocation2 + $0xb8] sm:$0xff] }
 0x2a6   : > { %v4137_v32 = vld [vmem:[#allocation2 + $0xa9] sm:$0xff]  ;;  %15280 = vmatprep.mubr.msk.f32.mxu0 %vm917_vm3, %v3712_v7  ;;  %v4138_v11 = vld [vmem:[#allocation2 + $0xb1] sm:$0xff]  ;;  %3350 = vst.msk [vmem:[#allocation2 + $0x108] sm:$0xff] %vm689_vm1, %v3309_v22 }
 0x2a7   : > { %15334 = vmatmul.mubr.msk.f32.gmra.mrb[188].mxu1 %vm917_vm3, %v4137_v32  ;;  %v3306_v31 = vadd.f32 %v3265_v47, %v2773_v8  ;;  %15281 = vmatmul.mubr.msk.f32.gmra.mrb[190].mxu0 %vm917_vm3, %v3713_v12  ;;  %v3721_v32 = vld [vmem:[#allocation2 + $0xf8] sm:$0xff] }
 0x2a8   : > { %15336 = vmatprep.mubr.msk.f32.mxu1 %vm917_vm3, %v4138_v11  ;;  %v16423_v50 = vpop.permute.xlu1 %16422  ;;  %v4512_v14 = vld [vmem:[#allocation4 + $0x28] sm:$0xff] }
 0x2a9   : > { %3347 = vst.msk [vmem:[#allocation2 + $0xf0] sm:$0xff] %vm689_vm1, %v3306_v31  ;;  %v16425_v24 = vunpack.i.h.bf16 %v16423_v50  ;;  %v16424_v25 = vunpack.i.l.bf16 %v16423_v50  ;;  %v4511_v7 = vld [vmem:[#allocation4 + $0x20] sm:$0xff] }
 0x2aa   : > { %3635 = vst.msk [vmem:[#allocation2 + $0xf0] sm:$0xff] %vm3604_vm4, %v16439_v52 }
 0x2ab   : > { %3629 = vst.msk [vmem:[#allocation2 + $0xc0] sm:$0xff] %vm3604_vm4, %v16424_v25  ;;  %3630 = vst.msk [vmem:[#allocation2 + $0xc8] sm:$0xff] %vm3604_vm4, %v16425_v24  ;;  %v2777_v23 = vld [vmem:[#allocation2 + $0x110] sm:$0xff] }
 0x2ac   : > { %v3193_v4 = vpop.permute.xlu1 %3192 }
 0x2ad   : > { %v3267_v30 = vmul.f32 %v3193_v4, %v18331_v54 }
 0x2af   : > { %v3308_v17 = vadd.f32 %v3267_v30, %v2775_v37 }
 0x2b0   : > { %v16428_v0 = vpop.permute.xlu1 %16427 }
 0x2b1   : > { %3349 = vst.msk [vmem:[#allocation2 + $0x100] sm:$0xff] %vm689_vm1, %v3308_v17  ;;  %v16430_v1 = vunpack.i.h.bf16 %v16428_v0  ;;  %v16429_v57 = vunpack.i.l.bf16 %v16428_v0  ;;  %v3720_v16 = vld [vmem:[#allocation2 + $0xf0] sm:$0xff] }
 0x2b2   : > { %v3714_v13 = vld [vmem:[#allocation2 + $0xc0] sm:$0xff]  ;;  %v3715_v21 = vld [vmem:[#allocation2 + $0xc8] sm:$0xff]  ;;  %v4146_v12 = vld [vmem:[#allocation2 + $0xf1] sm:$0xff] }
 0x2b3   : > { %v4139_v60 = vld [vmem:[#allocation2 + $0xb9] sm:$0xff]  ;;  %3631 = vst.msk [vmem:[#allocation2 + $0xd0] sm:$0xff] %vm3604_vm4, %v16429_v57  ;;  %3632 = vst.msk [vmem:[#allocation2 + $0xd8] sm:$0xff] %vm3604_vm4, %v16430_v1  ;;  %15283 = vmatprep.mubr.msk.f32.mxu0 %vm917_vm3, %v3714_v13  ;;  %v4140_v5 = vld [vmem:[#allocation2 + $0xc1] sm:$0xff] }
 0x2b4   : > { %15337 = vmatmul.mubr.msk.f32.gmra.mrb[190].mxu1 %vm917_vm3, %v4139_v60  ;;  %v3203_v54 = vpop.permute.xlu1 %3202  ;;  %15284 = vmatmul.mubr.msk.f32.gmra.mrb[192].mxu0 %vm917_vm3, %v3715_v21  ;;  %v4145_v11 = vld [vmem:[#allocation2 + $0xe9] sm:$0xff] }
 0x2b5   : > { %15339 = vmatprep.mubr.msk.f32.mxu1 %vm917_vm3, %v4140_v5  ;;  %v3269_v38 = vmul.f32 %v3203_v54, %v18349_v51 }
 0x2b7   : > { %v3310_v10 = vadd.f32 %v3269_v38, %v2777_v23 }
 0x2b8   : > { %v3208_v29 = vpop.permute.xlu1 %3207 }
 0x2b9   : > { %3351 = vst.msk [vmem:[#allocation2 + $0x110] sm:$0xff] %vm689_vm1, %v3310_v10  ;;  %v3270_v46 = vmul.f32 %v3208_v29, %v18352_v39  ;;  %v4615_v29 = vld [vmem:[#allocation2 + $0x2] sm:$0xff] }
 0x2ba   : > { %3639 = vst.msk [vmem:[#allocation2 + $0x110] sm:$0xff] %vm3604_vm4, %v16449_v33  ;;  %v3716_v44 = vld [vmem:[#allocation2 + $0xd0] sm:$0xff]  ;;  %v3717_v3 = vld [vmem:[#allocation2 + $0xd8] sm:$0xff] }
 0x2bb   : > { %v4141_v27 = vld [vmem:[#allocation2 + $0xc9] sm:$0xff]  ;;  %v3311_v9 = vadd.f32 %v3270_v46, %v2778_v58  ;;  %15286 = vmatprep.mubr.msk.f32.mxu0 %vm917_vm3, %v3716_v44  ;;  %v4142_v51 = vld [vmem:[#allocation2 + $0xd1] sm:$0xff]  ;;  %v4143_v2 = vld [vmem:[#allocation2 + $0xd9] sm:$0xff] }
 0x2bc   : > { %15340 = vmatmul.mubr.msk.f32.gmra.mrb[192].mxu1 %vm917_vm3, %v4141_v27  ;;  %v16443_v28 = vpop.permute.xlu1 %16442  ;;  %15287 = vmatmul.mubr.msk.f32.gmra.mrb[194].mxu0 %vm917_vm3, %v3717_v3  ;;  %v4616_v46 = vld [vmem:[#allocation2 + $0xa] sm:$0xff]  ;;  %v21042_v44 = vld [vmem:[#allocation34_spill] sm:$0xff] }
 0x2bd   : > { %15342 = vmatprep.mubr.msk.f32.mxu1 %vm917_vm3, %v4142_v51  ;;  %3352 = vst.msk [vmem:[#allocation2 + $0x118] sm:$0xff] %vm689_vm1, %v3311_v9  ;;  %v16445_v39 = vunpack.i.h.bf16 %v16443_v28  ;;  %v16444_v48 = vunpack.i.l.bf16 %v16443_v28  ;;  %15289 = vmatprep.mubr.msk.f32.mxu0 %vm917_vm3, %v3718_v55  ;;  %v18635_v55 = vld [vmem:[#allocation2 + $0x12] sm:$0xff]  ;;  %v18643_v9 = vld [vmem:[#allocation2 + $0x1a] sm:$0xff]  ;;  %v18647_v28 = vld [vmem:[#allocation2 + $0x22] sm:$0xff] }
 0x2be   : > { %3640 = vst.msk [vmem:[#allocation2 + $0x118] sm:$0xff] %vm3604_vm4, %v16450_v20 }
 0x2bf   : > { %3637 = vst.msk [vmem:[#allocation2 + $0x100] sm:$0xff] %vm3604_vm4, %v16444_v48  ;;  %3638 = vst.msk [vmem:[#allocation2 + $0x108] sm:$0xff] %vm3604_vm4, %v16445_v39  ;;  %v18653_v48 = vld [vmem:[#allocation2 + $0x2a] sm:$0xff] }
 0x2c0   : > { %15343 = vmatmul.mubr.msk.f32.gmra.mrb[194].mxu1 %vm917_vm3, %v4143_v2  ;;  %v620_v41 = vpop.permute.xlu1 %619  ;;  %15290 = vmatmul.mubr.msk.f32.gmra.mrb[196].mxu0 %vm917_vm3, %v3719_v18  ;;  %v18657_v18 = vld [vmem:[#allocation2 + $0x32] sm:$0xff]  ;;  %v21043_v2 = vld [vmem:[#allocation35_spill] sm:$0xff] }
 0x2c1   : > { %v15311_v34 = vpop.f32.mrb[172].mxu1  ;;  %15345 = vmatprep.mubr.msk.f32.mxu1 %vm917_vm3, %v4144_v61  ;;  %v684_v26 = vmul.f32 %v18600_v49, %v620_v41  ;;  %v15258_v22 = vpop.f32.mrb[174].mxu0  ;;  %15292 = vmatprep.mubr.msk.f32.mxu0 %vm917_vm3, %v3720_v16  ;;  %v3724_v25 = vld [vmem:[#allocation2 + $0x110] sm:$0xff] }
 0x2c2   : > { %v4548_v53 = vadd.f32 %v15311_v34, %v4512_v14  ;;  %v4348_v47 = vpop.f32.mrb[173].mxu1  ;;  %4087 = vst.msk [vmem:[#allocation4 + $0x38] sm:$0xff] %vm689_vm1, %v15258_v22  ;;  %v3931_v8 = vpop.f32.mrb[175].mxu0  ;;  %v769_v41 = vld [vmem:[#allocation2 + $0x130] sm:$0xff]  ;;  %v18663_v14 = vld [vmem:[#allocation2 + $0x3a] sm:$0xff] }
 0x2c3   : > { %v4547_v52 = vadd.f32 %v4511_v7, %v4348_v47  ;;  %726 = vst.msk [vmem:[#allocation2 + $0x120] sm:$0xff] %vm689_vm1, %v684_v26  ;;  %4086 = vst.msk [vmem:[#allocation4 + $0x30] sm:$0xff] %vm689_vm1, %v3931_v8  ;;  %v18668_v47 = vld [vmem:[#allocation2 + $0x42] sm:$0xff]  ;;  %v18678_v8 = vld [vmem:[#allocation2 + $0x52] sm:$0xff] }
 0x2c4   : > { %4584 = vst.msk [vmem:[#allocation4 + $0x28] sm:$0xff] %vm689_vm1, %v4548_v53  ;;  %15346 = vmatmul.mubr.msk.f32.gmra.mrb[196].mxu1 %vm917_vm3, %v4145_v11  ;;  %15293 = vmatmul.mubr.msk.f32.gmra.mrb[198].mxu0 %vm917_vm3, %v3721_v32  ;;  %v21044_v53 = vld [vmem:[#allocation38_spill] sm:$0xff] }
 0x2c5   : > { %4583 = vst.msk [vmem:[#allocation4 + $0x20] sm:$0xff] %vm689_vm1, %v4547_v52  ;;  %v15314_v31 = vpop.f32.mrb[174].mxu1  ;;  %15348 = vmatprep.mubr.msk.f32.mxu1 %vm917_vm3, %v4146_v12  ;;  %v1983_v50 = vpop.permute.xlu1 %1982  ;;  %v3725_v13 = vld [vmem:[#allocation2 + $0x118] sm:$0xff]  ;;  %v18673_v52 = vld [vmem:[#allocation2 + $0x4a] sm:$0xff] }
 0x2c6   : > { %v15261_v24 = vpop.f32.mrb[176].mxu0  ;;  %v4358_v4 = vpop.f32.mrb[175].mxu1  ;;  %v3722_v37 = vld [vmem:[#allocation2 + $0x100] sm:$0xff]  ;;  %v3723_v0 = vld [vmem:[#allocation2 + $0x108] sm:$0xff]  ;;  %v4150_v60 = vld [vmem:[#allocation2 + $0x111] sm:$0xff]  ;;  %v2041_v27 = vmul.f32 %v1983_v50, %v21042_v44 }
 0x2c7   : > { %4089 = vst.msk [vmem:[#allocation4 + $0x48] sm:$0xff] %vm689_vm1, %v15261_v24  ;;  %v3941_v30 = vpop.f32.mrb[177].mxu0  ;;  %v4147_v17 = vld [vmem:[#allocation2 + $0xf9] sm:$0xff]  ;;  %15295 = vmatprep.mubr.msk.f32.mxu0 %vm917_vm3, %v3722_v37  ;;  %v4148_v1 = vld [vmem:[#allocation2 + $0x101] sm:$0xff]  ;;  %v4149_v33 = vld [vmem:[#allocation2 + $0x109] sm:$0xff] }
 0x2c8   : > { %4088 = vst.msk [vmem:[#allocation4 + $0x40] sm:$0xff] %vm689_vm1, %v3941_v30  ;;  %15349 = vmatmul.mubr.msk.f32.gmra.mrb[198].mxu1 %vm917_vm3, %v4147_v17  ;;  %15296 = vmatmul.mubr.msk.f32.gmra.mrb[200].mxu0 %vm917_vm3, %v3723_v0  ;;  %v18687_v50 = vld [vmem:[#allocation2 + $0x62] sm:$0xff]  ;;  %v18693_v0 = vld [vmem:[#allocation2 + $0x6a] sm:$0xff] }
 0x2c9   : > { %15351 = vmatprep.mubr.msk.f32.mxu1 %vm917_vm3, %v4148_v1  ;;  %v4514_v57 = vld [vmem:[#allocation4 + $0x38] sm:$0xff]  ;;  %15298 = vmatprep.mubr.msk.f32.mxu0 %vm917_vm3, %v3724_v25  ;;  %v21045_v25 = vld [vmem:[#allocation39_spill] sm:$0xff] }
 0x2ca   : > { %v767_v21 = vld [vmem:[#allocation2 + $0x120] sm:$0xff]  ;;  %v4550_v5 = vadd.f32 %v15314_v31, %v4514_v57  ;;  %v2598_v38 = vpop.permute.xlu1 %2597 }
 0x2cb   : > { %v4513_v54 = vld [vmem:[#allocation4 + $0x30] sm:$0xff]  ;;  %v1467_v23 = vadd.f32 %v18241_v36, %v767_v21  ;;  %v18632_v36 = vld [vmem:[%s20922_s5 + $0x30] sm:$0xff]  ;;  %v2656_v61 = vmul.f32 %v2598_v38, %v18355_v6 }
 0x2cc   : > { %v4549_v10 = vadd.f32 %v4513_v54, %v4358_v4  ;;  %15352 = vmatmul.mubr.msk.f32.gmra.mrb[200].mxu1 %vm917_vm3, %v4149_v33  ;;  %4586 = vst.msk [vmem:[#allocation4 + $0x38] sm:$0xff] %vm689_vm1, %v4550_v5  ;;  %15299 = vmatmul.mubr.msk.f32.gmra.mrb[202].mxu0 %vm917_vm3, %v3725_v13  ;;  %v18683_v31 = vld [vmem:[#allocation2 + $0x5a] sm:$0xff]  ;;  %v18697_v13 = vld [vmem:[#allocation2 + $0x72] sm:$0xff]  ;;  %v18711_v5 = vld [vmem:[#allocation2 + $0x82] sm:$0xff] }
 0x2cd   : > { %15354 = vmatprep.mubr.msk.f32.mxu1 %vm917_vm3, %v4150_v60  ;;  %1508 = vst.msk [vmem:[#allocation2 + $0x120] sm:$0xff] %vm689_vm1, %v1467_v23  ;;  %15359 = vmatprep.mubr.msk.f32.mxu0 %vm917_vm3, %v4615_v29  ;;  %v18716_v38 = vld [vmem:[#allocation2 + $0x8a] sm:$0xff]  ;;  %v18720_v23 = vld [vmem:[#allocation2 + $0x92] sm:$0xff] }
 0x2ce   : > { %4585 = vst.msk [vmem:[#allocation4 + $0x30] sm:$0xff] %vm689_vm1, %v4549_v10  ;;  %v18627_v58 = vpop.permute.xlu1 %3553 }
 0x2d0   : > { %15360 = vmatmul.mubr.msk.f32.vlgmr.msra.gmra.mrb[204].mxu0 %vm917_vm3, %v4616_v46 }
 0x2d1   : > { %15470 = vmatpush3.msra.mxu0 %v18472_v35  ;;  %15362 = vmatprep.mubr.msk.f32.mxu0 %vm917_vm3, %v18635_v55 }
 0x2d2   : > { %v625_v20 = vpop.permute.xlu1 %624  ;;  %15581 = vmatprep.subr.mxu0 %v18632_v36 }
 0x2d3   : > { %v685_v3 = vmul.f32 %v18600_v49, %v625_v20  ;;  %v18726_v20 = vld [vmem:[#allocation2 + $0x9a] sm:$0xff] }
 0x2d4   : > { %v1549_v51 = vld [vmem:[#allocation2 + $0x120] sm:$0xff]  ;;  %15363 = vmatmul.mubr.msk.f32.gmra.mrb[206].mxu0 %vm917_vm3, %v18643_v9 }
 0x2d5   : > { %v2082_v39 = vadd.f32 %v2041_v27, %v1549_v51  ;;  %727 = vst.msk [vmem:[#allocation2 + $0x128] sm:$0xff] %vm689_vm1, %v685_v3  ;;  %15365 = vmatprep.mubr.msk.f32.mxu0 %vm917_vm3, %v18647_v28  ;;  %v18733_v27 = vld [vmem:[#allocation2 + $0xa2] sm:$0xff]  ;;  %v18741_v3 = vld [vmem:[#allocation2 + $0xaa] sm:$0xff] }
 0x2d7   : > { %2123 = vst.msk [vmem:[#allocation2 + $0x120] sm:$0xff] %vm689_vm1, %v2082_v39  ;;  %v1373_v35 = vpop.permute.xlu1 %1372  ;;  %v18748_v39 = vld [vmem:[#allocation2 + $0xb2] sm:$0xff] }
 0x2d8   : > { %15366 = vmatmul.mubr.msk.f32.gmra.mrb[208].mxu0 %vm917_vm3, %v18653_v48  ;;  %v1427_v16 = vmul.f32 %v1373_v35, %v21043_v2  ;;  %v18762_v2 = vld [vmem:[#allocation2 + $0xba] sm:$0xff] }
 0x2d9   : > { %15368 = vmatprep.mubr.msk.f32.mxu0 %vm917_vm3, %v18657_v18 }
 0x2db   : > { %v1378_v34 = vpop.permute.xlu1 %1377 }
 0x2dc   : > { %v768_v26 = vld [vmem:[#allocation2 + $0x128] sm:$0xff]  ;;  %v1428_v22 = vmul.f32 %v1378_v34, %v21044_v53  ;;  %15369 = vmatmul.mubr.msk.f32.gmra.mrb[210].mxu0 %vm917_vm3, %v18663_v14 }
 0x2dd   : > { %v1468_v7 = vadd.f32 %v1427_v16, %v768_v26  ;;  %15371 = vmatprep.mubr.msk.f32.mxu0 %vm917_vm3, %v18668_v47  ;;  %v771_v26 = vld [vmem:[#allocation2 + $0x140] sm:$0xff] }
 0x2de   : > { %v2164_v32 = vld [vmem:[#allocation2 + $0x120] sm:$0xff]  ;;  %v1469_v6 = vadd.f32 %v1428_v22, %v769_v41  ;;  %v21046_v41 = vld [vmem:[#allocation40_spill] sm:$0xff] }
 0x2df   : > { %v2697_v12 = vadd.f32 %v2656_v61, %v2164_v32  ;;  %1509 = vst.msk [vmem:[#allocation2 + $0x128] sm:$0xff] %vm689_vm1, %v1468_v7 }
 0x2e0   : > { %1510 = vst.msk [vmem:[#allocation2 + $0x130] sm:$0xff] %vm689_vm1, %v1469_v6  ;;  %15372 = vmatmul.mubr.msk.f32.gmra.mrb[212].mxu0 %vm917_vm3, %v18673_v52  ;;  %v1993_v11 = vpop.permute.xlu1 %1992  ;;  %v4516_v6 = vld [vmem:[#allocation4 + $0x48] sm:$0xff] }
 0x2e1   : > { %2738 = vst.msk [vmem:[#allocation2 + $0x120] sm:$0xff] %vm689_vm1, %v2697_v12  ;;  %15374 = vmatprep.mubr.msk.f32.mxu0 %vm917_vm3, %v18678_v8  ;;  %v2043_v4 = vmul.f32 %v1993_v11, %v21045_v25  ;;  %v18781_v12 = vld [vmem:[#allocation2 + $0xca] sm:$0xff] }
 0x2e4   : > { %15375 = vmatmul.mubr.msk.f32.gmra.mrb[214].mxu0 %vm917_vm3, %v18683_v31 }
 0x2e5   : > { %15377 = vmatprep.mubr.msk.f32.mxu0 %vm917_vm3, %v18687_v50  ;;  %v2603_v24 = vpop.permute.xlu1 %2602 }
 0x2e6   : > { %v1550_v30 = vld [vmem:[#allocation2 + $0x128] sm:$0xff] }
 0x2e7   : > { %v1551_v37 = vld [vmem:[#allocation2 + $0x130] sm:$0xff]  ;;  %v2083_v17 = vadd.f32 %v18282_v40, %v1550_v30  ;;  %v18705_v40 = vld [vmem:[#allocation2 + $0x7a] sm:$0xff] }
 0x2e8   : > { %v2779_v1 = vld [vmem:[#allocation2 + $0x120] sm:$0xff]  ;;  %v2084_v57 = vadd.f32 %v2043_v4, %v1551_v37  ;;  %15378 = vmatmul.mubr.msk.f32.gmra.mrb[216].mxu0 %vm917_vm3, %v18693_v0  ;;  %v4515_v4 = vld [vmem:[#allocation4 + $0x40] sm:$0xff] }
 0x2e9   : > { %v3312_v60 = vadd.f32 %v18366_v56, %v2779_v1  ;;  %2124 = vst.msk [vmem:[#allocation2 + $0x128] sm:$0xff] %vm689_vm1, %v2083_v17  ;;  %15380 = vmatprep.mubr.msk.f32.mxu0 %vm917_vm3, %v18697_v13  ;;  %v2657_v56 = vmul.f32 %v2603_v24, %v18361_v15  ;;  %v1998_v17 = vpop.permute.xlu0 %1997 }
 0x2ea   : > { %2125 = vst.msk [vmem:[#allocation2 + $0x130] sm:$0xff] %vm689_vm1, %v2084_v57  ;;  %v3218_v21 = vpop.permute.xlu1 %3217  ;;  %v18805_v57 = vld [vmem:[#allocation2 + $0xe2] sm:$0xff] }
 0x2eb   : > { %3353 = vst.msk [vmem:[#allocation2 + $0x120] sm:$0xff] %vm689_vm1, %v3312_v60 }
 0x2ec   : > { %3641 = vst.msk [vmem:[#allocation2 + $0x120] sm:$0xff] %vm3604_vm4, %v18627_v58  ;;  %15381 = vmatmul.mubr.msk.f32.gmra.mrb[218].mxu0 %vm917_vm3, %v18705_v40 }
 0x2ed   : > { %15383 = vmatprep.mubr.msk.f32.mxu0 %vm917_vm3, %v18711_v5 }
 0x2ee   : > { %v3223_v54 = vpop.permute.xlu1 %3222 }
 0x2f0   : > { %v2165_v33 = vld [vmem:[#allocation2 + $0x128] sm:$0xff]  ;;  %15384 = vmatmul.mubr.msk.f32.gmra.mrb[220].mxu0 %vm917_vm3, %v18716_v38 }
 0x2f1   : > { %v2698_v10 = vadd.f32 %v2657_v56, %v2165_v33  ;;  %v2166_v29 = vld [vmem:[#allocation2 + $0x130] sm:$0xff]  ;;  %15386 = vmatprep.mubr.msk.f32.mxu0 %vm917_vm3, %v18720_v23 }
 0x2f2   : > { %v2699_v58 = vadd.f32 %v18376_v45, %v2166_v29  ;;  %v3272_v45 = vmul.f32 %v3218_v21, %v18368_v42  ;;  %v16467_v42 = vunpack.i.l.bf16 %v18308_v59  ;;  %v21049_v21 = vld [vmem:[#allocation44_spill] sm:$0xff] }
 0x2f3   : > { %2739 = vst.msk [vmem:[#allocation2 + $0x128] sm:$0xff] %vm689_vm1, %v2698_v10  ;;  %v635_v15 = vpop.permute.xlu1 %634  ;;  %v4151_v46 = vld [vmem:[#allocation2 + $0x119] sm:$0xff] }
 0x2f4   : > { %2740 = vst.msk [vmem:[#allocation2 + $0x130] sm:$0xff] %vm689_vm1, %v2699_v58  ;;  %v687_v44 = vmul.f32 %v18600_v49, %v635_v15  ;;  %15355 = vmatmul.mubr.msk.f32.gmra.mrb[202].mxu1 %vm917_vm3, %v4151_v46  ;;  %15387 = vmatmul.mubr.msk.f32.gmra.mrb[222].mxu0 %vm917_vm3, %v18726_v20  ;;  %v3273_v49 = vmul.f32 %v3223_v54, %v18387_v63  ;;  %v18813_v54 = vld [vmem:[#allocation2 + $0xea] sm:$0xff]  ;;  %v2618_v46 = vpop.permute.xlu0 %2617 }
 0x2f5   : > { %15389 = vmatprep.mubr.msk.f32.mxu0 %vm917_vm3, %v18733_v27  ;;  %15415 = vmatprep.mubr.msk.f32.mxu1 %vm917_vm3, %v18635_v55  ;;  %v18753_v55 = vld [vmem:[%s20922_s5 + $0x38] sm:$0xff] }
 0x2f6   : > { %729 = vst.msk [vmem:[#allocation2 + $0x138] sm:$0xff] %vm689_vm1, %v687_v44  ;;  %v21050_v44 = vld [vmem:[#allocation28_spill] sm:$0xff] }
 0x2f8   : > { %v1383_v51 = vpop.permute.xlu1 %1382  ;;  %15390 = vmatmul.mubr.msk.f32.gmra.mrb[224].mxu0 %vm917_vm3, %v18741_v3  ;;  %15416 = vmatmul.mubr.msk.f32.vlgmr.msra.gmra.mrb[204].mxu1 %vm917_vm3, %v18643_v9  ;;  %v16468_v9 = vunpack.i.h.bf16 %v18308_v59 }
 0x2f9   : > { %15392 = vmatprep.mubr.msk.f32.mxu0 %vm917_vm3, %v18748_v39  ;;  %15418 = vmatprep.mubr.msk.f32.mxu1 %vm917_vm3, %v18647_v28  ;;  %v1429_v34 = vmul.f32 %v1383_v51, %v21046_v41  ;;  %v21047_v28 = vld [vmem:[#allocation42_spill] sm:$0xff] }
 0x2fa   : > { %v2780_v63 = vld [vmem:[#allocation2 + $0x128] sm:$0xff]  ;;  %15526 = vmatpush3.msra.mxu1 %v18535_v62 }
 0x2fb   : > { %v3313_v35 = vadd.f32 %v3272_v45, %v2780_v63  ;;  %v2781_v61 = vld [vmem:[#allocation2 + $0x130] sm:$0xff]  ;;  %15637 = vmatprep.subr.mxu1 %v18753_v55  ;;  %v18770_v62 = vld [vmem:[#allocation2 + $0xc2] sm:$0xff]  ;;  %v2660_v45 = vmul.f32 %v2618_v46, %v21050_v44 }
 0x2fc   : > { %v3314_v16 = vadd.f32 %v3273_v49, %v2781_v61  ;;  %v1388_v53 = vpop.permute.xlu1 %1387  ;;  %15393 = vmatmul.mubr.msk.f32.gmra.mrb[226].mxu0 %vm917_vm3, %v18762_v2  ;;  %15419 = vmatmul.mubr.msk.f32.gmra.mrb[206].mxu1 %vm917_vm3, %v18653_v48  ;;  %v18841_v49 = vld [vmem:[#allocation2 + $0x10a] sm:$0xff]  ;;  %v18867_v61 = vld [vmem:[%s20922_s5 + $0x40] sm:$0xff]  ;;  %v6112_v46 = vld [vmem:[#allocation2 + $0x14] sm:$0xff] }
 0x2fd   : > { %3354 = vst.msk [vmem:[#allocation2 + $0x128] sm:$0xff] %vm689_vm1, %v3313_v35  ;;  %v770_v59 = vld [vmem:[#allocation2 + $0x138] sm:$0xff]  ;;  %v1430_v22 = vmul.f32 %v1388_v53, %v21047_v28  ;;  %15395 = vmatprep.mubr.msk.f32.mxu0 %vm917_vm3, %v18770_v62  ;;  %15421 = vmatprep.mubr.msk.f32.mxu1 %vm917_vm3, %v18657_v18 }
 0x2fe   : > { %3642 = vst.msk [vmem:[#allocation2 + $0x128] sm:$0xff] %vm3604_vm4, %v16467_v42  ;;  %v1470_v7 = vadd.f32 %v1429_v34, %v770_v59  ;;  %v18788_v18 = vld [vmem:[#allocation2 + $0xd2] sm:$0xff]  ;;  %v5614_v35 = vld [vmem:[#allocation2 + $0x1b] sm:$0xff] }
 0x2ff   : > { %3355 = vst.msk [vmem:[#allocation2 + $0x130] sm:$0xff] %vm689_vm1, %v3314_v16  ;;  %v1471_v48 = vadd.f32 %v1430_v22, %v771_v26  ;;  %v21051_v16 = vld [vmem:[#allocation26_spill] sm:$0xff] }
 0x300   : > { %3643 = vst.msk [vmem:[#allocation2 + $0x130] sm:$0xff] %vm3604_vm4, %v16468_v9  ;;  %v15317_v32 = vpop.f32.mrb[176].mxu1  ;;  %15396 = vmatmul.mubr.msk.f32.gmra.mrb[228].mxu0 %vm917_vm3, %v18781_v12  ;;  %15422 = vmatmul.mubr.msk.f32.gmra.mrb[208].mxu1 %vm917_vm3, %v18663_v14  ;;  %v18799_v14 = vld [vmem:[#allocation2 + $0xda] sm:$0xff] }
 0x301   : > { %1511 = vst.msk [vmem:[#allocation2 + $0x138] sm:$0xff] %vm689_vm1, %v1470_v7  ;;  %v4552_v11 = vadd.f32 %v15317_v32, %v4516_v6  ;;  %v15264_v24 = vpop.f32.mrb[178].mxu0  ;;  %v4368_v25 = vpop.f32.mrb[177].mxu1  ;;  %1512 = vst.msk [vmem:[#allocation2 + $0x140] sm:$0xff] %vm689_vm1, %v1471_v48  ;;  %15398 = vmatprep.mubr.msk.f32.mxu0 %vm917_vm3, %v18788_v18  ;;  %15424 = vmatprep.mubr.msk.f32.mxu1 %vm917_vm3, %v18668_v47  ;;  %v21048_v47 = vld [vmem:[#allocation41_spill] sm:$0xff]  ;;  %v18853_v9 = vld [vmem:[#allocation2 + $0x11a] sm:$0xff] }
 0x302   : > { %4091 = vst.msk [vmem:[#allocation4 + $0x58] sm:$0xff] %vm689_vm1, %v15264_v24  ;;  %v4551_v30 = vadd.f32 %v4515_v4, %v4368_v25  ;;  %v3951_v37 = vpop.f32.mrb[179].mxu0  ;;  %v2003_v1 = vpop.permute.xlu1 %2002  ;;  %v2044_v60 = vmul.f32 %v1998_v17, %v21048_v47  ;;  %v5616_v48 = vld [vmem:[#allocation2 + $0x2b] sm:$0xff]  ;;  %v6113_v44 = vld [vmem:[#allocation2 + $0x1c] sm:$0xff] }
 0x303   : > { %4588 = vst.msk [vmem:[#allocation4 + $0x48] sm:$0xff] %vm689_vm1, %v4552_v11  ;;  %4090 = vst.msk [vmem:[#allocation4 + $0x50] sm:$0xff] %vm689_vm1, %v3951_v37  ;;  %v2045_v56 = vmul.f32 %v2003_v1, %v21049_v21  ;;  %v5618_v37 = vld [vmem:[#allocation2 + $0x3b] sm:$0xff]  ;;  %v5620_v47 = vld [vmem:[#allocation2 + $0x4b] sm:$0xff] }
 0x304   : > { %4587 = vst.msk [vmem:[#allocation4 + $0x40] sm:$0xff] %vm689_vm1, %v4551_v30  ;;  %15399 = vmatmul.mubr.msk.f32.gmra.mrb[230].mxu0 %vm917_vm3, %v18799_v14  ;;  %15425 = vmatmul.mubr.msk.f32.gmra.mrb[210].mxu1 %vm917_vm3, %v18673_v52  ;;  %v18819_v52 = vld [vmem:[#allocation2 + $0xf2] sm:$0xff] }
 0x305   : > { %15401 = vmatprep.mubr.msk.f32.mxu0 %vm917_vm3, %v18805_v57  ;;  %15427 = vmatprep.mubr.msk.f32.mxu1 %vm917_vm3, %v18678_v8  ;;  %v18827_v8 = vld [vmem:[#allocation2 + $0xfa] sm:$0xff] }
 0x306   : > { %v2613_v15 = vpop.permute.xlu1 %2612 }
 0x308   : > { %v1552_v33 = vld [vmem:[#allocation2 + $0x138] sm:$0xff]  ;;  %v1553_v10 = vld [vmem:[#allocation2 + $0x140] sm:$0xff]  ;;  %15402 = vmatmul.mubr.msk.f32.gmra.mrb[232].mxu0 %vm917_vm3, %v18813_v54  ;;  %15428 = vmatmul.mubr.msk.f32.gmra.mrb[212].mxu1 %vm917_vm3, %v18683_v31 }
 0x309   : > { %v2085_v29 = vadd.f32 %v2044_v60, %v1552_v33  ;;  %v2086_v58 = vadd.f32 %v2045_v56, %v1553_v10  ;;  %15404 = vmatprep.mubr.msk.f32.mxu0 %vm917_vm3, %v18819_v52  ;;  %15430 = vmatprep.mubr.msk.f32.mxu1 %vm917_vm3, %v18687_v50  ;;  %v18833_v31 = vld [vmem:[#allocation2 + $0x102] sm:$0xff]  ;;  %v2659_v50 = vmul.f32 %v2613_v15, %v18382_v19  ;;  %v5624_v33 = vld [vmem:[#allocation2 + $0x6b] sm:$0xff]  ;;  %v5629_v10 = vld [vmem:[#allocation2 + $0x93] sm:$0xff] }
 0x30a   : > { %v4518_v53 = vld [vmem:[#allocation4 + $0x58] sm:$0xff]  ;;  %v4517_v7 = vld [vmem:[#allocation4 + $0x50] sm:$0xff] }
 0x30b   : > { %2126 = vst.msk [vmem:[#allocation2 + $0x138] sm:$0xff] %vm689_vm1, %v2085_v29  ;;  %2127 = vst.msk [vmem:[#allocation2 + $0x140] sm:$0xff] %vm689_vm1, %v2086_v58  ;;  %v3228_v51 = vpop.permute.xlu1 %3227  ;;  %v5148_v29 = vld [vmem:[#allocation2 + $0x122] sm:$0xff]  ;;  %v5632_v15 = vld [vmem:[#allocation2 + $0xab] sm:$0xff] }
 0x30c   : > { %15405 = vmatmul.mubr.msk.f32.gmra.mrb[234].mxu0 %vm917_vm3, %v18827_v8  ;;  %15431 = vmatmul.mubr.msk.f32.gmra.mrb[214].mxu1 %vm917_vm3, %v18693_v0  ;;  %v18847_v0 = vld [vmem:[#allocation2 + $0x112] sm:$0xff]  ;;  %v3274_v41 = vmul.f32 %v3228_v51, %v21051_v16  ;;  %v5631_v58 = vld [vmem:[#allocation2 + $0xa3] sm:$0xff] }
 0x30d   : > { %15407 = vmatprep.mubr.msk.f32.mxu0 %vm917_vm3, %v18833_v31  ;;  %15433 = vmatprep.mubr.msk.f32.mxu1 %vm917_vm3, %v18697_v13  ;;  %v18950_v51 = vld [vmem:[#allocation2 + $0x2c] sm:$0xff] }
 0x310   : > { %15408 = vmatmul.mubr.msk.f32.gmra.mrb[236].mxu0 %vm917_vm3, %v18841_v49  ;;  %15434 = vmatmul.mubr.msk.f32.gmra.mrb[216].mxu1 %vm917_vm3, %v18705_v40  ;;  %v5613_v40 = vld [vmem:[#allocation2 + $0x13] sm:$0xff] }
 0x311   : > { %15410 = vmatprep.mubr.msk.f32.mxu0 %vm917_vm3, %v18847_v0  ;;  %15436 = vmatprep.mubr.msk.f32.mxu1 %vm917_vm3, %v18711_v5  ;;  %v3233_v5 = vpop.permute.xlu1 %3232 }
 0x312   : > { %v2167_v42 = vld [vmem:[#allocation2 + $0x138] sm:$0xff]  ;;  %v2168_v13 = vld [vmem:[#allocation2 + $0x140] sm:$0xff]  ;;  %v3275_v34 = vmul.f32 %v3233_v5, %v18400_v43 }
 0x313   : > { %v2700_v19 = vadd.f32 %v2659_v50, %v2167_v42  ;;  %v2701_v63 = vadd.f32 %v2660_v45, %v2168_v13  ;;  %v5617_v43 = vld [vmem:[#allocation2 + $0x33] sm:$0xff]  ;;  %v5634_v50 = vld [vmem:[#allocation2 + $0xbb] sm:$0xff]  ;;  %v5635_v45 = vld [vmem:[#allocation2 + $0xc3] sm:$0xff] }
 0x314   : > { %15411 = vmatmul.mubr.msk.f32.gmra.mrb[238].mxu0 %vm917_vm3, %v18853_v9  ;;  %15437 = vmatmul.mubr.msk.f32.gmra.mrb[218].mxu1 %vm917_vm3, %v18716_v38  ;;  %v16479_v38 = vpop.permute.xlu0 %16478  ;;  %v5637_v42 = vld [vmem:[#allocation2 + $0xd3] sm:$0xff]  ;;  %v3654_v13 = vld [vmem:[%s20919_s2] sm:$0xff] }
 0x315   : > { %2741 = vst.msk [vmem:[#allocation2 + $0x138] sm:$0xff] %vm689_vm1, %v2700_v19  ;;  %2742 = vst.msk [vmem:[#allocation2 + $0x140] sm:$0xff] %vm689_vm1, %v2701_v63  ;;  %15439 = vmatprep.mubr.msk.f32.mxu1 %vm917_vm3, %v18720_v23  ;;  %15471 = vmatprep.mubr.msk.f32.mxu0 %vm917_vm3, %v5613_v40  ;;  %v5615_v23 = vld [vmem:[#allocation2 + $0x23] sm:$0xff]  ;;  %v16480_v32 = vunpack.i.l.bf16 %v16479_v38  ;;  %v16481_v24 = vunpack.i.h.bf16 %v16479_v38  ;;  %v18955_v19 = vld [vmem:[#allocation2 + $0x34] sm:$0xff] }
 0x316   : > { %v5638_v63 = vld [vmem:[#allocation2 + $0xdb] sm:$0xff]  ;;  %v5639_v40 = vld [vmem:[#allocation2 + $0xe3] sm:$0xff] }
 0x317   : > { %v18968_v5 = vld [vmem:[#allocation2 + $0x44] sm:$0xff] }
 0x318   : > { %15440 = vmatmul.mubr.msk.f32.gmra.mrb[220].mxu1 %vm917_vm3, %v18726_v20  ;;  %15472 = vmatmul.mubr.msk.f32.vlgmr.msra.gmra.mrb[240].mxu0 %vm917_vm3, %v5614_v35  ;;  %v3656_v35 = vld [vmem:[%s20919_s2 + $0x10] sm:$0xff] }
 0x319   : > { %15582 = vmatpush3.msra.mxu0 %v18632_v36  ;;  %15442 = vmatprep.mubr.msk.f32.mxu1 %vm917_vm3, %v18733_v27 }
 0x31a   : > { %15474 = vmatprep.mubr.msk.f32.mxu0 %vm917_vm3, %v5615_v23  ;;  %15693 = vmatprep.subr.mxu0 %v18867_v61 }
 0x31b   : > { %v15320_v26 = vpop.f32.mrb[178].mxu1  ;;  %v15267_v20 = vpop.f32.mrb[180].mxu0 }
 0x31c   : > { %v2782_v59 = vld [vmem:[#allocation2 + $0x138] sm:$0xff]  ;;  %v4554_v28 = vadd.f32 %v15320_v26, %v4518_v53  ;;  %v4378_v22 = vpop.f32.mrb[179].mxu1  ;;  %v2783_v6 = vld [vmem:[#allocation2 + $0x140] sm:$0xff]  ;;  %4093 = vst.msk [vmem:[#allocation4 + $0x68] sm:$0xff] %vm689_vm1, %v15267_v20  ;;  %v3961_v11 = vpop.f32.mrb[181].mxu0  ;;  %15443 = vmatmul.mubr.msk.f32.gmra.mrb[222].mxu1 %vm917_vm3, %v18741_v3  ;;  %15475 = vmatmul.mubr.msk.f32.gmra.mrb[242].mxu0 %vm917_vm3, %v5616_v48  ;;  %v18977_v20 = vld [vmem:[#allocation2 + $0x4c] sm:$0xff] }
 0x31d   : > { %v3315_v36 = vadd.f32 %v3274_v41, %v2782_v59  ;;  %v4553_v27 = vadd.f32 %v4517_v7, %v4378_v22  ;;  %v3316_v25 = vadd.f32 %v3275_v34, %v2783_v6  ;;  %4092 = vst.msk [vmem:[#allocation4 + $0x60] sm:$0xff] %vm689_vm1, %v3961_v11  ;;  %15445 = vmatprep.mubr.msk.f32.mxu1 %vm917_vm3, %v18748_v39  ;;  %v5619_v39 = vld [vmem:[#allocation2 + $0x43] sm:$0xff]  ;;  %v5641_v22 = vld [vmem:[#allocation2 + $0xf3] sm:$0xff] }
 0x31e   : > { %4590 = vst.msk [vmem:[#allocation4 + $0x58] sm:$0xff] %vm689_vm1, %v4554_v28  ;;  %15477 = vmatprep.mubr.msk.f32.mxu0 %vm917_vm3, %v5617_v43  ;;  %v5640_v28 = vld [vmem:[#allocation2 + $0xeb] sm:$0xff]  ;;  %v18984_v7 = vld [vmem:[#allocation2 + $0x54] sm:$0xff] }
 0x31f   : > { %3356 = vst.msk [vmem:[#allocation2 + $0x138] sm:$0xff] %vm689_vm1, %v3315_v36  ;;  %4589 = vst.msk [vmem:[#allocation4 + $0x50] sm:$0xff] %vm689_vm1, %v4553_v27  ;;  %v15323_v4 = vpop.f32.mrb[180].mxu1  ;;  %v15270_v3 = vpop.f32.mrb[182].mxu0  ;;  %v3657_v48 = vld [vmem:[%s20919_s2 + $0x18] sm:$0xff]  ;;  %v3655_v6 = vld [vmem:[%s20919_s2 + $0x8] sm:$0xff] }
 0x320   : > { %3357 = vst.msk [vmem:[#allocation2 + $0x140] sm:$0xff] %vm689_vm1, %v3316_v25  ;;  %v4388_v30 = vpop.f32.mrb[181].mxu1  ;;  %4095 = vst.msk [vmem:[#allocation4 + $0x78] sm:$0xff] %vm689_vm1, %v15270_v3  ;;  %v3971_v17 = vpop.f32.mrb[183].mxu0  ;;  %15446 = vmatmul.mubr.msk.f32.gmra.mrb[224].mxu1 %vm917_vm3, %v18762_v2  ;;  %15478 = vmatmul.mubr.msk.f32.gmra.mrb[244].mxu0 %vm917_vm3, %v5618_v37  ;;  %v5621_v2 = vld [vmem:[#allocation2 + $0x53] sm:$0xff]  ;;  %v18993_v36 = vld [vmem:[#allocation2 + $0x5c] sm:$0xff] }
 0x321   : > { %3644 = vst.msk [vmem:[#allocation2 + $0x138] sm:$0xff] %vm3604_vm4, %v16480_v32  ;;  %3645 = vst.msk [vmem:[#allocation2 + $0x140] sm:$0xff] %vm3604_vm4, %v16481_v24  ;;  %15448 = vmatprep.mubr.msk.f32.mxu1 %vm917_vm3, %v18770_v62  ;;  %15480 = vmatprep.mubr.msk.f32.mxu0 %vm917_vm3, %v5619_v39  ;;  %v5622_v62 = vld [vmem:[#allocation2 + $0x5b] sm:$0xff]  ;;  %v5643_v27 = vld [vmem:[#allocation2 + $0x103] sm:$0xff] }
 0x322   : > { %4094 = vst.msk [vmem:[#allocation4 + $0x70] sm:$0xff] %vm689_vm1, %v3971_v17  ;;  %v5642_v32 = vld [vmem:[#allocation2 + $0xfb] sm:$0xff]  ;;  %v19001_v11 = vld [vmem:[#allocation2 + $0x64] sm:$0xff]  ;;  %v19009_v25 = vld [vmem:[#allocation2 + $0x6c] sm:$0xff] }
 0x323   : > { %v4520_v1 = vld [vmem:[#allocation4 + $0x68] sm:$0xff]  ;;  %v3659_v43 = vld [vmem:[%s20919_s2 + $0x28] sm:$0xff] }
 0x324   : > { %v4556_v60 = vadd.f32 %v15323_v4, %v4520_v1  ;;  %v4519_v21 = vld [vmem:[#allocation4 + $0x60] sm:$0xff]  ;;  %15449 = vmatmul.mubr.msk.f32.gmra.mrb[226].mxu1 %vm917_vm3, %v18781_v12  ;;  %15481 = vmatmul.mubr.msk.f32.gmra.mrb[246].mxu0 %vm917_vm3, %v5620_v47  ;;  %v5623_v12 = vld [vmem:[#allocation2 + $0x63] sm:$0xff]  ;;  %v3661_v37 = vld [vmem:[%s20919_s2 + $0x38] sm:$0xff] }
 0x325   : > { %v4555_v56 = vadd.f32 %v4519_v21, %v4388_v30  ;;  %15451 = vmatprep.mubr.msk.f32.mxu1 %vm917_vm3, %v18788_v18  ;;  %15483 = vmatprep.mubr.msk.f32.mxu0 %vm917_vm3, %v5621_v2  ;;  %v5625_v18 = vld [vmem:[#allocation2 + $0x73] sm:$0xff]  ;;  %v5644_v24 = vld [vmem:[#allocation2 + $0x10b] sm:$0xff]  ;;  %v3658_v4 = vld [vmem:[%s20919_s2 + $0x20] sm:$0xff] }
 0x326   : > { %4592 = vst.msk [vmem:[#allocation4 + $0x68] sm:$0xff] %vm689_vm1, %v4556_v60  ;;  %v5645_v3 = vld [vmem:[#allocation2 + $0x113] sm:$0xff]  ;;  %v5646_v17 = vld [vmem:[#allocation2 + $0x11b] sm:$0xff]  ;;  %v5647_v47 = vld [vmem:[#allocation2 + $0x123] sm:$0xff] }
 0x327   : > { %4591 = vst.msk [vmem:[#allocation4 + $0x60] sm:$0xff] %vm689_vm1, %v4555_v56  ;;  %v4522_v41 = vld [vmem:[#allocation4 + $0x78] sm:$0xff]  ;;  %v19017_v30 = vld [vmem:[#allocation2 + $0x74] sm:$0xff]  ;;  %v19025_v39 = vld [vmem:[#allocation2 + $0x7c] sm:$0xff] }
 0x328   : > { %15452 = vmatmul.mubr.msk.f32.gmra.mrb[228].mxu1 %vm917_vm3, %v18799_v14  ;;  %15484 = vmatmul.mubr.msk.f32.gmra.mrb[248].mxu0 %vm917_vm3, %v5622_v62  ;;  %v5626_v14 = vld [vmem:[#allocation2 + $0x7b] sm:$0xff]  ;;  %v3660_v1 = vld [vmem:[%s20919_s2 + $0x30] sm:$0xff]  ;;  %v19033_v60 = vld [vmem:[#allocation2 + $0x84] sm:$0xff] }
 0x329   : > { %15454 = vmatprep.mubr.msk.f32.mxu1 %vm917_vm3, %v18805_v57  ;;  %15486 = vmatprep.mubr.msk.f32.mxu0 %vm917_vm3, %v5623_v12  ;;  %v5627_v57 = vld [vmem:[#allocation2 + $0x83] sm:$0xff]  ;;  %v19041_v2 = vld [vmem:[#allocation2 + $0x8c] sm:$0xff] }
 0x32a   : > { %v4521_v26 = vld [vmem:[#allocation4 + $0x70] sm:$0xff]  ;;  %v3663_v21 = vld [vmem:[%s20919_s2 + $0x48] sm:$0xff] }
 0x32b   : > { %v5648_v12 = vld [vmem:[#allocation2 + $0x12b] sm:$0xff] }
 0x32c   : > { %15455 = vmatmul.mubr.msk.f32.gmra.mrb[230].mxu1 %vm917_vm3, %v18813_v54  ;;  %15487 = vmatmul.mubr.msk.f32.gmra.mrb[250].mxu0 %vm917_vm3, %v5624_v33  ;;  %v5628_v54 = vld [vmem:[#allocation2 + $0x8b] sm:$0xff]  ;;  %v3662_v33 = vld [vmem:[%s20919_s2 + $0x40] sm:$0xff] }
 0x32d   : > { %15457 = vmatprep.mubr.msk.f32.mxu1 %vm917_vm3, %v18819_v52  ;;  %15489 = vmatprep.mubr.msk.f32.mxu0 %vm917_vm3, %v5625_v18  ;;  %v5630_v52 = vld [vmem:[#allocation2 + $0x9b] sm:$0xff] }
 0x330   : > { %15458 = vmatmul.mubr.msk.f32.gmra.mrb[232].mxu1 %vm917_vm3, %v18827_v8  ;;  %15490 = vmatmul.mubr.msk.f32.gmra.mrb[252].mxu0 %vm917_vm3, %v5626_v14  ;;  %v5149_v8 = vld [vmem:[#allocation2 + $0x12a] sm:$0xff] }
 0x331   : > { %15460 = vmatprep.mubr.msk.f32.mxu1 %vm917_vm3, %v18833_v31  ;;  %15492 = vmatprep.mubr.msk.f32.mxu0 %vm917_vm3, %v5627_v57  ;;  %v5633_v31 = vld [vmem:[#allocation2 + $0xb3] sm:$0xff] }
 0x334   : > { %15461 = vmatmul.mubr.msk.f32.gmra.mrb[234].mxu1 %vm917_vm3, %v18841_v49  ;;  %15493 = vmatmul.mubr.msk.f32.gmra.mrb[254].mxu0 %vm917_vm3, %v5628_v54  ;;  %v18944_v49 = vld [vmem:[#allocation2 + $0x24] sm:$0xff] }
 0x335   : > { %15463 = vmatprep.mubr.msk.f32.mxu1 %vm917_vm3, %v18847_v0  ;;  %15495 = vmatprep.mubr.msk.f32.mxu0 %vm917_vm3, %v5629_v10  ;;  %v5636_v0 = vld [vmem:[#allocation2 + $0xcb] sm:$0xff]  ;;  %v19049_v10 = vld [vmem:[#allocation2 + $0x94] sm:$0xff] }
 0x338   : > { %15464 = vmatmul.mubr.msk.f32.gmra.mrb[236].mxu1 %vm917_vm3, %v18853_v9  ;;  %15496 = vmatmul.mubr.msk.f32.gmra.mrb[0].mxu0 %vm917_vm3, %v5630_v52  ;;  %v18963_v9 = vld [vmem:[#allocation2 + $0x3c] sm:$0xff] }
 0x339   : > { %15466 = vmatprep.mubr.msk.f32.mxu1 %vm917_vm3, %v5148_v29  ;;  %15498 = vmatprep.mubr.msk.f32.mxu0 %vm917_vm3, %v5631_v58  ;;  %v3665_v52 = vld [vmem:[%s20919_s2 + $0x58] sm:$0xff] }
 0x33c   : > { %15467 = vmatmul.mubr.msk.f32.gmra.mrb[238].mxu1 %vm917_vm3, %v5149_v8  ;;  %15499 = vmatmul.mubr.msk.f32.gmra.mrb[2].mxu0 %vm917_vm3, %v5632_v15  ;;  %v19062_v8 = vld [vmem:[#allocation2 + $0x9c] sm:$0xff]  ;;  %v3664_v15 = vld [vmem:[%s20919_s2 + $0x50] sm:$0xff] }
 0x33d   : > { %15501 = vmatprep.mubr.msk.f32.mxu0 %vm917_vm3, %v5633_v31  ;;  %15527 = vmatprep.mubr.msk.f32.mxu1 %vm917_vm3, %v6112_v46  ;;  %v19071_v31 = vld [vmem:[#allocation2 + $0xa4] sm:$0xff] }
 0x33e   : > { %v3667_v46 = vld [vmem:[%s20919_s2 + $0x68] sm:$0xff] }
 0x340   : > { %15502 = vmatmul.mubr.msk.f32.gmra.mrb[4].mxu0 %vm917_vm3, %v5634_v50  ;;  %15528 = vmatmul.mubr.msk.f32.vlgmr.msra.gmra.mrb[240].mxu1 %vm917_vm3, %v6113_v44  ;;  %v19081_v50 = vld [vmem:[#allocation2 + $0xac] sm:$0xff]  ;;  %v3666_v44 = vld [vmem:[%s20919_s2 + $0x60] sm:$0xff] }
 0x341   : > { %15504 = vmatprep.mubr.msk.f32.mxu0 %vm917_vm3, %v5635_v45  ;;  %15530 = vmatprep.mubr.msk.f32.mxu1 %vm917_vm3, %v18944_v49  ;;  %v3669_v45 = vld [vmem:[%s20919_s2 + $0x78] sm:$0xff] }
 0x342   : > { %15638 = vmatpush3.msra.mxu1 %v18753_v55  ;;  %v16542_v55 = vmov 5  }
 0x343   : > { %16482 = vset.pattern.permute.xlu1 %v16542_v55  ;;  %16483 = vset.pattern.permute.xlu0 %v16542_v55  ;;  %v19126_v55 = vld [vmem:[#allocation2 + $0xd4] sm:$0xff] }
 0x344   : > { %15505 = vmatmul.mubr.msk.f32.gmra.mrb[6].mxu0 %vm917_vm3, %v5636_v0  ;;  %15531 = vmatmul.mubr.msk.f32.gmra.mrb[242].mxu1 %vm917_vm3, %v18950_v51  ;;  %v3668_v0 = vld [vmem:[%s20919_s2 + $0x70] sm:$0xff] }
 0x345   : > { %15507 = vmatprep.mubr.msk.f32.mxu0 %vm917_vm3, %v5637_v42  ;;  %15533 = vmatprep.mubr.msk.f32.mxu1 %vm917_vm3, %v18955_v19  ;;  %v3671_v42 = vld [vmem:[%s20919_s2 + $0x88] sm:$0xff] }
 0x346   : > { %8264 = vperm.xlu1 %16482, %v3654_v13   ;;  %8269 = vperm.xlu0 %16483, %v3655_v6   ;;  %v3670_v13 = vld [vmem:[%s20919_s2 + $0x80] sm:$0xff]  ;;  %v3679_v6 = vld [vmem:[%s20919_s2 + $0xc8] sm:$0xff] }
 0x348   : > { %15508 = vmatmul.mubr.msk.f32.gmra.mrb[8].mxu0 %vm917_vm3, %v5638_v63  ;;  %15534 = vmatmul.mubr.msk.f32.gmra.mrb[244].mxu1 %vm917_vm3, %v18963_v9  ;;  %v3673_v63 = vld [vmem:[%s20919_s2 + $0x98] sm:$0xff] }
 0x349   : > { %15510 = vmatprep.mubr.msk.f32.mxu0 %vm917_vm3, %v5639_v40  ;;  %15536 = vmatprep.mubr.msk.f32.mxu1 %vm917_vm3, %v18968_v5 }
 0x34a   : > { %v15326_v16 = vpop.f32.mrb[182].mxu1  ;;  %v15273_v23 = vpop.f32.mrb[184].mxu0  ;;  %8274 = vperm.xlu1 %16482, %v3656_v35   ;;  %8284 = vperm.xlu0 %16483, %v3658_v4  }
 0x34b   : > { %v4558_v38 = vadd.f32 %v15326_v16, %v4522_v41  ;;  %v4398_v34 = vpop.f32.mrb[183].mxu1  ;;  %4097 = vst.msk [vmem:[#allocation4 + $0x88] sm:$0xff] %vm689_vm1, %v15273_v23  ;;  %v3981_v59 = vpop.f32.mrb[185].mxu0 }
 0x34c   : > { %v4557_v53 = vadd.f32 %v4521_v26, %v4398_v34  ;;  %4096 = vst.msk [vmem:[#allocation4 + $0x80] sm:$0xff] %vm689_vm1, %v3981_v59  ;;  %15511 = vmatmul.mubr.msk.f32.gmra.mrb[10].mxu0 %vm917_vm3, %v5640_v28  ;;  %15537 = vmatmul.mubr.msk.f32.gmra.mrb[246].mxu1 %vm917_vm3, %v18977_v20  ;;  %v19136_v34 = vld [vmem:[#allocation2 + $0xdc] sm:$0xff]  ;;  %v3672_v26 = vld [vmem:[%s20919_s2 + $0x90] sm:$0xff]  ;;  %v3675_v59 = vld [vmem:[%s20919_s2 + $0xa8] sm:$0xff] }
 0x34d   : > { %4594 = vst.msk [vmem:[#allocation4 + $0x78] sm:$0xff] %vm689_vm1, %v4558_v38  ;;  %15513 = vmatprep.mubr.msk.f32.mxu0 %vm917_vm3, %v5641_v22  ;;  %15539 = vmatprep.mubr.msk.f32.mxu1 %vm917_vm3, %v18984_v7  ;;  %v19157_v28 = vld [vmem:[#allocation2 + $0xec] sm:$0xff]  ;;  %v19166_v22 = vld [vmem:[#allocation2 + $0xf4] sm:$0xff] }
 0x34e   : > { %4593 = vst.msk [vmem:[#allocation4 + $0x70] sm:$0xff] %vm689_vm1, %v4557_v53  ;;  %8279 = vperm.xlu1 %16482, %v3657_v48   ;;  %8294 = vperm.xlu0 %16483, %v3660_v1   ;;  %v19147_v53 = vld [vmem:[#allocation2 + $0xe4] sm:$0xff]  ;;  %v19175_v48 = vld [vmem:[#allocation2 + $0xfc] sm:$0xff] }
 0x34f   : > { %v3681_v1 = vld [vmem:[%s20919_s2 + $0xd8] sm:$0xff] }
 0x350   : > { %15514 = vmatmul.mubr.msk.f32.gmra.mrb[12].mxu0 %vm917_vm3, %v5642_v32  ;;  %15540 = vmatmul.mubr.msk.f32.gmra.mrb[248].mxu1 %vm917_vm3, %v18993_v36  ;;  %v3676_v32 = vld [vmem:[%s20919_s2 + $0xb0] sm:$0xff] }
 0x351   : > { %15516 = vmatprep.mubr.msk.f32.mxu0 %vm917_vm3, %v5643_v27  ;;  %15542 = vmatprep.mubr.msk.f32.mxu1 %vm917_vm3, %v19001_v11 }
 0x352   : > { %8289 = vperm.xlu1 %16482, %v3659_v43   ;;  %v4524_v62 = vld [vmem:[#allocation4 + $0x88] sm:$0xff]  ;;  %8304 = vperm.xlu0 %16483, %v3662_v33  }
 0x353   : > { %v4523_v54 = vld [vmem:[#allocation4 + $0x80] sm:$0xff]  ;;  %v3685_v33 = vld [vmem:[%s20919_s2 + $0xf8] sm:$0xff] }
 0x354   : > { %15517 = vmatmul.mubr.msk.f32.gmra.mrb[14].mxu0 %vm917_vm3, %v5644_v24  ;;  %15543 = vmatmul.mubr.msk.f32.gmra.mrb[250].mxu1 %vm917_vm3, %v19009_v25 }
 0x355   : > { %15519 = vmatprep.mubr.msk.f32.mxu0 %vm917_vm3, %v5645_v3  ;;  %15545 = vmatprep.mubr.msk.f32.mxu1 %vm917_vm3, %v19017_v30 }
 0x356   : > { %8299 = vperm.xlu1 %16482, %v3661_v37   ;;  %8314 = vperm.xlu0 %16483, %v3664_v15   ;;  %v19194_v37 = vld [vmem:[#allocation2 + $0x10c] sm:$0xff] }
 0x358   : > { %15520 = vmatmul.mubr.msk.f32.gmra.mrb[16].mxu0 %vm917_vm3, %v5646_v17  ;;  %15546 = vmatmul.mubr.msk.f32.gmra.mrb[252].mxu1 %vm917_vm3, %v19025_v39  ;;  %v3678_v17 = vld [vmem:[%s20919_s2 + $0xc0] sm:$0xff] }
 0x359   : > { %15522 = vmatprep.mubr.msk.f32.mxu0 %vm917_vm3, %v5647_v47  ;;  %15548 = vmatprep.mubr.msk.f32.mxu1 %vm917_vm3, %v19033_v60  ;;  %v19215_v47 = vld [vmem:[#allocation2 + $0x11c] sm:$0xff] }
 0x35a   : > { %8309 = vperm.xlu1 %16482, %v3663_v21   ;;  %8324 = vperm.xlu0 %16483, %v3666_v44   ;;  %v19224_v21 = vld [vmem:[#allocation2 + $0x124] sm:$0xff] }
 0x35b   : > { %v3686_v44 = vld [vmem:[%s20919_s2 + $0x100] sm:$0xff] }
 0x35c   : > { %v15329_v56 = vpop.f32.mrb[184].mxu1  ;;  %v15276_v14 = vpop.f32.mrb[186].mxu0  ;;  %15523 = vmatmul.mubr.msk.f32.gmra.mrb[18].mxu0 %vm917_vm3, %v5648_v12  ;;  %15549 = vmatmul.mubr.msk.f32.gmra.mrb[254].mxu1 %vm917_vm3, %v19041_v2  ;;  %v7110_v12 = vld [vmem:[#allocation2 + $0x25] sm:$0xff] }
 0x35d   : > { %v4560_v18 = vadd.f32 %v15329_v56, %v4524_v62  ;;  %v4408_v57 = vpop.f32.mrb[185].mxu1  ;;  %4099 = vst.msk [vmem:[#allocation4 + $0x98] sm:$0xff] %vm689_vm1, %v15276_v14  ;;  %v3991_v58 = vpop.f32.mrb[187].mxu0  ;;  %15551 = vmatprep.mubr.msk.f32.mxu1 %vm917_vm3, %v19049_v10  ;;  %15583 = vmatprep.mubr.msk.f32.mxu0 %vm917_vm3, %v18944_v49  ;;  %v19099_v49 = vld [vmem:[#allocation2 + $0xbc] sm:$0xff]  ;;  %v19233_v56 = vld [vmem:[#allocation2 + $0x12c] sm:$0xff] }
 0x35e   : > { %v4559_v29 = vadd.f32 %v4523_v54, %v4408_v57  ;;  %4098 = vst.msk [vmem:[#allocation4 + $0x90] sm:$0xff] %vm689_vm1, %v3991_v58  ;;  %8319 = vperm.xlu1 %16482, %v3665_v52   ;;  %8334 = vperm.xlu0 %16483, %v3668_v0   ;;  %v3682_v62 = vld [vmem:[%s20919_s2 + $0xe0] sm:$0xff]  ;;  %v3684_v58 = vld [vmem:[%s20919_s2 + $0xf0] sm:$0xff] }
 0x35f   : > { %4596 = vst.msk [vmem:[#allocation4 + $0x88] sm:$0xff] %vm689_vm1, %v4560_v18 }
 0x360   : > { %4595 = vst.msk [vmem:[#allocation4 + $0x80] sm:$0xff] %vm689_vm1, %v4559_v29  ;;  %15552 = vmatmul.mubr.msk.f32.gmra.mrb[0].mxu1 %vm917_vm3, %v19062_v8  ;;  %15584 = vmatmul.mubr.msk.f32.vlgmr.msra.gmra.mrb[20].mxu0 %vm917_vm3, %v18950_v51  ;;  %v19108_v51 = vld [vmem:[#allocation2 + $0xc4] sm:$0xff]  ;;  %v7111_v29 = vld [vmem:[#allocation2 + $0x2d] sm:$0xff] }
 0x361   : > { %15694 = vmatpush3.msra.mxu0 %v18867_v61  ;;  %15554 = vmatprep.mubr.msk.f32.mxu1 %vm917_vm3, %v19071_v31  ;;  %v19090_v61 = vld [vmem:[#allocation2 + $0xb4] sm:$0xff] }
 0x362   : > { %15586 = vmatprep.mubr.msk.f32.mxu0 %vm917_vm3, %v18955_v19  ;;  %8329 = vperm.xlu1 %16482, %v3667_v46   ;;  %v19117_v19 = vld [vmem:[#allocation2 + $0xcc] sm:$0xff] }
 0x363   : > { %8344 = vperm.xlu0 %16483, %v3670_v13   ;;  %v3687_v46 = vld [vmem:[%s20919_s2 + $0x108] sm:$0xff]  ;;  %v3688_v13 = vld [vmem:[%s20919_s2 + $0x110] sm:$0xff] }
 0x364   : > { %15555 = vmatmul.mubr.msk.f32.gmra.mrb[2].mxu1 %vm917_vm3, %v19081_v50  ;;  %15587 = vmatmul.mubr.msk.f32.gmra.mrb[22].mxu0 %vm917_vm3, %v18963_v9  ;;  %v4526_v40 = vld [vmem:[#allocation4 + $0x98] sm:$0xff] }
 0x365   : > { %15557 = vmatprep.mubr.msk.f32.mxu1 %vm917_vm3, %v19090_v61  ;;  %15589 = vmatprep.mubr.msk.f32.mxu0 %vm917_vm3, %v18968_v5  ;;  %v4525_v41 = vld [vmem:[#allocation4 + $0x90] sm:$0xff] }
 0x366   : > { %8339 = vperm.xlu1 %16482, %v3669_v45   ;;  %v3689_v45 = vld [vmem:[%s20919_s2 + $0x118] sm:$0xff] }
 0x367   : > { %8354 = vperm.xlu0 %16483, %v3672_v26  }
 0x368   : > { %15558 = vmatmul.mubr.msk.f32.gmra.mrb[4].mxu1 %vm917_vm3, %v19099_v49  ;;  %15590 = vmatmul.mubr.msk.f32.gmra.mrb[24].mxu0 %vm917_vm3, %v18977_v20  ;;  %v3674_v20 = vld [vmem:[%s20919_s2 + $0xa0] sm:$0xff] }
 0x369   : > { %15560 = vmatprep.mubr.msk.f32.mxu1 %vm917_vm3, %v19108_v51  ;;  %15592 = vmatprep.mubr.msk.f32.mxu0 %vm917_vm3, %v18984_v7  ;;  %v3677_v7 = vld [vmem:[%s20919_s2 + $0xb8] sm:$0xff] }
 0x36a   : > { %8349 = vperm.xlu1 %16482, %v3671_v42  }
 0x36b   : > { %8364 = vperm.xlu0 %16483, %v3674_v20   ;;  %v7119_v20 = vld [vmem:[#allocation2 + $0x6d] sm:$0xff] }
 0x36c   : > { %15561 = vmatmul.mubr.msk.f32.gmra.mrb[6].mxu1 %vm917_vm3, %v19117_v19  ;;  %15593 = vmatmul.mubr.msk.f32.gmra.mrb[26].mxu0 %vm917_vm3, %v18993_v36  ;;  %v19184_v36 = vld [vmem:[#allocation2 + $0x104] sm:$0xff] }
 0x36d   : > { %15563 = vmatprep.mubr.msk.f32.mxu1 %vm917_vm3, %v19126_v55  ;;  %15595 = vmatprep.mubr.msk.f32.mxu0 %vm917_vm3, %v19001_v11 }
 0x36e   : > { %v15332_v9 = vpop.f32.mrb[186].mxu1  ;;  %v15279_v35 = vpop.f32.mrb[188].mxu0  ;;  %8359 = vperm.xlu1 %16482, %v3673_v63  }
 0x36f   : > { %v4562_v5 = vadd.f32 %v15332_v9, %v4526_v40  ;;  %v4418_v16 = vpop.f32.mrb[187].mxu1  ;;  %4101 = vst.msk [vmem:[#allocation4 + $0xa8] sm:$0xff] %vm689_vm1, %v15279_v35  ;;  %v4001_v23 = vpop.f32.mrb[189].mxu0  ;;  %8374 = vperm.xlu0 %16483, %v3676_v32   ;;  %v7116_v40 = vld [vmem:[#allocation2 + $0x55] sm:$0xff] }
 0x370   : > { %v4561_v38 = vadd.f32 %v4525_v41, %v4418_v16  ;;  %4100 = vst.msk [vmem:[#allocation4 + $0xa0] sm:$0xff] %vm689_vm1, %v4001_v23  ;;  %15564 = vmatmul.mubr.msk.f32.gmra.mrb[8].mxu1 %vm917_vm3, %v19136_v34  ;;  %15596 = vmatmul.mubr.msk.f32.gmra.mrb[28].mxu0 %vm917_vm3, %v19009_v25  ;;  %v7120_v32 = vld [vmem:[#allocation2 + $0x75] sm:$0xff] }
 0x371   : > { %4598 = vst.msk [vmem:[#allocation4 + $0x98] sm:$0xff] %vm689_vm1, %v4562_v5  ;;  %15566 = vmatprep.mubr.msk.f32.mxu1 %vm917_vm3, %v19147_v53  ;;  %15598 = vmatprep.mubr.msk.f32.mxu0 %vm917_vm3, %v19017_v30 }
 0x372   : > { %4597 = vst.msk [vmem:[#allocation4 + $0x90] sm:$0xff] %vm689_vm1, %v4561_v38  ;;  %8369 = vperm.xlu1 %16482, %v3675_v59   ;;  %v7117_v38 = vld [vmem:[#allocation2 + $0x5d] sm:$0xff] }
 0x373   : > { %8384 = vperm.xlu0 %16483, %v3678_v17  }
 0x374   : > { %15567 = vmatmul.mubr.msk.f32.gmra.mrb[10].mxu1 %vm917_vm3, %v19157_v28  ;;  %15599 = vmatmul.mubr.msk.f32.gmra.mrb[30].mxu0 %vm917_vm3, %v19025_v39  ;;  %v19205_v39 = vld [vmem:[#allocation2 + $0x114] sm:$0xff] }
 0x375   : > { %15569 = vmatprep.mubr.msk.f32.mxu1 %vm917_vm3, %v19166_v22  ;;  %15601 = vmatprep.mubr.msk.f32.mxu0 %vm917_vm3, %v19033_v60  ;;  %v3680_v60 = vld [vmem:[%s20919_s2 + $0xd0] sm:$0xff] }
 0x376   : > { %8379 = vperm.xlu1 %16482, %v3677_v7   ;;  %v4528_v11 = vld [vmem:[#allocation4 + $0xa8] sm:$0xff] }
 0x377   : > { %v4527_v4 = vld [vmem:[#allocation4 + $0xa0] sm:$0xff]  ;;  %8394 = vperm.xlu0 %16483, %v3680_v60  }
 0x378   : > { %15570 = vmatmul.mubr.msk.f32.gmra.mrb[12].mxu1 %vm917_vm3, %v19175_v48  ;;  %15602 = vmatmul.mubr.msk.f32.gmra.mrb[32].mxu0 %vm917_vm3, %v19041_v2  ;;  %v3683_v2 = vld [vmem:[%s20919_s2 + $0xe8] sm:$0xff] }
 0x379   : > { %15572 = vmatprep.mubr.msk.f32.mxu1 %vm917_vm3, %v19184_v36  ;;  %15604 = vmatprep.mubr.msk.f32.mxu0 %vm917_vm3, %v19049_v10 }
 0x37a   : > { %v15335_v27 = vpop.f32.mrb[188].mxu1  ;;  %v15282_v24 = vpop.f32.mrb[190].mxu0  ;;  %8389 = vperm.xlu1 %16482, %v3679_v6  }
 0x37b   : > { %v4564_v43 = vadd.f32 %v15335_v27, %v4528_v11  ;;  %v4428_v25 = vpop.f32.mrb[189].mxu1  ;;  %4103 = vst.msk [vmem:[#allocation4 + $0xb8] sm:$0xff] %vm689_vm1, %v15282_v24  ;;  %v4011_v30 = vpop.f32.mrb[191].mxu0  ;;  %8404 = vperm.xlu0 %16483, %v3682_v62   ;;  %v7121_v24 = vld [vmem:[#allocation2 + $0x7d] sm:$0xff] }
 0x37c   : > { %v4563_v3 = vadd.f32 %v4527_v4, %v4428_v25  ;;  %4102 = vst.msk [vmem:[#allocation4 + $0xb0] sm:$0xff] %vm689_vm1, %v4011_v30  ;;  %15573 = vmatmul.mubr.msk.f32.gmra.mrb[14].mxu1 %vm917_vm3, %v19194_v37  ;;  %15605 = vmatmul.mubr.msk.f32.gmra.mrb[34].mxu0 %vm917_vm3, %v19062_v8  ;;  %v7122_v30 = vld [vmem:[#allocation2 + $0x85] sm:$0xff] }
 0x37d   : > { %4600 = vst.msk [vmem:[#allocation4 + $0xa8] sm:$0xff] %vm689_vm1, %v4564_v43  ;;  %15575 = vmatprep.mubr.msk.f32.mxu1 %vm917_vm3, %v19205_v39  ;;  %15607 = vmatprep.mubr.msk.f32.mxu0 %vm917_vm3, %v19071_v31  ;;  %v7112_v31 = vld [vmem:[#allocation2 + $0x35] sm:$0xff] }
 0x37e   : > { %4599 = vst.msk [vmem:[#allocation4 + $0xa0] sm:$0xff] %vm689_vm1, %v4563_v3  ;;  %8399 = vperm.xlu1 %16482, %v3681_v1  }
 0x37f   : > { %8414 = vperm.xlu0 %16483, %v3684_v58  }
 0x380   : > { %15576 = vmatmul.mubr.msk.f32.gmra.mrb[16].mxu1 %vm917_vm3, %v19215_v47  ;;  %15608 = vmatmul.mubr.msk.f32.gmra.mrb[36].mxu0 %vm917_vm3, %v19081_v50  ;;  %v7113_v50 = vld [vmem:[#allocation2 + $0x3d] sm:$0xff] }
 0x381   : > { %15578 = vmatprep.mubr.msk.f32.mxu1 %vm917_vm3, %v19224_v21  ;;  %15610 = vmatprep.mubr.msk.f32.mxu0 %vm917_vm3, %v19090_v61  ;;  %v7114_v61 = vld [vmem:[#allocation2 + $0x45] sm:$0xff] }
 0x382   : > { %8409 = vperm.xlu1 %16482, %v3683_v2   ;;  %v4530_v14 = vld [vmem:[#allocation4 + $0xb8] sm:$0xff] }
 0x383   : > { %v4529_v52 = vld [vmem:[#allocation4 + $0xb0] sm:$0xff]  ;;  %8424 = vperm.xlu0 %16483, %v3686_v44  }
 0x384   : > { %15579 = vmatmul.mubr.msk.f32.gmra.mrb[18].mxu1 %vm917_vm3, %v19233_v56  ;;  %15611 = vmatmul.mubr.msk.f32.gmra.mrb[38].mxu0 %vm917_vm3, %v19099_v49 }
 0x385   : > { %15613 = vmatprep.mubr.msk.f32.mxu0 %vm917_vm3, %v19108_v51  ;;  %15639 = vmatprep.mubr.msk.f32.mxu1 %vm917_vm3, %v7110_v12 }
 0x386   : > { %8419 = vperm.xlu1 %16482, %v3685_v33   ;;  %v7124_v33 = vld [vmem:[#allocation2 + $0x95] sm:$0xff] }
 0x387   : > { %v15338_v18 = vpop.f32.mrb[190].mxu1  ;;  %v15285_v54 = vpop.f32.mrb[192].mxu0  ;;  %8434 = vperm.xlu0 %16483, %v3688_v13   ;;  %v7128_v13 = vld [vmem:[#allocation2 + $0xb5] sm:$0xff] }
 0x388   : > { %v4566_v57 = vadd.f32 %v15338_v18, %v4530_v14  ;;  %v4438_v10 = vpop.f32.mrb[191].mxu1  ;;  %4105 = vst.msk [vmem:[#allocation4 + $0xc8] sm:$0xff] %vm689_vm1, %v15285_v54  ;;  %v4021_v15 = vpop.f32.mrb[193].mxu0  ;;  %15614 = vmatmul.mubr.msk.f32.gmra.mrb[40].mxu0 %vm917_vm3, %v19117_v19  ;;  %15640 = vmatmul.mubr.msk.f32.vlgmr.msra.gmra.mrb[20].mxu1 %vm917_vm3, %v7111_v29  ;;  %v7115_v19 = vld [vmem:[#allocation2 + $0x4d] sm:$0xff]  ;;  %v6646_v14 = vld [vmem:[#allocation2 + $0x13c] sm:$0xff] }
 0x389   : > { %v4565_v8 = vadd.f32 %v4529_v52, %v4438_v10  ;;  %4104 = vst.msk [vmem:[#allocation4 + $0xc0] sm:$0xff] %vm689_vm1, %v4021_v15  ;;  %15616 = vmatprep.mubr.msk.f32.mxu0 %vm917_vm3, %v19126_v55  ;;  %15642 = vmatprep.mubr.msk.f32.mxu1 %vm917_vm3, %v7112_v31  ;;  %v7125_v52 = vld [vmem:[#allocation2 + $0x9d] sm:$0xff]  ;;  %v5006_v31 = vld [vmem:[#allocation4] sm:$0xff] }
 0x38a   : > { %4602 = vst.msk [vmem:[#allocation4 + $0xb8] sm:$0xff] %vm689_vm1, %v4566_v57  ;;  %8429 = vperm.xlu1 %16482, %v3687_v46   ;;  %v7609_v57 = vld [vmem:[#allocation2 + $0x26] sm:$0xff] }
 0x38b   : > { %4601 = vst.msk [vmem:[#allocation4 + $0xb0] sm:$0xff] %vm689_vm1, %v4565_v8  ;;  %v7126_v46 = vld [vmem:[#allocation2 + $0xa5] sm:$0xff] }
 0x38c   : > { %15617 = vmatmul.mubr.msk.f32.gmra.mrb[42].mxu0 %vm917_vm3, %v19136_v34  ;;  %15643 = vmatmul.mubr.msk.f32.gmra.mrb[22].mxu1 %vm917_vm3, %v7113_v50  ;;  %v7118_v34 = vld [vmem:[#allocation2 + $0x65] sm:$0xff] }
 0x38d   : > { %15619 = vmatprep.mubr.msk.f32.mxu0 %vm917_vm3, %v19147_v53  ;;  %15645 = vmatprep.mubr.msk.f32.mxu1 %vm917_vm3, %v7114_v61 }
 0x38e   : > { %8439 = vperm.xlu1 %16482, %v3689_v45   ;;  %v5009_v45 = vld [vmem:[#allocation4 + $0x18] sm:$0xff] }
 0x38f   : > { %v15341_v49 = vpop.f32.mrb[192].mxu1  ;;  %v4532_v0 = vld [vmem:[#allocation4 + $0xc8] sm:$0xff]  ;;  %v15288_v51 = vpop.f32.mrb[194].mxu0 }
 0x390   : > { %v4448_v42 = vpop.f32.mrb[193].mxu1  ;;  %v4568_v55 = vadd.f32 %v15341_v49, %v4532_v0  ;;  %4107 = vst.msk [vmem:[#allocation4 + $0xd8] sm:$0xff] %vm689_vm1, %v15288_v51  ;;  %v4531_v63 = vld [vmem:[#allocation4 + $0xc0] sm:$0xff]  ;;  %v4031_v9 = vpop.f32.mrb[195].mxu0  ;;  %15620 = vmatmul.mubr.msk.f32.gmra.mrb[44].mxu0 %vm917_vm3, %v19157_v28  ;;  %15646 = vmatmul.mubr.msk.f32.gmra.mrb[24].mxu1 %vm917_vm3, %v7115_v19  ;;  %v5008_v19 = vld [vmem:[#allocation4 + $0x10] sm:$0xff] }
 0x391   : > { %v4567_v5 = vadd.f32 %v4531_v63, %v4448_v42  ;;  %4106 = vst.msk [vmem:[#allocation4 + $0xd0] sm:$0xff] %vm689_vm1, %v4031_v9  ;;  %15622 = vmatprep.mubr.msk.f32.mxu0 %vm917_vm3, %v19166_v22  ;;  %15648 = vmatprep.mubr.msk.f32.mxu1 %vm917_vm3, %v7116_v40  ;;  %v7127_v49 = vld [vmem:[#allocation2 + $0xad] sm:$0xff]  ;;  %v5011_v40 = vld [vmem:[#allocation4 + $0x28] sm:$0xff] }
 0x392   : > { %4604 = vst.msk [vmem:[#allocation4 + $0xc8] sm:$0xff] %vm689_vm1, %v4568_v55  ;;  %v7610_v0 = vld [vmem:[#allocation2 + $0x2e] sm:$0xff]  ;;  %v7611_v55 = vld [vmem:[#allocation2 + $0x36] sm:$0xff] }
 0x393   : > { %v15344_v35 = vpop.f32.mrb[194].mxu1  ;;  %4603 = vst.msk [vmem:[#allocation4 + $0xc0] sm:$0xff] %vm689_vm1, %v4567_v5  ;;  %v15291_v16 = vpop.f32.mrb[196].mxu0  ;;  %v7129_v5 = vld [vmem:[#allocation2 + $0xbd] sm:$0xff] }
 0x394   : > { %v4458_v41 = vpop.f32.mrb[195].mxu1  ;;  %4109 = vst.msk [vmem:[#allocation4 + $0xe8] sm:$0xff] %vm689_vm1, %v15291_v16  ;;  %v4041_v23 = vpop.f32.mrb[197].mxu0  ;;  %15623 = vmatmul.mubr.msk.f32.gmra.mrb[46].mxu0 %vm917_vm3, %v19175_v48  ;;  %15649 = vmatmul.mubr.msk.f32.gmra.mrb[26].mxu1 %vm917_vm3, %v7117_v38  ;;  %v5010_v38 = vld [vmem:[#allocation4 + $0x20] sm:$0xff] }
 0x395   : > { %4108 = vst.msk [vmem:[#allocation4 + $0xe0] sm:$0xff] %vm689_vm1, %v4041_v23  ;;  %15625 = vmatprep.mubr.msk.f32.mxu0 %vm917_vm3, %v19184_v36  ;;  %15651 = vmatprep.mubr.msk.f32.mxu1 %vm917_vm3, %v7118_v34  ;;  %v7130_v23 = vld [vmem:[#allocation2 + $0xc5] sm:$0xff] }
 0x396   : > { %v7613_v34 = vld [vmem:[#allocation2 + $0x46] sm:$0xff] }
 0x397   : > { %v15347_v26 = vpop.f32.mrb[196].mxu1  ;;  %v4534_v53 = vld [vmem:[#allocation4 + $0xd8] sm:$0xff]  ;;  %v15294_v59 = vpop.f32.mrb[198].mxu0 }
 0x398   : > { %v4468_v28 = vpop.f32.mrb[197].mxu1  ;;  %v4570_v22 = vadd.f32 %v15344_v35, %v4534_v53  ;;  %v4533_v7 = vld [vmem:[#allocation4 + $0xd0] sm:$0xff]  ;;  %4111 = vst.msk [vmem:[#allocation4 + $0xf8] sm:$0xff] %vm689_vm1, %v15294_v59  ;;  %v4051_v48 = vpop.f32.mrb[199].mxu0  ;;  %15626 = vmatmul.mubr.msk.f32.gmra.mrb[48].mxu0 %vm917_vm3, %v19194_v37  ;;  %15652 = vmatmul.mubr.msk.f32.gmra.mrb[28].mxu1 %vm917_vm3, %v7119_v20  ;;  %v5013_v59 = vld [vmem:[#allocation4 + $0x38] sm:$0xff] }
 0x399   : > { %v4569_v6 = vadd.f32 %v4533_v7, %v4458_v41  ;;  %4110 = vst.msk [vmem:[#allocation4 + $0xf0] sm:$0xff] %vm689_vm1, %v4051_v48  ;;  %15628 = vmatprep.mubr.msk.f32.mxu0 %vm917_vm3, %v19205_v39  ;;  %15654 = vmatprep.mubr.msk.f32.mxu1 %vm917_vm3, %v7120_v32  ;;  %v7612_v35 = vld [vmem:[#allocation2 + $0x3e] sm:$0xff]  ;;  %v7614_v20 = vld [vmem:[#allocation2 + $0x4e] sm:$0xff] }
 0x39a   : > { %4606 = vst.msk [vmem:[#allocation4 + $0xd8] sm:$0xff] %vm689_vm1, %v4570_v22  ;;  %v5012_v48 = vld [vmem:[#allocation4 + $0x30] sm:$0xff]  ;;  %v7132_v32 = vld [vmem:[#allocation2 + $0xd5] sm:$0xff] }
 0x39b   : > { %v15350_v36 = vpop.f32.mrb[198].mxu1  ;;  %4605 = vst.msk [vmem:[#allocation4 + $0xd0] sm:$0xff] %vm689_vm1, %v4569_v6  ;;  %v4536_v27 = vld [vmem:[#allocation4 + $0xe8] sm:$0xff]  ;;  %v15297_v11 = vpop.f32.mrb[200].mxu0 }
 0x39c   : > { %v4478_v43 = vpop.f32.mrb[199].mxu1  ;;  %v4572_v25 = vadd.f32 %v15347_v26, %v4536_v27  ;;  %v4535_v4 = vld [vmem:[#allocation4 + $0xe0] sm:$0xff]  ;;  %4113 = vst.msk [vmem:[#allocation4 + $0x108] sm:$0xff] %vm689_vm1, %v15297_v11  ;;  %v4061_v3 = vpop.f32.mrb[201].mxu0  ;;  %15629 = vmatmul.mubr.msk.f32.gmra.mrb[50].mxu0 %vm917_vm3, %v19215_v47  ;;  %15655 = vmatmul.mubr.msk.f32.gmra.mrb[30].mxu1 %vm917_vm3, %v7121_v24  ;;  %v5015_v11 = vld [vmem:[#allocation4 + $0x48] sm:$0xff] }
 0x39d   : > { %v4571_v37 = vadd.f32 %v4535_v4, %v4468_v28  ;;  %4112 = vst.msk [vmem:[#allocation4 + $0x100] sm:$0xff] %vm689_vm1, %v4061_v3  ;;  %15631 = vmatprep.mubr.msk.f32.mxu0 %vm917_vm3, %v19224_v21  ;;  %15657 = vmatprep.mubr.msk.f32.mxu1 %vm917_vm3, %v7122_v30  ;;  %v7123_v47 = vld [vmem:[#allocation2 + $0x8d] sm:$0xff]  ;;  %v7615_v6 = vld [vmem:[#allocation2 + $0x56] sm:$0xff]  ;;  %v7616_v24 = vld [vmem:[#allocation2 + $0x5e] sm:$0xff] }
 0x39e   : > { %4608 = vst.msk [vmem:[#allocation4 + $0xe8] sm:$0xff] %vm689_vm1, %v4572_v25  ;;  %v6645_v21 = vld [vmem:[#allocation2 + $0x134] sm:$0xff]  ;;  %v7134_v30 = vld [vmem:[#allocation2 + $0xe5] sm:$0xff] }
 0x39f   : > { %v15353_v17 = vpop.f32.mrb[200].mxu1  ;;  %4607 = vst.msk [vmem:[#allocation4 + $0xe0] sm:$0xff] %vm689_vm1, %v4571_v37  ;;  %v4538_v39 = vld [vmem:[#allocation4 + $0xf8] sm:$0xff]  ;;  %v15300_v1 = vpop.f32.mrb[202].mxu0  ;;  %v5014_v3 = vld [vmem:[#allocation4 + $0x40] sm:$0xff] }
 0x3a0   : > { %v4488_v60 = vpop.f32.mrb[201].mxu1  ;;  %v4574_v2 = vadd.f32 %v15350_v36, %v4538_v39  ;;  %v4537_v62 = vld [vmem:[#allocation4 + $0xf0] sm:$0xff]  ;;  %4115 = vst.msk [vmem:[#allocation4 + $0x118] sm:$0xff] %vm689_vm1, %v15300_v1  ;;  %v4071_v12 = vpop.f32.mrb[203].mxu0  ;;  %15632 = vmatmul.mubr.msk.f32.gmra.mrb[52].mxu0 %vm917_vm3, %v19233_v56  ;;  %15658 = vmatmul.mubr.msk.f32.gmra.mrb[32].mxu1 %vm917_vm3, %v7123_v47  ;;  %v5007_v56 = vld [vmem:[#allocation4 + $0x8] sm:$0xff]  ;;  %v7131_v28 = vld [vmem:[#allocation2 + $0xcd] sm:$0xff] }
 0x3a1   : > { %v4573_v18 = vadd.f32 %v4537_v62, %v4478_v43  ;;  %4114 = vst.msk [vmem:[#allocation4 + $0x110] sm:$0xff] %vm689_vm1, %v4071_v12  ;;  %15634 = vmatprep.mubr.msk.f32.mxu0 %vm917_vm3, %v6645_v21  ;;  %15660 = vmatprep.mubr.msk.f32.mxu1 %vm917_vm3, %v7124_v33  ;;  %v7133_v43 = vld [vmem:[#allocation2 + $0xdd] sm:$0xff]  ;;  %v7617_v37 = vld [vmem:[#allocation2 + $0x66] sm:$0xff]  ;;  %v7618_v47 = vld [vmem:[#allocation2 + $0x6e] sm:$0xff] }
 0x3a2   : > { %4610 = vst.msk [vmem:[#allocation4 + $0xf8] sm:$0xff] %vm689_vm1, %v4574_v2  ;;  %v5017_v1 = vld [vmem:[#allocation4 + $0x58] sm:$0xff]  ;;  %v5016_v12 = vld [vmem:[#allocation4 + $0x50] sm:$0xff]  ;;  %v7136_v21 = vld [vmem:[#allocation2 + $0xf5] sm:$0xff] }
 0x3a3   : > { %4609 = vst.msk [vmem:[#allocation4 + $0xf0] sm:$0xff] %vm689_vm1, %v4573_v18  ;;  %v4540_v54 = vld [vmem:[#allocation4 + $0x108] sm:$0xff]  ;;  %v15361_v10 = vpop.f32.mrb[204].mxu0 }
 0x3a4   : > { %v4576_v29 = vadd.f32 %v15353_v17, %v4540_v54  ;;  %v4539_v58 = vld [vmem:[#allocation4 + $0x100] sm:$0xff]  ;;  %v5043_v8 = vadd.f32 %v15361_v10, %v5007_v56  ;;  %v4827_v15 = vpop.f32.mrb[205].mxu0  ;;  %15635 = vmatmul.mubr.msk.f32.gmra.mrb[54].mxu0 %vm917_vm3, %v6646_v14  ;;  %15661 = vmatmul.mubr.msk.f32.gmra.mrb[34].mxu1 %vm917_vm3, %v7125_v52  ;;  %v7137_v54 = vld [vmem:[#allocation2 + $0xfd] sm:$0xff] }
 0x3a5   : > { %v4575_v50 = vadd.f32 %v4539_v58, %v4488_v60  ;;  %v5042_v44 = vadd.f32 %v5006_v31, %v4827_v15  ;;  %15663 = vmatprep.mubr.msk.f32.mxu1 %vm917_vm3, %v7126_v46  ;;  %15695 = vmatprep.mubr.msk.f32.mxu0 %vm917_vm3, %v7609_v57  ;;  %v7135_v60 = vld [vmem:[#allocation2 + $0xed] sm:$0xff]  ;;  %v7619_v33 = vld [vmem:[#allocation2 + $0x76] sm:$0xff]  ;;  %v7620_v10 = vld [vmem:[#allocation2 + $0x7e] sm:$0xff] }
 0x3a6   : > { %4612 = vst.msk [vmem:[#allocation4 + $0x108] sm:$0xff] %vm689_vm1, %v4576_v29  ;;  %5079 = vst.msk [vmem:[#allocation4 + $0x8] sm:$0xff] %vm689_vm1, %v5043_v8  ;;  %v5019_v57 = vld [vmem:[#allocation4 + $0x68] sm:$0xff]  ;;  %v5018_v29 = vld [vmem:[#allocation4 + $0x60] sm:$0xff] }
 0x3a7   : > { %4611 = vst.msk [vmem:[#allocation4 + $0x100] sm:$0xff] %vm689_vm1, %v4575_v50  ;;  %5078 = vst.msk [vmem:[#allocation4] sm:$0xff] %vm689_vm1, %v5042_v44  ;;  %v15364_v61 = vpop.f32.mrb[206].mxu0  ;;  %v7138_v58 = vld [vmem:[#allocation2 + $0x105] sm:$0xff]  ;;  %v7139_v50 = vld [vmem:[#allocation2 + $0x10d] sm:$0xff] }
 0x3a8   : > { %v5045_v51 = vadd.f32 %v15364_v61, %v5009_v45  ;;  %v4837_v42 = vpop.f32.mrb[207].mxu0  ;;  %15664 = vmatmul.mubr.msk.f32.gmra.mrb[36].mxu1 %vm917_vm3, %v7127_v49  ;;  %15696 = vmatmul.mubr.msk.f32.vlgmr.msra.gmra.mrb[56].mxu0 %vm917_vm3, %v7610_v0  ;;  %v7621_v8 = vld [vmem:[#allocation2 + $0x86] sm:$0xff]  ;;  %v7622_v44 = vld [vmem:[#allocation2 + $0x8e] sm:$0xff] }
 0x3a9   : > { %v5044_v63 = vadd.f32 %v5008_v19, %v4837_v42  ;;  %15666 = vmatprep.mubr.msk.f32.mxu1 %vm917_vm3, %v7128_v13  ;;  %15698 = vmatprep.mubr.msk.f32.mxu0 %vm917_vm3, %v7611_v55  ;;  %v5021_v46 = vld [vmem:[#allocation4 + $0x78] sm:$0xff]  ;;  %v5020_v49 = vld [vmem:[#allocation4 + $0x70] sm:$0xff]  ;;  %v7140_v0 = vld [vmem:[#allocation2 + $0x115] sm:$0xff] }
 0x3aa   : > { %5081 = vst.msk [vmem:[#allocation4 + $0x18] sm:$0xff] %vm689_vm1, %v5045_v51  ;;  %v7623_v51 = vld [vmem:[#allocation2 + $0x96] sm:$0xff] }
 0x3ab   : > { %5080 = vst.msk [vmem:[#allocation4 + $0x10] sm:$0xff] %vm689_vm1, %v5044_v63  ;;  %v15367_v9 = vpop.f32.mrb[208].mxu0  ;;  %v5023_v13 = vld [vmem:[#allocation4 + $0x88] sm:$0xff] }
 0x3ac   : > { %v5047_v16 = vadd.f32 %v15367_v9, %v5011_v40  ;;  %v4847_v41 = vpop.f32.mrb[209].mxu0  ;;  %15667 = vmatmul.mubr.msk.f32.gmra.mrb[38].mxu1 %vm917_vm3, %v7129_v5  ;;  %15699 = vmatmul.mubr.msk.f32.gmra.mrb[58].mxu0 %vm917_vm3, %v7612_v35  ;;  %v7141_v55 = vld [vmem:[#allocation2 + $0x11d] sm:$0xff]  ;;  %v5022_v5 = vld [vmem:[#allocation4 + $0x80] sm:$0xff]  ;;  %v7142_v35 = vld [vmem:[#allocation2 + $0x125] sm:$0xff] }
 0x3ad   : > { %v5046_v26 = vadd.f32 %v5010_v38, %v4847_v41  ;;  %15669 = vmatprep.mubr.msk.f32.mxu1 %vm917_vm3, %v7130_v23  ;;  %15701 = vmatprep.mubr.msk.f32.mxu0 %vm917_vm3, %v7613_v34  ;;  %v7624_v63 = vld [vmem:[#allocation2 + $0x9e] sm:$0xff]  ;;  %v7626_v38 = vld [vmem:[#allocation2 + $0xae] sm:$0xff]  ;;  %v7627_v23 = vld [vmem:[#allocation2 + $0xb6] sm:$0xff] }
 0x3ae   : > { %5083 = vst.msk [vmem:[#allocation4 + $0x28] sm:$0xff] %vm689_vm1, %v5047_v16  ;;  %v7625_v16 = vld [vmem:[#allocation2 + $0xa6] sm:$0xff] }
 0x3af   : > { %5082 = vst.msk [vmem:[#allocation4 + $0x20] sm:$0xff] %vm689_vm1, %v5046_v26  ;;  %v15370_v53 = vpop.f32.mrb[210].mxu0  ;;  %v4542_v26 = vld [vmem:[#allocation4 + $0x118] sm:$0xff] }
 0x3b0   : > { %v5049_v22 = vadd.f32 %v15370_v53, %v5013_v59  ;;  %v4857_v7 = vpop.f32.mrb[211].mxu0  ;;  %15670 = vmatmul.mubr.msk.f32.gmra.mrb[40].mxu1 %vm917_vm3, %v7131_v28  ;;  %15702 = vmatmul.mubr.msk.f32.gmra.mrb[60].mxu0 %vm917_vm3, %v7614_v20  ;;  %v5025_v59 = vld [vmem:[#allocation4 + $0x98] sm:$0xff] }
 0x3b1   : > { %v5048_v36 = vadd.f32 %v5012_v48, %v4857_v7  ;;  %15672 = vmatprep.mubr.msk.f32.mxu1 %vm917_vm3, %v7132_v32  ;;  %15704 = vmatprep.mubr.msk.f32.mxu0 %vm917_vm3, %v7615_v6  ;;  %v7143_v28 = vld [vmem:[#allocation2 + $0x12d] sm:$0xff]  ;;  %v4541_v48 = vld [vmem:[#allocation4 + $0x110] sm:$0xff] }
 0x3b2   : > { %5085 = vst.msk [vmem:[#allocation4 + $0x38] sm:$0xff] %vm689_vm1, %v5049_v22  ;;  %v5024_v6 = vld [vmem:[#allocation4 + $0x90] sm:$0xff] }
 0x3b3   : > { %5084 = vst.msk [vmem:[#allocation4 + $0x30] sm:$0xff] %vm689_vm1, %v5048_v36  ;;  %v15373_v27 = vpop.f32.mrb[212].mxu0  ;;  %v7144_v36 = vld [vmem:[#allocation2 + $0x135] sm:$0xff] }
 0x3b4   : > { %v5051_v25 = vadd.f32 %v15373_v27, %v5015_v11  ;;  %v4867_v4 = vpop.f32.mrb[213].mxu0  ;;  %15673 = vmatmul.mubr.msk.f32.gmra.mrb[42].mxu1 %vm917_vm3, %v7133_v43  ;;  %15705 = vmatmul.mubr.msk.f32.gmra.mrb[62].mxu0 %vm917_vm3, %v7616_v24  ;;  %v7628_v43 = vld [vmem:[#allocation2 + $0xbe] sm:$0xff] }
 0x3b5   : > { %v5050_v17 = vadd.f32 %v5014_v3, %v4867_v4  ;;  %15675 = vmatprep.mubr.msk.f32.mxu1 %vm917_vm3, %v7134_v30  ;;  %15707 = vmatprep.mubr.msk.f32.mxu0 %vm917_vm3, %v7617_v37  ;;  %v5506_v3 = vld [vmem:[#allocation4 + $0x8] sm:$0xff] }
 0x3b6   : > { %5087 = vst.msk [vmem:[#allocation4 + $0x48] sm:$0xff] %vm689_vm1, %v5051_v25  ;;  %v5027_v25 = vld [vmem:[#allocation4 + $0xa8] sm:$0xff] }
 0x3b7   : > { %5086 = vst.msk [vmem:[#allocation4 + $0x40] sm:$0xff] %vm689_vm1, %v5050_v17  ;;  %v15376_v39 = vpop.f32.mrb[214].mxu0  ;;  %v7145_v30 = vld [vmem:[#allocation2 + $0x13d] sm:$0xff] }
 0x3b8   : > { %v5053_v2 = vadd.f32 %v15376_v39, %v5017_v1  ;;  %v4877_v62 = vpop.f32.mrb[215].mxu0  ;;  %15676 = vmatmul.mubr.msk.f32.gmra.mrb[44].mxu1 %vm917_vm3, %v7135_v60  ;;  %15708 = vmatmul.mubr.msk.f32.gmra.mrb[64].mxu0 %vm917_vm3, %v7618_v47  ;;  %v5026_v1 = vld [vmem:[#allocation4 + $0xa0] sm:$0xff] }
 0x3b9   : > { %v5052_v18 = vadd.f32 %v5016_v12, %v4877_v62  ;;  %15678 = vmatprep.mubr.msk.f32.mxu1 %vm917_vm3, %v7136_v21  ;;  %15710 = vmatprep.mubr.msk.f32.mxu0 %vm917_vm3, %v7619_v33  ;;  %v5505_v47 = vld [vmem:[#allocation4] sm:$0xff]  ;;  %v8550_v21 = vld [vmem:[%s20924_s7] sm:$0xf] }
 0x3ba   : > { %5089 = vst.msk [vmem:[#allocation4 + $0x58] sm:$0xff] %vm689_vm1, %v5053_v2  ;;  %v7629_v2 = vld [vmem:[#allocation2 + $0xc6] sm:$0xff]  ;;  %15749 = vmatprep.subr.msk.mxu1 %vm981_vm0, %v8550_v21 }
 0x3bb   : > { %5088 = vst.msk [vmem:[#allocation4 + $0x50] sm:$0xff] %vm689_vm1, %v5052_v18  ;;  %v15379_v14 = vpop.f32.mrb[216].mxu0  ;;  %v5029_v18 = vld [vmem:[#allocation4 + $0xb8] sm:$0xff]  ;;  %15750 = vmatpush3.msk.msra.mxu1 %vm981_vm0, %v8550_v21 }
 0x3bc   : > { %v5055_v56 = vadd.f32 %v15379_v14, %v5019_v57  ;;  %v4887_v52 = vpop.f32.mrb[217].mxu0  ;;  %15679 = vmatmul.mubr.msk.f32.gmra.mrb[46].mxu1 %vm917_vm3, %v7137_v54  ;;  %15711 = vmatmul.mubr.msk.f32.gmra.mrb[66].mxu0 %vm917_vm3, %v7620_v10  ;;  %v5508_v57 = vld [vmem:[#allocation4 + $0x18] sm:$0xff] }
 0x3bd   : > { %v5054_v15 = vadd.f32 %v5018_v29, %v4887_v52  ;;  %15681 = vmatprep.mubr.msk.f32.mxu1 %vm917_vm3, %v7138_v58  ;;  %15713 = vmatprep.mubr.msk.f32.mxu0 %vm917_vm3, %v7621_v8  ;;  %v7630_v54 = vld [vmem:[#allocation2 + $0xce] sm:$0xff]  ;;  %v5028_v29 = vld [vmem:[#allocation4 + $0xb0] sm:$0xff] }
 0x3be   : > { %5091 = vst.msk [vmem:[#allocation4 + $0x68] sm:$0xff] %vm689_vm1, %v5055_v56  ;;  %v5507_v8 = vld [vmem:[#allocation4 + $0x10] sm:$0xff] }
 0x3bf   : > { %5090 = vst.msk [vmem:[#allocation4 + $0x60] sm:$0xff] %vm689_vm1, %v5054_v15  ;;  %v15382_v31 = vpop.f32.mrb[218].mxu0  ;;  %v7631_v15 = vld [vmem:[#allocation2 + $0xd6] sm:$0xff] }
 0x3c0   : > { %v5057_v61 = vadd.f32 %v15382_v31, %v5021_v46  ;;  %v4897_v45 = vpop.f32.mrb[219].mxu0  ;;  %15682 = vmatmul.mubr.msk.f32.gmra.mrb[48].mxu1 %vm917_vm3, %v7139_v50  ;;  %15714 = vmatmul.mubr.msk.f32.gmra.mrb[68].mxu0 %vm917_vm3, %v7622_v44  ;;  %v5031_v44 = vld [vmem:[#allocation4 + $0xc8] sm:$0xff] }
 0x3c1   : > { %v5056_v42 = vadd.f32 %v5020_v49, %v4897_v45  ;;  %15684 = vmatprep.mubr.msk.f32.mxu1 %vm917_vm3, %v7140_v0  ;;  %15716 = vmatprep.mubr.msk.f32.mxu0 %vm917_vm3, %v7623_v51  ;;  %v5510_v45 = vld [vmem:[#allocation4 + $0x28] sm:$0xff] }
 0x3c2   : > { %5093 = vst.msk [vmem:[#allocation4 + $0x78] sm:$0xff] %vm689_vm1, %v5057_v61  ;;  %v7632_v49 = vld [vmem:[#allocation2 + $0xde] sm:$0xff] }
 0x3c3   : > { %5092 = vst.msk [vmem:[#allocation4 + $0x70] sm:$0xff] %vm689_vm1, %v5056_v42  ;;  %v15385_v19 = vpop.f32.mrb[220].mxu0 }
 0x3c4   : > { %v5059_v9 = vadd.f32 %v15385_v19, %v5023_v13  ;;  %v4907_v40 = vpop.f32.mrb[221].mxu0  ;;  %15685 = vmatmul.mubr.msk.f32.gmra.mrb[50].mxu1 %vm917_vm3, %v7141_v55  ;;  %15717 = vmatmul.mubr.msk.f32.gmra.mrb[70].mxu0 %vm917_vm3, %v7624_v63  ;;  %v5030_v19 = vld [vmem:[#allocation4 + $0xc0] sm:$0xff]  ;;  %v7633_v63 = vld [vmem:[#allocation2 + $0xe6] sm:$0xff] }
 0x3c5   : > { %v5058_v41 = vadd.f32 %v5022_v5, %v4907_v40  ;;  %15687 = vmatprep.mubr.msk.f32.mxu1 %vm917_vm3, %v7142_v35  ;;  %15719 = vmatprep.mubr.msk.f32.mxu0 %vm917_vm3, %v7625_v16  ;;  %v5509_v55 = vld [vmem:[#allocation4 + $0x20] sm:$0xff]  ;;  %v5033_v35 = vld [vmem:[#allocation4 + $0xd8] sm:$0xff] }
 0x3c6   : > { %5095 = vst.msk [vmem:[#allocation4 + $0x88] sm:$0xff] %vm689_vm1, %v5059_v9 }
 0x3c7   : > { %5094 = vst.msk [vmem:[#allocation4 + $0x80] sm:$0xff] %vm689_vm1, %v5058_v41  ;;  %v15356_v34 = vpop.f32.mrb[202].mxu1  ;;  %v15388_v53 = vpop.f32.mrb[222].mxu0  ;;  %v5512_v41 = vld [vmem:[#allocation4 + $0x38] sm:$0xff] }
 0x3c8   : > { %v4578_v20 = vadd.f32 %v15356_v34, %v4542_v26  ;;  %v5061_v22 = vadd.f32 %v15388_v53, %v5025_v59  ;;  %v4498_v7 = vpop.f32.mrb[203].mxu1  ;;  %v4917_v32 = vpop.f32.mrb[223].mxu0  ;;  %15688 = vmatmul.mubr.msk.f32.gmra.mrb[52].mxu1 %vm917_vm3, %v7143_v28  ;;  %15720 = vmatmul.mubr.msk.f32.gmra.mrb[72].mxu0 %vm917_vm3, %v7626_v38  ;;  %v7634_v38 = vld [vmem:[#allocation2 + $0xee] sm:$0xff]  ;;  %v5032_v53 = vld [vmem:[#allocation4 + $0xd0] sm:$0xff] }
 0x3c9   : > { %v4577_v27 = vadd.f32 %v4541_v48, %v4498_v7  ;;  %v5060_v11 = vadd.f32 %v5024_v6, %v4917_v32  ;;  %15690 = vmatprep.mubr.msk.f32.mxu1 %vm917_vm3, %v7144_v36  ;;  %15722 = vmatprep.mubr.msk.f32.mxu0 %vm917_vm3, %v7627_v23  ;;  %v5511_v28 = vld [vmem:[#allocation4 + $0x30] sm:$0xff]  ;;  %v5035_v32 = vld [vmem:[#allocation4 + $0xe8] sm:$0xff] }
 0x3ca   : > { %4614 = vst.msk [vmem:[#allocation4 + $0x118] sm:$0xff] %vm689_vm1, %v4578_v20  ;;  %5097 = vst.msk [vmem:[#allocation4 + $0x98] sm:$0xff] %vm689_vm1, %v5061_v22  ;;  %v7635_v20 = vld [vmem:[#allocation2 + $0xf6] sm:$0xff] }
 0x3cb   : > { %4613 = vst.msk [vmem:[#allocation4 + $0x110] sm:$0xff] %vm689_vm1, %v4577_v27  ;;  %5096 = vst.msk [vmem:[#allocation4 + $0x90] sm:$0xff] %vm689_vm1, %v5060_v11  ;;  %v15391_v24 = vpop.f32.mrb[224].mxu0  ;;  %v15417_v4 = vpop.f32.mrb[204].mxu1  ;;  %v5514_v36 = vld [vmem:[#allocation4 + $0x48] sm:$0xff] }
 0x3cc   : > { %v5063_v37 = vadd.f32 %v15391_v24, %v5027_v25  ;;  %v5542_v17 = vadd.f32 %v15417_v4, %v5506_v3  ;;  %v4927_v39 = vpop.f32.mrb[225].mxu0  ;;  %v5326_v60 = vpop.f32.mrb[205].mxu1  ;;  %15691 = vmatmul.mubr.msk.f32.gmra.mrb[54].mxu1 %vm917_vm3, %v7145_v30  ;;  %15723 = vmatmul.mubr.msk.f32.gmra.mrb[74].mxu0 %vm917_vm3, %v7628_v43  ;;  %v7636_v27 = vld [vmem:[#allocation2 + $0xfe] sm:$0xff]  ;;  %v5034_v25 = vld [vmem:[#allocation4 + $0xe0] sm:$0xff]  ;;  %v7637_v30 = vld [vmem:[#allocation2 + $0x106] sm:$0xff] }
 0x3cd   : > { %v5062_v62 = vadd.f32 %v5026_v1, %v4927_v39  ;;  %v5541_v12 = vadd.f32 %v5505_v47, %v5326_v60  ;;  %15725 = vmatprep.mubr.msk.f32.mxu0 %vm917_vm3, %v7629_v2  ;;  %v5513_v3 = vld [vmem:[#allocation4 + $0x40] sm:$0xff]  ;;  %v5037_v1 = vld [vmem:[#allocation4 + $0xf8] sm:$0xff] }
 0x3ce   : > { %5099 = vst.msk [vmem:[#allocation4 + $0xa8] sm:$0xff] %vm689_vm1, %v5063_v37  ;;  %5578 = vst.msk [vmem:[#allocation4 + $0x8] sm:$0xff] %vm689_vm1, %v5542_v17  ;;  %v5516_v47 = vld [vmem:[#allocation4 + $0x58] sm:$0xff] }
 0x3cf   : > { %5098 = vst.msk [vmem:[#allocation4 + $0xa0] sm:$0xff] %vm689_vm1, %v5062_v62  ;;  %5577 = vst.msk [vmem:[#allocation4] sm:$0xff] %vm689_vm1, %v5541_v12  ;;  %v15394_v33 = vpop.f32.mrb[226].mxu0  ;;  %v15420_v14 = vpop.f32.mrb[206].mxu1  ;;  %v7638_v2 = vld [vmem:[#allocation2 + $0x10e] sm:$0xff] }
 0x3d0   : > { %v5065_v10 = vadd.f32 %v15394_v33, %v5029_v18  ;;  %v5544_v56 = vadd.f32 %v15420_v14, %v5508_v57  ;;  %v4937_v52 = vpop.f32.mrb[227].mxu0  ;;  %v5336_v58 = vpop.f32.mrb[207].mxu1  ;;  %15726 = vmatmul.mubr.msk.f32.gmra.mrb[76].mxu0 %vm917_vm3, %v7630_v54  ;;  %v5036_v33 = vld [vmem:[#allocation4 + $0xf0] sm:$0xff]  ;;  %v7639_v57 = vld [vmem:[#allocation2 + $0x116] sm:$0xff] }
 0x3d1   : > { %v5064_v31 = vadd.f32 %v5028_v29, %v4937_v52  ;;  %v5543_v46 = vadd.f32 %v5507_v8, %v5336_v58  ;;  %15728 = vmatprep.mubr.msk.f32.mxu0 %vm917_vm3, %v7631_v15  ;;  %v5515_v14 = vld [vmem:[#allocation4 + $0x50] sm:$0xff]  ;;  %v5039_v52 = vld [vmem:[#allocation4 + $0x108] sm:$0xff] }
 0x3d2   : > { %5101 = vst.msk [vmem:[#allocation4 + $0xb8] sm:$0xff] %vm689_vm1, %v5065_v10  ;;  %5580 = vst.msk [vmem:[#allocation4 + $0x18] sm:$0xff] %vm689_vm1, %v5544_v56  ;;  %v5518_v58 = vld [vmem:[#allocation4 + $0x68] sm:$0xff] }
 0x3d3   : > { %5100 = vst.msk [vmem:[#allocation4 + $0xb0] sm:$0xff] %vm689_vm1, %v5064_v31  ;;  %5579 = vst.msk [vmem:[#allocation4 + $0x10] sm:$0xff] %vm689_vm1, %v5543_v46  ;;  %v15397_v50 = vpop.f32.mrb[228].mxu0  ;;  %v15423_v61 = vpop.f32.mrb[208].mxu1  ;;  %v7640_v8 = vld [vmem:[#allocation2 + $0x11e] sm:$0xff] }
 0x3d4   : > { %v5067_v0 = vadd.f32 %v15397_v50, %v5031_v44  ;;  %v5546_v51 = vadd.f32 %v15423_v61, %v5510_v45  ;;  %v4947_v42 = vpop.f32.mrb[229].mxu0  ;;  %v5346_v13 = vpop.f32.mrb[209].mxu1  ;;  %15729 = vmatmul.mubr.msk.f32.gmra.mrb[78].mxu0 %vm917_vm3, %v7632_v49  ;;  %v5038_v50 = vld [vmem:[#allocation4 + $0x100] sm:$0xff]  ;;  %v7641_v45 = vld [vmem:[#allocation2 + $0x126] sm:$0xff] }
 0x3d5   : > { %v5066_v9 = vadd.f32 %v5030_v19, %v4947_v42  ;;  %v5545_v40 = vadd.f32 %v5509_v55, %v5346_v13  ;;  %15731 = vmatprep.mubr.msk.f32.mxu0 %vm917_vm3, %v7633_v63  ;;  %v5517_v61 = vld [vmem:[#allocation4 + $0x60] sm:$0xff]  ;;  %v5041_v42 = vld [vmem:[#allocation4 + $0x118] sm:$0xff] }
 0x3d6   : > { %5103 = vst.msk [vmem:[#allocation4 + $0xc8] sm:$0xff] %vm689_vm1, %v5067_v0  ;;  %5582 = vst.msk [vmem:[#allocation4 + $0x28] sm:$0xff] %vm689_vm1, %v5546_v51  ;;  %v5520_v13 = vld [vmem:[#allocation4 + $0x78] sm:$0xff] }
 0x3d7   : > { %5102 = vst.msk [vmem:[#allocation4 + $0xc0] sm:$0xff] %vm689_vm1, %v5066_v9  ;;  %5581 = vst.msk [vmem:[#allocation4 + $0x20] sm:$0xff] %vm689_vm1, %v5545_v40  ;;  %v15400_v5 = vpop.f32.mrb[230].mxu0  ;;  %v15426_v16 = vpop.f32.mrb[210].mxu1  ;;  %v7642_v55 = vld [vmem:[#allocation2 + $0x12e] sm:$0xff] }
 0x3d8   : > { %v5069_v23 = vadd.f32 %v15400_v5, %v5033_v35  ;;  %v5548_v34 = vadd.f32 %v15426_v16, %v5512_v41  ;;  %v4957_v26 = vpop.f32.mrb[231].mxu0  ;;  %v5356_v59 = vpop.f32.mrb[211].mxu1  ;;  %15732 = vmatmul.mubr.msk.f32.gmra.mrb[80].mxu0 %vm917_vm3, %v7634_v38  ;;  %v5040_v5 = vld [vmem:[#allocation4 + $0x110] sm:$0xff]  ;;  %v7643_v41 = vld [vmem:[#allocation2 + $0x136] sm:$0xff] }
 0x3d9   : > { %v5068_v22 = vadd.f32 %v5032_v53, %v4957_v26  ;;  %v5547_v7 = vadd.f32 %v5511_v28, %v5356_v59  ;;  %15734 = vmatprep.mubr.msk.f32.mxu0 %vm917_vm3, %v7635_v20  ;;  %v5519_v16 = vld [vmem:[#allocation4 + $0x70] sm:$0xff]  ;;  %v5522_v26 = vld [vmem:[#allocation4 + $0x88] sm:$0xff] }
 0x3da   : > { %5105 = vst.msk [vmem:[#allocation4 + $0xd8] sm:$0xff] %vm689_vm1, %v5069_v23  ;;  %5584 = vst.msk [vmem:[#allocation4 + $0x38] sm:$0xff] %vm689_vm1, %v5548_v34  ;;  %v6005_v59 = vld [vmem:[#allocation4 + $0x8] sm:$0xff] }
 0x3db   : > { %5104 = vst.msk [vmem:[#allocation4 + $0xd0] sm:$0xff] %vm689_vm1, %v5068_v22  ;;  %5583 = vst.msk [vmem:[#allocation4 + $0x30] sm:$0xff] %vm689_vm1, %v5547_v7  ;;  %v15403_v48 = vpop.f32.mrb[232].mxu0  ;;  %v15429_v6 = vpop.f32.mrb[212].mxu1  ;;  %v7644_v28 = vld [vmem:[#allocation2 + $0x13e] sm:$0xff] }
 0x3dc   : > { %v5071_v11 = vadd.f32 %v15403_v48, %v5035_v32  ;;  %v5550_v43 = vadd.f32 %v15429_v6, %v5514_v36  ;;  %v4967_v24 = vpop.f32.mrb[233].mxu0  ;;  %v5366_v4 = vpop.f32.mrb[213].mxu1  ;;  %15735 = vmatmul.mubr.msk.f32.gmra.mrb[82].mxu0 %vm917_vm3, %v7636_v27  ;;  %v5521_v48 = vld [vmem:[#allocation4 + $0x80] sm:$0xff] }
 0x3dd   : > { %v5070_v37 = vadd.f32 %v5034_v25, %v4967_v24  ;;  %v5549_v17 = vadd.f32 %v5513_v3, %v5366_v4  ;;  %15737 = vmatprep.mubr.msk.f32.mxu0 %vm917_vm3, %v7637_v30  ;;  %v6004_v6 = vld [vmem:[#allocation4] sm:$0xff]  ;;  %v6007_v25 = vld [vmem:[#allocation4 + $0x18] sm:$0xff] }
 0x3de   : > { %5107 = vst.msk [vmem:[#allocation4 + $0xe8] sm:$0xff] %vm689_vm1, %v5071_v11  ;;  %5586 = vst.msk [vmem:[#allocation4 + $0x48] sm:$0xff] %vm689_vm1, %v5550_v43  ;;  %v5524_v43 = vld [vmem:[#allocation4 + $0x98] sm:$0xff] }
 0x3df   : > { %5106 = vst.msk [vmem:[#allocation4 + $0xe0] sm:$0xff] %vm689_vm1, %v5070_v37  ;;  %5585 = vst.msk [vmem:[#allocation4 + $0x40] sm:$0xff] %vm689_vm1, %v5549_v17  ;;  %v15406_v39 = vpop.f32.mrb[234].mxu0  ;;  %v15432_v60 = vpop.f32.mrb[214].mxu1  ;;  %v5523_v37 = vld [vmem:[#allocation4 + $0x90] sm:$0xff] }
 0x3e0   : > { %v5073_v62 = vadd.f32 %v15406_v39, %v5037_v1  ;;  %v5552_v12 = vadd.f32 %v15432_v60, %v5516_v47  ;;  %v4977_v21 = vpop.f32.mrb[235].mxu0  ;;  %v5376_v18 = vpop.f32.mrb[215].mxu1  ;;  %15738 = vmatmul.mubr.msk.f32.gmra.mrb[84].mxu0 %vm917_vm3, %v7638_v2  ;;  %v6006_v39 = vld [vmem:[#allocation4 + $0x10] sm:$0xff]  ;;  %v5526_v2 = vld [vmem:[#allocation4 + $0xa8] sm:$0xff] }
 0x3e1   : > { %v5072_v54 = vadd.f32 %v5036_v33, %v4977_v21  ;;  %v5551_v10 = vadd.f32 %v5515_v14, %v5376_v18  ;;  %15740 = vmatprep.mubr.msk.f32.mxu0 %vm917_vm3, %v7639_v57  ;;  %v5525_v14 = vld [vmem:[#allocation4 + $0xa0] sm:$0xff] }
 0x3e2   : > { %5109 = vst.msk [vmem:[#allocation4 + $0xf8] sm:$0xff] %vm689_vm1, %v5073_v62  ;;  %5588 = vst.msk [vmem:[#allocation4 + $0x58] sm:$0xff] %vm689_vm1, %v5552_v12  ;;  %v6009_v12 = vld [vmem:[#allocation4 + $0x28] sm:$0xff] }
 0x3e3   : > { %5108 = vst.msk [vmem:[#allocation4 + $0xf0] sm:$0xff] %vm689_vm1, %v5072_v54  ;;  %5587 = vst.msk [vmem:[#allocation4 + $0x50] sm:$0xff] %vm689_vm1, %v5551_v10  ;;  %v15409_v56 = vpop.f32.mrb[236].mxu0  ;;  %v15435_v29 = vpop.f32.mrb[216].mxu1  ;;  %v6008_v54 = vld [vmem:[#allocation4 + $0x20] sm:$0xff] }
 0x3e4   : > { %v5075_v15 = vadd.f32 %v15409_v56, %v5039_v52  ;;  %v5554_v31 = vadd.f32 %v15435_v29, %v5518_v58  ;;  %v4987_v46 = vpop.f32.mrb[237].mxu0  ;;  %v5386_v44 = vpop.f32.mrb[217].mxu1  ;;  %15741 = vmatmul.mubr.msk.f32.gmra.mrb[86].mxu0 %vm917_vm3, %v7640_v8  ;;  %v5528_v29 = vld [vmem:[#allocation4 + $0xb8] sm:$0xff] }
 0x3e5   : > { %v5074_v49 = vadd.f32 %v5038_v50, %v4987_v46  ;;  %v5553_v0 = vadd.f32 %v5517_v61, %v5386_v44  ;;  %15743 = vmatprep.mubr.msk.f32.mxu0 %vm917_vm3, %v7641_v45  ;;  %v6011_v8 = vld [vmem:[#allocation4 + $0x38] sm:$0xff]  ;;  %v5527_v50 = vld [vmem:[#allocation4 + $0xb0] sm:$0xff] }
 0x3e6   : > { %5111 = vst.msk [vmem:[#allocation4 + $0x108] sm:$0xff] %vm689_vm1, %v5075_v15  ;;  %5590 = vst.msk [vmem:[#allocation4 + $0x68] sm:$0xff] %vm689_vm1, %v5554_v31  ;;  %v6010_v61 = vld [vmem:[#allocation4 + $0x30] sm:$0xff] }
 0x3e7   : > { %5110 = vst.msk [vmem:[#allocation4 + $0x100] sm:$0xff] %vm689_vm1, %v5074_v49  ;;  %5589 = vst.msk [vmem:[#allocation4 + $0x60] sm:$0xff] %vm689_vm1, %v5553_v0  ;;  %v15412_v51 = vpop.f32.mrb[238].mxu0  ;;  %v15438_v19 = vpop.f32.mrb[218].mxu1 }
 0x3e8   : > { %v5077_v63 = vadd.f32 %v15412_v51, %v5041_v42  ;;  %v5556_v9 = vadd.f32 %v15438_v19, %v5520_v13  ;;  %v4997_v40 = vpop.f32.mrb[239].mxu0  ;;  %v5396_v35 = vpop.f32.mrb[219].mxu1  ;;  %15744 = vmatmul.mubr.msk.f32.gmra.mrb[88].mxu0 %vm917_vm3, %v7642_v55  ;;  %v5530_v51 = vld [vmem:[#allocation4 + $0xc8] sm:$0xff] }
 0x3e9   : > { %v5076_v38 = vadd.f32 %v5040_v5, %v4997_v40  ;;  %v5555_v23 = vadd.f32 %v5519_v16, %v5396_v35  ;;  %15746 = vmatprep.mubr.msk.f32.mxu0 %vm917_vm3, %v7643_v41  ;;  %v6013_v19 = vld [vmem:[#allocation4 + $0x48] sm:$0xff]  ;;  %v6012_v5 = vld [vmem:[#allocation4 + $0x40] sm:$0xff] }
 0x3ea   : > { %5113 = vst.msk [vmem:[#allocation4 + $0x118] sm:$0xff] %vm689_vm1, %v5077_v63  ;;  %5592 = vst.msk [vmem:[#allocation4 + $0x78] sm:$0xff] %vm689_vm1, %v5556_v9  ;;  %v5529_v9 = vld [vmem:[#allocation4 + $0xc0] sm:$0xff] }
 0x3eb   : > { %5112 = vst.msk [vmem:[#allocation4 + $0x110] sm:$0xff] %vm689_vm1, %v5076_v38  ;;  %5591 = vst.msk [vmem:[#allocation4 + $0x70] sm:$0xff] %vm689_vm1, %v5555_v23  ;;  %v15441_v34 = vpop.f32.mrb[220].mxu1  ;;  %v15473_v53 = vpop.f32.mrb[240].mxu0  ;;  %v5532_v38 = vld [vmem:[#allocation4 + $0xd8] sm:$0xff] }
 0x3ec   : > { %v5558_v20 = vadd.f32 %v15441_v34, %v5522_v26  ;;  %v6041_v22 = vadd.f32 %v15473_v53, %v6005_v59  ;;  %v5406_v7 = vpop.f32.mrb[221].mxu1  ;;  %v5825_v32 = vpop.f32.mrb[241].mxu0  ;;  %15747 = vmatmul.mubr.msk.f32.gmra.mrb[90].mxu0 %vm917_vm3, %v7644_v28  ;;  %v6015_v34 = vld [vmem:[#allocation4 + $0x58] sm:$0xff]  ;;  %v5531_v28 = vld [vmem:[#allocation4 + $0xd0] sm:$0xff] }
 0x3ed   : > { %v5557_v36 = vadd.f32 %v5521_v48, %v5406_v7  ;;  %v6040_v27 = vadd.f32 %v6004_v6, %v5825_v32  ;;  %v5534_v6 = vld [vmem:[#allocation4 + $0xe8] sm:$0xff] }
 0x3ee   : > { %5594 = vst.msk [vmem:[#allocation4 + $0x88] sm:$0xff] %vm689_vm1, %v5558_v20  ;;  %6077 = vst.msk [vmem:[#allocation4 + $0x8] sm:$0xff] %vm689_vm1, %v6041_v22  ;;  %v6014_v22 = vld [vmem:[#allocation4 + $0x50] sm:$0xff] }
 0x3ef   : > { %5593 = vst.msk [vmem:[#allocation4 + $0x80] sm:$0xff] %vm689_vm1, %v5557_v36  ;;  %6076 = vst.msk [vmem:[#allocation4] sm:$0xff] %vm689_vm1, %v6040_v27  ;;  %v15444_v11 = vpop.f32.mrb[222].mxu1  ;;  %v15476_v24 = vpop.f32.mrb[242].mxu0  ;;  %v6017_v27 = vld [vmem:[#allocation4 + $0x68] sm:$0xff] }
 0x3f0   : > { %v5560_v4 = vadd.f32 %v15444_v11, %v5524_v43  ;;  %v6043_v3 = vadd.f32 %v15476_v24, %v6007_v25  ;;  %v5416_v30 = vpop.f32.mrb[223].mxu1  ;;  %v5835_v17 = vpop.f32.mrb[243].mxu0  ;;  %v5533_v25 = vld [vmem:[#allocation4 + $0xe0] sm:$0xff] }
 0x3f1   : > { %v5559_v1 = vadd.f32 %v5523_v37, %v5416_v30  ;;  %v6042_v60 = vadd.f32 %v6006_v39, %v5835_v17  ;;  %v5536_v39 = vld [vmem:[#allocation4 + $0xf8] sm:$0xff] }
 0x3f2   : > { %5596 = vst.msk [vmem:[#allocation4 + $0x98] sm:$0xff] %vm689_vm1, %v5560_v4  ;;  %6079 = vst.msk [vmem:[#allocation4 + $0x18] sm:$0xff] %vm689_vm1, %v6043_v3  ;;  %v6016_v3 = vld [vmem:[#allocation4 + $0x60] sm:$0xff] }
 0x3f3   : > { %5595 = vst.msk [vmem:[#allocation4 + $0x90] sm:$0xff] %vm689_vm1, %v5559_v1  ;;  %6078 = vst.msk [vmem:[#allocation4 + $0x10] sm:$0xff] %vm689_vm1, %v6042_v60  ;;  %v15447_v47 = vpop.f32.mrb[224].mxu1  ;;  %v15479_v62 = vpop.f32.mrb[244].mxu0  ;;  %v6019_v60 = vld [vmem:[#allocation4 + $0x78] sm:$0xff] }
 0x3f4   : > { %v5562_v21 = vadd.f32 %v15447_v47, %v5526_v2  ;;  %v6045_v33 = vadd.f32 %v15479_v62, %v6009_v12  ;;  %v5426_v18 = vpop.f32.mrb[225].mxu1  ;;  %v5845_v57 = vpop.f32.mrb[245].mxu0  ;;  %v5535_v12 = vld [vmem:[#allocation4 + $0xf0] sm:$0xff] }
 0x3f5   : > { %v5561_v10 = vadd.f32 %v5525_v14, %v5426_v18  ;;  %v6044_v56 = vadd.f32 %v6008_v54, %v5845_v57  ;;  %v5538_v54 = vld [vmem:[#allocation4 + $0x108] sm:$0xff] }
 0x3f6   : > { %5598 = vst.msk [vmem:[#allocation4 + $0xa8] sm:$0xff] %vm689_vm1, %v5562_v21  ;;  %6081 = vst.msk [vmem:[#allocation4 + $0x28] sm:$0xff] %vm689_vm1, %v6045_v33  ;;  %v6018_v33 = vld [vmem:[#allocation4 + $0x70] sm:$0xff] }
 0x3f7   : > { %5597 = vst.msk [vmem:[#allocation4 + $0xa0] sm:$0xff] %vm689_vm1, %v5561_v10  ;;  %6080 = vst.msk [vmem:[#allocation4 + $0x20] sm:$0xff] %vm689_vm1, %v6044_v56  ;;  %v15450_v52 = vpop.f32.mrb[226].mxu1  ;;  %v15482_v58 = vpop.f32.mrb[246].mxu0  ;;  %v6021_v56 = vld [vmem:[#allocation4 + $0x88] sm:$0xff] }
 0x3f8   : > { %v5564_v15 = vadd.f32 %v15450_v52, %v5528_v29  ;;  %v6047_v31 = vadd.f32 %v15482_v58, %v6011_v8  ;;  %v5436_v46 = vpop.f32.mrb[227].mxu1  ;;  %v5855_v44 = vpop.f32.mrb[247].mxu0  ;;  %v5537_v8 = vld [vmem:[#allocation4 + $0x100] sm:$0xff] }
 0x3f9   : > { %v5563_v45 = vadd.f32 %v5527_v50, %v5436_v46  ;;  %v6046_v49 = vadd.f32 %v6010_v61, %v5855_v44  ;;  %v5540_v61 = vld [vmem:[#allocation4 + $0x118] sm:$0xff] }
 0x3fa   : > { %5600 = vst.msk [vmem:[#allocation4 + $0xb8] sm:$0xff] %vm689_vm1, %v5564_v15  ;;  %6083 = vst.msk [vmem:[#allocation4 + $0x38] sm:$0xff] %vm689_vm1, %v6047_v31  ;;  %v6020_v31 = vld [vmem:[#allocation4 + $0x80] sm:$0xff] }
 0x3fb   : > { %5599 = vst.msk [vmem:[#allocation4 + $0xb0] sm:$0xff] %vm689_vm1, %v5563_v45  ;;  %6082 = vst.msk [vmem:[#allocation4 + $0x30] sm:$0xff] %vm689_vm1, %v6046_v49  ;;  %v15453_v0 = vpop.f32.mrb[228].mxu1  ;;  %v15485_v42 = vpop.f32.mrb[248].mxu0  ;;  %v6023_v49 = vld [vmem:[#allocation4 + $0x98] sm:$0xff] }
 0x3fc   : > { %v5566_v13 = vadd.f32 %v15453_v0, %v5530_v51  ;;  %v6049_v55 = vadd.f32 %v15485_v42, %v6013_v19  ;;  %v5446_v63 = vpop.f32.mrb[229].mxu1  ;;  %v5865_v40 = vpop.f32.mrb[249].mxu0  ;;  %v5539_v19 = vld [vmem:[#allocation4 + $0x110] sm:$0xff] }
 0x3fd   : > { %v5565_v35 = vadd.f32 %v5529_v9, %v5446_v63  ;;  %v6048_v16 = vadd.f32 %v6012_v5, %v5865_v40  ;;  %v6025_v5 = vld [vmem:[#allocation4 + $0xa8] sm:$0xff] }
 0x3fe   : > { %5602 = vst.msk [vmem:[#allocation4 + $0xc8] sm:$0xff] %vm689_vm1, %v5566_v13  ;;  %6085 = vst.msk [vmem:[#allocation4 + $0x48] sm:$0xff] %vm689_vm1, %v6049_v55  ;;  %v6022_v55 = vld [vmem:[#allocation4 + $0x90] sm:$0xff] }
 0x3ff   : > { %5601 = vst.msk [vmem:[#allocation4 + $0xc0] sm:$0xff] %vm689_vm1, %v5565_v35  ;;  %6084 = vst.msk [vmem:[#allocation4 + $0x40] sm:$0xff] %vm689_vm1, %v6048_v16  ;;  %v15456_v41 = vpop.f32.mrb[230].mxu1  ;;  %v15488_v23 = vpop.f32.mrb[250].mxu0  ;;  %v6504_v16 = vld [vmem:[#allocation4 + $0x8] sm:$0xff] }
 0x400   : > { %v5568_v26 = vadd.f32 %v15456_v41, %v5532_v38  ;;  %v6051_v53 = vadd.f32 %v15488_v23, %v6015_v34  ;;  %v5456_v59 = vpop.f32.mrb[231].mxu1  ;;  %v5875_v20 = vpop.f32.mrb[251].mxu0  ;;  %v6024_v34 = vld [vmem:[#allocation4 + $0xa0] sm:$0xff] }
 0x401   : > { %v5567_v7 = vadd.f32 %v5531_v28, %v5456_v59  ;;  %v6050_v48 = vadd.f32 %v6014_v22, %v5875_v20  ;;  %v21052_v20 = vmov 0.0   ;;  %v13740_v22 = vld [vmem:[%s20924_s7 + $0x4] sm:$0xf] }
 0x402   : > { %5604 = vst.msk [vmem:[#allocation4 + $0xd8] sm:$0xff] %vm689_vm1, %v5568_v26  ;;  %6087 = vst.msk [vmem:[#allocation4 + $0x58] sm:$0xff] %vm689_vm1, %v6051_v53  ;;  %v6503_v53 = vld [vmem:[#allocation4] sm:$0xff]  ;;  %15805 = vmatprep.subr.msk.mxu0 %vm981_vm0, %v13740_v22 }
 0x403   : > { %5603 = vst.msk [vmem:[#allocation4 + $0xd0] sm:$0xff] %vm689_vm1, %v5567_v7  ;;  %6086 = vst.msk [vmem:[#allocation4 + $0x50] sm:$0xff] %vm689_vm1, %v6050_v48  ;;  %v15459_v32 = vpop.f32.mrb[232].mxu1  ;;  %v15491_v36 = vpop.f32.mrb[252].mxu0  ;;  %v6027_v48 = vld [vmem:[#allocation4 + $0xb8] sm:$0xff]  ;;  %15806 = vmatpush3.msk.msra.mxu0 %vm981_vm0, %v13740_v22 }
 0x404   : > { %v5570_v11 = vadd.f32 %v15459_v32, %v5534_v6  ;;  %v6053_v43 = vadd.f32 %v15491_v36, %v6017_v27  ;;  %v5466_v24 = vpop.f32.mrb[233].mxu1  ;;  %v5885_v4 = vpop.f32.mrb[253].mxu0  ;;  %3649 = vst.msk [vmem:[#allocation3 + $0x10] sm:$0x7] %vm3648_vm5, %v21052_v20  ;;  %v6506_v6 = vld [vmem:[#allocation4 + $0x18] sm:$0xff] }
 0x405   : > { %v5569_v30 = vadd.f32 %v5533_v25, %v5466_v24  ;;  %v6052_v37 = vadd.f32 %v6016_v3, %v5885_v4  ;;  %v6505_v25 = vld [vmem:[#allocation4 + $0x10] sm:$0xff]  ;;  %3653 = vst.msk [vmem:[#allocation3 + $0x143] sm:$0x1f] %vm3652_vm6, %v21052_v20 }
 0x406   : > { %5606 = vst.msk [vmem:[#allocation4 + $0xe8] sm:$0xff] %vm689_vm1, %v5570_v11  ;;  %6089 = vst.msk [vmem:[#allocation4 + $0x68] sm:$0xff] %vm689_vm1, %v6053_v43  ;;  %v6026_v43 = vld [vmem:[#allocation4 + $0xb0] sm:$0xff] }
 0x407   : > { %5605 = vst.msk [vmem:[#allocation4 + $0xe0] sm:$0xff] %vm689_vm1, %v5569_v30  ;;  %6088 = vst.msk [vmem:[#allocation4 + $0x60] sm:$0xff] %vm689_vm1, %v6052_v37  ;;  %v15462_v17 = vpop.f32.mrb[234].mxu1  ;;  %v15494_v1 = vpop.f32.mrb[254].mxu0  ;;  %v6508_v30 = vld [vmem:[#allocation4 + $0x28] sm:$0xff]  ;;  %v8514_v37 = vld [vmem:[#allocation3] sm:$0xff] }
 0x408   : > { %v5572_v47 = vadd.f32 %v15462_v17, %v5536_v39  ;;  %v6055_v2 = vadd.f32 %v15494_v1, %v6019_v60  ;;  %v5476_v62 = vpop.f32.mrb[235].mxu1  ;;  %v5895_v21 = vpop.f32.mrb[255].mxu0  ;;  %v6029_v39 = vld [vmem:[#allocation4 + $0xc8] sm:$0xff]  ;;  %15751 = vmatprep.mubr.msk.f32.mxu1 %vm689_vm1, %v8514_v37  ;;  %v8515_v60 = vld [vmem:[#allocation3 + $0x8] sm:$0xff] }
 0x409   : > { %v5571_v18 = vadd.f32 %v5535_v12, %v5476_v62  ;;  %v6054_v14 = vadd.f32 %v6018_v33, %v5895_v21  ;;  %v6028_v21 = vld [vmem:[#allocation4 + $0xc0] sm:$0xff]  ;;  %15752 = vmatmul.mubr.msk.f32.vlgmr.msra.gmra.mrb[56].mxu1 %vm689_vm1, %v8515_v60 }
 0x40a   : > { %5608 = vst.msk [vmem:[#allocation4 + $0xf8] sm:$0xff] %vm689_vm1, %v5572_v47  ;;  %6091 = vst.msk [vmem:[#allocation4 + $0x78] sm:$0xff] %vm689_vm1, %v6055_v2  ;;  %v8943_v47 = vld [vmem:[#allocation3 + $0x1] sm:$0xff]  ;;  %v6513_v22 = vld [vmem:[#allocation4 + $0x50] sm:$0xff] }
 0x40b   : > { %5607 = vst.msk [vmem:[#allocation4 + $0xf0] sm:$0xff] %vm689_vm1, %v5571_v18  ;;  %6090 = vst.msk [vmem:[#allocation4 + $0x70] sm:$0xff] %vm689_vm1, %v6054_v14  ;;  %v15465_v57 = vpop.f32.mrb[236].mxu1  ;;  %v15497_v10 = vpop.f32.mrb[0].mxu0  ;;  %v6507_v18 = vld [vmem:[#allocation4 + $0x20] sm:$0xff]  ;;  %15807 = vmatprep.mubr.msk.f32.mxu0 %vm689_vm1, %v8943_v47 }
 0x40c   : > { %v5574_v52 = vadd.f32 %v15465_v57, %v5538_v54  ;;  %v6057_v29 = vadd.f32 %v15497_v10, %v6021_v56  ;;  %v5486_v58 = vpop.f32.mrb[237].mxu1  ;;  %v5905_v15 = vpop.f32.mrb[1].mxu0  ;;  %v8944_v14 = vld [vmem:[#allocation3 + $0x9] sm:$0xff]  ;;  %v6031_v56 = vld [vmem:[#allocation4 + $0xd8] sm:$0xff] }
 0x40d   : > { %v5573_v46 = vadd.f32 %v5537_v8, %v5486_v58  ;;  %v6056_v50 = vadd.f32 %v6020_v31, %v5905_v15  ;;  %15808 = vmatmul.mubr.msk.f32.vlgmr.msra.gmra.mrb[92].mxu0 %vm689_vm1, %v8944_v14  ;;  %v6030_v31 = vld [vmem:[#allocation4 + $0xd0] sm:$0xff] }
 0x40e   : > { %5610 = vst.msk [vmem:[#allocation4 + $0x108] sm:$0xff] %vm689_vm1, %v5574_v52  ;;  %6093 = vst.msk [vmem:[#allocation4 + $0x88] sm:$0xff] %vm689_vm1, %v6057_v29  ;;  %v6510_v29 = vld [vmem:[#allocation4 + $0x38] sm:$0xff] }
 0x40f   : > { %5609 = vst.msk [vmem:[#allocation4 + $0x100] sm:$0xff] %vm689_vm1, %v5573_v46  ;;  %6092 = vst.msk [vmem:[#allocation4 + $0x80] sm:$0xff] %vm689_vm1, %v6056_v50  ;;  %v15468_v44 = vpop.f32.mrb[238].mxu1  ;;  %v15500_v45 = vpop.f32.mrb[2].mxu0  ;;  %v6509_v50 = vld [vmem:[#allocation4 + $0x30] sm:$0xff] }
 0x410   : > { %v5576_v0 = vadd.f32 %v15468_v44, %v5540_v61  ;;  %v6059_v51 = vadd.f32 %v15500_v45, %v6023_v49  ;;  %v5496_v42 = vpop.f32.mrb[239].mxu1  ;;  %v5915_v13 = vpop.f32.mrb[3].mxu0  ;;  %v13778_v45 = vld [vmem:[%s20924_s7 + $0x8] sm:$0xf] }
 0x411   : > { %v5575_v63 = vadd.f32 %v5539_v19, %v5496_v42  ;;  %v6058_v9 = vadd.f32 %v6022_v55, %v5915_v13  ;;  %v6512_v42 = vld [vmem:[#allocation4 + $0x48] sm:$0xff]  ;;  %15861 = vmatprep.subr.msk.mxu1 %vm981_vm0, %v13778_v45  ;;  %v6518_v60 = vld [vmem:[#allocation4 + $0x78] sm:$0xff] }
 0x412   : > { %5612 = vst.msk [vmem:[#allocation4 + $0x118] sm:$0xff] %vm689_vm1, %v5576_v0  ;;  %6095 = vst.msk [vmem:[#allocation4 + $0x98] sm:$0xff] %vm689_vm1, %v6059_v51  ;;  %v6033_v0 = vld [vmem:[#allocation4 + $0xe8] sm:$0xff]  ;;  %15862 = vmatpush3.msk.msra.mxu1 %vm981_vm0, %v13778_v45 }
 0x413   : > { %5611 = vst.msk [vmem:[#allocation4 + $0x110] sm:$0xff] %vm689_vm1, %v5575_v63  ;;  %6094 = vst.msk [vmem:[#allocation4 + $0x90] sm:$0xff] %vm689_vm1, %v6058_v9  ;;  %v15503_v40 = vpop.f32.mrb[4].mxu0  ;;  %v15529_v35 = vpop.f32.mrb[240].mxu1  ;;  %v6032_v63 = vld [vmem:[#allocation4 + $0xe0] sm:$0xff] }
 0x414   : > { %v6061_v41 = vadd.f32 %v15503_v40, %v6025_v5  ;;  %v6540_v38 = vadd.f32 %v15529_v35, %v6504_v16  ;;  %v5925_v23 = vpop.f32.mrb[5].mxu0  ;;  %v6324_v26 = vpop.f32.mrb[241].mxu1  ;;  %v6511_v40 = vld [vmem:[#allocation4 + $0x40] sm:$0xff] }
 0x415   : > { %v6060_v59 = vadd.f32 %v6024_v34, %v5925_v23  ;;  %v6539_v28 = vadd.f32 %v6503_v53, %v6324_v26  ;;  %v6514_v23 = vld [vmem:[#allocation4 + $0x58] sm:$0xff] }
 0x416   : > { %6097 = vst.msk [vmem:[#allocation4 + $0xa8] sm:$0xff] %vm689_vm1, %v6061_v41  ;;  %6576 = vst.msk [vmem:[#allocation4 + $0x8] sm:$0xff] %vm689_vm1, %v6540_v38  ;;  %v6035_v41 = vld [vmem:[#allocation4 + $0xf8] sm:$0xff] }
 0x417   : > { %6096 = vst.msk [vmem:[#allocation4 + $0xa0] sm:$0xff] %vm689_vm1, %v6060_v59  ;;  %6575 = vst.msk [vmem:[#allocation4] sm:$0xff] %vm689_vm1, %v6539_v28  ;;  %v15506_v7 = vpop.f32.mrb[6].mxu0  ;;  %v15532_v32 = vpop.f32.mrb[242].mxu1  ;;  %v6034_v59 = vld [vmem:[#allocation4 + $0xf0] sm:$0xff] }
 0x418   : > { %v6063_v36 = vadd.f32 %v15506_v7, %v6027_v48  ;;  %v6542_v27 = vadd.f32 %v15532_v32, %v6506_v6  ;;  %v5935_v11 = vpop.f32.mrb[7].mxu0  ;;  %v6334_v24 = vpop.f32.mrb[243].mxu1  ;;  %v6037_v6 = vld [vmem:[#allocation4 + $0x108] sm:$0xff] }
 0x419   : > { %v6062_v4 = vadd.f32 %v6026_v43, %v5935_v11  ;;  %v6541_v3 = vadd.f32 %v6505_v25, %v6334_v24  ;;  %v6036_v25 = vld [vmem:[#allocation4 + $0x100] sm:$0xff] }
 0x41a   : > { %6099 = vst.msk [vmem:[#allocation4 + $0xb8] sm:$0xff] %vm689_vm1, %v6063_v36  ;;  %6578 = vst.msk [vmem:[#allocation4 + $0x18] sm:$0xff] %vm689_vm1, %v6542_v27  ;;  %v6516_v27 = vld [vmem:[#allocation4 + $0x68] sm:$0xff] }
 0x41b   : > { %6098 = vst.msk [vmem:[#allocation4 + $0xb0] sm:$0xff] %vm689_vm1, %v6062_v4  ;;  %6577 = vst.msk [vmem:[#allocation4 + $0x10] sm:$0xff] %vm689_vm1, %v6541_v3  ;;  %v15509_v17 = vpop.f32.mrb[8].mxu0  ;;  %v15535_v1 = vpop.f32.mrb[244].mxu1  ;;  %v6515_v3 = vld [vmem:[#allocation4 + $0x60] sm:$0xff] }
 0x41c   : > { %v6065_v2 = vadd.f32 %v15509_v17, %v6029_v39  ;;  %v6544_v62 = vadd.f32 %v15535_v1, %v6508_v30  ;;  %v5945_v12 = vpop.f32.mrb[9].mxu0  ;;  %v6344_v33 = vpop.f32.mrb[245].mxu1  ;;  %v6039_v39 = vld [vmem:[#allocation4 + $0x118] sm:$0xff] }
 0x41d   : > { %v6064_v57 = vadd.f32 %v6028_v21, %v5945_v12  ;;  %v6543_v54 = vadd.f32 %v6507_v18, %v6344_v33  ;;  %v6038_v12 = vld [vmem:[#allocation4 + $0x110] sm:$0xff] }
 0x41e   : > { %6101 = vst.msk [vmem:[#allocation4 + $0xc8] sm:$0xff] %vm689_vm1, %v6065_v2  ;;  %6580 = vst.msk [vmem:[#allocation4 + $0x28] sm:$0xff] %vm689_vm1, %v6544_v62  ;;  %v6517_v33 = vld [vmem:[#allocation4 + $0x70] sm:$0xff] }
 0x41f   : > { %6100 = vst.msk [vmem:[#allocation4 + $0xc0] sm:$0xff] %vm689_vm1, %v6064_v57  ;;  %6579 = vst.msk [vmem:[#allocation4 + $0x20] sm:$0xff] %vm689_vm1, %v6543_v54  ;;  %v15512_v10 = vpop.f32.mrb[10].mxu0  ;;  %v15538_v52 = vpop.f32.mrb[246].mxu1  ;;  %v6520_v54 = vld [vmem:[#allocation4 + $0x88] sm:$0xff] }
 0x420   : > { %v6067_v58 = vadd.f32 %v15512_v10, %v6031_v56  ;;  %v6546_v8 = vadd.f32 %v15538_v52, %v6510_v29  ;;  %v5955_v15 = vpop.f32.mrb[11].mxu0  ;;  %v6354_v46 = vpop.f32.mrb[247].mxu1  ;;  %v7003_v56 = vld [vmem:[#allocation4 + $0x8] sm:$0xff] }
 0x421   : > { %v6066_v44 = vadd.f32 %v6030_v31, %v5955_v15  ;;  %v6545_v61 = vadd.f32 %v6509_v50, %v6354_v46  ;;  %v7002_v31 = vld [vmem:[#allocation4] sm:$0xff] }
 0x422   : > { %6103 = vst.msk [vmem:[#allocation4 + $0xd8] sm:$0xff] %vm689_vm1, %v6067_v58  ;;  %6582 = vst.msk [vmem:[#allocation4 + $0x38] sm:$0xff] %vm689_vm1, %v6546_v8  ;;  %v6519_v8 = vld [vmem:[#allocation4 + $0x80] sm:$0xff] }
 0x423   : > { %6102 = vst.msk [vmem:[#allocation4 + $0xd0] sm:$0xff] %vm689_vm1, %v6066_v44  ;;  %6581 = vst.msk [vmem:[#allocation4 + $0x30] sm:$0xff] %vm689_vm1, %v6545_v61  ;;  %v15515_v49 = vpop.f32.mrb[12].mxu0  ;;  %v15541_v51 = vpop.f32.mrb[248].mxu1  ;;  %v6522_v61 = vld [vmem:[#allocation4 + $0x98] sm:$0xff] }
 0x424   : > { %v6069_v19 = vadd.f32 %v15515_v49, %v6033_v0  ;;  %v6548_v13 = vadd.f32 %v15541_v51, %v6512_v42  ;;  %v5965_v55 = vpop.f32.mrb[13].mxu0  ;;  %v6364_v9 = vpop.f32.mrb[249].mxu1  ;;  %v7005_v49 = vld [vmem:[#allocation4 + $0x18] sm:$0xff] }
 0x425   : > { %v6068_v5 = vadd.f32 %v6032_v63, %v5965_v55  ;;  %v6547_v35 = vadd.f32 %v6511_v40, %v6364_v9  ;;  %v7004_v55 = vld [vmem:[#allocation4 + $0x10] sm:$0xff] }
 0x426   : > { %6105 = vst.msk [vmem:[#allocation4 + $0xe8] sm:$0xff] %vm689_vm1, %v6069_v19  ;;  %6584 = vst.msk [vmem:[#allocation4 + $0x48] sm:$0xff] %vm689_vm1, %v6548_v13  ;;  %v6521_v19 = vld [vmem:[#allocation4 + $0x90] sm:$0xff] }
 0x427   : > { %6104 = vst.msk [vmem:[#allocation4 + $0xe0] sm:$0xff] %vm689_vm1, %v6068_v5  ;;  %6583 = vst.msk [vmem:[#allocation4 + $0x40] sm:$0xff] %vm689_vm1, %v6547_v35  ;;  %v15518_v16 = vpop.f32.mrb[14].mxu0  ;;  %v15544_v38 = vpop.f32.mrb[250].mxu1  ;;  %v6524_v5 = vld [vmem:[#allocation4 + $0xa8] sm:$0xff] }
 0x428   : > { %v6071_v34 = vadd.f32 %v15518_v16, %v6035_v41  ;;  %v6550_v26 = vadd.f32 %v15544_v38, %v6514_v23  ;;  %v5975_v53 = vpop.f32.mrb[15].mxu0  ;;  %v6374_v28 = vpop.f32.mrb[251].mxu1  ;;  %v7007_v16 = vld [vmem:[#allocation4 + $0x28] sm:$0xff] }
 0x429   : > { %v6070_v7 = vadd.f32 %v6034_v59, %v5975_v53  ;;  %v6549_v48 = vadd.f32 %v6513_v22, %v6374_v28  ;;  %v7006_v53 = vld [vmem:[#allocation4 + $0x20] sm:$0xff] }
 0x42a   : > { %6107 = vst.msk [vmem:[#allocation4 + $0xf8] sm:$0xff] %vm689_vm1, %v6071_v34  ;;  %6586 = vst.msk [vmem:[#allocation4 + $0x58] sm:$0xff] %vm689_vm1, %v6550_v26  ;;  %v6523_v34 = vld [vmem:[#allocation4 + $0xa0] sm:$0xff] }
 0x42b   : > { %6106 = vst.msk [vmem:[#allocation4 + $0xf0] sm:$0xff] %vm689_vm1, %v6070_v7  ;;  %6585 = vst.msk [vmem:[#allocation4 + $0x50] sm:$0xff] %vm689_vm1, %v6549_v48  ;;  %v15521_v32 = vpop.f32.mrb[16].mxu0  ;;  %v15547_v36 = vpop.f32.mrb[252].mxu1  ;;  %v6526_v7 = vld [vmem:[#allocation4 + $0xb8] sm:$0xff] }
 0x42c   : > { %v6073_v11 = vadd.f32 %v15521_v32, %v6037_v6  ;;  %v6552_v43 = vadd.f32 %v15547_v36, %v6516_v27  ;;  %v5985_v24 = vpop.f32.mrb[17].mxu0  ;;  %v6384_v4 = vpop.f32.mrb[253].mxu1  ;;  %v7009_v32 = vld [vmem:[#allocation4 + $0x38] sm:$0xff] }
 0x42d   : > { %v6072_v30 = vadd.f32 %v6036_v25, %v5985_v24  ;;  %v6551_v37 = vadd.f32 %v6515_v3, %v6384_v4  ;;  %v7008_v24 = vld [vmem:[#allocation4 + $0x30] sm:$0xff] }
 0x42e   : > { %6109 = vst.msk [vmem:[#allocation4 + $0x108] sm:$0xff] %vm689_vm1, %v6073_v11  ;;  %6588 = vst.msk [vmem:[#allocation4 + $0x68] sm:$0xff] %vm689_vm1, %v6552_v43  ;;  %v6525_v11 = vld [vmem:[#allocation4 + $0xb0] sm:$0xff] }
 0x42f   : > { %6108 = vst.msk [vmem:[#allocation4 + $0x100] sm:$0xff] %vm689_vm1, %v6072_v30  ;;  %6587 = vst.msk [vmem:[#allocation4 + $0x60] sm:$0xff] %vm689_vm1, %v6551_v37  ;;  %v15524_v17 = vpop.f32.mrb[18].mxu0  ;;  %v15550_v1 = vpop.f32.mrb[254].mxu1  ;;  %v6528_v30 = vld [vmem:[#allocation4 + $0xc8] sm:$0xff] }
 0x430   : > { %v6075_v47 = vadd.f32 %v15524_v17, %v6039_v39  ;;  %v6554_v2 = vadd.f32 %v15550_v1, %v6518_v60  ;;  %v5995_v62 = vpop.f32.mrb[19].mxu0  ;;  %v6394_v21 = vpop.f32.mrb[255].mxu1  ;;  %v7011_v17 = vld [vmem:[#allocation4 + $0x48] sm:$0xff] }
 0x431   : > { %v6074_v18 = vadd.f32 %v6038_v12, %v5995_v62  ;;  %v6553_v14 = vadd.f32 %v6517_v33, %v6394_v21  ;;  %v7010_v62 = vld [vmem:[#allocation4 + $0x40] sm:$0xff] }
 0x432   : > { %6111 = vst.msk [vmem:[#allocation4 + $0x118] sm:$0xff] %vm689_vm1, %v6075_v47  ;;  %6590 = vst.msk [vmem:[#allocation4 + $0x78] sm:$0xff] %vm689_vm1, %v6554_v2  ;;  %v6527_v47 = vld [vmem:[#allocation4 + $0xc0] sm:$0xff] }
 0x433   : > { %6110 = vst.msk [vmem:[#allocation4 + $0x110] sm:$0xff] %vm689_vm1, %v6074_v18  ;;  %6589 = vst.msk [vmem:[#allocation4 + $0x70] sm:$0xff] %vm689_vm1, %v6553_v14  ;;  %v15553_v57 = vpop.f32.mrb[0].mxu1  ;;  %v15585_v10 = vpop.f32.mrb[20].mxu0  ;;  %v6530_v18 = vld [vmem:[#allocation4 + $0xd8] sm:$0xff] }
 0x434   : > { %v6556_v52 = vadd.f32 %v15553_v57, %v6520_v54  ;;  %v7039_v29 = vadd.f32 %v15585_v10, %v7003_v56  ;;  %v6404_v58 = vpop.f32.mrb[1].mxu1  ;;  %v6823_v15 = vpop.f32.mrb[21].mxu0  ;;  %v7013_v57 = vld [vmem:[#allocation4 + $0x58] sm:$0xff] }
 0x435   : > { %v6555_v46 = vadd.f32 %v6519_v8, %v6404_v58  ;;  %v7038_v50 = vadd.f32 %v7002_v31, %v6823_v15  ;;  %v7012_v58 = vld [vmem:[#allocation4 + $0x50] sm:$0xff] }
 0x436   : > { %6592 = vst.msk [vmem:[#allocation4 + $0x88] sm:$0xff] %vm689_vm1, %v6556_v52  ;;  %7075 = vst.msk [vmem:[#allocation4 + $0x8] sm:$0xff] %vm689_vm1, %v7039_v29  ;;  %v6529_v52 = vld [vmem:[#allocation4 + $0xd0] sm:$0xff] }
 0x437   : > { %6591 = vst.msk [vmem:[#allocation4 + $0x80] sm:$0xff] %vm689_vm1, %v6555_v46  ;;  %7074 = vst.msk [vmem:[#allocation4] sm:$0xff] %vm689_vm1, %v7038_v50  ;;  %v15556_v44 = vpop.f32.mrb[2].mxu1  ;;  %v15588_v45 = vpop.f32.mrb[22].mxu0  ;;  %v6532_v46 = vld [vmem:[#allocation4 + $0xe8] sm:$0xff] }
 0x438   : > { %v6558_v0 = vadd.f32 %v15556_v44, %v6522_v61  ;;  %v7041_v51 = vadd.f32 %v15588_v45, %v7005_v49  ;;  %v6414_v42 = vpop.f32.mrb[3].mxu1  ;;  %v6833_v13 = vpop.f32.mrb[23].mxu0  ;;  %v7015_v44 = vld [vmem:[#allocation4 + $0x68] sm:$0xff] }
 0x439   : > { %v6557_v63 = vadd.f32 %v6521_v19, %v6414_v42  ;;  %v7040_v9 = vadd.f32 %v7004_v55, %v6833_v13  ;;  %v7014_v42 = vld [vmem:[#allocation4 + $0x60] sm:$0xff]  ;;  %v19556_v55 = vpop.permute.xlu1 %8264 }
 0x43a   : > { %6594 = vst.msk [vmem:[#allocation4 + $0x98] sm:$0xff] %vm689_vm1, %v6558_v0  ;;  %7077 = vst.msk [vmem:[#allocation4 + $0x18] sm:$0xff] %vm689_vm1, %v7041_v51  ;;  %v6531_v0 = vld [vmem:[#allocation4 + $0xe0] sm:$0xff] }
 0x43b   : > { %6593 = vst.msk [vmem:[#allocation4 + $0x90] sm:$0xff] %vm689_vm1, %v6557_v63  ;;  %7076 = vst.msk [vmem:[#allocation4 + $0x10] sm:$0xff] %vm689_vm1, %v7040_v9  ;;  %v15559_v40 = vpop.f32.mrb[4].mxu1  ;;  %v15591_v35 = vpop.f32.mrb[24].mxu0  ;;  %v6534_v9 = vld [vmem:[#allocation4 + $0xf8] sm:$0xff] }
 0x43c   : > { %v6560_v41 = vadd.f32 %v15559_v40, %v6524_v5  ;;  %v7043_v38 = vadd.f32 %v15591_v35, %v7007_v16  ;;  %v6424_v23 = vpop.f32.mrb[5].mxu1  ;;  %v6843_v26 = vpop.f32.mrb[25].mxu0  ;;  %v7017_v5 = vld [vmem:[#allocation4 + $0x78] sm:$0xff] }
 0x43d   : > { %v6559_v59 = vadd.f32 %v6523_v34, %v6424_v23  ;;  %v7042_v28 = vadd.f32 %v7006_v53, %v6843_v26  ;;  %v7016_v34 = vld [vmem:[#allocation4 + $0x70] sm:$0xff] }
 0x43e   : > { %6596 = vst.msk [vmem:[#allocation4 + $0xa8] sm:$0xff] %vm689_vm1, %v6560_v41  ;;  %7079 = vst.msk [vmem:[#allocation4 + $0x28] sm:$0xff] %vm689_vm1, %v7043_v38  ;;  %v6533_v38 = vld [vmem:[#allocation4 + $0xf0] sm:$0xff] }
 0x43f   : > { %6595 = vst.msk [vmem:[#allocation4 + $0xa0] sm:$0xff] %vm689_vm1, %v6559_v59  ;;  %7078 = vst.msk [vmem:[#allocation4 + $0x20] sm:$0xff] %vm689_vm1, %v7042_v28  ;;  %v15562_v22 = vpop.f32.mrb[6].mxu1  ;;  %v15594_v48 = vpop.f32.mrb[26].mxu0  ;;  %v13816_v59 = vld [vmem:[%s20924_s7 + $0xc] sm:$0xf] }
 0x440   : > { %v6562_v6 = vadd.f32 %v15562_v22, %v6526_v7  ;;  %v7045_v36 = vadd.f32 %v15594_v48, %v7009_v32  ;;  %v6434_v27 = vpop.f32.mrb[7].mxu1  ;;  %v6853_v43 = vpop.f32.mrb[27].mxu0  ;;  %15917 = vmatprep.subr.msk.mxu0 %vm981_vm0, %v13816_v59  ;;  %v6536_v22 = vld [vmem:[#allocation4 + $0x108] sm:$0xff] }
 0x441   : > { %v6561_v25 = vadd.f32 %v6525_v11, %v6434_v27  ;;  %v7044_v4 = vadd.f32 %v7008_v24, %v6853_v43  ;;  %v7019_v48 = vld [vmem:[#allocation4 + $0x88] sm:$0xff]  ;;  %15918 = vmatpush3.msk.msra.mxu0 %vm981_vm0, %v13816_v59  ;;  %v6535_v27 = vld [vmem:[#allocation4 + $0x100] sm:$0xff] }
 0x442   : > { %6598 = vst.msk [vmem:[#allocation4 + $0xb8] sm:$0xff] %vm689_vm1, %v6562_v6  ;;  %7081 = vst.msk [vmem:[#allocation4 + $0x38] sm:$0xff] %vm689_vm1, %v7045_v36  ;;  %v7018_v43 = vld [vmem:[#allocation4 + $0x80] sm:$0xff] }
 0x443   : > { %6597 = vst.msk [vmem:[#allocation4 + $0xb0] sm:$0xff] %vm689_vm1, %v6561_v25  ;;  %7080 = vst.msk [vmem:[#allocation4 + $0x30] sm:$0xff] %vm689_vm1, %v7044_v4  ;;  %v15565_v3 = vpop.f32.mrb[8].mxu1  ;;  %v15597_v37 = vpop.f32.mrb[28].mxu0 }
 0x444   : > { %v6564_v39 = vadd.f32 %v15565_v3, %v6528_v30  ;;  %v7047_v1 = vadd.f32 %v15597_v37, %v7011_v17  ;;  %v6444_v60 = vpop.f32.mrb[9].mxu1  ;;  %v6863_v2 = vpop.f32.mrb[29].mxu0  ;;  %v6538_v30 = vld [vmem:[#allocation4 + $0x118] sm:$0xff] }
 0x445   : > { %v6563_v12 = vadd.f32 %v6527_v47, %v6444_v60  ;;  %v7046_v21 = vadd.f32 %v7010_v62, %v6863_v2  ;;  %v19571_v4 = vpop.permute.xlu1 %8274  ;;  %v7021_v17 = vld [vmem:[#allocation4 + $0x98] sm:$0xff]  ;;  %v6537_v47 = vld [vmem:[#allocation4 + $0x110] sm:$0xff] }
 0x446   : > { %6600 = vst.msk [vmem:[#allocation4 + $0xc8] sm:$0xff] %vm689_vm1, %v6564_v39  ;;  %7083 = vst.msk [vmem:[#allocation4 + $0x48] sm:$0xff] %vm689_vm1, %v7047_v1  ;;  %v7020_v62 = vld [vmem:[#allocation4 + $0x90] sm:$0xff]  ;;  %v7505_v59 = vld [vmem:[#allocation4 + $0x20] sm:$0xff] }
 0x447   : > { %6599 = vst.msk [vmem:[#allocation4 + $0xc0] sm:$0xff] %vm689_vm1, %v6563_v12  ;;  %7082 = vst.msk [vmem:[#allocation4 + $0x40] sm:$0xff] %vm689_vm1, %v7046_v21  ;;  %v15568_v33 = vpop.f32.mrb[10].mxu1  ;;  %v15600_v14 = vpop.f32.mrb[30].mxu0 }
 0x448   : > { %v6566_v54 = vadd.f32 %v15568_v33, %v6530_v18  ;;  %v7049_v10 = vadd.f32 %v15600_v14, %v7013_v57  ;;  %v6454_v56 = vpop.f32.mrb[11].mxu1  ;;  %v6873_v29 = vpop.f32.mrb[31].mxu0  ;;  %v7023_v18 = vld [vmem:[#allocation4 + $0xa8] sm:$0xff] }
 0x449   : > { %v6565_v8 = vadd.f32 %v6529_v52, %v6454_v56  ;;  %v7048_v15 = vadd.f32 %v7012_v58, %v6873_v29  ;;  %v7502_v57 = vld [vmem:[#allocation4 + $0x8] sm:$0xff]  ;;  %v7022_v29 = vld [vmem:[#allocation4 + $0xa0] sm:$0xff] }
 0x44a   : > { %6602 = vst.msk [vmem:[#allocation4 + $0xd8] sm:$0xff] %vm689_vm1, %v6566_v54  ;;  %7085 = vst.msk [vmem:[#allocation4 + $0x58] sm:$0xff] %vm689_vm1, %v7049_v10  ;;  %v13854_v54 = vld [vmem:[%s20924_s7 + $0x10] sm:$0xf] }
 0x44b   : > { %6601 = vst.msk [vmem:[#allocation4 + $0xd0] sm:$0xff] %vm689_vm1, %v6565_v8  ;;  %7084 = vst.msk [vmem:[#allocation4 + $0x50] sm:$0xff] %vm689_vm1, %v7048_v15  ;;  %v15571_v31 = vpop.f32.mrb[12].mxu1  ;;  %v15603_v50 = vpop.f32.mrb[32].mxu0  ;;  %v7501_v8 = vld [vmem:[#allocation4] sm:$0xff]  ;;  %15973 = vmatprep.subr.msk.mxu1 %vm981_vm0, %v13854_v54 }
 0x44c   : > { %v6568_v61 = vadd.f32 %v15571_v31, %v6532_v46  ;;  %v7051_v45 = vadd.f32 %v15603_v50, %v7015_v44  ;;  %v6464_v49 = vpop.f32.mrb[13].mxu1  ;;  %v6883_v51 = vpop.f32.mrb[33].mxu0 }
 0x44d   : > { %v6567_v19 = vadd.f32 %v6531_v0, %v6464_v49  ;;  %v7050_v13 = vadd.f32 %v7014_v42, %v6883_v51  ;;  %v19585_v46 = vpop.permute.xlu1 %8279  ;;  %v19587_v50 = vpop.permute.xlu0 %8269  ;;  %v7504_v49 = vld [vmem:[#allocation4 + $0x18] sm:$0xff] }
 0x44e   : > { %6604 = vst.msk [vmem:[#allocation4 + $0xe8] sm:$0xff] %vm689_vm1, %v6568_v61  ;;  %7087 = vst.msk [vmem:[#allocation4 + $0x68] sm:$0xff] %vm689_vm1, %v7051_v45  ;;  %v7025_v61 = vld [vmem:[#allocation4 + $0xb8] sm:$0xff] }
 0x44f   : > { %6603 = vst.msk [vmem:[#allocation4 + $0xe0] sm:$0xff] %vm689_vm1, %v6567_v19  ;;  %7086 = vst.msk [vmem:[#allocation4 + $0x60] sm:$0xff] %vm689_vm1, %v7050_v13  ;;  %v15574_v63 = vpop.f32.mrb[14].mxu1  ;;  %v15606_v40 = vpop.f32.mrb[34].mxu0  ;;  %v7024_v19 = vld [vmem:[#allocation4 + $0xb0] sm:$0xff] }
 0x450   : > { %v6570_v35 = vadd.f32 %v15574_v63, %v6534_v9  ;;  %v7053_v16 = vadd.f32 %v15606_v40, %v7017_v5  ;;  %v6474_v41 = vpop.f32.mrb[15].mxu1  ;;  %v6893_v23 = vpop.f32.mrb[35].mxu0  ;;  %v7503_v63 = vld [vmem:[#allocation4 + $0x10] sm:$0xff] }
 0x451   : > { %v6569_v26 = vadd.f32 %v6533_v38, %v6474_v41  ;;  %v7052_v53 = vadd.f32 %v7016_v34, %v6893_v23  ;;  %v7506_v41 = vld [vmem:[#allocation4 + $0x28] sm:$0xff] }
 0x452   : > { %6606 = vst.msk [vmem:[#allocation4 + $0xf8] sm:$0xff] %vm689_vm1, %v6570_v35  ;;  %7089 = vst.msk [vmem:[#allocation4 + $0x78] sm:$0xff] %vm689_vm1, %v7053_v16  ;;  %v7027_v35 = vld [vmem:[#allocation4 + $0xc8] sm:$0xff] }
 0x453   : > { %6605 = vst.msk [vmem:[#allocation4 + $0xf0] sm:$0xff] %vm689_vm1, %v6569_v26  ;;  %7088 = vst.msk [vmem:[#allocation4 + $0x70] sm:$0xff] %vm689_vm1, %v7052_v53  ;;  %v15577_v28 = vpop.f32.mrb[16].mxu1  ;;  %v15609_v7 = vpop.f32.mrb[36].mxu0  ;;  %v7026_v26 = vld [vmem:[#allocation4 + $0xc0] sm:$0xff] }
 0x454   : > { %v6572_v32 = vadd.f32 %v15577_v28, %v6536_v22  ;;  %v7055_v6 = vadd.f32 %v15609_v7, %v7019_v48  ;;  %v6484_v36 = vpop.f32.mrb[17].mxu1  ;;  %v6903_v11 = vpop.f32.mrb[37].mxu0 }
 0x455   : > { %v6571_v24 = vadd.f32 %v6535_v27, %v6484_v36  ;;  %v7054_v25 = vadd.f32 %v7018_v43, %v6903_v11  ;;  %v19597_v7 = vpop.permute.xlu1 %8289  ;;  %v19599_v48 = vpop.permute.xlu0 %8284  ;;  %v7508_v27 = vld [vmem:[#allocation4 + $0x38] sm:$0xff] }
 0x456   : > { %6608 = vst.msk [vmem:[#allocation4 + $0x108] sm:$0xff] %vm689_vm1, %v6572_v32  ;;  %7091 = vst.msk [vmem:[#allocation4 + $0x88] sm:$0xff] %vm689_vm1, %v7055_v6  ;;  %v7029_v6 = vld [vmem:[#allocation4 + $0xd8] sm:$0xff] }
 0x457   : > { %6607 = vst.msk [vmem:[#allocation4 + $0x100] sm:$0xff] %vm689_vm1, %v6571_v24  ;;  %7090 = vst.msk [vmem:[#allocation4 + $0x80] sm:$0xff] %vm689_vm1, %v7054_v25  ;;  %v15580_v3 = vpop.f32.mrb[18].mxu1  ;;  %v15612_v37 = vpop.f32.mrb[38].mxu0  ;;  %v7028_v25 = vld [vmem:[#allocation4 + $0xd0] sm:$0xff] }
 0x458   : > { %v6574_v39 = vadd.f32 %v15580_v3, %v6538_v30  ;;  %v7057_v1 = vadd.f32 %v15612_v37, %v7021_v17  ;;  %v6494_v60 = vpop.f32.mrb[19].mxu1  ;;  %v6913_v2 = vpop.f32.mrb[39].mxu0  ;;  %v7507_v30 = vld [vmem:[#allocation4 + $0x30] sm:$0xff] }
 0x459   : > { %v6573_v12 = vadd.f32 %v6537_v47, %v6494_v60  ;;  %v7056_v21 = vadd.f32 %v7020_v62, %v6913_v2  ;;  %v7510_v47 = vld [vmem:[#allocation4 + $0x48] sm:$0xff]  ;;  %v19609_v54 = vpop.permute.xlu1 %8299 }
 0x45a   : > { %6610 = vst.msk [vmem:[#allocation4 + $0x118] sm:$0xff] %vm689_vm1, %v6574_v39  ;;  %7093 = vst.msk [vmem:[#allocation4 + $0x98] sm:$0xff] %vm689_vm1, %v7057_v1  ;;  %v7031_v1 = vld [vmem:[#allocation4 + $0xe8] sm:$0xff] }
 0x45b   : > { %6609 = vst.msk [vmem:[#allocation4 + $0x110] sm:$0xff] %vm689_vm1, %v6573_v12  ;;  %7092 = vst.msk [vmem:[#allocation4 + $0x90] sm:$0xff] %vm689_vm1, %v7056_v21  ;;  %v15615_v33 = vpop.f32.mrb[40].mxu0  ;;  %v15641_v14 = vpop.f32.mrb[20].mxu1  ;;  %v7030_v21 = vld [vmem:[#allocation4 + $0xe0] sm:$0xff] }
 0x45c   : > { %v7059_v10 = vadd.f32 %v15615_v33, %v7023_v18  ;;  %v7538_v56 = vadd.f32 %v15641_v14, %v7502_v57  ;;  %v6923_v52 = vpop.f32.mrb[41].mxu0  ;;  %v7322_v58 = vpop.f32.mrb[21].mxu1  ;;  %v7509_v18 = vld [vmem:[#allocation4 + $0x40] sm:$0xff] }
 0x45d   : > { %v7058_v15 = vadd.f32 %v7022_v29, %v6923_v52  ;;  %v7537_v31 = vadd.f32 %v7501_v8, %v7322_v58  ;;  %v7033_v52 = vld [vmem:[#allocation4 + $0xf8] sm:$0xff] }
 0x45e   : > { %7095 = vst.msk [vmem:[#allocation4 + $0xa8] sm:$0xff] %vm689_vm1, %v7059_v10  ;;  %7574 = vst.msk [vmem:[#allocation4 + $0x8] sm:$0xff] %vm689_vm1, %v7538_v56  ;;  %v19611_v10 = vpop.permute.xlu0 %8294  ;;  %v7512_v58 = vld [vmem:[#allocation4 + $0x58] sm:$0xff] }
 0x45f   : > { %7094 = vst.msk [vmem:[#allocation4 + $0xa0] sm:$0xff] %vm689_vm1, %v7058_v15  ;;  %7573 = vst.msk [vmem:[#allocation4] sm:$0xff] %vm689_vm1, %v7537_v31  ;;  %v15618_v44 = vpop.f32.mrb[42].mxu0  ;;  %v15644_v45 = vpop.f32.mrb[22].mxu1 }
 0x460   : > { %v7061_v0 = vadd.f32 %v15618_v44, %v7025_v61  ;;  %v7540_v51 = vadd.f32 %v15644_v45, %v7504_v49  ;;  %v6933_v42 = vpop.f32.mrb[43].mxu0  ;;  %v7332_v13 = vpop.f32.mrb[23].mxu1  ;;  %v7032_v44 = vld [vmem:[#allocation4 + $0xf0] sm:$0xff] }
 0x461   : > { %v7060_v9 = vadd.f32 %v7024_v19, %v6933_v42  ;;  %v7539_v40 = vadd.f32 %v7503_v63, %v7332_v13  ;;  %v7511_v45 = vld [vmem:[#allocation4 + $0x50] sm:$0xff]  ;;  %v7035_v42 = vld [vmem:[#allocation4 + $0x108] sm:$0xff] }
 0x462   : > { %7097 = vst.msk [vmem:[#allocation4 + $0xb8] sm:$0xff] %vm689_vm1, %v7061_v0  ;;  %7576 = vst.msk [vmem:[#allocation4 + $0x18] sm:$0xff] %vm689_vm1, %v7540_v51  ;;  %v7514_v13 = vld [vmem:[#allocation4 + $0x68] sm:$0xff] }
 0x463   : > { %7096 = vst.msk [vmem:[#allocation4 + $0xb0] sm:$0xff] %vm689_vm1, %v7060_v9  ;;  %7575 = vst.msk [vmem:[#allocation4 + $0x10] sm:$0xff] %vm689_vm1, %v7539_v40  ;;  %v15621_v5 = vpop.f32.mrb[44].mxu0  ;;  %v15647_v16 = vpop.f32.mrb[24].mxu1 }
 0x464   : > { %v7063_v38 = vadd.f32 %v15621_v5, %v7027_v35  ;;  %v7542_v23 = vadd.f32 %v15647_v16, %v7506_v41  ;;  %v6943_v34 = vpop.f32.mrb[45].mxu0  ;;  %v7342_v53 = vpop.f32.mrb[25].mxu1  ;;  %v7034_v5 = vld [vmem:[#allocation4 + $0x100] sm:$0xff] }
 0x465   : > { %v7062_v28 = vadd.f32 %v7026_v26, %v6943_v34  ;;  %v7541_v22 = vadd.f32 %v7505_v59, %v7342_v53  ;;  %v7513_v16 = vld [vmem:[#allocation4 + $0x60] sm:$0xff]  ;;  %v19623_v34 = vpop.permute.xlu0 %8304  ;;  %v7037_v53 = vld [vmem:[#allocation4 + $0x118] sm:$0xff] }
 0x466   : > { %7099 = vst.msk [vmem:[#allocation4 + $0xc8] sm:$0xff] %vm689_vm1, %v7063_v38  ;;  %7578 = vst.msk [vmem:[#allocation4 + $0x28] sm:$0xff] %vm689_vm1, %v7542_v23  ;;  %v19621_v23 = vpop.permute.xlu1 %8309 }
 0x467   : > { %7098 = vst.msk [vmem:[#allocation4 + $0xc0] sm:$0xff] %vm689_vm1, %v7062_v28  ;;  %7577 = vst.msk [vmem:[#allocation4 + $0x20] sm:$0xff] %vm689_vm1, %v7541_v22  ;;  %v15624_v32 = vpop.f32.mrb[46].mxu0  ;;  %v15650_v36 = vpop.f32.mrb[26].mxu1  ;;  %v7516_v28 = vld [vmem:[#allocation4 + $0x78] sm:$0xff] }
 0x468   : > { %v7065_v11 = vadd.f32 %v15624_v32, %v7029_v6  ;;  %v7544_v43 = vadd.f32 %v15650_v36, %v7508_v27  ;;  %v6953_v24 = vpop.f32.mrb[47].mxu0  ;;  %v7352_v3 = vpop.f32.mrb[27].mxu1  ;;  %v7036_v36 = vld [vmem:[#allocation4 + $0x110] sm:$0xff] }
 0x469   : > { %v7064_v37 = vadd.f32 %v7028_v25, %v6953_v24  ;;  %v7543_v17 = vadd.f32 %v7507_v30, %v7352_v3  ;;  %v7518_v3 = vld [vmem:[#allocation4 + $0x88] sm:$0xff] }
 0x46a   : > { %7101 = vst.msk [vmem:[#allocation4 + $0xd8] sm:$0xff] %vm689_vm1, %v7065_v11  ;;  %7580 = vst.msk [vmem:[#allocation4 + $0x38] sm:$0xff] %vm689_vm1, %v7544_v43  ;;  %v7515_v11 = vld [vmem:[#allocation4 + $0x70] sm:$0xff] }
 0x46b   : > { %7100 = vst.msk [vmem:[#allocation4 + $0xd0] sm:$0xff] %vm689_vm1, %v7064_v37  ;;  %7579 = vst.msk [vmem:[#allocation4 + $0x30] sm:$0xff] %vm689_vm1, %v7543_v17  ;;  %v15627_v39 = vpop.f32.mrb[48].mxu0  ;;  %v15653_v60 = vpop.f32.mrb[28].mxu1  ;;  %v8001_v37 = vld [vmem:[#allocation4 + $0x8] sm:$0xff] }
 0x46c   : > { %v7067_v2 = vadd.f32 %v15627_v39, %v7031_v1  ;;  %v7546_v62 = vadd.f32 %v15653_v60, %v7510_v47  ;;  %v6963_v12 = vpop.f32.mrb[49].mxu0  ;;  %v7362_v33 = vpop.f32.mrb[29].mxu1  ;;  %v7517_v60 = vld [vmem:[#allocation4 + $0x80] sm:$0xff] }
 0x46d   : > { %v7066_v14 = vadd.f32 %v7030_v21, %v6963_v12  ;;  %v7545_v57 = vadd.f32 %v7509_v18, %v7362_v33  ;;  %v19633_v21 = vpop.permute.xlu1 %8319  ;;  %v19635_v33 = vpop.permute.xlu0 %8314 }
 0x46e   : > { %7103 = vst.msk [vmem:[#allocation4 + $0xe8] sm:$0xff] %vm689_vm1, %v7067_v2  ;;  %7582 = vst.msk [vmem:[#allocation4 + $0x48] sm:$0xff] %vm689_vm1, %v7546_v62  ;;  %v8000_v2 = vld [vmem:[#allocation4] sm:$0xff] }
 0x46f   : > { %7102 = vst.msk [vmem:[#allocation4 + $0xe0] sm:$0xff] %vm689_vm1, %v7066_v14  ;;  %7581 = vst.msk [vmem:[#allocation4 + $0x40] sm:$0xff] %vm689_vm1, %v7545_v57  ;;  %v15630_v56 = vpop.f32.mrb[50].mxu0  ;;  %v15656_v29 = vpop.f32.mrb[30].mxu1  ;;  %v7520_v14 = vld [vmem:[#allocation4 + $0x98] sm:$0xff] }
 0x470   : > { %v7069_v8 = vadd.f32 %v15630_v56, %v7033_v52  ;;  %v7548_v15 = vadd.f32 %v15656_v29, %v7512_v58  ;;  %v6973_v31 = vpop.f32.mrb[51].mxu0  ;;  %v7372_v61 = vpop.f32.mrb[31].mxu1  ;;  %v8003_v56 = vld [vmem:[#allocation4 + $0x18] sm:$0xff] }
 0x471   : > { %v7068_v49 = vadd.f32 %v7032_v44, %v6973_v31  ;;  %v7547_v0 = vadd.f32 %v7511_v45, %v7372_v61  ;;  %v8002_v31 = vld [vmem:[#allocation4 + $0x10] sm:$0xff] }
 0x472   : > { %7105 = vst.msk [vmem:[#allocation4 + $0xf8] sm:$0xff] %vm689_vm1, %v7069_v8  ;;  %7584 = vst.msk [vmem:[#allocation4 + $0x58] sm:$0xff] %vm689_vm1, %v7548_v15  ;;  %v7519_v8 = vld [vmem:[#allocation4 + $0x90] sm:$0xff] }
 0x473   : > { %7104 = vst.msk [vmem:[#allocation4 + $0xf0] sm:$0xff] %vm689_vm1, %v7068_v49  ;;  %7583 = vst.msk [vmem:[#allocation4 + $0x50] sm:$0xff] %vm689_vm1, %v7547_v0  ;;  %v15633_v51 = vpop.f32.mrb[52].mxu0  ;;  %v15659_v19 = vpop.f32.mrb[32].mxu1  ;;  %v19646_v45 = vld [vmem:[%s20923_s6] ss:$0 sm:$0xff] }
 0x474   : > { %v7071_v63 = vadd.f32 %v15633_v51, %v7035_v42  ;;  %v7550_v9 = vadd.f32 %v15659_v19, %v7514_v13  ;;  %v6983_v40 = vpop.f32.mrb[53].mxu0  ;;  %v7382_v35 = vpop.f32.mrb[33].mxu1  ;;  %v7522_v0 = vld [vmem:[#allocation4 + $0xa8] sm:$0xff] }
 0x475   : > { %v7070_v41 = vadd.f32 %v7034_v5, %v6983_v40  ;;  %v7549_v38 = vadd.f32 %v7513_v16, %v7382_v35  ;;  %v8005_v42 = vld [vmem:[#allocation4 + $0x28] sm:$0xff]  ;;  %v8004_v5 = vld [vmem:[#allocation4 + $0x20] sm:$0xff]  ;;  %v19653_v16 = vld [vmem:[%s20923_s6 + $0x1] ss:$0 sm:$0xff] }
 0x476   : > { %7107 = vst.msk [vmem:[#allocation4 + $0x108] sm:$0xff] %vm689_vm1, %v7071_v63  ;;  %7586 = vst.msk [vmem:[#allocation4 + $0x68] sm:$0xff] %vm689_vm1, %v7550_v9  ;;  %v7521_v9 = vld [vmem:[#allocation4 + $0xa0] sm:$0xff] }
 0x477   : > { %7106 = vst.msk [vmem:[#allocation4 + $0x100] sm:$0xff] %vm689_vm1, %v7070_v41  ;;  %7585 = vst.msk [vmem:[#allocation4 + $0x60] sm:$0xff] %vm689_vm1, %v7549_v38  ;;  %v15636_v26 = vpop.f32.mrb[54].mxu0  ;;  %v15662_v59 = vpop.f32.mrb[34].mxu1 }
 0x478   : > { %v7073_v22 = vadd.f32 %v15636_v26, %v7037_v53  ;;  %v7552_v32 = vadd.f32 %v15662_v59, %v7516_v28  ;;  %v6993_v6 = vpop.f32.mrb[55].mxu0  ;;  %v7392_v27 = vpop.f32.mrb[35].mxu1 }
 0x479   : > { %v7072_v43 = vadd.f32 %v7036_v36, %v6993_v6  ;;  %v7551_v24 = vadd.f32 %v7515_v11, %v7392_v27  ;;  %v19655_v26 = vpop.permute.xlu1 %8329  ;;  %v19657_v53 = vpop.permute.xlu0 %8324  ;;  %v7524_v6 = vld [vmem:[#allocation4 + $0xb8] sm:$0xff] }
 0x47a   : > { %7109 = vst.msk [vmem:[#allocation4 + $0x118] sm:$0xff] %vm689_vm1, %v7073_v22  ;;  %7588 = vst.msk [vmem:[#allocation4 + $0x78] sm:$0xff] %vm689_vm1, %v7552_v32  ;;  %v8007_v27 = vld [vmem:[#allocation4 + $0x38] sm:$0xff] }
 0x47b   : > { %7108 = vst.msk [vmem:[#allocation4 + $0x110] sm:$0xff] %vm689_vm1, %v7072_v43  ;;  %7587 = vst.msk [vmem:[#allocation4 + $0x70] sm:$0xff] %vm689_vm1, %v7551_v24  ;;  %v15665_v25 = vpop.f32.mrb[36].mxu1  ;;  %v15697_v30 = vpop.f32.mrb[56].mxu0 }
 0x47c   : > { %v7554_v17 = vadd.f32 %v15665_v25, %v7518_v3  ;;  %v8037_v39 = vadd.f32 %v15697_v30, %v8001_v37  ;;  %v7402_v1 = vpop.f32.mrb[37].mxu1  ;;  %v7821_v47 = vpop.f32.mrb[57].mxu0  ;;  %v7523_v3 = vld [vmem:[#allocation4 + $0xb0] sm:$0xff] }
 0x47d   : > { %v7553_v62 = vadd.f32 %v7517_v60, %v7402_v1  ;;  %v8036_v12 = vadd.f32 %v8000_v2, %v7821_v47  ;;  %v8006_v37 = vld [vmem:[#allocation4 + $0x30] sm:$0xff] }
 0x47e   : > { %7590 = vst.msk [vmem:[#allocation4 + $0x88] sm:$0xff] %vm689_vm1, %v7554_v17  ;;  %8073 = vst.msk [vmem:[#allocation4 + $0x8] sm:$0xff] %vm689_vm1, %v8037_v39 }
 0x47f   : > { %7589 = vst.msk [vmem:[#allocation4 + $0x80] sm:$0xff] %vm689_vm1, %v7553_v62  ;;  %8072 = vst.msk [vmem:[#allocation4] sm:$0xff] %vm689_vm1, %v8036_v12  ;;  %v15668_v18 = vpop.f32.mrb[38].mxu1  ;;  %v15700_v57 = vpop.f32.mrb[58].mxu0 }
 0x480   : > { %v7556_v52 = vadd.f32 %v15668_v18, %v7520_v14  ;;  %v8039_v29 = vadd.f32 %v15700_v57, %v8003_v56  ;;  %v7412_v58 = vpop.f32.mrb[39].mxu1  ;;  %v7831_v15 = vpop.f32.mrb[59].mxu0  ;;  %v7526_v14 = vld [vmem:[#allocation4 + $0xc8] sm:$0xff] }
 0x481   : > { %v7555_v44 = vadd.f32 %v7519_v8, %v7412_v58  ;;  %v8038_v61 = vadd.f32 %v8002_v31, %v7831_v15  ;;  %v8009_v56 = vld [vmem:[#allocation4 + $0x48] sm:$0xff]  ;;  %v7525_v31 = vld [vmem:[#allocation4 + $0xc0] sm:$0xff] }
 0x482   : > { %7592 = vst.msk [vmem:[#allocation4 + $0x98] sm:$0xff] %vm689_vm1, %v7556_v52  ;;  %8075 = vst.msk [vmem:[#allocation4 + $0x18] sm:$0xff] %vm689_vm1, %v8039_v29 }
 0x483   : > { %7591 = vst.msk [vmem:[#allocation4 + $0x90] sm:$0xff] %vm689_vm1, %v7555_v44  ;;  %8074 = vst.msk [vmem:[#allocation4 + $0x10] sm:$0xff] %vm689_vm1, %v8038_v61  ;;  %v15671_v49 = vpop.f32.mrb[40].mxu1  ;;  %v15703_v51 = vpop.f32.mrb[60].mxu0  ;;  %v8008_v61 = vld [vmem:[#allocation4 + $0x40] sm:$0xff] }
 0x484   : > { %v7558_v19 = vadd.f32 %v15671_v49, %v7522_v0  ;;  %v8041_v13 = vadd.f32 %v15703_v51, %v8005_v42  ;;  %v7422_v63 = vpop.f32.mrb[41].mxu1  ;;  %v7841_v40 = vpop.f32.mrb[61].mxu0 }
 0x485   : > { %v8109_v35 = vld [vmem:[#allocation4 + $0x8] sm:$0xff]  ;;  %v7557_v41 = vadd.f32 %v7521_v9, %v7422_v63  ;;  %v8040_v38 = vadd.f32 %v8004_v5, %v7841_v40  ;;  %v19677_v63 = vpop.permute.xlu1 %8339  ;;  %v19679_v9 = vpop.permute.xlu0 %8334 }
 0x486   : > { %v8150_v59 = vmul.f32 %v19646_v45, %v8109_v35  ;;  %v8108_v28 = vld [vmem:[#allocation4] sm:$0xff]  ;;  %7594 = vst.msk [vmem:[#allocation4 + $0xa8] sm:$0xff] %vm689_vm1, %v7558_v19  ;;  %8077 = vst.msk [vmem:[#allocation4 + $0x28] sm:$0xff] %vm689_vm1, %v8041_v13 }
 0x487   : > { %v8149_v22 = vmul.f32 %v19646_v45, %v8108_v28  ;;  %7593 = vst.msk [vmem:[#allocation4 + $0xa0] sm:$0xff] %vm689_vm1, %v7557_v41  ;;  %8076 = vst.msk [vmem:[#allocation4 + $0x20] sm:$0xff] %vm689_vm1, %v8040_v38  ;;  %v15674_v32 = vpop.f32.mrb[42].mxu1  ;;  %v15706_v36 = vpop.f32.mrb[62].mxu0 }
 0x488   : > { %v8191_v11 = vadd.f32 %v19653_v16, %v8150_v59  ;;  %v7560_v43 = vadd.f32 %v15674_v32, %v7524_v6  ;;  %v8043_v24 = vadd.f32 %v15706_v36, %v8007_v27  ;;  %v7432_v25 = vpop.f32.mrb[43].mxu1  ;;  %v7851_v30 = vpop.f32.mrb[63].mxu0  ;;  %v7528_v59 = vld [vmem:[#allocation4 + $0xd8] sm:$0xff] }
 0x489   : > { %v8111_v17 = vld [vmem:[#allocation4 + $0x18] sm:$0xff]  ;;  %v7559_v39 = vadd.f32 %v7523_v3, %v7432_v25  ;;  %v8042_v1 = vadd.f32 %v8006_v37, %v7851_v30  ;;  %v8190_v60 = vadd.f32 %v19653_v16, %v8149_v22  ;;  %v8010_v25 = vld [vmem:[#allocation4 + $0x50] sm:$0xff] }
 0x48a   : > { %v8227_v47 = vmax.f32 %v8191_v11, 0.0  ;;  %v8152_v2 = vmul.f32 %v19646_v45, %v8111_v17  ;;  %v8110_v62 = vld [vmem:[#allocation4 + $0x10] sm:$0xff]  ;;  %7596 = vst.msk [vmem:[#allocation4 + $0xb8] sm:$0xff] %vm689_vm1, %v7560_v43  ;;  %8079 = vst.msk [vmem:[#allocation4 + $0x38] sm:$0xff] %vm689_vm1, %v8043_v24  ;;  %v8011_v22 = vld [vmem:[#allocation4 + $0x58] sm:$0xff] }
 0x48b   : > { %v8151_v12 = vmul.f32 %v19646_v45, %v8110_v62  ;;  %7595 = vst.msk [vmem:[#allocation4 + $0xb0] sm:$0xff] %vm689_vm1, %v7559_v39  ;;  %8078 = vst.msk [vmem:[#allocation4 + $0x30] sm:$0xff] %vm689_vm1, %v8042_v1  ;;  %v15677_v18 = vpop.f32.mrb[44].mxu1  ;;  %v15709_v57 = vpop.f32.mrb[64].mxu0  ;;  %v8226_v52 = vmax.f32 %v8190_v60, 0.0  ;;  %v7527_v43 = vld [vmem:[#allocation4 + $0xd0] sm:$0xff] }
 0x48c   : > { %v8193_v29 = vadd.f32 %v19653_v16, %v8152_v2  ;;  %v7562_v58 = vadd.f32 %v15677_v18, %v7526_v14  ;;  %v8045_v8 = vadd.f32 %v15709_v57, %v8009_v56  ;;  %v7442_v15 = vpop.f32.mrb[45].mxu1  ;;  %v7861_v44 = vpop.f32.mrb[65].mxu0  ;;  %v8443_v49 = vmul.f32 %v19587_v50, %v8227_v47  ;;  %v7530_v18 = vld [vmem:[#allocation4 + $0xe8] sm:$0xff] }
 0x48d   : > { %v8113_v0 = vld [vmem:[#allocation4 + $0x28] sm:$0xff]  ;;  %v7561_v51 = vadd.f32 %v7525_v31, %v7442_v15  ;;  %v8044_v42 = vadd.f32 %v8008_v61, %v7861_v44  ;;  %v8442_v19 = vmul.f32 %v19556_v55, %v8226_v52  ;;  %v8192_v13 = vadd.f32 %v19653_v16, %v8151_v12  ;;  %v7529_v15 = vld [vmem:[#allocation4 + $0xe0] sm:$0xff] }
 0x48e   : > { %v8229_v40 = vmax.f32 %v8193_v29, 0.0  ;;  %v8154_v5 = vmul.f32 %v19646_v45, %v8113_v0  ;;  %v8112_v35 = vld [vmem:[#allocation4 + $0x20] sm:$0xff]  ;;  %7598 = vst.msk [vmem:[#allocation4 + $0xc8] sm:$0xff] %vm689_vm1, %v7562_v58  ;;  %8081 = vst.msk [vmem:[#allocation4 + $0x48] sm:$0xff] %vm689_vm1, %v8045_v8  ;;  %v8013_v57 = vld [vmem:[#allocation4 + $0x68] sm:$0xff] }
 0x48f   : > { %8479 = vst.msk [vmem:[#allocation3 + $0x1b] sm:$0xff] %vm689_vm1, %v8443_v49  ;;  %v8153_v41 = vmul.f32 %v19646_v45, %v8112_v35  ;;  %7597 = vst.msk [vmem:[#allocation4 + $0xc0] sm:$0xff] %vm689_vm1, %v7561_v51  ;;  %v15680_v38 = vpop.f32.mrb[46].mxu1  ;;  %v15712_v28 = vpop.f32.mrb[66].mxu0  ;;  %v8228_v32 = vmax.f32 %v8192_v13, 0.0  ;;  %v8012_v44 = vld [vmem:[#allocation4 + $0x60] sm:$0xff] }
 0x490   : > { %8080 = vst.msk [vmem:[#allocation4 + $0x40] sm:$0xff] %vm689_vm1, %v8044_v42  ;;  %8478 = vst.msk [vmem:[#allocation3 + $0x13] sm:$0xff] %vm689_vm1, %v8442_v19  ;;  %v8195_v6 = vadd.f32 %v19653_v16, %v8154_v5  ;;  %v7564_v36 = vadd.f32 %v15680_v38, %v7528_v59  ;;  %v8047_v27 = vadd.f32 %v15712_v28, %v8011_v22  ;;  %v7452_v11 = vpop.f32.mrb[47].mxu1  ;;  %v7871_v24 = vpop.f32.mrb[67].mxu0  ;;  %v7532_v42 = vld [vmem:[#allocation4 + $0xf8] sm:$0xff] }
 0x491   : > { %v8445_v3 = vmul.f32 %v19585_v46, %v8229_v40  ;;  %v8115_v30 = vld [vmem:[#allocation4 + $0x38] sm:$0xff]  ;;  %v7563_v37 = vadd.f32 %v7527_v43, %v7452_v11  ;;  %v8046_v17 = vadd.f32 %v8010_v25, %v7871_v24  ;;  %v8444_v39 = vmul.f32 %v19571_v4, %v8228_v32  ;;  %v19705_v40 = vpop.permute.xlu1 %8349  ;;  %v19707_v5 = vpop.permute.xlu0 %8344 }
 0x492   : > { %v8194_v1 = vadd.f32 %v19653_v16, %v8153_v41  ;;  %v8231_v60 = vmax.f32 %v8195_v6, 0.0  ;;  %v8156_v47 = vmul.f32 %v19646_v45, %v8115_v30  ;;  %v8114_v2 = vld [vmem:[#allocation4 + $0x30] sm:$0xff]  ;;  %7600 = vst.msk [vmem:[#allocation4 + $0xd8] sm:$0xff] %vm689_vm1, %v7564_v36  ;;  %8083 = vst.msk [vmem:[#allocation4 + $0x58] sm:$0xff] %vm689_vm1, %v8047_v27  ;;  %v8015_v36 = vld [vmem:[#allocation4 + $0x78] sm:$0xff] }
 0x493   : > { %8481 = vst.msk [vmem:[#allocation3 + $0x2b] sm:$0xff] %vm689_vm1, %v8445_v3  ;;  %v8155_v62 = vmul.f32 %v19646_v45, %v8114_v2  ;;  %7599 = vst.msk [vmem:[#allocation4 + $0xd0] sm:$0xff] %vm689_vm1, %v7563_v37  ;;  %v15683_v12 = vpop.f32.mrb[48].mxu1  ;;  %v15715_v14 = vpop.f32.mrb[68].mxu0  ;;  %v7531_v37 = vld [vmem:[#allocation4 + $0xf0] sm:$0xff]  ;;  %v7534_v2 = vld [vmem:[#allocation4 + $0x108] sm:$0xff] }
 0x494   : > { %8082 = vst.msk [vmem:[#allocation4 + $0x50] sm:$0xff] %vm689_vm1, %v8046_v17  ;;  %8480 = vst.msk [vmem:[#allocation3 + $0x23] sm:$0xff] %vm689_vm1, %v8444_v39  ;;  %v8230_v56 = vmax.f32 %v8194_v1, 0.0  ;;  %v8197_v52 = vadd.f32 %v19653_v16, %v8156_v47  ;;  %v7566_v29 = vadd.f32 %v15683_v12, %v7530_v18  ;;  %v8049_v58 = vadd.f32 %v15715_v14, %v8013_v57  ;;  %v7462_v8 = vpop.f32.mrb[49].mxu1  ;;  %v7881_v31 = vpop.f32.mrb[69].mxu0  ;;  %v8014_v39 = vld [vmem:[#allocation4 + $0x70] sm:$0xff] }
 0x495   : > { %v8447_v61 = vmul.f32 %v19597_v7, %v8231_v60  ;;  %v8117_v49 = vld [vmem:[#allocation4 + $0x48] sm:$0xff]  ;;  %v7565_v0 = vadd.f32 %v7529_v15, %v7462_v8  ;;  %v8048_v51 = vadd.f32 %v8012_v44, %v7881_v31  ;;  %v8196_v13 = vadd.f32 %v19653_v16, %v8155_v62 }
 0x496   : > { %v8446_v19 = vmul.f32 %v19599_v48, %v8230_v56  ;;  %v8233_v35 = vmax.f32 %v8197_v52, 0.0  ;;  %v8158_v41 = vmul.f32 %v19646_v45, %v8117_v49  ;;  %7602 = vst.msk [vmem:[#allocation4 + $0xe8] sm:$0xff] %vm689_vm1, %v7566_v29  ;;  %8085 = vst.msk [vmem:[#allocation4 + $0x68] sm:$0xff] %vm689_vm1, %v8049_v58  ;;  %v8017_v31 = vld [vmem:[#allocation4 + $0x88] sm:$0xff] }
 0x497   : > { %v8116_v38 = vld [vmem:[#allocation4 + $0x40] sm:$0xff]  ;;  %v8516_v59 = vld [vmem:[#allocation3 + $0x10] sm:$0xff]  ;;  %8483 = vst.msk [vmem:[#allocation3 + $0x3b] sm:$0xff] %vm689_vm1, %v8447_v61  ;;  %7601 = vst.msk [vmem:[#allocation4 + $0xe0] sm:$0xff] %vm689_vm1, %v7565_v0  ;;  %v15686_v32 = vpop.f32.mrb[50].mxu1  ;;  %v15718_v6 = vpop.f32.mrb[70].mxu0 }
 0x498   : > { %v8945_v28 = vld [vmem:[#allocation3 + $0x11] sm:$0xff]  ;;  %v8157_v22 = vmul.f32 %v19646_v45, %v8116_v38  ;;  %8084 = vst.msk [vmem:[#allocation4 + $0x60] sm:$0xff] %vm689_vm1, %v8048_v51  ;;  %15754 = vmatprep.mubr.msk.f32.mxu1 %vm689_vm1, %v8516_v59  ;;  %v8946_v11 = vld [vmem:[#allocation3 + $0x19] sm:$0xff]  ;;  %8482 = vst.msk [vmem:[#allocation3 + $0x33] sm:$0xff] %vm689_vm1, %v8446_v19  ;;  %v8232_v43 = vmax.f32 %v8196_v13, 0.0  ;;  %v8199_v24 = vadd.f32 %v19653_v16, %v8158_v41  ;;  %v7472_v30 = vpop.f32.mrb[51].mxu1 }
 0x499   : > { %15810 = vmatprep.mubr.msk.f32.mxu0 %vm689_vm1, %v8945_v28  ;;  %v8517_v27 = vld [vmem:[#allocation3 + $0x18] sm:$0xff]  ;;  %v7568_v25 = vadd.f32 %v15686_v32, %v7532_v42  ;;  %v8051_v3 = vadd.f32 %v15718_v6, %v8015_v36  ;;  %v7891_v17 = vpop.f32.mrb[71].mxu0  ;;  %v8119_v1 = vld [vmem:[#allocation4 + $0x58] sm:$0xff]  ;;  %v7567_v60 = vadd.f32 %v7531_v37, %v7472_v30  ;;  %v8449_v12 = vmul.f32 %v19609_v54, %v8233_v35  ;;  %v7533_v19 = vld [vmem:[#allocation4 + $0x100] sm:$0xff] }
 0x49a   : > { %15755 = vmatmul.mubr.msk.f32.gmra.mrb[58].mxu1 %vm689_vm1, %v8517_v27  ;;  %15811 = vmatmul.mubr.msk.f32.gmra.mrb[94].mxu0 %vm689_vm1, %v8946_v11  ;;  %v8050_v47 = vadd.f32 %v8014_v39, %v7891_v17  ;;  %v8448_v62 = vmul.f32 %v19611_v10, %v8232_v43  ;;  %v8235_v18 = vmax.f32 %v8199_v24, 0.0  ;;  %v8160_v14 = vmul.f32 %v19646_v45, %v8119_v1  ;;  %v8016_v35 = vld [vmem:[#allocation4 + $0x80] sm:$0xff]  ;;  %v19745_v27 = vpop.permute.xlu1 %8359  ;;  %v19747_v11 = vpop.permute.xlu0 %8354 }
 0x49b   : > { %v8118_v57 = vld [vmem:[#allocation4 + $0x50] sm:$0xff]  ;;  %7604 = vst.msk [vmem:[#allocation4 + $0xf8] sm:$0xff] %vm689_vm1, %v7568_v25  ;;  %8087 = vst.msk [vmem:[#allocation4 + $0x78] sm:$0xff] %vm689_vm1, %v8051_v3  ;;  %v8518_v56 = vld [vmem:[#allocation3 + $0x20] sm:$0xff]  ;;  %v8198_v29 = vadd.f32 %v19653_v16, %v8157_v22  ;;  %v15689_v8 = vpop.f32.mrb[52].mxu1  ;;  %v15721_v15 = vpop.f32.mrb[72].mxu0 }
 0x49c   : > { %v8947_v52 = vld [vmem:[#allocation3 + $0x21] sm:$0xff]  ;;  %v8159_v58 = vmul.f32 %v19646_v45, %v8118_v57  ;;  %7603 = vst.msk [vmem:[#allocation4 + $0xf0] sm:$0xff] %vm689_vm1, %v7567_v60  ;;  %8086 = vst.msk [vmem:[#allocation4 + $0x70] sm:$0xff] %vm689_vm1, %v8050_v47  ;;  %15757 = vmatprep.mubr.msk.f32.mxu1 %vm689_vm1, %v8518_v56  ;;  %v8948_v61 = vld [vmem:[#allocation3 + $0x29] sm:$0xff]  ;;  %v8201_v49 = vadd.f32 %v19653_v16, %v8160_v14  ;;  %v7570_v0 = vadd.f32 %v15689_v8, %v7534_v2  ;;  %v7482_v42 = vpop.f32.mrb[53].mxu1  ;;  %v7901_v13 = vpop.f32.mrb[73].mxu0 }
 0x49d   : > { %15813 = vmatprep.mubr.msk.f32.mxu0 %vm689_vm1, %v8947_v52  ;;  %v8519_v44 = vld [vmem:[#allocation3 + $0x28] sm:$0xff]  ;;  %8484 = vst.msk [vmem:[#allocation3 + $0x43] sm:$0xff] %vm689_vm1, %v8448_v62  ;;  %8485 = vst.msk [vmem:[#allocation3 + $0x4b] sm:$0xff] %vm689_vm1, %v8449_v12  ;;  %v8053_v51 = vadd.f32 %v15721_v15, %v8017_v31  ;;  %v8234_v41 = vmax.f32 %v8198_v29, 0.0  ;;  %v8121_v38 = vld [vmem:[#allocation4 + $0x68] sm:$0xff]  ;;  %v7569_v59 = vadd.f32 %v7533_v19, %v7482_v42 }
 0x49e   : > { %15758 = vmatmul.mubr.msk.f32.gmra.mrb[60].mxu1 %vm689_vm1, %v8519_v44  ;;  %15814 = vmatmul.mubr.msk.f32.gmra.mrb[96].mxu0 %vm689_vm1, %v8948_v61  ;;  %v8052_v28 = vadd.f32 %v8016_v35, %v7901_v13  ;;  %v7536_v22 = vld [vmem:[#allocation4 + $0x118] sm:$0xff]  ;;  %v8451_v32 = vmul.f32 %v19621_v23, %v8235_v18  ;;  %v8200_v6 = vadd.f32 %v19653_v16, %v8159_v58  ;;  %v19743_v36 = vld [vmem:[%s20924_s7 + $0x14] sm:$0xf]  ;;  %v8237_v43 = vmax.f32 %v8201_v49, 0.0  ;;  %v7535_v56 = vld [vmem:[#allocation4 + $0x110] sm:$0xff] }
 0x49f   : > { %21053 = vst [vmem:[#allocation33_spill] sm:$0xff] %v19745_v27  ;;  %21054 = vst [vmem:[#allocation14_spill] sm:$0xff] %v19747_v11  ;;  %v8162_v24 = vmul.f32 %v19646_v45, %v8121_v38  ;;  %v8120_v25 = vld [vmem:[#allocation4 + $0x60] sm:$0xff]  ;;  %v8520_v3 = vld [vmem:[#allocation3 + $0x30] sm:$0xff]  ;;  %v8450_v37 = vmul.f32 %v19623_v34, %v8234_v41  ;;  %16029 = vmatprep.subr.msk.mxu0 %vm981_vm0, %v19743_v36  ;;  %v15692_v39 = vpop.f32.mrb[54].mxu1  ;;  %v15724_v1 = vpop.f32.mrb[74].mxu0 }
 0x4a0   : > { %7606 = vst.msk [vmem:[#allocation4 + $0x108] sm:$0xff] %vm689_vm1, %v7570_v0  ;;  %8089 = vst.msk [vmem:[#allocation4 + $0x88] sm:$0xff] %vm689_vm1, %v8053_v51  ;;  %v8949_v30 = vld [vmem:[#allocation3 + $0x31] sm:$0xff]  ;;  %v8161_v17 = vmul.f32 %v19646_v45, %v8120_v25  ;;  %v8019_v60 = vld [vmem:[#allocation4 + $0x98] sm:$0xff]  ;;  %15760 = vmatprep.mubr.msk.f32.mxu1 %vm689_vm1, %v8520_v3  ;;  %v8236_v62 = vmax.f32 %v8200_v6, 0.0  ;;  %v7572_v18 = vadd.f32 %v15692_v39, %v7536_v22  ;;  %v7492_v57 = vpop.f32.mrb[55].mxu1  ;;  %v19782_v25 = vpop.permute.xlu1 %8369 }
 0x4a1   : > { %7605 = vst.msk [vmem:[#allocation4 + $0x100] sm:$0xff] %vm689_vm1, %v7569_v59  ;;  %8088 = vst.msk [vmem:[#allocation4 + $0x80] sm:$0xff] %vm689_vm1, %v8052_v28  ;;  %15816 = vmatprep.mubr.msk.f32.mxu0 %vm689_vm1, %v8949_v30  ;;  %v8521_v47 = vld [vmem:[#allocation3 + $0x38] sm:$0xff]  ;;  %v8203_v12 = vadd.f32 %v19653_v16, %v8162_v24  ;;  %v8055_v14 = vadd.f32 %v15724_v1, %v8019_v60  ;;  %v7911_v52 = vpop.f32.mrb[75].mxu0  ;;  %v7571_v8 = vadd.f32 %v7535_v56, %v7492_v57  ;;  %v8021_v41 = vld [vmem:[#allocation4 + $0xa8] sm:$0xff] }
 0x4a2   : > { %v8950_v2 = vld [vmem:[#allocation3 + $0x39] sm:$0xff]  ;;  %8487 = vst.msk [vmem:[#allocation3 + $0x5b] sm:$0xff] %vm689_vm1, %v8451_v32  ;;  %15761 = vmatmul.mubr.msk.f32.gmra.mrb[62].mxu1 %vm689_vm1, %v8521_v47  ;;  %8486 = vst.msk [vmem:[#allocation3 + $0x53] sm:$0xff] %vm689_vm1, %v8450_v37  ;;  %v8452_v31 = vmul.f32 %v19635_v33, %v8236_v62  ;;  %v8453_v44 = vmul.f32 %v19633_v21, %v8237_v43  ;;  %v8202_v19 = vadd.f32 %v19653_v16, %v8161_v17  ;;  %v8020_v6 = vld [vmem:[#allocation4 + $0xa0] sm:$0xff]  ;;  %v19785_v17 = vpop.permute.xlu0 %8364 }
 0x4a3   : > { %v8018_v29 = vld [vmem:[#allocation4 + $0x90] sm:$0xff]  ;;  %15817 = vmatmul.mubr.msk.f32.gmra.mrb[98].mxu0 %vm689_vm1, %v8950_v2  ;;  %v8123_v58 = vld [vmem:[#allocation4 + $0x78] sm:$0xff]  ;;  %v8239_v61 = vmax.f32 %v8203_v12, 0.0  ;;  %7608 = vst.msk [vmem:[#allocation4 + $0x118] sm:$0xff] %vm689_vm1, %v7572_v18  ;;  %8091 = vst.msk [vmem:[#allocation4 + $0x98] sm:$0xff] %vm689_vm1, %v8055_v14  ;;  %v15727_v35 = vpop.f32.mrb[76].mxu0 }
 0x4a4   : > { %v8054_v15 = vadd.f32 %v8018_v29, %v7911_v52  ;;  %v8164_v49 = vmul.f32 %v19646_v45, %v8123_v58  ;;  %v8122_v0 = vld [vmem:[#allocation4 + $0x70] sm:$0xff]  ;;  %v8522_v51 = vld [vmem:[#allocation3 + $0x40] sm:$0xff]  ;;  %7607 = vst.msk [vmem:[#allocation4 + $0x110] sm:$0xff] %vm689_vm1, %v7571_v8  ;;  %v8523_v38 = vld [vmem:[#allocation3 + $0x48] sm:$0xff]  ;;  %v8057_v22 = vadd.f32 %v15727_v35, %v8021_v41  ;;  %v7921_v32 = vpop.f32.mrb[77].mxu0  ;;  %v8238_v43 = vmax.f32 %v8202_v19, 0.0  ;;  %v19805_v41 = vpop.permute.xlu1 %8379 }
 0x4a5   : > { %v8951_v42 = vld [vmem:[#allocation3 + $0x41] sm:$0xff]  ;;  %v8163_v13 = vmul.f32 %v19646_v45, %v8122_v0  ;;  %15763 = vmatprep.mubr.msk.f32.mxu1 %vm689_vm1, %v8522_v51  ;;  %v8952_v59 = vld [vmem:[#allocation3 + $0x49] sm:$0xff]  ;;  %8488 = vst.msk [vmem:[#allocation3 + $0x63] sm:$0xff] %vm689_vm1, %v8452_v31  ;;  %8489 = vst.msk [vmem:[#allocation3 + $0x6b] sm:$0xff] %vm689_vm1, %v8453_v44  ;;  %v8455_v24 = vmul.f32 %v19655_v26, %v8239_v61  ;;  %v8056_v30 = vadd.f32 %v8020_v6, %v7921_v32 }
 0x4a6   : > { %8090 = vst.msk [vmem:[#allocation4 + $0x90] sm:$0xff] %vm689_vm1, %v8054_v15  ;;  %15819 = vmatprep.mubr.msk.f32.mxu0 %vm689_vm1, %v8951_v42  ;;  %v8205_v28 = vadd.f32 %v19653_v16, %v8164_v49  ;;  %15764 = vmatmul.mubr.msk.f32.gmra.mrb[64].mxu1 %vm689_vm1, %v8523_v38  ;;  %21055 = vst [vmem:[#allocation15_spill] sm:$0xff] %v19782_v25  ;;  %v8023_v47 = vld [vmem:[#allocation4 + $0xb8] sm:$0xff]  ;;  %v8454_v2 = vmul.f32 %v19657_v53, %v8238_v43  ;;  %v8022_v8 = vld [vmem:[#allocation4 + $0xb0] sm:$0xff]  ;;  %v19812_v43 = vpop.permute.xlu0 %8374 }
 0x4a7   : > { %15820 = vmatmul.mubr.msk.f32.gmra.mrb[100].mxu0 %vm689_vm1, %v8952_v59  ;;  %v8125_v3 = vld [vmem:[#allocation4 + $0x88] sm:$0xff]  ;;  %v8204_v37 = vadd.f32 %v19653_v16, %v8163_v13  ;;  %21056 = vst [vmem:[#allocation6_spill] sm:$0xff] %v19785_v17  ;;  %8093 = vst.msk [vmem:[#allocation4 + $0xa8] sm:$0xff] %vm689_vm1, %v8057_v22  ;;  %v15730_v12 = vpop.f32.mrb[78].mxu0 }
 0x4a8   : > { %v8241_v39 = vmax.f32 %v8205_v28, 0.0  ;;  %v8166_v1 = vmul.f32 %v19646_v45, %v8125_v3  ;;  %v8124_v60 = vld [vmem:[#allocation4 + $0x80] sm:$0xff]  ;;  %8491 = vst.msk [vmem:[#allocation3 + $0x7b] sm:$0xff] %vm689_vm1, %v8455_v24  ;;  %8092 = vst.msk [vmem:[#allocation4 + $0xa0] sm:$0xff] %vm689_vm1, %v8056_v30  ;;  %v8059_v29 = vadd.f32 %v15730_v12, %v8023_v47  ;;  %v7931_v58 = vpop.f32.mrb[79].mxu0  ;;  %v8025_v28 = vld [vmem:[#allocation4 + $0xc8] sm:$0xff] }
 0x4a9   : > { %v8165_v62 = vmul.f32 %v19646_v45, %v8124_v60  ;;  %v8524_v18 = vld [vmem:[#allocation3 + $0x50] sm:$0xff]  ;;  %v8525_v57 = vld [vmem:[#allocation3 + $0x58] sm:$0xff]  ;;  %v8240_v56 = vmax.f32 %v8204_v37, 0.0  ;;  %8490 = vst.msk [vmem:[#allocation3 + $0x73] sm:$0xff] %vm689_vm1, %v8454_v2  ;;  %v8058_v61 = vadd.f32 %v8022_v8, %v7931_v58  ;;  %21057 = vst [vmem:[#allocation16_spill] sm:$0xff] %v19805_v41 }
 0x4aa   : > { %v8953_v14 = vld [vmem:[#allocation3 + $0x51] sm:$0xff]  ;;  %v8207_v52 = vadd.f32 %v19653_v16, %v8166_v1  ;;  %15766 = vmatprep.mubr.msk.f32.mxu1 %vm689_vm1, %v8524_v18  ;;  %v8954_v15 = vld [vmem:[#allocation3 + $0x59] sm:$0xff]  ;;  %v8457_v31 = vmul.f32 %v19677_v63, %v8241_v39  ;;  %8095 = vst.msk [vmem:[#allocation4 + $0xb8] sm:$0xff] %vm689_vm1, %v8059_v29  ;;  %21058 = vst [vmem:[#allocation10_spill] sm:$0xff] %v19812_v43 }
 0x4ab   : > { %15822 = vmatprep.mubr.msk.f32.mxu0 %vm689_vm1, %v8953_v14  ;;  %v8127_v44 = vld [vmem:[#allocation4 + $0x98] sm:$0xff]  ;;  %15767 = vmatmul.mubr.msk.f32.gmra.mrb[66].mxu1 %vm689_vm1, %v8525_v57  ;;  %v8456_v49 = vmul.f32 %v19679_v9, %v8240_v56  ;;  %v8206_v0 = vadd.f32 %v19653_v16, %v8165_v62  ;;  %8094 = vst.msk [vmem:[#allocation4 + $0xb0] sm:$0xff] %vm689_vm1, %v8058_v61  ;;  %v15733_v59 = vpop.f32.mrb[80].mxu0  ;;  %v8024_v37 = vld [vmem:[#allocation4 + $0xc0] sm:$0xff]  ;;  %v8026_v61 = vld [vmem:[#allocation4 + $0xd0] sm:$0xff] }
 0x4ac   : > { %15823 = vmatmul.mubr.msk.f32.gmra.mrb[102].mxu0 %vm689_vm1, %v8954_v15  ;;  %v8243_v51 = vmax.f32 %v8207_v52, 0.0  ;;  %v8168_v42 = vmul.f32 %v19646_v45, %v8127_v44  ;;  %v8526_v13 = vld [vmem:[#allocation3 + $0x60] sm:$0xff]  ;;  %8493 = vst.msk [vmem:[#allocation3 + $0x8b] sm:$0xff] %vm689_vm1, %v8457_v31  ;;  %v8527_v22 = vld [vmem:[#allocation3 + $0x68] sm:$0xff]  ;;  %v8061_v3 = vadd.f32 %v15733_v59, %v8025_v28  ;;  %v7941_v30 = vpop.f32.mrb[81].mxu0 }
 0x4ad   : > { %v8126_v19 = vld [vmem:[#allocation4 + $0x90] sm:$0xff]  ;;  %v8955_v35 = vld [vmem:[#allocation3 + $0x61] sm:$0xff]  ;;  %15769 = vmatprep.mubr.msk.f32.mxu1 %vm689_vm1, %v8526_v13  ;;  %v8956_v32 = vld [vmem:[#allocation3 + $0x69] sm:$0xff]  ;;  %8492 = vst.msk [vmem:[#allocation3 + $0x83] sm:$0xff] %vm689_vm1, %v8456_v49  ;;  %v8242_v6 = vmax.f32 %v8206_v0, 0.0  ;;  %v8060_v60 = vadd.f32 %v8024_v37, %v7941_v30 }
 0x4ae   : > { %v8167_v38 = vmul.f32 %v19646_v45, %v8126_v19  ;;  %15825 = vmatprep.mubr.msk.f32.mxu0 %vm689_vm1, %v8955_v35  ;;  %v8209_v24 = vadd.f32 %v19653_v16, %v8168_v42  ;;  %v8459_v39 = vmul.f32 %v19705_v40, %v8243_v51  ;;  %v8129_v1 = vld [vmem:[#allocation4 + $0xa8] sm:$0xff]  ;;  %8097 = vst.msk [vmem:[#allocation4 + $0xc8] sm:$0xff] %vm689_vm1, %v8061_v3  ;;  %v8027_v14 = vld [vmem:[#allocation4 + $0xd8] sm:$0xff]  ;;  %v19830_v51 = vpop.permute.xlu1 %8389 }
 0x4af   : > { %15770 = vmatmul.mubr.msk.f32.gmra.mrb[68].mxu1 %vm689_vm1, %v8527_v22  ;;  %v8458_v47 = vmul.f32 %v19707_v5, %v8242_v6  ;;  %v8170_v12 = vmul.f32 %v19646_v45, %v8129_v1  ;;  %v8128_v18 = vld [vmem:[#allocation4 + $0xa0] sm:$0xff]  ;;  %8096 = vst.msk [vmem:[#allocation4 + $0xc0] sm:$0xff] %vm689_vm1, %v8060_v60  ;;  %v15736_v56 = vpop.f32.mrb[82].mxu0  ;;  %21059 = vst [vmem:[#allocation32_spill] sm:$0xff] %v19830_v51  ;;  %v8029_v30 = vld [vmem:[#allocation4 + $0xe8] sm:$0xff] }
 0x4b0   : > { %15826 = vmatmul.mubr.msk.f32.gmra.mrb[104].mxu0 %vm689_vm1, %v8956_v32  ;;  %v8208_v2 = vadd.f32 %v19653_v16, %v8167_v38  ;;  %v8245_v62 = vmax.f32 %v8209_v24, 0.0  ;;  %8495 = vst.msk [vmem:[#allocation3 + $0x9b] sm:$0xff] %vm689_vm1, %v8459_v39  ;;  %v8169_v57 = vmul.f32 %v19646_v45, %v8128_v18  ;;  %v8528_v52 = vld [vmem:[#allocation3 + $0x70] sm:$0xff]  ;;  %v8529_v58 = vld [vmem:[#allocation3 + $0x78] sm:$0xff]  ;;  %v8063_v31 = vadd.f32 %v15736_v56, %v8027_v14  ;;  %v7951_v44 = vpop.f32.mrb[83].mxu0  ;;  %v19836_v38 = vpop.permute.xlu0 %8384 }
 0x4b1   : > { %v8957_v29 = vld [vmem:[#allocation3 + $0x71] sm:$0xff]  ;;  %8494 = vst.msk [vmem:[#allocation3 + $0x93] sm:$0xff] %vm689_vm1, %v8458_v47  ;;  %v8211_v15 = vadd.f32 %v19653_v16, %v8170_v12  ;;  %15772 = vmatprep.mubr.msk.f32.mxu1 %vm689_vm1, %v8528_v52  ;;  %v8958_v49 = vld [vmem:[#allocation3 + $0x79] sm:$0xff]  ;;  %v8062_v19 = vadd.f32 %v8026_v61, %v7951_v44  ;;  %21060 = vst [vmem:[#allocation17_spill] sm:$0xff] %v19836_v38 }
 0x4b2   : > { %v8244_v8 = vmax.f32 %v8208_v2, 0.0  ;;  %15828 = vmatprep.mubr.msk.f32.mxu0 %vm689_vm1, %v8957_v29  ;;  %v8461_v0 = vmul.f32 %v19745_v27, %v8245_v62  ;;  %v8131_v42 = vld [vmem:[#allocation4 + $0xb8] sm:$0xff]  ;;  %v8210_v35 = vadd.f32 %v19653_v16, %v8169_v57  ;;  %v8130_v22 = vld [vmem:[#allocation4 + $0xb0] sm:$0xff]  ;;  %8099 = vst.msk [vmem:[#allocation4 + $0xd8] sm:$0xff] %vm689_vm1, %v8063_v31  ;;  %v8028_v62 = vld [vmem:[#allocation4 + $0xe0] sm:$0xff]  ;;  %v19855_v31 = vpop.permute.xlu1 %8399 }
 0x4b3   : > { %15773 = vmatmul.mubr.msk.f32.gmra.mrb[70].mxu1 %vm689_vm1, %v8529_v58  ;;  %v8247_v59 = vmax.f32 %v8211_v15, 0.0  ;;  %v8172_v28 = vmul.f32 %v19646_v45, %v8131_v42  ;;  %v8171_v24 = vmul.f32 %v19646_v45, %v8130_v22  ;;  %8098 = vst.msk [vmem:[#allocation4 + $0xd0] sm:$0xff] %vm689_vm1, %v8062_v19  ;;  %v15739_v3 = vpop.f32.mrb[84].mxu0  ;;  %21061 = vst [vmem:[#allocation7_spill] sm:$0xff] %v19855_v31  ;;  %v8030_v22 = vld [vmem:[#allocation4 + $0xf0] sm:$0xff] }
 0x4b4   : > { %15829 = vmatmul.mubr.msk.f32.gmra.mrb[106].mxu0 %vm689_vm1, %v8958_v49  ;;  %v8460_v13 = vmul.f32 %v19747_v11, %v8244_v8  ;;  %v8530_v32 = vld [vmem:[#allocation3 + $0x80] sm:$0xff]  ;;  %8497 = vst.msk [vmem:[#allocation3 + $0xab] sm:$0xff] %vm689_vm1, %v8461_v0  ;;  %v8531_v37 = vld [vmem:[#allocation3 + $0x88] sm:$0xff]  ;;  %v8246_v1 = vmax.f32 %v8210_v35, 0.0  ;;  %v8065_v47 = vadd.f32 %v15739_v3, %v8029_v30  ;;  %v7961_v2 = vpop.f32.mrb[85].mxu0 }
 0x4b5   : > { %v8959_v6 = vld [vmem:[#allocation3 + $0x81] sm:$0xff]  ;;  %15775 = vmatprep.mubr.msk.f32.mxu1 %vm689_vm1, %v8530_v32  ;;  %v8960_v39 = vld [vmem:[#allocation3 + $0x89] sm:$0xff]  ;;  %v8213_v60 = vadd.f32 %v19653_v16, %v8172_v28  ;;  %v8463_v12 = vmul.f32 %v19782_v25, %v8247_v59  ;;  %v8064_v14 = vadd.f32 %v8028_v62, %v7961_v2  ;;  %v8212_v56 = vadd.f32 %v19653_v16, %v8171_v24 }
 0x4b6   : > { %15831 = vmatprep.mubr.msk.f32.mxu0 %vm689_vm1, %v8959_v6  ;;  %8496 = vst.msk [vmem:[#allocation3 + $0xa3] sm:$0xff] %vm689_vm1, %v8460_v13  ;;  %v8133_v18 = vld [vmem:[#allocation4 + $0xc8] sm:$0xff]  ;;  %v8462_v57 = vmul.f32 %v19785_v17, %v8246_v1  ;;  %v8132_v58 = vld [vmem:[#allocation4 + $0xc0] sm:$0xff]  ;;  %8101 = vst.msk [vmem:[#allocation4 + $0xe8] sm:$0xff] %vm689_vm1, %v8065_v47  ;;  %v19862_v13 = vpop.permute.xlu0 %8394 }
 0x4b7   : > { %15776 = vmatmul.mubr.msk.f32.gmra.mrb[72].mxu1 %vm689_vm1, %v8531_v37  ;;  %v8249_v52 = vmax.f32 %v8213_v60, 0.0  ;;  %v8174_v29 = vmul.f32 %v19646_v45, %v8133_v18  ;;  %8499 = vst.msk [vmem:[#allocation3 + $0xbb] sm:$0xff] %vm689_vm1, %v8463_v12  ;;  %v8173_v44 = vmul.f32 %v19646_v45, %v8132_v58  ;;  %8100 = vst.msk [vmem:[#allocation4 + $0xe0] sm:$0xff] %vm689_vm1, %v8064_v14  ;;  %v15742_v61 = vpop.f32.mrb[86].mxu0  ;;  %v8031_v49 = vld [vmem:[#allocation4 + $0xf8] sm:$0xff]  ;;  %v8248_v19 = vmax.f32 %v8212_v56, 0.0 }
 0x4b8   : > { %15832 = vmatmul.mubr.msk.f32.gmra.mrb[108].mxu0 %vm689_vm1, %v8960_v39  ;;  %v8532_v8 = vld [vmem:[#allocation3 + $0x90] sm:$0xff]  ;;  %v8533_v0 = vld [vmem:[#allocation3 + $0x98] sm:$0xff]  ;;  %8498 = vst.msk [vmem:[#allocation3 + $0xb3] sm:$0xff] %vm689_vm1, %v8462_v57  ;;  %21062 = vst [vmem:[#allocation43_spill] sm:$0xff] %v19862_v13  ;;  %v8067_v59 = vadd.f32 %v15742_v61, %v8031_v49  ;;  %v7971_v28 = vpop.f32.mrb[87].mxu0 }
 0x4b9   : > { %v8961_v15 = vld [vmem:[#allocation3 + $0x91] sm:$0xff]  ;;  %15778 = vmatprep.mubr.msk.f32.mxu1 %vm689_vm1, %v8532_v8  ;;  %v8962_v42 = vld [vmem:[#allocation3 + $0x99] sm:$0xff]  ;;  %v8215_v35 = vadd.f32 %v19653_v16, %v8174_v29  ;;  %v8465_v32 = vmul.f32 %v19805_v41, %v8249_v52  ;;  %v8066_v24 = vadd.f32 %v8030_v22, %v7971_v28  ;;  %v8464_v3 = vmul.f32 %v19812_v43, %v8248_v19  ;;  %v8032_v58 = vld [vmem:[#allocation4 + $0x100] sm:$0xff] }
 0x4ba   : > { %15834 = vmatprep.mubr.msk.f32.mxu0 %vm689_vm1, %v8961_v15  ;;  %v8135_v6 = vld [vmem:[#allocation4 + $0xd8] sm:$0xff]  ;;  %v8214_v30 = vadd.f32 %v19653_v16, %v8173_v44  ;;  %v8134_v1 = vld [vmem:[#allocation4 + $0xd0] sm:$0xff]  ;;  %8103 = vst.msk [vmem:[#allocation4 + $0xf8] sm:$0xff] %vm689_vm1, %v8067_v59  ;;  %v8033_v12 = vld [vmem:[#allocation4 + $0x108] sm:$0xff]  ;;  %v19880_v15 = vpop.permute.xlu1 %8409 }
 0x4bb   : > { %15779 = vmatmul.mubr.msk.f32.gmra.mrb[74].mxu1 %vm689_vm1, %v8533_v0  ;;  %v8251_v37 = vmax.f32 %v8215_v35, 0.0  ;;  %v8176_v39 = vmul.f32 %v19646_v45, %v8135_v6  ;;  %8501 = vst.msk [vmem:[#allocation3 + $0xcb] sm:$0xff] %vm689_vm1, %v8465_v32  ;;  %v8175_v2 = vmul.f32 %v19646_v45, %v8134_v1  ;;  %8102 = vst.msk [vmem:[#allocation4 + $0xf0] sm:$0xff] %vm689_vm1, %v8066_v24  ;;  %v15745_v62 = vpop.f32.mrb[88].mxu0  ;;  %v8035_v24 = vld [vmem:[#allocation4 + $0x118] sm:$0xff]  ;;  %v11956_v41 = vld [vmem:[#allocation3 + $0x2d] sm:$0xff] }
 0x4bc   : > { %15835 = vmatmul.mubr.msk.f32.gmra.mrb[110].mxu0 %vm689_vm1, %v8962_v42  ;;  %8500 = vst.msk [vmem:[#allocation3 + $0xc3] sm:$0xff] %vm689_vm1, %v8464_v3  ;;  %v8250_v57 = vmax.f32 %v8214_v30, 0.0  ;;  %v8069_v52 = vadd.f32 %v15745_v62, %v8033_v12  ;;  %v7981_v29 = vpop.f32.mrb[89].mxu0  ;;  %21063 = vst [vmem:[#allocation11_spill] sm:$0xff] %v19880_v15  ;;  %v19886_v42 = vpop.permute.xlu0 %8404  ;;  %v11958_v17 = vld [vmem:[#allocation3 + $0x3d] sm:$0xff]  ;;  %v11960_v11 = vld [vmem:[#allocation3 + $0x4d] sm:$0xff] }
 0x4bd   : > { %v8534_v60 = vld [vmem:[#allocation3 + $0xa0] sm:$0xff]  ;;  %v8535_v18 = vld [vmem:[#allocation3 + $0xa8] sm:$0xff]  ;;  %v8217_v56 = vadd.f32 %v19653_v16, %v8176_v39  ;;  %v8467_v8 = vmul.f32 %v19830_v51, %v8251_v37  ;;  %v8137_v44 = vld [vmem:[#allocation4 + $0xe8] sm:$0xff]  ;;  %v8068_v61 = vadd.f32 %v8032_v58, %v7981_v29  ;;  %v8216_v0 = vadd.f32 %v19653_v16, %v8175_v2  ;;  %21064 = vst [vmem:[#allocation36_spill] sm:$0xff] %v19886_v42 }
 0x4be   : > { %v8963_v47 = vld [vmem:[#allocation3 + $0xa1] sm:$0xff]  ;;  %15781 = vmatprep.mubr.msk.f32.mxu1 %vm689_vm1, %v8534_v60  ;;  %v8964_v14 = vld [vmem:[#allocation3 + $0xa9] sm:$0xff]  ;;  %v8466_v49 = vmul.f32 %v19836_v38, %v8250_v57  ;;  %v8178_v35 = vmul.f32 %v19646_v45, %v8137_v44  ;;  %8105 = vst.msk [vmem:[#allocation4 + $0x108] sm:$0xff] %vm689_vm1, %v8069_v52 }
 0x4bf   : > { %15837 = vmatprep.mubr.msk.f32.mxu0 %vm689_vm1, %v8963_v47  ;;  %15782 = vmatmul.mubr.msk.f32.gmra.mrb[76].mxu1 %vm689_vm1, %v8535_v18  ;;  %v8253_v19 = vmax.f32 %v8217_v56, 0.0  ;;  %v8136_v59 = vld [vmem:[#allocation4 + $0xe0] sm:$0xff]  ;;  %v8536_v28 = vld [vmem:[#allocation3 + $0xb0] sm:$0xff]  ;;  %8503 = vst.msk [vmem:[#allocation3 + $0xdb] sm:$0xff] %vm689_vm1, %v8467_v8  ;;  %8104 = vst.msk [vmem:[#allocation4 + $0x100] sm:$0xff] %vm689_vm1, %v8068_v61  ;;  %v15748_v6 = vpop.f32.mrb[90].mxu0  ;;  %v19905_v8 = vpop.permute.xlu1 %8419 }
 0x4c0   : > { %15838 = vmatmul.mubr.msk.f32.gmra.mrb[112].mxu0 %vm689_vm1, %v8964_v14  ;;  %v8965_v22 = vld [vmem:[#allocation3 + $0xb1] sm:$0xff]  ;;  %v8177_v32 = vmul.f32 %v19646_v45, %v8136_v59  ;;  %15784 = vmatprep.mubr.msk.f32.mxu1 %vm689_vm1, %v8536_v28  ;;  %v8966_v30 = vld [vmem:[#allocation3 + $0xb9] sm:$0xff]  ;;  %8502 = vst.msk [vmem:[#allocation3 + $0xd3] sm:$0xff] %vm689_vm1, %v8466_v49  ;;  %v8252_v37 = vmax.f32 %v8216_v0, 0.0  ;;  %v8219_v39 = vadd.f32 %v19653_v16, %v8178_v35  ;;  %v7991_v60 = vpop.f32.mrb[91].mxu0  ;;  %21065 = vst [vmem:[#allocation37_spill] sm:$0xff] %v19905_v8 }
 0x4c1   : > { %15840 = vmatprep.mubr.msk.f32.mxu0 %vm689_vm1, %v8965_v22  ;;  %v8537_v3 = vld [vmem:[#allocation3 + $0xb8] sm:$0xff]  ;;  %v8071_v1 = vadd.f32 %v15748_v6, %v8035_v24  ;;  %v8469_v2 = vmul.f32 %v19855_v31, %v8253_v19  ;;  %v8139_v62 = vld [vmem:[#allocation4 + $0xf8] sm:$0xff]  ;;  %v19912_v19 = vpop.permute.xlu0 %8414 }
 0x4c2   : > { %v8034_v47 = vld [vmem:[#allocation4 + $0x110] sm:$0xff]  ;;  %v8468_v18 = vmul.f32 %v19862_v13, %v8252_v37  ;;  %v8218_v14 = vadd.f32 %v19653_v16, %v8177_v32  ;;  %v8255_v57 = vmax.f32 %v8219_v39, 0.0  ;;  %v8180_v56 = vmul.f32 %v19646_v45, %v8139_v62  ;;  %21066 = vst [vmem:[#allocation18_spill] sm:$0xff] %v19912_v19  ;;  %v10467_v20 = vld [vmem:[#allocation3 + $0xa3] sm:$0xff] }
 0x4c3   : > { %v8070_v12 = vadd.f32 %v8034_v47, %v7991_v60  ;;  %15785 = vmatmul.mubr.msk.f32.gmra.mrb[78].mxu1 %vm689_vm1, %v8537_v3  ;;  %v8138_v52 = vld [vmem:[#allocation4 + $0xf0] sm:$0xff]  ;;  %8107 = vst.msk [vmem:[#allocation4 + $0x118] sm:$0xff] %vm689_vm1, %v8071_v1  ;;  %v8538_v29 = vld [vmem:[#allocation3 + $0xc0] sm:$0xff]  ;;  %8505 = vst.msk [vmem:[#allocation3 + $0xeb] sm:$0xff] %vm689_vm1, %v8469_v2 }
 0x4c4   : > { %15841 = vmatmul.mubr.msk.f32.gmra.mrb[114].mxu0 %vm689_vm1, %v8966_v30  ;;  %v8967_v58 = vld [vmem:[#allocation3 + $0xc1] sm:$0xff]  ;;  %v8179_v44 = vmul.f32 %v19646_v45, %v8138_v52  ;;  %15787 = vmatprep.mubr.msk.f32.mxu1 %vm689_vm1, %v8538_v29  ;;  %v8968_v49 = vld [vmem:[#allocation3 + $0xc9] sm:$0xff]  ;;  %8504 = vst.msk [vmem:[#allocation3 + $0xe3] sm:$0xff] %vm689_vm1, %v8468_v18  ;;  %v8254_v0 = vmax.f32 %v8218_v14, 0.0  ;;  %v8221_v35 = vadd.f32 %v19653_v16, %v8180_v56  ;;  %v16523_v52 = vld [vmem:[%s20923_s6] ss:$0 sm:$0xff] }
 0x4c5   : > { %8106 = vst.msk [vmem:[#allocation4 + $0x110] sm:$0xff] %vm689_vm1, %v8070_v12  ;;  %15843 = vmatprep.mubr.msk.f32.mxu0 %vm689_vm1, %v8967_v58  ;;  %v8539_v61 = vld [vmem:[#allocation3 + $0xc8] sm:$0xff]  ;;  %v8471_v59 = vmul.f32 %v19880_v15, %v8255_v57  ;;  %v8141_v28 = vld [vmem:[#allocation4 + $0x108] sm:$0xff]  ;;  %v19928_v12 = vpop.permute.xlu1 %8429  ;;  %v19934_v57 = vpop.permute.xlu0 %8424 }
 0x4c6   : > { %v8470_v22 = vmul.f32 %v19886_v42, %v8254_v0  ;;  %v8220_v32 = vadd.f32 %v19653_v16, %v8179_v44  ;;  %v8257_v6 = vmax.f32 %v8221_v35, 0.0  ;;  %v8182_v24 = vmul.f32 %v19646_v45, %v8141_v28  ;;  %v8140_v3 = vld [vmem:[#allocation4 + $0x100] sm:$0xff]  ;;  %21067 = vst [vmem:[#allocation27_spill] sm:$0xff] %v19928_v12  ;;  %21068 = vst [vmem:[#allocation5_spill] sm:$0xff] %v19934_v57 }
 0x4c7   : > { %15788 = vmatmul.mubr.msk.f32.gmra.mrb[80].mxu1 %vm689_vm1, %v8539_v61  ;;  %v8540_v30 = vld [vmem:[#allocation3 + $0xd0] sm:$0xff]  ;;  %8507 = vst.msk [vmem:[#allocation3 + $0xfb] sm:$0xff] %vm689_vm1, %v8471_v59  ;;  %v8181_v39 = vmul.f32 %v19646_v45, %v8140_v3  ;;  %v8541_v1 = vld [vmem:[#allocation3 + $0xd8] sm:$0xff] }
 0x4c8   : > { %15844 = vmatmul.mubr.msk.f32.gmra.mrb[116].mxu0 %vm689_vm1, %v8968_v49  ;;  %v8969_v37 = vld [vmem:[#allocation3 + $0xd1] sm:$0xff]  ;;  %15790 = vmatprep.mubr.msk.f32.mxu1 %vm689_vm1, %v8540_v30  ;;  %v8970_v60 = vld [vmem:[#allocation3 + $0xd9] sm:$0xff]  ;;  %8506 = vst.msk [vmem:[#allocation3 + $0xf3] sm:$0xff] %vm689_vm1, %v8470_v22  ;;  %v8256_v47 = vmax.f32 %v8220_v32, 0.0  ;;  %v8223_v2 = vadd.f32 %v19653_v16, %v8182_v24  ;;  %v8473_v62 = vmul.f32 %v19905_v8, %v8257_v6 }
 0x4c9   : > { %15846 = vmatprep.mubr.msk.f32.mxu0 %vm689_vm1, %v8969_v37  ;;  %v8222_v14 = vadd.f32 %v19653_v16, %v8181_v39  ;;  %v16524_v59 = vld [vmem:[%s20923_s6 + $0x1] ss:$0 sm:$0xff]  ;;  %v19951_v39 = vpop.permute.xlu1 %8439 }
 0x4ca   : > { %v8143_v18 = vld [vmem:[#allocation4 + $0x118] sm:$0xff]  ;;  %v8472_v45 = vmul.f32 %v19912_v19, %v8256_v47  ;;  %v8259_v56 = vmax.f32 %v8223_v2, 0.0  ;;  %8509 = vst.msk [vmem:[#allocation3 + $0x10b] sm:$0xff] %vm689_vm1, %v8473_v62  ;;  %21069 = vst [vmem:[#allocation20_spill] sm:$0xff] %v19951_v39  ;;  %v19956_v47 = vpop.permute.xlu0 %8434 }
 0x4cb   : > { %15791 = vmatmul.mubr.msk.f32.gmra.mrb[82].mxu1 %vm689_vm1, %v8541_v1  ;;  %v8184_v29 = vmul.f32 %v16523_v52, %v8143_v18  ;;  %v8542_v44 = vld [vmem:[#allocation3 + $0xe0] sm:$0xff]  ;;  %v8543_v0 = vld [vmem:[#allocation3 + $0xe8] sm:$0xff]  ;;  %v8258_v35 = vmax.f32 %v8222_v14, 0.0  ;;  %21070 = vst [vmem:[#allocation12_spill] sm:$0xff] %v19956_v47 }
 0x4cc   : > { %15847 = vmatmul.mubr.msk.f32.gmra.mrb[118].mxu0 %vm689_vm1, %v8970_v60  ;;  %v8142_v58 = vld [vmem:[#allocation4 + $0x110] sm:$0xff]  ;;  %v8971_v61 = vld [vmem:[#allocation3 + $0xe1] sm:$0xff]  ;;  %15793 = vmatprep.mubr.msk.f32.mxu1 %vm689_vm1, %v8542_v44  ;;  %v8972_v16 = vld [vmem:[#allocation3 + $0xe9] sm:$0xff]  ;;  %8508 = vst.msk [vmem:[#allocation3 + $0x103] sm:$0xff] %vm689_vm1, %v8472_v45  ;;  %v8475_v22 = vmul.f32 %v19928_v12, %v8259_v56 }
 0x4cd   : > { %v8183_v49 = vmul.f32 %v16523_v52, %v8142_v58  ;;  %15849 = vmatprep.mubr.msk.f32.mxu0 %vm689_vm1, %v8971_v61  ;;  %v8225_v28 = vadd.f32 %v16524_v59, %v8184_v29  ;;  %v8474_v32 = vmul.f32 %v19934_v57, %v8258_v35  ;;  %v9445_v61 = vld [vmem:[#allocation3 + $0x2] sm:$0xff]  ;;  %v19979_v35 = vld [vmem:[%s20924_s7 + $0x18] sm:$0xf] }
 0x4ce   : > { %8511 = vst.msk [vmem:[#allocation3 + $0x11b] sm:$0xff] %vm689_vm1, %v8475_v22  ;;  %v9950_v22 = vld [vmem:[#allocation3 + $0x2a] sm:$0xff] }
 0x4cf   : > { %15794 = vmatmul.mubr.msk.f32.gmra.mrb[84].mxu1 %vm689_vm1, %v8543_v0  ;;  %v8224_v6 = vadd.f32 %v16524_v59, %v8183_v49  ;;  %v8261_v24 = vmax.f32 %v8225_v28, 0.0  ;;  %v8544_v3 = vld [vmem:[#allocation3 + $0xf0] sm:$0xff]  ;;  %v8545_v37 = vld [vmem:[#allocation3 + $0xf8] sm:$0xff]  ;;  %8510 = vst.msk [vmem:[#allocation3 + $0x113] sm:$0xff] %vm689_vm1, %v8474_v32  ;;  %v16525_v59 = vld [vmem:[%s20924_s7 + $0x10] sm:$0xf] }
 0x4d0   : > { %15850 = vmatmul.mubr.msk.f32.gmra.mrb[120].mxu0 %vm689_vm1, %v8972_v16  ;;  %v8973_v30 = vld [vmem:[#allocation3 + $0xf1] sm:$0xff]  ;;  %15796 = vmatprep.mubr.msk.f32.mxu1 %vm689_vm1, %v8544_v3  ;;  %v8974_v1 = vld [vmem:[#allocation3 + $0xf9] sm:$0xff]  ;;  %v9949_v28 = vld [vmem:[#allocation3 + $0x22] sm:$0xff] }
 0x4d1   : > { %15852 = vmatprep.mubr.msk.f32.mxu0 %vm689_vm1, %v8973_v30  ;;  %v8260_v60 = vmax.f32 %v8224_v6, 0.0  ;;  %v8477_v2 = vmul.f32 %v19951_v39, %v8261_v24  ;;  %v9947_v49 = vld [vmem:[#allocation3 + $0x12] sm:$0xff]  ;;  %v9446_v0 = vld [vmem:[#allocation3 + $0xa] sm:$0xff]  ;;  %v9948_v16 = vld [vmem:[#allocation3 + $0x1a] sm:$0xff] }
 0x4d2   : > { %v9951_v32 = vld [vmem:[#allocation3 + $0x32] sm:$0xff]  ;;  %v9953_v24 = vld [vmem:[#allocation3 + $0x42] sm:$0xff]  ;;  %v9954_v3 = vld [vmem:[#allocation3 + $0x4a] sm:$0xff] }
 0x4d3   : > { %15797 = vmatmul.mubr.msk.f32.gmra.mrb[86].mxu1 %vm689_vm1, %v8545_v37  ;;  %v8476_v62 = vmul.f32 %v19956_v47, %v8260_v60  ;;  %v8546_v18 = vld [vmem:[#allocation3 + $0x100] sm:$0xff]  ;;  %v8547_v14 = vld [vmem:[#allocation3 + $0x108] sm:$0xff]  ;;  %8513 = vst.msk [vmem:[#allocation3 + $0x12b] sm:$0xff] %vm689_vm1, %v8477_v2  ;;  %v19998_v6 = vld [vmem:[%s20924_s7 + $0x1c] sm:$0xf] }
 0x4d4   : > { %15853 = vmatmul.mubr.msk.f32.gmra.mrb[122].mxu0 %vm689_vm1, %v8974_v1  ;;  %v8975_v45 = vld [vmem:[#allocation3 + $0x101] sm:$0xff]  ;;  %15799 = vmatprep.mubr.msk.f32.mxu1 %vm689_vm1, %v8546_v18  ;;  %v8976_v56 = vld [vmem:[#allocation3 + $0x109] sm:$0xff]  ;;  %v9955_v30 = vld [vmem:[#allocation3 + $0x52] sm:$0xff] }
 0x4d5   : > { %15855 = vmatprep.mubr.msk.f32.mxu0 %vm689_vm1, %v8975_v45  ;;  %8512 = vst.msk [vmem:[#allocation3 + $0x123] sm:$0xff] %vm689_vm1, %v8476_v62  ;;  %v9956_v37 = vld [vmem:[#allocation3 + $0x5a] sm:$0xff]  ;;  %v9957_v1 = vld [vmem:[#allocation3 + $0x62] sm:$0xff]  ;;  %v9958_v2 = vld [vmem:[#allocation3 + $0x6a] sm:$0xff] }
 0x4d6   : > { %v8548_v52 = vld [vmem:[#allocation3 + $0x110] sm:$0xff]  ;;  %v8549_v58 = vld [vmem:[#allocation3 + $0x118] sm:$0xff]  ;;  %v20204_v47 = vld [vmem:[#allocation3 + $0xe4] sm:$0xff] }
 0x4d7   : > { %15800 = vmatmul.mubr.msk.f32.gmra.mrb[88].mxu1 %vm689_vm1, %v8547_v14  ;;  %v8977_v29 = vld [vmem:[#allocation3 + $0x111] sm:$0xff]  ;;  %v8978_v44 = vld [vmem:[#allocation3 + $0x119] sm:$0xff]  ;;  %v20224_v19 = vld [vmem:[#allocation3 + $0x104] sm:$0xff] }
 0x4d8   : > { %15856 = vmatmul.mubr.msk.f32.gmra.mrb[124].mxu0 %vm689_vm1, %v8976_v56  ;;  %15802 = vmatprep.mubr.msk.f32.mxu1 %vm689_vm1, %v8548_v52  ;;  %v9959_v45 = vld [vmem:[#allocation3 + $0x72] sm:$0xff]  ;;  %v9960_v56 = vld [vmem:[#allocation3 + $0x7a] sm:$0xff]  ;;  %v9961_v52 = vld [vmem:[#allocation3 + $0x82] sm:$0xff] }
 0x4d9   : > { %15858 = vmatprep.mubr.msk.f32.mxu0 %vm689_vm1, %v8977_v29  ;;  %v20209_v39 = vld [vmem:[#allocation3 + $0xec] sm:$0xff]  ;;  %v20214_v57 = vld [vmem:[#allocation3 + $0xf4] sm:$0xff]  ;;  %v20219_v12 = vld [vmem:[#allocation3 + $0xfc] sm:$0xff] }
 0x4da   : > { %v20229_v8 = vld [vmem:[#allocation3 + $0x10c] sm:$0xff]  ;;  %v20234_v42 = vld [vmem:[#allocation3 + $0x114] sm:$0xff] }
 0x4db   : > { %15803 = vmatmul.mubr.msk.f32.gmra.mrb[90].mxu1 %vm689_vm1, %v8549_v58  ;;  %v9962_v58 = vld [vmem:[#allocation3 + $0x8a] sm:$0xff] }
 0x4dc   : > { %15859 = vmatmul.mubr.msk.f32.gmra.mrb[126].mxu0 %vm689_vm1, %v8978_v44  ;;  %15863 = vmatprep.mubr.msk.f32.mxu1 %vm689_vm1, %v9445_v61  ;;  %v15753_v60 = vpop.f32.mrb[56].mxu1  ;;  %v20239_v15 = vld [vmem:[#allocation3 + $0x11c] sm:$0xff]  ;;  %v20244_v13 = vld [vmem:[#allocation3 + $0x124] sm:$0xff]  ;;  %v20249_v31 = vld [vmem:[#allocation3 + $0x12c] sm:$0xff] }
 0x4dd   : > { %15919 = vmatprep.mubr.msk.f32.mxu0 %vm689_vm1, %v9947_v49  ;;  %8908 = vst.msk [vmem:[#allocation4 + $0x8] sm:$0xff] %vm689_vm1, %v15753_v60  ;;  %v8728_v62 = vpop.f32.mrb[57].mxu1  ;;  %v9975_v60 = vld [vmem:[#allocation3 + $0xf2] sm:$0xff] }
 0x4de   : > { %8907 = vst.msk [vmem:[#allocation4] sm:$0xff] %vm689_vm1, %v8728_v62  ;;  %v9977_v62 = vld [vmem:[#allocation3 + $0x102] sm:$0xff] }
 0x4df   : > { %15864 = vmatmul.mubr.msk.f32.vlgmr.msra.gmra.mrb[92].mxu1 %vm689_vm1, %v9446_v0 }
 0x4e0   : > { %15920 = vmatmul.mubr.msk.f32.vlgmr.msra.gmra.mrb[128].mxu0 %vm689_vm1, %v9948_v16  ;;  %15974 = vmatpush3.msk.msra.mxu1 %vm981_vm0, %v16525_v59  ;;  %v15809_v18 = vpop.f32.mrb[92].mxu0  ;;  %v9965_v59 = vld [vmem:[#allocation3 + $0xa2] sm:$0xff] }
 0x4e1   : > { %15866 = vmatprep.mubr.msk.f32.mxu1 %vm689_vm1, %v9947_v49  ;;  %15922 = vmatprep.mubr.msk.f32.mxu0 %vm689_vm1, %v9949_v28  ;;  %v9158_v14 = vpop.f32.mrb[93].mxu0  ;;  %v9963_v49 = vld [vmem:[#allocation3 + $0x92] sm:$0xff] }
 0x4e2   : > { %16030 = vmatpush3.msk.msra.mxu0 %vm981_vm0, %v19743_v36  ;;  %16085 = vmatprep.subr.msk.mxu1 %vm981_vm0, %v19979_v35  ;;  %v9952_v36 = vld [vmem:[#allocation3 + $0x3a] sm:$0xff] }
 0x4e3   : > { %15867 = vmatmul.mubr.msk.f32.gmra.mrb[94].mxu1 %vm689_vm1, %v9948_v16  ;;  %16141 = vmatprep.subr.msk.mxu0 %vm981_vm0, %v19998_v6  ;;  %v9964_v16 = vld [vmem:[#allocation3 + $0x9a] sm:$0xff] }
 0x4e4   : > { %15923 = vmatmul.mubr.msk.f32.gmra.mrb[130].mxu0 %vm689_vm1, %v9950_v22  ;;  %15869 = vmatprep.mubr.msk.f32.mxu1 %vm689_vm1, %v9949_v28  ;;  %v9338_v29 = vld [vmem:[#allocation4 + $0x8] sm:$0xff] }
 0x4e5   : > { %15925 = vmatprep.mubr.msk.f32.mxu0 %vm689_vm1, %v9951_v32  ;;  %v9374_v44 = vadd.f32 %v15809_v18, %v9338_v29  ;;  %v9337_v61 = vld [vmem:[#allocation4] sm:$0xff]  ;;  %v10449_v29 = vld [vmem:[#allocation3 + $0x13] sm:$0xff] }
 0x4e6   : > { %v9373_v0 = vadd.f32 %v9337_v61, %v9158_v14  ;;  %v9966_v28 = vld [vmem:[#allocation3 + $0xaa] sm:$0xff]  ;;  %v9980_v14 = vld [vmem:[#allocation3 + $0x11a] sm:$0xff] }
 0x4e7   : > { %15870 = vmatmul.mubr.msk.f32.gmra.mrb[96].mxu1 %vm689_vm1, %v9950_v22  ;;  %9410 = vst.msk [vmem:[#allocation4 + $0x8] sm:$0xff] %vm689_vm1, %v9374_v44  ;;  %v9967_v22 = vld [vmem:[#allocation3 + $0xb2] sm:$0xff]  ;;  %v9978_v18 = vld [vmem:[#allocation3 + $0x10a] sm:$0xff]  ;;  %v10450_v44 = vld [vmem:[#allocation3 + $0x1b] sm:$0xff] }
 0x4e8   : > { %15926 = vmatmul.mubr.msk.f32.gmra.mrb[132].mxu0 %vm689_vm1, %v9952_v36  ;;  %15872 = vmatprep.mubr.msk.f32.mxu1 %vm689_vm1, %v9951_v32  ;;  %9409 = vst.msk [vmem:[#allocation4] sm:$0xff] %vm689_vm1, %v9373_v0  ;;  %v9968_v32 = vld [vmem:[#allocation3 + $0xba] sm:$0xff] }
 0x4e9   : > { %15928 = vmatprep.mubr.msk.f32.mxu0 %vm689_vm1, %v9953_v24  ;;  %v10952_v61 = vld [vmem:[#allocation3 + $0x1c] sm:$0xff]  ;;  %v20075_v0 = vld [vmem:[%s20924_s7 + $0x20] sm:$0xf] }
 0x4eb   : > { %15873 = vmatmul.mubr.msk.f32.gmra.mrb[98].mxu1 %vm689_vm1, %v9952_v36  ;;  %v9969_v36 = vld [vmem:[#allocation3 + $0xc2] sm:$0xff] }
 0x4ec   : > { %15929 = vmatmul.mubr.msk.f32.gmra.mrb[134].mxu0 %vm689_vm1, %v9954_v3  ;;  %15875 = vmatprep.mubr.msk.f32.mxu1 %vm689_vm1, %v9953_v24  ;;  %v9970_v24 = vld [vmem:[#allocation3 + $0xca] sm:$0xff] }
 0x4ed   : > { %15931 = vmatprep.mubr.msk.f32.mxu0 %vm689_vm1, %v9955_v30 }
 0x4ef   : > { %15876 = vmatmul.mubr.msk.f32.gmra.mrb[100].mxu1 %vm689_vm1, %v9954_v3  ;;  %v9971_v3 = vld [vmem:[#allocation3 + $0xd2] sm:$0xff] }
 0x4f0   : > { %15932 = vmatmul.mubr.msk.f32.gmra.mrb[136].mxu0 %vm689_vm1, %v9956_v37  ;;  %15878 = vmatprep.mubr.msk.f32.mxu1 %vm689_vm1, %v9955_v30  ;;  %v9972_v30 = vld [vmem:[#allocation3 + $0xda] sm:$0xff] }
 0x4f1   : > { %15934 = vmatprep.mubr.msk.f32.mxu0 %vm689_vm1, %v9957_v1 }
 0x4f3   : > { %15879 = vmatmul.mubr.msk.f32.gmra.mrb[102].mxu1 %vm689_vm1, %v9956_v37  ;;  %v9973_v37 = vld [vmem:[#allocation3 + $0xe2] sm:$0xff] }
 0x4f4   : > { %15935 = vmatmul.mubr.msk.f32.gmra.mrb[138].mxu0 %vm689_vm1, %v9958_v2  ;;  %15881 = vmatprep.mubr.msk.f32.mxu1 %vm689_vm1, %v9957_v1  ;;  %v9974_v1 = vld [vmem:[#allocation3 + $0xea] sm:$0xff] }
 0x4f5   : > { %15937 = vmatprep.mubr.msk.f32.mxu0 %vm689_vm1, %v9959_v45 }
 0x4f7   : > { %15882 = vmatmul.mubr.msk.f32.gmra.mrb[104].mxu1 %vm689_vm1, %v9958_v2  ;;  %v9976_v2 = vld [vmem:[#allocation3 + $0xfa] sm:$0xff] }
 0x4f8   : > { %15938 = vmatmul.mubr.msk.f32.gmra.mrb[140].mxu0 %vm689_vm1, %v9960_v56  ;;  %15884 = vmatprep.mubr.msk.f32.mxu1 %vm689_vm1, %v9959_v45  ;;  %v9979_v45 = vld [vmem:[#allocation3 + $0x112] sm:$0xff] }
 0x4f9   : > { %15940 = vmatprep.mubr.msk.f32.mxu0 %vm689_vm1, %v9961_v52 }
 0x4fb   : > { %15885 = vmatmul.mubr.msk.f32.gmra.mrb[106].mxu1 %vm689_vm1, %v9960_v56  ;;  %v9981_v56 = vld [vmem:[#allocation3 + $0x122] sm:$0xff] }
 0x4fc   : > { %15941 = vmatmul.mubr.msk.f32.gmra.mrb[142].mxu0 %vm689_vm1, %v9962_v58  ;;  %15887 = vmatprep.mubr.msk.f32.mxu1 %vm689_vm1, %v9961_v52  ;;  %v9982_v52 = vld [vmem:[#allocation3 + $0x12a] sm:$0xff] }
 0x4fd   : > { %15943 = vmatprep.mubr.msk.f32.mxu0 %vm689_vm1, %v9963_v49 }
 0x4ff   : > { %15888 = vmatmul.mubr.msk.f32.gmra.mrb[108].mxu1 %vm689_vm1, %v9962_v58  ;;  %v10951_v58 = vld [vmem:[#allocation3 + $0x14] sm:$0xff] }
 0x500   : > { %15944 = vmatmul.mubr.msk.f32.gmra.mrb[144].mxu0 %vm689_vm1, %v9964_v16  ;;  %15890 = vmatprep.mubr.msk.f32.mxu1 %vm689_vm1, %v9963_v49  ;;  %v10451_v49 = vld [vmem:[#allocation3 + $0x23] sm:$0xff] }
 0x501   : > { %15946 = vmatprep.mubr.msk.f32.mxu0 %vm689_vm1, %v9965_v59 }
 0x503   : > { %15891 = vmatmul.mubr.msk.f32.gmra.mrb[110].mxu1 %vm689_vm1, %v9964_v16  ;;  %v20080_v16 = vld [vmem:[#allocation3 + $0x24] sm:$0xff] }
 0x504   : > { %15947 = vmatmul.mubr.msk.f32.gmra.mrb[146].mxu0 %vm689_vm1, %v9966_v28  ;;  %15893 = vmatprep.mubr.msk.f32.mxu1 %vm689_vm1, %v9965_v59  ;;  %v10452_v59 = vld [vmem:[#allocation3 + $0x2b] sm:$0xff] }
 0x505   : > { %15949 = vmatprep.mubr.msk.f32.mxu0 %vm689_vm1, %v9967_v22 }
 0x507   : > { %15894 = vmatmul.mubr.msk.f32.gmra.mrb[112].mxu1 %vm689_vm1, %v9966_v28  ;;  %v20086_v28 = vld [vmem:[#allocation3 + $0x2c] sm:$0xff] }
 0x508   : > { %15950 = vmatmul.mubr.msk.f32.gmra.mrb[148].mxu0 %vm689_vm1, %v9968_v32  ;;  %15896 = vmatprep.mubr.msk.f32.mxu1 %vm689_vm1, %v9967_v22  ;;  %v20093_v22 = vld [vmem:[#allocation3 + $0x34] sm:$0xff] }
 0x509   : > { %15952 = vmatprep.mubr.msk.f32.mxu0 %vm689_vm1, %v9969_v36 }
 0x50b   : > { %15897 = vmatmul.mubr.msk.f32.gmra.mrb[114].mxu1 %vm689_vm1, %v9968_v32  ;;  %v20098_v32 = vld [vmem:[#allocation3 + $0x3c] sm:$0xff] }
 0x50c   : > { %15953 = vmatmul.mubr.msk.f32.gmra.mrb[150].mxu0 %vm689_vm1, %v9970_v24  ;;  %15899 = vmatprep.mubr.msk.f32.mxu1 %vm689_vm1, %v9969_v36  ;;  %v10455_v36 = vld [vmem:[#allocation3 + $0x43] sm:$0xff] }
 0x50d   : > { %15955 = vmatprep.mubr.msk.f32.mxu0 %vm689_vm1, %v9971_v3 }
 0x50f   : > { %15900 = vmatmul.mubr.msk.f32.gmra.mrb[116].mxu1 %vm689_vm1, %v9970_v24  ;;  %v20103_v24 = vld [vmem:[#allocation3 + $0x44] sm:$0xff] }
 0x510   : > { %15956 = vmatmul.mubr.msk.f32.gmra.mrb[152].mxu0 %vm689_vm1, %v9972_v30  ;;  %15902 = vmatprep.mubr.msk.f32.mxu1 %vm689_vm1, %v9971_v3  ;;  %v10456_v3 = vld [vmem:[#allocation3 + $0x4b] sm:$0xff] }
 0x511   : > { %15958 = vmatprep.mubr.msk.f32.mxu0 %vm689_vm1, %v9973_v37 }
 0x513   : > { %15903 = vmatmul.mubr.msk.f32.gmra.mrb[118].mxu1 %vm689_vm1, %v9972_v30  ;;  %v20108_v30 = vld [vmem:[#allocation3 + $0x4c] sm:$0xff] }
 0x514   : > { %15959 = vmatmul.mubr.msk.f32.gmra.mrb[154].mxu0 %vm689_vm1, %v9974_v1  ;;  %15905 = vmatprep.mubr.msk.f32.mxu1 %vm689_vm1, %v9973_v37  ;;  %v10457_v37 = vld [vmem:[#allocation3 + $0x53] sm:$0xff] }
 0x515   : > { %15961 = vmatprep.mubr.msk.f32.mxu0 %vm689_vm1, %v9975_v60 }
 0x517   : > { %15906 = vmatmul.mubr.msk.f32.gmra.mrb[120].mxu1 %vm689_vm1, %v9974_v1  ;;  %v20113_v1 = vld [vmem:[#allocation3 + $0x54] sm:$0xff] }
 0x518   : > { %15962 = vmatmul.mubr.msk.f32.gmra.mrb[156].mxu0 %vm689_vm1, %v9976_v2  ;;  %15908 = vmatprep.mubr.msk.f32.mxu1 %vm689_vm1, %v9975_v60  ;;  %v10458_v60 = vld [vmem:[#allocation3 + $0x5b] sm:$0xff] }
 0x519   : > { %15964 = vmatprep.mubr.msk.f32.mxu0 %vm689_vm1, %v9977_v62 }
 0x51b   : > { %15909 = vmatmul.mubr.msk.f32.gmra.mrb[122].mxu1 %vm689_vm1, %v9976_v2  ;;  %v20118_v2 = vld [vmem:[#allocation3 + $0x5c] sm:$0xff] }
 0x51c   : > { %15965 = vmatmul.mubr.msk.f32.gmra.mrb[158].mxu0 %vm689_vm1, %v9978_v18  ;;  %15911 = vmatprep.mubr.msk.f32.mxu1 %vm689_vm1, %v9977_v62  ;;  %v10459_v62 = vld [vmem:[#allocation3 + $0x63] sm:$0xff] }
 0x51d   : > { %15967 = vmatprep.mubr.msk.f32.mxu0 %vm689_vm1, %v9979_v45 }
 0x51f   : > { %15912 = vmatmul.mubr.msk.f32.gmra.mrb[124].mxu1 %vm689_vm1, %v9978_v18  ;;  %v20123_v18 = vld [vmem:[#allocation3 + $0x64] sm:$0xff] }
 0x520   : > { %15968 = vmatmul.mubr.msk.f32.gmra.mrb[160].mxu0 %vm689_vm1, %v9980_v14  ;;  %15914 = vmatprep.mubr.msk.f32.mxu1 %vm689_vm1, %v9979_v45  ;;  %v10460_v45 = vld [vmem:[#allocation3 + $0x6b] sm:$0xff] }
 0x521   : > { %15970 = vmatprep.mubr.msk.f32.mxu0 %vm689_vm1, %v9981_v56  ;;  %v10461_v56 = vld [vmem:[#allocation3 + $0x73] sm:$0xff] }
 0x523   : > { %15915 = vmatmul.mubr.msk.f32.gmra.mrb[126].mxu1 %vm689_vm1, %v9980_v14  ;;  %v20128_v14 = vld [vmem:[#allocation3 + $0x6c] sm:$0xff] }
 0x524   : > { %15971 = vmatmul.mubr.msk.f32.gmra.mrb[162].mxu0 %vm689_vm1, %v9982_v52  ;;  %15975 = vmatprep.mubr.msk.f32.mxu1 %vm689_vm1, %v10449_v29  ;;  %v20133_v52 = vld [vmem:[#allocation3 + $0x74] sm:$0xff] }
 0x525   : > { %16031 = vmatprep.mubr.msk.f32.mxu0 %vm689_vm1, %v10951_v58  ;;  %v10462_v29 = vld [vmem:[#allocation3 + $0x7b] sm:$0xff] }
 0x526   : > { %v20138_v58 = vld [vmem:[#allocation3 + $0x7c] sm:$0xff] }
 0x527   : > { %15976 = vmatmul.mubr.msk.f32.vlgmr.msra.gmra.mrb[128].mxu1 %vm689_vm1, %v10450_v44  ;;  %v10463_v44 = vld [vmem:[#allocation3 + $0x83] sm:$0xff] }
 0x528   : > { %16032 = vmatmul.mubr.msk.f32.vlgmr.msra.gmra.mrb[164].mxu0 %vm689_vm1, %v10952_v61  ;;  %16086 = vmatpush3.msk.msra.mxu1 %vm981_vm0, %v19979_v35  ;;  %v10453_v35 = vld [vmem:[#allocation3 + $0x33] sm:$0xff]  ;;  %v20143_v61 = vld [vmem:[#allocation3 + $0x84] sm:$0xff] }
 0x529   : > { %15978 = vmatprep.mubr.msk.f32.mxu1 %vm689_vm1, %v10451_v49  ;;  %16034 = vmatprep.mubr.msk.f32.mxu0 %vm689_vm1, %v20080_v16  ;;  %v10464_v49 = vld [vmem:[#allocation3 + $0x8b] sm:$0xff] }
 0x52a   : > { %16142 = vmatpush3.msk.msra.mxu0 %vm981_vm0, %v19998_v6  ;;  %16197 = vmatprep.subr.msk.mxu1 %vm981_vm0, %v20075_v0  ;;  %v10454_v6 = vld [vmem:[#allocation3 + $0x3b] sm:$0xff] }
 0x52b   : > { %15979 = vmatmul.mubr.msk.f32.gmra.mrb[130].mxu1 %vm689_vm1, %v10452_v59  ;;  %v20149_v59 = vld [vmem:[#allocation3 + $0x8c] sm:$0xff] }
 0x52c   : > { %16035 = vmatmul.mubr.msk.f32.gmra.mrb[166].mxu0 %vm689_vm1, %v20086_v28  ;;  %15981 = vmatprep.mubr.msk.f32.mxu1 %vm689_vm1, %v10453_v35  ;;  %v10465_v35 = vld [vmem:[#allocation3 + $0x93] sm:$0xff] }
 0x52d   : > { %16037 = vmatprep.mubr.msk.f32.mxu0 %vm689_vm1, %v20093_v22 }
 0x52f   : > { %15982 = vmatmul.mubr.msk.f32.gmra.mrb[132].mxu1 %vm689_vm1, %v10454_v6  ;;  %v20154_v6 = vld [vmem:[#allocation3 + $0x94] sm:$0xff] }
 0x530   : > { %16038 = vmatmul.mubr.msk.f32.gmra.mrb[168].mxu0 %vm689_vm1, %v20098_v32  ;;  %15984 = vmatprep.mubr.msk.f32.mxu1 %vm689_vm1, %v10455_v36  ;;  %v10466_v36 = vld [vmem:[#allocation3 + $0x9b] sm:$0xff] }
 0x531   : > { %16040 = vmatprep.mubr.msk.f32.mxu0 %vm689_vm1, %v20103_v24 }
 0x533   : > { %15985 = vmatmul.mubr.msk.f32.gmra.mrb[134].mxu1 %vm689_vm1, %v10456_v3  ;;  %v20159_v3 = vld [vmem:[#allocation3 + $0x9c] sm:$0xff] }
 0x534   : > { %16041 = vmatmul.mubr.msk.f32.gmra.mrb[170].mxu0 %vm689_vm1, %v20108_v30  ;;  %15987 = vmatprep.mubr.msk.f32.mxu1 %vm689_vm1, %v10457_v37  ;;  %v20164_v37 = vld [vmem:[#allocation3 + $0xa4] sm:$0xff] }
 0x535   : > { %16043 = vmatprep.mubr.msk.f32.mxu0 %vm689_vm1, %v20113_v1 }
 0x537   : > { %15988 = vmatmul.mubr.msk.f32.gmra.mrb[136].mxu1 %vm689_vm1, %v10458_v60  ;;  %v10468_v60 = vld [vmem:[#allocation3 + $0xab] sm:$0xff] }
 0x538   : > { %16044 = vmatmul.mubr.msk.f32.gmra.mrb[172].mxu0 %vm689_vm1, %v20118_v2  ;;  %15990 = vmatprep.mubr.msk.f32.mxu1 %vm689_vm1, %v10459_v62  ;;  %v20169_v62 = vld [vmem:[#allocation3 + $0xac] sm:$0xff] }
 0x539   : > { %16046 = vmatprep.mubr.msk.f32.mxu0 %vm689_vm1, %v20123_v18 }
 0x53b   : > { %15991 = vmatmul.mubr.msk.f32.gmra.mrb[138].mxu1 %vm689_vm1, %v10460_v45  ;;  %v10469_v45 = vld [vmem:[#allocation3 + $0xb3] sm:$0xff] }
 0x53c   : > { %16047 = vmatmul.mubr.msk.f32.gmra.mrb[174].mxu0 %vm689_vm1, %v20128_v14  ;;  %15993 = vmatprep.mubr.msk.f32.mxu1 %vm689_vm1, %v10461_v56  ;;  %v20174_v56 = vld [vmem:[#allocation3 + $0xb4] sm:$0xff] }
 0x53d   : > { %16049 = vmatprep.mubr.msk.f32.mxu0 %vm689_vm1, %v20133_v52 }
 0x53f   : > { %15994 = vmatmul.mubr.msk.f32.gmra.mrb[140].mxu1 %vm689_vm1, %v10462_v29  ;;  %v10470_v29 = vld [vmem:[#allocation3 + $0xbb] sm:$0xff] }
 0x540   : > { %16050 = vmatmul.mubr.msk.f32.gmra.mrb[176].mxu0 %vm689_vm1, %v20138_v58  ;;  %15996 = vmatprep.mubr.msk.f32.mxu1 %vm689_vm1, %v10463_v44  ;;  %v20179_v44 = vld [vmem:[#allocation3 + $0xbc] sm:$0xff] }
 0x541   : > { %16052 = vmatprep.mubr.msk.f32.mxu0 %vm689_vm1, %v20143_v61 }
 0x543   : > { %15997 = vmatmul.mubr.msk.f32.gmra.mrb[142].mxu1 %vm689_vm1, %v10464_v49  ;;  %v10471_v49 = vld [vmem:[#allocation3 + $0xc3] sm:$0xff] }
 0x544   : > { %16053 = vmatmul.mubr.msk.f32.gmra.mrb[178].mxu0 %vm689_vm1, %v20149_v59  ;;  %15999 = vmatprep.mubr.msk.f32.mxu1 %vm689_vm1, %v10465_v35  ;;  %v20184_v35 = vld [vmem:[#allocation3 + $0xc4] sm:$0xff] }
 0x545   : > { %16055 = vmatprep.mubr.msk.f32.mxu0 %vm689_vm1, %v20154_v6 }
 0x547   : > { %16000 = vmatmul.mubr.msk.f32.gmra.mrb[144].mxu1 %vm689_vm1, %v10466_v36  ;;  %v10472_v36 = vld [vmem:[#allocation3 + $0xcb] sm:$0xff] }
 0x548   : > { %16056 = vmatmul.mubr.msk.f32.gmra.mrb[180].mxu0 %vm689_vm1, %v20159_v3  ;;  %16002 = vmatprep.mubr.msk.f32.mxu1 %vm689_vm1, %v10467_v20  ;;  %v20189_v20 = vld [vmem:[#allocation3 + $0xcc] sm:$0xff] }
 0x549   : > { %16058 = vmatprep.mubr.msk.f32.mxu0 %vm689_vm1, %v20164_v37 }
 0x54b   : > { %16003 = vmatmul.mubr.msk.f32.gmra.mrb[146].mxu1 %vm689_vm1, %v10468_v60  ;;  %v10473_v60 = vld [vmem:[#allocation3 + $0xd3] sm:$0xff] }
 0x54c   : > { %16059 = vmatmul.mubr.msk.f32.gmra.mrb[182].mxu0 %vm689_vm1, %v20169_v62  ;;  %16005 = vmatprep.mubr.msk.f32.mxu1 %vm689_vm1, %v10469_v45  ;;  %v20194_v45 = vld [vmem:[#allocation3 + $0xd4] sm:$0xff] }
 0x54d   : > { %16061 = vmatprep.mubr.msk.f32.mxu0 %vm689_vm1, %v20174_v56 }
 0x54f   : > { %16006 = vmatmul.mubr.msk.f32.gmra.mrb[148].mxu1 %vm689_vm1, %v10470_v29  ;;  %v10474_v29 = vld [vmem:[#allocation3 + $0xdb] sm:$0xff] }
 0x550   : > { %16062 = vmatmul.mubr.msk.f32.gmra.mrb[184].mxu0 %vm689_vm1, %v20179_v44  ;;  %16008 = vmatprep.mubr.msk.f32.mxu1 %vm689_vm1, %v10471_v49  ;;  %v20199_v49 = vld [vmem:[#allocation3 + $0xdc] sm:$0xff] }
 0x551   : > { %16064 = vmatprep.mubr.msk.f32.mxu0 %vm689_vm1, %v20184_v35 }
 0x553   : > { %16009 = vmatmul.mubr.msk.f32.gmra.mrb[150].mxu1 %vm689_vm1, %v10472_v36  ;;  %v10475_v36 = vld [vmem:[#allocation3 + $0xe3] sm:$0xff] }
 0x554   : > { %16065 = vmatmul.mubr.msk.f32.gmra.mrb[186].mxu0 %vm689_vm1, %v20189_v20  ;;  %16011 = vmatprep.mubr.msk.f32.mxu1 %vm689_vm1, %v10473_v60  ;;  %v10476_v60 = vld [vmem:[#allocation3 + $0xeb] sm:$0xff] }
 0x555   : > { %16067 = vmatprep.mubr.msk.f32.mxu0 %vm689_vm1, %v20194_v45 }
 0x557   : > { %16012 = vmatmul.mubr.msk.f32.gmra.mrb[152].mxu1 %vm689_vm1, %v10474_v29  ;;  %v10477_v29 = vld [vmem:[#allocation3 + $0xf3] sm:$0xff] }
 0x558   : > { %16068 = vmatmul.mubr.msk.f32.gmra.mrb[188].mxu0 %vm689_vm1, %v20199_v49  ;;  %16014 = vmatprep.mubr.msk.f32.mxu1 %vm689_vm1, %v10475_v36  ;;  %v10478_v36 = vld [vmem:[#allocation3 + $0xfb] sm:$0xff] }
 0x559   : > { %16070 = vmatprep.mubr.msk.f32.mxu0 %vm689_vm1, %v20204_v47 }
 0x55b   : > { %16015 = vmatmul.mubr.msk.f32.gmra.mrb[154].mxu1 %vm689_vm1, %v10476_v60  ;;  %v10479_v60 = vld [vmem:[#allocation3 + $0x103] sm:$0xff] }
 0x55c   : > { %16071 = vmatmul.mubr.msk.f32.gmra.mrb[190].mxu0 %vm689_vm1, %v20209_v39  ;;  %16017 = vmatprep.mubr.msk.f32.mxu1 %vm689_vm1, %v10477_v29  ;;  %v10480_v29 = vld [vmem:[#allocation3 + $0x10b] sm:$0xff] }
 0x55d   : > { %16073 = vmatprep.mubr.msk.f32.mxu0 %vm689_vm1, %v20214_v57 }
 0x55f   : > { %16018 = vmatmul.mubr.msk.f32.gmra.mrb[156].mxu1 %vm689_vm1, %v10478_v36  ;;  %v10481_v36 = vld [vmem:[#allocation3 + $0x113] sm:$0xff] }
 0x560   : > { %16074 = vmatmul.mubr.msk.f32.gmra.mrb[192].mxu0 %vm689_vm1, %v20219_v12  ;;  %16020 = vmatprep.mubr.msk.f32.mxu1 %vm689_vm1, %v10479_v60  ;;  %v10482_v60 = vld [vmem:[#allocation3 + $0x11b] sm:$0xff] }
 0x561   : > { %16076 = vmatprep.mubr.msk.f32.mxu0 %vm689_vm1, %v20224_v19 }
 0x563   : > { %16021 = vmatmul.mubr.msk.f32.gmra.mrb[158].mxu1 %vm689_vm1, %v10480_v29  ;;  %v10483_v29 = vld [vmem:[#allocation3 + $0x123] sm:$0xff] }
 0x564   : > { %16077 = vmatmul.mubr.msk.f32.gmra.mrb[194].mxu0 %vm689_vm1, %v20229_v8  ;;  %16023 = vmatprep.mubr.msk.f32.mxu1 %vm689_vm1, %v10481_v36  ;;  %v10484_v36 = vld [vmem:[#allocation3 + $0x12b] sm:$0xff] }
 0x565   : > { %16079 = vmatprep.mubr.msk.f32.mxu0 %vm689_vm1, %v20234_v42 }
 0x567   : > { %16024 = vmatmul.mubr.msk.f32.gmra.mrb[160].mxu1 %vm689_vm1, %v10482_v60  ;;  %v11955_v60 = vld [vmem:[#allocation3 + $0x25] sm:$0xff] }
 0x568   : > { %16080 = vmatmul.mubr.msk.f32.gmra.mrb[196].mxu0 %vm689_vm1, %v20239_v15  ;;  %16026 = vmatprep.mubr.msk.f32.mxu1 %vm689_vm1, %v10483_v29 }
 0x569   : > { %16082 = vmatprep.mubr.msk.f32.mxu0 %vm689_vm1, %v20244_v13 }
 0x56b   : > { %16027 = vmatmul.mubr.msk.f32.gmra.mrb[162].mxu1 %vm689_vm1, %v10484_v36 }
 0x56c   : > { %16083 = vmatmul.mubr.msk.f32.gmra.mrb[198].mxu0 %vm689_vm1, %v20249_v31  ;;  %16087 = vmatprep.mubr.msk.f32.mxu1 %vm689_vm1, %v20080_v16  ;;  %v11957_v16 = vld [vmem:[#allocation3 + $0x35] sm:$0xff] }
 0x56d   : > { %16143 = vmatprep.mubr.msk.f32.mxu0 %vm689_vm1, %v11955_v60  ;;  %v15756_v38 = vpop.f32.mrb[58].mxu1  ;;  %v15812_v51 = vpop.f32.mrb[94].mxu0 }
 0x56e   : > { %8910 = vst.msk [vmem:[#allocation4 + $0x18] sm:$0xff] %vm689_vm1, %v15756_v38  ;;  %v8738_v29 = vpop.f32.mrb[59].mxu1  ;;  %v9168_v43 = vpop.f32.mrb[95].mxu0 }
 0x56f   : > { %8909 = vst.msk [vmem:[#allocation4 + $0x10] sm:$0xff] %vm689_vm1, %v8738_v29  ;;  %16088 = vmatmul.mubr.msk.f32.vlgmr.msra.gmra.mrb[164].mxu1 %vm689_vm1, %v20086_v28 }
 0x570   : > { %16144 = vmatmul.mubr.msk.f32.vlgmr.msra.gmra.mrb[200].mxu0 %vm689_vm1, %v11956_v41  ;;  %16198 = vmatpush3.msk.msra.mxu1 %vm981_vm0, %v20075_v0  ;;  %v11959_v41 = vld [vmem:[#allocation3 + $0x45] sm:$0xff] }
 0x571   : > { %16090 = vmatprep.mubr.msk.f32.mxu1 %vm689_vm1, %v20093_v22  ;;  %16146 = vmatprep.mubr.msk.f32.mxu0 %vm689_vm1, %v11957_v16  ;;  %v15759_v38 = vpop.f32.mrb[60].mxu1  ;;  %v15815_v36 = vpop.f32.mrb[96].mxu0 }
 0x572   : > { %8912 = vst.msk [vmem:[#allocation4 + $0x28] sm:$0xff] %vm689_vm1, %v15759_v38  ;;  %v8748_v60 = vpop.f32.mrb[61].mxu1  ;;  %v9178_v29 = vpop.f32.mrb[97].mxu0 }
 0x573   : > { %8911 = vst.msk [vmem:[#allocation4 + $0x20] sm:$0xff] %vm689_vm1, %v8748_v60  ;;  %16091 = vmatmul.mubr.msk.f32.gmra.mrb[166].mxu1 %vm689_vm1, %v20098_v32 }
 0x574   : > { %16147 = vmatmul.mubr.msk.f32.gmra.mrb[202].mxu0 %vm689_vm1, %v11958_v17  ;;  %16093 = vmatprep.mubr.msk.f32.mxu1 %vm689_vm1, %v20103_v24  ;;  %v11961_v17 = vld [vmem:[#allocation3 + $0x55] sm:$0xff] }
 0x575   : > { %16149 = vmatprep.mubr.msk.f32.mxu0 %vm689_vm1, %v11959_v41  ;;  %v9340_v0 = vld [vmem:[#allocation4 + $0x18] sm:$0xff]  ;;  %v15762_v28 = vpop.f32.mrb[62].mxu1 }
 0x576   : > { %v15818_v22 = vpop.f32.mrb[98].mxu0  ;;  %v9376_v16 = vadd.f32 %v15812_v51, %v9340_v0  ;;  %v9339_v38 = vld [vmem:[#allocation4 + $0x10] sm:$0xff]  ;;  %8914 = vst.msk [vmem:[#allocation4 + $0x38] sm:$0xff] %vm689_vm1, %v15762_v28  ;;  %v8758_v25 = vpop.f32.mrb[63].mxu1 }
 0x577   : > { %v9188_v60 = vpop.f32.mrb[99].mxu0  ;;  %v9375_v27 = vadd.f32 %v9339_v38, %v9168_v43  ;;  %8913 = vst.msk [vmem:[#allocation4 + $0x30] sm:$0xff] %vm689_vm1, %v8758_v25  ;;  %16094 = vmatmul.mubr.msk.f32.gmra.mrb[168].mxu1 %vm689_vm1, %v20108_v30  ;;  %v11964_v38 = vld [vmem:[#allocation3 + $0x6d] sm:$0xff] }
 0x578   : > { %16150 = vmatmul.mubr.msk.f32.gmra.mrb[204].mxu0 %vm689_vm1, %v11960_v11  ;;  %9412 = vst.msk [vmem:[#allocation4 + $0x18] sm:$0xff] %vm689_vm1, %v9376_v16  ;;  %16096 = vmatprep.mubr.msk.f32.mxu1 %vm689_vm1, %v20113_v1  ;;  %v11962_v11 = vld [vmem:[#allocation3 + $0x5d] sm:$0xff]  ;;  %v11963_v1 = vld [vmem:[#allocation3 + $0x65] sm:$0xff] }
 0x579   : > { %16152 = vmatprep.mubr.msk.f32.mxu0 %vm689_vm1, %v11961_v17  ;;  %9411 = vst.msk [vmem:[#allocation4 + $0x10] sm:$0xff] %vm689_vm1, %v9375_v27  ;;  %v9342_v51 = vld [vmem:[#allocation4 + $0x28] sm:$0xff]  ;;  %v15765_v32 = vpop.f32.mrb[64].mxu1 }
 0x57a   : > { %v15821_v43 = vpop.f32.mrb[100].mxu0  ;;  %v9378_v24 = vadd.f32 %v15815_v36, %v9342_v51  ;;  %v9341_v25 = vld [vmem:[#allocation4 + $0x20] sm:$0xff]  ;;  %8916 = vst.msk [vmem:[#allocation4 + $0x48] sm:$0xff] %vm689_vm1, %v15765_v32  ;;  %v8768_v30 = vpop.f32.mrb[65].mxu1 }
 0x57b   : > { %v9198_v41 = vpop.f32.mrb[101].mxu0  ;;  %v9377_v0 = vadd.f32 %v9341_v25, %v9178_v29  ;;  %8915 = vst.msk [vmem:[#allocation4 + $0x40] sm:$0xff] %vm689_vm1, %v8768_v30  ;;  %16097 = vmatmul.mubr.msk.f32.gmra.mrb[170].mxu1 %vm689_vm1, %v20118_v2 }
 0x57c   : > { %16153 = vmatmul.mubr.msk.f32.gmra.mrb[206].mxu0 %vm689_vm1, %v11962_v11  ;;  %9414 = vst.msk [vmem:[#allocation4 + $0x28] sm:$0xff] %vm689_vm1, %v9378_v24  ;;  %16099 = vmatprep.mubr.msk.f32.mxu1 %vm689_vm1, %v20123_v18  ;;  %v11965_v18 = vld [vmem:[#allocation3 + $0x75] sm:$0xff] }
 0x57d   : > { %16155 = vmatprep.mubr.msk.f32.mxu0 %vm689_vm1, %v11963_v1  ;;  %9413 = vst.msk [vmem:[#allocation4 + $0x20] sm:$0xff] %vm689_vm1, %v9377_v0  ;;  %v9344_v27 = vld [vmem:[#allocation4 + $0x38] sm:$0xff] }
 0x57e   : > { %v9380_v36 = vadd.f32 %v15818_v22, %v9344_v27  ;;  %v9343_v29 = vld [vmem:[#allocation4 + $0x30] sm:$0xff]  ;;  %v15768_v28 = vpop.f32.mrb[66].mxu1  ;;  %v11968_v27 = vld [vmem:[#allocation3 + $0x8d] sm:$0xff] }
 0x57f   : > { %v15824_v16 = vpop.f32.mrb[102].mxu0  ;;  %v9379_v17 = vadd.f32 %v9343_v29, %v9188_v60  ;;  %8918 = vst.msk [vmem:[#allocation4 + $0x58] sm:$0xff] %vm689_vm1, %v15768_v28  ;;  %v8778_v2 = vpop.f32.mrb[67].mxu1  ;;  %16100 = vmatmul.mubr.msk.f32.gmra.mrb[172].mxu1 %vm689_vm1, %v20128_v14  ;;  %v11966_v14 = vld [vmem:[#allocation3 + $0x7d] sm:$0xff] }
 0x580   : > { %v9208_v51 = vpop.f32.mrb[103].mxu0  ;;  %16156 = vmatmul.mubr.msk.f32.gmra.mrb[208].mxu0 %vm689_vm1, %v11964_v38  ;;  %9416 = vst.msk [vmem:[#allocation4 + $0x38] sm:$0xff] %vm689_vm1, %v9380_v36  ;;  %8917 = vst.msk [vmem:[#allocation4 + $0x50] sm:$0xff] %vm689_vm1, %v8778_v2  ;;  %16102 = vmatprep.mubr.msk.f32.mxu1 %vm689_vm1, %v20133_v52  ;;  %v11967_v52 = vld [vmem:[#allocation3 + $0x85] sm:$0xff] }
 0x581   : > { %16158 = vmatprep.mubr.msk.f32.mxu0 %vm689_vm1, %v11965_v18  ;;  %9415 = vst.msk [vmem:[#allocation4 + $0x30] sm:$0xff] %vm689_vm1, %v9379_v17  ;;  %v9346_v22 = vld [vmem:[#allocation4 + $0x48] sm:$0xff]  ;;  %v11970_v18 = vld [vmem:[#allocation3 + $0x9d] sm:$0xff] }
 0x582   : > { %v9382_v60 = vadd.f32 %v15821_v43, %v9346_v22  ;;  %v9345_v32 = vld [vmem:[#allocation4 + $0x40] sm:$0xff]  ;;  %v15771_v24 = vpop.f32.mrb[68].mxu1 }
 0x583   : > { %v15827_v25 = vpop.f32.mrb[104].mxu0  ;;  %v9381_v30 = vadd.f32 %v9345_v32, %v9198_v41  ;;  %8920 = vst.msk [vmem:[#allocation4 + $0x68] sm:$0xff] %vm689_vm1, %v15771_v24  ;;  %v8788_v11 = vpop.f32.mrb[69].mxu1  ;;  %16103 = vmatmul.mubr.msk.f32.gmra.mrb[174].mxu1 %vm689_vm1, %v20138_v58 }
 0x584   : > { %v9218_v0 = vpop.f32.mrb[105].mxu0  ;;  %16159 = vmatmul.mubr.msk.f32.gmra.mrb[210].mxu0 %vm689_vm1, %v11966_v14  ;;  %9418 = vst.msk [vmem:[#allocation4 + $0x48] sm:$0xff] %vm689_vm1, %v9382_v60  ;;  %8919 = vst.msk [vmem:[#allocation4 + $0x60] sm:$0xff] %vm689_vm1, %v8788_v11  ;;  %16105 = vmatprep.mubr.msk.f32.mxu1 %vm689_vm1, %v20143_v61  ;;  %v11969_v61 = vld [vmem:[#allocation3 + $0x95] sm:$0xff] }
 0x585   : > { %16161 = vmatprep.mubr.msk.f32.mxu0 %vm689_vm1, %v11967_v52  ;;  %9417 = vst.msk [vmem:[#allocation4 + $0x40] sm:$0xff] %vm689_vm1, %v9381_v30  ;;  %v11972_v30 = vld [vmem:[#allocation3 + $0xad] sm:$0xff] }
 0x586   : > { %v9348_v43 = vld [vmem:[#allocation4 + $0x58] sm:$0xff]  ;;  %v15774_v41 = vpop.f32.mrb[70].mxu1 }
 0x587   : > { %v15830_v1 = vpop.f32.mrb[106].mxu0  ;;  %v9384_v36 = vadd.f32 %v15824_v16, %v9348_v43  ;;  %v9347_v58 = vld [vmem:[#allocation4 + $0x50] sm:$0xff]  ;;  %8922 = vst.msk [vmem:[#allocation4 + $0x78] sm:$0xff] %vm689_vm1, %v15774_v41  ;;  %v8798_v29 = vpop.f32.mrb[71].mxu1  ;;  %16106 = vmatmul.mubr.msk.f32.gmra.mrb[176].mxu1 %vm689_vm1, %v20149_v59 }
 0x588   : > { %v9228_v28 = vpop.f32.mrb[107].mxu0  ;;  %16162 = vmatmul.mubr.msk.f32.gmra.mrb[212].mxu0 %vm689_vm1, %v11968_v27  ;;  %v9383_v38 = vadd.f32 %v9347_v58, %v9208_v51  ;;  %8921 = vst.msk [vmem:[#allocation4 + $0x70] sm:$0xff] %vm689_vm1, %v8798_v29  ;;  %16108 = vmatprep.mubr.msk.f32.mxu1 %vm689_vm1, %v20154_v6  ;;  %v11971_v6 = vld [vmem:[#allocation3 + $0xa5] sm:$0xff] }
 0x589   : > { %16164 = vmatprep.mubr.msk.f32.mxu0 %vm689_vm1, %v11969_v61  ;;  %9420 = vst.msk [vmem:[#allocation4 + $0x58] sm:$0xff] %vm689_vm1, %v9384_v36  ;;  %v11974_v36 = vld [vmem:[#allocation3 + $0xbd] sm:$0xff] }
 0x58a   : > { %9419 = vst.msk [vmem:[#allocation4 + $0x50] sm:$0xff] %vm689_vm1, %v9383_v38  ;;  %v9350_v16 = vld [vmem:[#allocation4 + $0x68] sm:$0xff]  ;;  %v15777_v17 = vpop.f32.mrb[72].mxu1 }
 0x58b   : > { %v15833_v2 = vpop.f32.mrb[108].mxu0  ;;  %v9386_v59 = vadd.f32 %v15827_v25, %v9350_v16  ;;  %v9349_v22 = vld [vmem:[#allocation4 + $0x60] sm:$0xff]  ;;  %8924 = vst.msk [vmem:[#allocation4 + $0x88] sm:$0xff] %vm689_vm1, %v15777_v17  ;;  %v8808_v51 = vpop.f32.mrb[73].mxu1  ;;  %16109 = vmatmul.mubr.msk.f32.gmra.mrb[178].mxu1 %vm689_vm1, %v20159_v3 }
 0x58c   : > { %v9238_v60 = vpop.f32.mrb[109].mxu0  ;;  %16165 = vmatmul.mubr.msk.f32.gmra.mrb[214].mxu0 %vm689_vm1, %v11970_v18  ;;  %v9385_v32 = vadd.f32 %v9349_v22, %v9218_v0  ;;  %8923 = vst.msk [vmem:[#allocation4 + $0x80] sm:$0xff] %vm689_vm1, %v8808_v51  ;;  %16111 = vmatprep.mubr.msk.f32.mxu1 %vm689_vm1, %v20164_v37  ;;  %v11973_v37 = vld [vmem:[#allocation3 + $0xb5] sm:$0xff] }
 0x58d   : > { %16167 = vmatprep.mubr.msk.f32.mxu0 %vm689_vm1, %v11971_v6  ;;  %9422 = vst.msk [vmem:[#allocation4 + $0x68] sm:$0xff] %vm689_vm1, %v9386_v59 }
 0x58e   : > { %9421 = vst.msk [vmem:[#allocation4 + $0x60] sm:$0xff] %vm689_vm1, %v9385_v32  ;;  %v9352_v24 = vld [vmem:[#allocation4 + $0x78] sm:$0xff]  ;;  %v15780_v25 = vpop.f32.mrb[74].mxu1 }
 0x58f   : > { %v15836_v14 = vpop.f32.mrb[110].mxu0  ;;  %v9388_v3 = vadd.f32 %v15830_v1, %v9352_v24  ;;  %v9351_v11 = vld [vmem:[#allocation4 + $0x70] sm:$0xff]  ;;  %8926 = vst.msk [vmem:[#allocation4 + $0x98] sm:$0xff] %vm689_vm1, %v15780_v25  ;;  %v8818_v0 = vpop.f32.mrb[75].mxu1  ;;  %16112 = vmatmul.mubr.msk.f32.gmra.mrb[180].mxu1 %vm689_vm1, %v20169_v62 }
 0x590   : > { %v9248_v52 = vpop.f32.mrb[111].mxu0  ;;  %16168 = vmatmul.mubr.msk.f32.gmra.mrb[216].mxu0 %vm689_vm1, %v11972_v30  ;;  %v9387_v43 = vadd.f32 %v9351_v11, %v9228_v28  ;;  %8925 = vst.msk [vmem:[#allocation4 + $0x90] sm:$0xff] %vm689_vm1, %v8818_v0  ;;  %16114 = vmatprep.mubr.msk.f32.mxu1 %vm689_vm1, %v20174_v56  ;;  %v11975_v56 = vld [vmem:[#allocation3 + $0xc5] sm:$0xff]  ;;  %v11978_v24 = vld [vmem:[#allocation3 + $0xdd] sm:$0xff] }
 0x591   : > { %16170 = vmatprep.mubr.msk.f32.mxu0 %vm689_vm1, %v11973_v37  ;;  %9424 = vst.msk [vmem:[#allocation4 + $0x78] sm:$0xff] %vm689_vm1, %v9388_v3  ;;  %v11980_v37 = vld [vmem:[#allocation3 + $0xed] sm:$0xff] }
 0x592   : > { %9423 = vst.msk [vmem:[#allocation4 + $0x70] sm:$0xff] %vm689_vm1, %v9387_v43  ;;  %v9354_v41 = vld [vmem:[#allocation4 + $0x88] sm:$0xff]  ;;  %v15783_v1 = vpop.f32.mrb[76].mxu1 }
 0x593   : > { %v15839_v27 = vpop.f32.mrb[112].mxu0  ;;  %v9390_v62 = vadd.f32 %v15833_v2, %v9354_v41  ;;  %v9353_v58 = vld [vmem:[#allocation4 + $0x80] sm:$0xff]  ;;  %8928 = vst.msk [vmem:[#allocation4 + $0xa8] sm:$0xff] %vm689_vm1, %v15783_v1  ;;  %v8828_v29 = vpop.f32.mrb[77].mxu1  ;;  %16115 = vmatmul.mubr.msk.f32.gmra.mrb[182].mxu1 %vm689_vm1, %v20179_v44 }
 0x594   : > { %v9258_v28 = vpop.f32.mrb[113].mxu0  ;;  %16171 = vmatmul.mubr.msk.f32.gmra.mrb[218].mxu0 %vm689_vm1, %v11974_v36  ;;  %v9389_v61 = vadd.f32 %v9353_v58, %v9238_v60  ;;  %8927 = vst.msk [vmem:[#allocation4 + $0xa0] sm:$0xff] %vm689_vm1, %v8828_v29  ;;  %16117 = vmatprep.mubr.msk.f32.mxu1 %vm689_vm1, %v20184_v35  ;;  %v11976_v2 = vld [vmem:[#allocation3 + $0xcd] sm:$0xff]  ;;  %v11977_v35 = vld [vmem:[#allocation3 + $0xd5] sm:$0xff]  ;;  %v11982_v29 = vld [vmem:[#allocation3 + $0xfd] sm:$0xff] }
 0x595   : > { %16173 = vmatprep.mubr.msk.f32.mxu0 %vm689_vm1, %v11975_v56  ;;  %9426 = vst.msk [vmem:[#allocation4 + $0x88] sm:$0xff] %vm689_vm1, %v9390_v62 }
 0x596   : > { %9425 = vst.msk [vmem:[#allocation4 + $0x80] sm:$0xff] %vm689_vm1, %v9389_v61  ;;  %v9356_v38 = vld [vmem:[#allocation4 + $0x98] sm:$0xff]  ;;  %v15786_v16 = vpop.f32.mrb[78].mxu1 }
 0x597   : > { %v15842_v17 = vpop.f32.mrb[114].mxu0  ;;  %v9392_v44 = vadd.f32 %v15836_v14, %v9356_v38  ;;  %v9355_v18 = vld [vmem:[#allocation4 + $0x90] sm:$0xff]  ;;  %8930 = vst.msk [vmem:[#allocation4 + $0xb8] sm:$0xff] %vm689_vm1, %v15786_v16  ;;  %v8838_v59 = vpop.f32.mrb[79].mxu1  ;;  %16118 = vmatmul.mubr.msk.f32.gmra.mrb[184].mxu1 %vm689_vm1, %v20189_v20 }
 0x598   : > { %v9268_v22 = vpop.f32.mrb[115].mxu0  ;;  %16174 = vmatmul.mubr.msk.f32.gmra.mrb[220].mxu0 %vm689_vm1, %v11976_v2  ;;  %v9391_v51 = vadd.f32 %v9355_v18, %v9248_v52  ;;  %8929 = vst.msk [vmem:[#allocation4 + $0xb0] sm:$0xff] %vm689_vm1, %v8838_v59  ;;  %16120 = vmatprep.mubr.msk.f32.mxu1 %vm689_vm1, %v20194_v45  ;;  %v11979_v45 = vld [vmem:[#allocation3 + $0xe5] sm:$0xff] }
 0x599   : > { %16176 = vmatprep.mubr.msk.f32.mxu0 %vm689_vm1, %v11977_v35  ;;  %9428 = vst.msk [vmem:[#allocation4 + $0x98] sm:$0xff] %vm689_vm1, %v9392_v44  ;;  %v11984_v44 = vld [vmem:[#allocation3 + $0x10d] sm:$0xff] }
 0x59a   : > { %9427 = vst.msk [vmem:[#allocation4 + $0x90] sm:$0xff] %vm689_vm1, %v9391_v51  ;;  %v9358_v60 = vld [vmem:[#allocation4 + $0xa8] sm:$0xff]  ;;  %v15789_v6 = vpop.f32.mrb[80].mxu1 }
 0x59b   : > { %v15845_v32 = vpop.f32.mrb[116].mxu0  ;;  %v9394_v20 = vadd.f32 %v15839_v27, %v9358_v60  ;;  %v9357_v25 = vld [vmem:[#allocation4 + $0xa0] sm:$0xff]  ;;  %8932 = vst.msk [vmem:[#allocation4 + $0xc8] sm:$0xff] %vm689_vm1, %v15789_v6  ;;  %v8848_v14 = vpop.f32.mrb[81].mxu1  ;;  %16121 = vmatmul.mubr.msk.f32.gmra.mrb[186].mxu1 %vm689_vm1, %v20199_v49 }
 0x59c   : > { %v9278_v30 = vpop.f32.mrb[117].mxu0  ;;  %16177 = vmatmul.mubr.msk.f32.gmra.mrb[222].mxu0 %vm689_vm1, %v11978_v24  ;;  %v9393_v3 = vadd.f32 %v9357_v25, %v9258_v28  ;;  %8931 = vst.msk [vmem:[#allocation4 + $0xc0] sm:$0xff] %vm689_vm1, %v8848_v14  ;;  %16123 = vmatprep.mubr.msk.f32.mxu1 %vm689_vm1, %v20204_v47  ;;  %v11981_v47 = vld [vmem:[#allocation3 + $0xf5] sm:$0xff] }
 0x59d   : > { %16179 = vmatprep.mubr.msk.f32.mxu0 %vm689_vm1, %v11979_v45  ;;  %9430 = vst.msk [vmem:[#allocation4 + $0xa8] sm:$0xff] %vm689_vm1, %v9394_v20  ;;  %v11989_v45 = vld [vmem:[#allocation3 + $0x135] sm:$0xff] }
 0x59e   : > { %9429 = vst.msk [vmem:[#allocation4 + $0xa0] sm:$0xff] %vm689_vm1, %v9393_v3  ;;  %v9360_v11 = vld [vmem:[#allocation4 + $0xb8] sm:$0xff]  ;;  %v15792_v0 = vpop.f32.mrb[82].mxu1 }
 0x59f   : > { %v15848_v52 = vpop.f32.mrb[118].mxu0  ;;  %v9396_v49 = vadd.f32 %v15842_v17, %v9360_v11  ;;  %v9359_v43 = vld [vmem:[#allocation4 + $0xb0] sm:$0xff]  ;;  %8934 = vst.msk [vmem:[#allocation4 + $0xd8] sm:$0xff] %vm689_vm1, %v15792_v0  ;;  %v8858_v41 = vpop.f32.mrb[83].mxu1  ;;  %16124 = vmatmul.mubr.msk.f32.gmra.mrb[188].mxu1 %vm689_vm1, %v20209_v39  ;;  %v11988_v0 = vld [vmem:[#allocation3 + $0x12d] sm:$0xff] }
 0x5a0   : > { %v9288_v1 = vpop.f32.mrb[119].mxu0  ;;  %16180 = vmatmul.mubr.msk.f32.gmra.mrb[224].mxu0 %vm689_vm1, %v11980_v37  ;;  %v9395_v27 = vadd.f32 %v9359_v43, %v9268_v22  ;;  %8933 = vst.msk [vmem:[#allocation4 + $0xd0] sm:$0xff] %vm689_vm1, %v8858_v41  ;;  %16126 = vmatprep.mubr.msk.f32.mxu1 %vm689_vm1, %v20214_v57  ;;  %v11983_v57 = vld [vmem:[#allocation3 + $0x105] sm:$0xff]  ;;  %v11488_v41 = vld [vmem:[#allocation3 + $0x13c] sm:$0xff] }
 0x5a1   : > { %16182 = vmatprep.mubr.msk.f32.mxu0 %vm689_vm1, %v11981_v47  ;;  %9432 = vst.msk [vmem:[#allocation4 + $0xb8] sm:$0xff] %vm689_vm1, %v9396_v49 }
 0x5a2   : > { %9431 = vst.msk [vmem:[#allocation4 + $0xb0] sm:$0xff] %vm689_vm1, %v9395_v27  ;;  %v9362_v36 = vld [vmem:[#allocation4 + $0xc8] sm:$0xff]  ;;  %v15795_v62 = vpop.f32.mrb[84].mxu1 }
 0x5a3   : > { %v15851_v58 = vpop.f32.mrb[120].mxu0  ;;  %v9398_v39 = vadd.f32 %v15845_v32, %v9362_v36  ;;  %v9361_v28 = vld [vmem:[#allocation4 + $0xc0] sm:$0xff]  ;;  %8936 = vst.msk [vmem:[#allocation4 + $0xe8] sm:$0xff] %vm689_vm1, %v15795_v62  ;;  %v8868_v56 = vpop.f32.mrb[85].mxu1  ;;  %16127 = vmatmul.mubr.msk.f32.gmra.mrb[190].mxu1 %vm689_vm1, %v20219_v12  ;;  %v11986_v32 = vld [vmem:[#allocation3 + $0x11d] sm:$0xff]  ;;  %v9840_v36 = vld [vmem:[#allocation4 + $0x8] sm:$0xff] }
 0x5a4   : > { %v9298_v61 = vpop.f32.mrb[121].mxu0  ;;  %16183 = vmatmul.mubr.msk.f32.gmra.mrb[226].mxu0 %vm689_vm1, %v11982_v29  ;;  %v9397_v38 = vadd.f32 %v9361_v28, %v9278_v30  ;;  %8935 = vst.msk [vmem:[#allocation4 + $0xe0] sm:$0xff] %vm689_vm1, %v8868_v56  ;;  %16129 = vmatprep.mubr.msk.f32.mxu1 %vm689_vm1, %v20224_v19  ;;  %v11985_v19 = vld [vmem:[#allocation3 + $0x115] sm:$0xff]  ;;  %v9839_v28 = vld [vmem:[#allocation4] sm:$0xff] }
 0x5a5   : > { %16185 = vmatprep.mubr.msk.f32.mxu0 %vm689_vm1, %v11983_v57  ;;  %9434 = vst.msk [vmem:[#allocation4 + $0xc8] sm:$0xff] %vm689_vm1, %v9398_v39  ;;  %v11487_v30 = vld [vmem:[#allocation3 + $0x134] sm:$0xff] }
 0x5a6   : > { %9433 = vst.msk [vmem:[#allocation4 + $0xc0] sm:$0xff] %vm689_vm1, %v9397_v38  ;;  %v9364_v16 = vld [vmem:[#allocation4 + $0xd8] sm:$0xff]  ;;  %v15798_v17 = vpop.f32.mrb[86].mxu1 }
 0x5a7   : > { %v15854_v2 = vpop.f32.mrb[122].mxu0  ;;  %v9400_v12 = vadd.f32 %v15848_v52, %v9364_v16  ;;  %v9363_v18 = vld [vmem:[#allocation4 + $0xd0] sm:$0xff]  ;;  %8938 = vst.msk [vmem:[#allocation4 + $0xf8] sm:$0xff] %vm689_vm1, %v15798_v17  ;;  %v8878_v59 = vpop.f32.mrb[87].mxu1  ;;  %16130 = vmatmul.mubr.msk.f32.gmra.mrb[192].mxu1 %vm689_vm1, %v20229_v8 }
 0x5a8   : > { %v9308_v22 = vpop.f32.mrb[123].mxu0  ;;  %16186 = vmatmul.mubr.msk.f32.gmra.mrb[228].mxu0 %vm689_vm1, %v11984_v44  ;;  %v9399_v35 = vadd.f32 %v9363_v18, %v9288_v1  ;;  %8937 = vst.msk [vmem:[#allocation4 + $0xf0] sm:$0xff] %vm689_vm1, %v8878_v59  ;;  %16132 = vmatprep.mubr.msk.f32.mxu1 %vm689_vm1, %v20234_v42  ;;  %v11987_v42 = vld [vmem:[#allocation3 + $0x125] sm:$0xff]  ;;  %v11990_v1 = vld [vmem:[#allocation3 + $0x13d] sm:$0xff] }
 0x5a9   : > { %16188 = vmatprep.mubr.msk.f32.mxu0 %vm689_vm1, %v11985_v19  ;;  %9436 = vst.msk [vmem:[#allocation4 + $0xd8] sm:$0xff] %vm689_vm1, %v9400_v12  ;;  %v12458_v12 = vld [vmem:[#allocation3 + $0x2e] sm:$0xff] }
 0x5aa   : > { %9435 = vst.msk [vmem:[#allocation4 + $0xd0] sm:$0xff] %vm689_vm1, %v9399_v35  ;;  %v9366_v51 = vld [vmem:[#allocation4 + $0xe8] sm:$0xff]  ;;  %v15801_v60 = vpop.f32.mrb[88].mxu1  ;;  %v9841_v35 = vld [vmem:[#allocation4 + $0x10] sm:$0xff] }
 0x5ab   : > { %v15857_v6 = vpop.f32.mrb[124].mxu0  ;;  %v9402_v8 = vadd.f32 %v15851_v58, %v9366_v51  ;;  %v9365_v24 = vld [vmem:[#allocation4 + $0xe0] sm:$0xff]  ;;  %8940 = vst.msk [vmem:[#allocation4 + $0x108] sm:$0xff] %vm689_vm1, %v15801_v60  ;;  %v8888_v20 = vpop.f32.mrb[89].mxu1  ;;  %16133 = vmatmul.mubr.msk.f32.gmra.mrb[194].mxu1 %vm689_vm1, %v20239_v15  ;;  %v12459_v60 = vld [vmem:[#allocation3 + $0x36] sm:$0xff] }
 0x5ac   : > { %v9318_v25 = vpop.f32.mrb[125].mxu0  ;;  %16189 = vmatmul.mubr.msk.f32.gmra.mrb[230].mxu0 %vm689_vm1, %v11986_v32  ;;  %v9401_v14 = vadd.f32 %v9365_v24, %v9298_v61  ;;  %8939 = vst.msk [vmem:[#allocation4 + $0x100] sm:$0xff] %vm689_vm1, %v8888_v20  ;;  %16135 = vmatprep.mubr.msk.f32.mxu1 %vm689_vm1, %v20244_v13  ;;  %v12457_v61 = vld [vmem:[#allocation3 + $0x26] sm:$0xff]  ;;  %v9844_v24 = vld [vmem:[#allocation4 + $0x28] sm:$0xff] }
 0x5ad   : > { %16191 = vmatprep.mubr.msk.f32.mxu0 %vm689_vm1, %v11987_v42  ;;  %9438 = vst.msk [vmem:[#allocation4 + $0xe8] sm:$0xff] %vm689_vm1, %v9402_v8 }
 0x5ae   : > { %9437 = vst.msk [vmem:[#allocation4 + $0xe0] sm:$0xff] %vm689_vm1, %v9401_v14  ;;  %v9368_v3 = vld [vmem:[#allocation4 + $0xf8] sm:$0xff]  ;;  %v15804_v11 = vpop.f32.mrb[90].mxu1 }
 0x5af   : > { %v15860_v15 = vpop.f32.mrb[126].mxu0  ;;  %v9404_v52 = vadd.f32 %v15854_v2, %v9368_v3  ;;  %v9367_v37 = vld [vmem:[#allocation4 + $0xf0] sm:$0xff]  ;;  %8942 = vst.msk [vmem:[#allocation4 + $0x118] sm:$0xff] %vm689_vm1, %v15804_v11  ;;  %v8898_v49 = vpop.f32.mrb[91].mxu1  ;;  %16136 = vmatmul.mubr.msk.f32.gmra.mrb[196].mxu1 %vm689_vm1, %v20249_v31  ;;  %v9842_v2 = vld [vmem:[#allocation4 + $0x18] sm:$0xff] }
 0x5b0   : > { %v9328_v43 = vpop.f32.mrb[127].mxu0  ;;  %16192 = vmatmul.mubr.msk.f32.gmra.mrb[232].mxu0 %vm689_vm1, %v11988_v0  ;;  %v9403_v13 = vadd.f32 %v9367_v37, %v9308_v22  ;;  %8941 = vst.msk [vmem:[#allocation4 + $0x110] sm:$0xff] %vm689_vm1, %v8898_v49  ;;  %16138 = vmatprep.mubr.msk.f32.mxu1 %vm689_vm1, %v11487_v30  ;;  %v9843_v30 = vld [vmem:[#allocation4 + $0x20] sm:$0xff] }
 0x5b1   : > { %16194 = vmatprep.mubr.msk.f32.mxu0 %vm689_vm1, %v11989_v45  ;;  %9440 = vst.msk [vmem:[#allocation4 + $0xf8] sm:$0xff] %vm689_vm1, %v9404_v52  ;;  %v12461_v3 = vld [vmem:[#allocation3 + $0x46] sm:$0xff] }
 0x5b2   : > { %9439 = vst.msk [vmem:[#allocation4 + $0xf0] sm:$0xff] %vm689_vm1, %v9403_v13  ;;  %v9370_v47 = vld [vmem:[#allocation4 + $0x108] sm:$0xff]  ;;  %v15865_v27 = vpop.f32.mrb[92].mxu1 }
 0x5b3   : > { %v15921_v62 = vpop.f32.mrb[128].mxu0  ;;  %v9406_v31 = vadd.f32 %v15857_v6, %v9370_v47  ;;  %v9369_v58 = vld [vmem:[#allocation4 + $0x100] sm:$0xff]  ;;  %v9876_v29 = vadd.f32 %v15865_v27, %v9840_v36  ;;  %v9660_v39 = vpop.f32.mrb[93].mxu1  ;;  %16139 = vmatmul.mubr.msk.f32.gmra.mrb[198].mxu1 %vm689_vm1, %v11488_v41  ;;  %v9845_v27 = vld [vmem:[#allocation4 + $0x30] sm:$0xff] }
 0x5b4   : > { %v10162_v56 = vpop.f32.mrb[129].mxu0  ;;  %16195 = vmatmul.mubr.msk.f32.gmra.mrb[234].mxu0 %vm689_vm1, %v11990_v1  ;;  %v9405_v57 = vadd.f32 %v9369_v58, %v9318_v25  ;;  %v9875_v38 = vadd.f32 %v9839_v28, %v9660_v39  ;;  %16199 = vmatprep.mubr.msk.f32.mxu1 %vm689_vm1, %v12457_v61  ;;  %v12460_v25 = vld [vmem:[#allocation3 + $0x3e] sm:$0xff]  ;;  %v12462_v41 = vld [vmem:[#allocation3 + $0x4e] sm:$0xff] }
 0x5b5   : > { %9442 = vst.msk [vmem:[#allocation4 + $0x108] sm:$0xff] %vm689_vm1, %v9406_v31  ;;  %9912 = vst.msk [vmem:[#allocation4 + $0x8] sm:$0xff] %vm689_vm1, %v9876_v29  ;;  %v12463_v31 = vld [vmem:[#allocation3 + $0x56] sm:$0xff] }
 0x5b6   : > { %9441 = vst.msk [vmem:[#allocation4 + $0x100] sm:$0xff] %vm689_vm1, %v9405_v57  ;;  %v9372_v16 = vld [vmem:[#allocation4 + $0x118] sm:$0xff]  ;;  %9911 = vst.msk [vmem:[#allocation4] sm:$0xff] %vm689_vm1, %v9875_v38  ;;  %v15868_v17 = vpop.f32.mrb[94].mxu1  ;;  %v9848_v61 = vld [vmem:[#allocation4 + $0x48] sm:$0xff] }
 0x5b7   : > { %v15924_v44 = vpop.f32.mrb[130].mxu0  ;;  %v9408_v18 = vadd.f32 %v15860_v15, %v9372_v16  ;;  %v9371_v59 = vld [vmem:[#allocation4 + $0x110] sm:$0xff]  ;;  %v9878_v22 = vadd.f32 %v15868_v17, %v9842_v2  ;;  %v9670_v19 = vpop.f32.mrb[95].mxu1  ;;  %16200 = vmatmul.mubr.msk.f32.vlgmr.msra.gmra.mrb[200].mxu1 %vm689_vm1, %v12458_v12  ;;  %v9847_v2 = vld [vmem:[#allocation4 + $0x40] sm:$0xff] }
 0x5b8   : > { %v10172_v51 = vpop.f32.mrb[131].mxu0  ;;  %v9407_v6 = vadd.f32 %v9371_v59, %v9328_v43  ;;  %v9877_v32 = vadd.f32 %v9841_v35, %v9670_v19  ;;  %16202 = vmatprep.mubr.msk.f32.mxu1 %vm689_vm1, %v12459_v60  ;;  %v9846_v43 = vld [vmem:[#allocation4 + $0x38] sm:$0xff] }
 0x5b9   : > { %9444 = vst.msk [vmem:[#allocation4 + $0x118] sm:$0xff] %vm689_vm1, %v9408_v18  ;;  %9914 = vst.msk [vmem:[#allocation4 + $0x18] sm:$0xff] %vm689_vm1, %v9878_v22  ;;  %v12464_v38 = vld [vmem:[#allocation3 + $0x5e] sm:$0xff]  ;;  %v12465_v18 = vld [vmem:[#allocation3 + $0x66] sm:$0xff] }
 0x5ba   : > { %9443 = vst.msk [vmem:[#allocation4 + $0x110] sm:$0xff] %vm689_vm1, %v9407_v6  ;;  %9913 = vst.msk [vmem:[#allocation4 + $0x10] sm:$0xff] %vm689_vm1, %v9877_v32  ;;  %v15871_v8 = vpop.f32.mrb[96].mxu1  ;;  %v9850_v60 = vld [vmem:[#allocation4 + $0x58] sm:$0xff]  ;;  %v12466_v32 = vld [vmem:[#allocation3 + $0x6e] sm:$0xff] }
 0x5bb   : > { %v15927_v20 = vpop.f32.mrb[132].mxu0  ;;  %v9880_v42 = vadd.f32 %v15871_v8, %v9844_v24  ;;  %v9680_v14 = vpop.f32.mrb[97].mxu1  ;;  %16203 = vmatmul.mubr.msk.f32.gmra.mrb[202].mxu1 %vm689_vm1, %v12460_v25  ;;  %v9849_v25 = vld [vmem:[#allocation4 + $0x50] sm:$0xff] }
 0x5bc   : > { %v10182_v45 = vpop.f32.mrb[133].mxu0  ;;  %v10342_v11 = vld [vmem:[#allocation4 + $0x8] sm:$0xff]  ;;  %v9879_v15 = vadd.f32 %v9843_v30, %v9680_v14  ;;  %16205 = vmatprep.mubr.msk.f32.mxu1 %vm689_vm1, %v12461_v3 }
 0x5bd   : > { %v10378_v0 = vadd.f32 %v15921_v62, %v10342_v11  ;;  %v10341_v52 = vld [vmem:[#allocation4] sm:$0xff]  ;;  %9916 = vst.msk [vmem:[#allocation4 + $0x28] sm:$0xff] %vm689_vm1, %v9880_v42  ;;  %v12467_v14 = vld [vmem:[#allocation3 + $0x76] sm:$0xff] }
 0x5be   : > { %v10377_v37 = vadd.f32 %v10341_v52, %v10162_v56  ;;  %9915 = vst.msk [vmem:[#allocation4 + $0x20] sm:$0xff] %vm689_vm1, %v9879_v15  ;;  %v15874_v49 = vpop.f32.mrb[98].mxu1 }
 0x5bf   : > { %v15930_v13 = vpop.f32.mrb[134].mxu0  ;;  %10414 = vst.msk [vmem:[#allocation4 + $0x8] sm:$0xff] %vm689_vm1, %v10378_v0  ;;  %v9882_v1 = vadd.f32 %v15874_v49, %v9846_v43  ;;  %v9690_v47 = vpop.f32.mrb[99].mxu1  ;;  %16206 = vmatmul.mubr.msk.f32.gmra.mrb[204].mxu1 %vm689_vm1, %v12462_v41  ;;  %v9852_v0 = vld [vmem:[#allocation4 + $0x68] sm:$0xff]  ;;  %v9851_v41 = vld [vmem:[#allocation4 + $0x60] sm:$0xff] }
 0x5c0   : > { %v10192_v36 = vpop.f32.mrb[135].mxu0  ;;  %10413 = vst.msk [vmem:[#allocation4] sm:$0xff] %vm689_vm1, %v10377_v37  ;;  %v10344_v62 = vld [vmem:[#allocation4 + $0x18] sm:$0xff]  ;;  %v9881_v58 = vadd.f32 %v9845_v27, %v9690_v47  ;;  %16208 = vmatprep.mubr.msk.f32.mxu1 %vm689_vm1, %v12463_v31 }
 0x5c1   : > { %v10380_v29 = vadd.f32 %v15924_v44, %v10344_v62  ;;  %v10343_v39 = vld [vmem:[#allocation4 + $0x10] sm:$0xff]  ;;  %9918 = vst.msk [vmem:[#allocation4 + $0x38] sm:$0xff] %vm689_vm1, %v9882_v1  ;;  %v12469_v47 = vld [vmem:[#allocation3 + $0x86] sm:$0xff] }
 0x5c2   : > { %v10379_v28 = vadd.f32 %v10343_v39, %v10172_v51  ;;  %9917 = vst.msk [vmem:[#allocation4 + $0x30] sm:$0xff] %vm689_vm1, %v9881_v58  ;;  %v15877_v56 = vpop.f32.mrb[100].mxu1  ;;  %v12468_v37 = vld [vmem:[#allocation3 + $0x7e] sm:$0xff] }
 0x5c3   : > { %v15933_v57 = vpop.f32.mrb[136].mxu0  ;;  %10416 = vst.msk [vmem:[#allocation4 + $0x18] sm:$0xff] %vm689_vm1, %v10380_v29  ;;  %v9884_v16 = vadd.f32 %v15877_v56, %v9848_v61  ;;  %v9700_v17 = vpop.f32.mrb[101].mxu1  ;;  %16209 = vmatmul.mubr.msk.f32.gmra.mrb[206].mxu1 %vm689_vm1, %v12464_v38  ;;  %v9854_v29 = vld [vmem:[#allocation4 + $0x78] sm:$0xff]  ;;  %v9853_v38 = vld [vmem:[#allocation4 + $0x70] sm:$0xff] }
 0x5c4   : > { %v10202_v12 = vpop.f32.mrb[137].mxu0  ;;  %10415 = vst.msk [vmem:[#allocation4 + $0x10] sm:$0xff] %vm689_vm1, %v10379_v28  ;;  %v10346_v44 = vld [vmem:[#allocation4 + $0x28] sm:$0xff]  ;;  %v9883_v59 = vadd.f32 %v9847_v2, %v9700_v17  ;;  %16211 = vmatprep.mubr.msk.f32.mxu1 %vm689_vm1, %v12465_v18 }
 0x5c5   : > { %v10382_v22 = vadd.f32 %v15927_v20, %v10346_v44  ;;  %v10345_v19 = vld [vmem:[#allocation4 + $0x20] sm:$0xff]  ;;  %9920 = vst.msk [vmem:[#allocation4 + $0x48] sm:$0xff] %vm689_vm1, %v9884_v16  ;;  %v12471_v17 = vld [vmem:[#allocation3 + $0x96] sm:$0xff] }
 0x5c6   : > { %v10381_v35 = vadd.f32 %v10345_v19, %v10182_v45  ;;  %9919 = vst.msk [vmem:[#allocation4 + $0x40] sm:$0xff] %vm689_vm1, %v9883_v59  ;;  %v15880_v51 = vpop.f32.mrb[102].mxu1  ;;  %v12470_v28 = vld [vmem:[#allocation3 + $0x8e] sm:$0xff] }
 0x5c7   : > { %v15936_v6 = vpop.f32.mrb[138].mxu0  ;;  %10418 = vst.msk [vmem:[#allocation4 + $0x28] sm:$0xff] %vm689_vm1, %v10382_v22  ;;  %v9886_v8 = vadd.f32 %v15880_v51, %v9850_v60  ;;  %v9710_v24 = vpop.f32.mrb[103].mxu1  ;;  %16212 = vmatmul.mubr.msk.f32.gmra.mrb[208].mxu1 %vm689_vm1, %v12466_v32  ;;  %v9856_v22 = vld [vmem:[#allocation4 + $0x88] sm:$0xff]  ;;  %v9855_v32 = vld [vmem:[#allocation4 + $0x80] sm:$0xff] }
 0x5c8   : > { %v10212_v42 = vpop.f32.mrb[139].mxu0  ;;  %10417 = vst.msk [vmem:[#allocation4 + $0x20] sm:$0xff] %vm689_vm1, %v10381_v35  ;;  %v10348_v20 = vld [vmem:[#allocation4 + $0x38] sm:$0xff]  ;;  %v9885_v30 = vadd.f32 %v9849_v25, %v9710_v24  ;;  %16214 = vmatprep.mubr.msk.f32.mxu1 %vm689_vm1, %v12467_v14 }
 0x5c9   : > { %v10384_v45 = vadd.f32 %v15930_v13, %v10348_v20  ;;  %v10347_v3 = vld [vmem:[#allocation4 + $0x30] sm:$0xff]  ;;  %9922 = vst.msk [vmem:[#allocation4 + $0x58] sm:$0xff] %vm689_vm1, %v9886_v8  ;;  %v12473_v24 = vld [vmem:[#allocation3 + $0xa6] sm:$0xff] }
 0x5ca   : > { %v10383_v11 = vadd.f32 %v10347_v3, %v10192_v36  ;;  %9921 = vst.msk [vmem:[#allocation4 + $0x50] sm:$0xff] %vm689_vm1, %v9885_v30  ;;  %v15883_v15 = vpop.f32.mrb[104].mxu1  ;;  %v12472_v35 = vld [vmem:[#allocation3 + $0x9e] sm:$0xff] }
 0x5cb   : > { %v15939_v52 = vpop.f32.mrb[140].mxu0  ;;  %10420 = vst.msk [vmem:[#allocation4 + $0x38] sm:$0xff] %vm689_vm1, %v10384_v45  ;;  %v9888_v49 = vadd.f32 %v15883_v15, %v9852_v0  ;;  %v9720_v43 = vpop.f32.mrb[105].mxu1  ;;  %16215 = vmatmul.mubr.msk.f32.gmra.mrb[210].mxu1 %vm689_vm1, %v12468_v37  ;;  %v9858_v45 = vld [vmem:[#allocation4 + $0x98] sm:$0xff]  ;;  %v9857_v37 = vld [vmem:[#allocation4 + $0x90] sm:$0xff] }
 0x5cc   : > { %v10222_v1 = vpop.f32.mrb[141].mxu0  ;;  %10419 = vst.msk [vmem:[#allocation4 + $0x30] sm:$0xff] %vm689_vm1, %v10383_v11  ;;  %v10350_v13 = vld [vmem:[#allocation4 + $0x48] sm:$0xff]  ;;  %v9887_v27 = vadd.f32 %v9851_v41, %v9720_v43  ;;  %16217 = vmatprep.mubr.msk.f32.mxu1 %vm689_vm1, %v12469_v47 }
 0x5cd   : > { %v10386_v36 = vadd.f32 %v15933_v57, %v10350_v13  ;;  %v10349_v31 = vld [vmem:[#allocation4 + $0x40] sm:$0xff]  ;;  %9924 = vst.msk [vmem:[#allocation4 + $0x68] sm:$0xff] %vm689_vm1, %v9888_v49  ;;  %v12475_v43 = vld [vmem:[#allocation3 + $0xb6] sm:$0xff] }
 0x5ce   : > { %v10385_v62 = vadd.f32 %v10349_v31, %v10202_v12  ;;  %9923 = vst.msk [vmem:[#allocation4 + $0x60] sm:$0xff] %vm689_vm1, %v9887_v27  ;;  %v15886_v58 = vpop.f32.mrb[106].mxu1  ;;  %v12474_v11 = vld [vmem:[#allocation3 + $0xae] sm:$0xff] }
 0x5cf   : > { %v15942_v39 = vpop.f32.mrb[142].mxu0  ;;  %10422 = vst.msk [vmem:[#allocation4 + $0x48] sm:$0xff] %vm689_vm1, %v10386_v36  ;;  %v9890_v56 = vadd.f32 %v15886_v58, %v9854_v29  ;;  %v9730_v61 = vpop.f32.mrb[107].mxu1  ;;  %16218 = vmatmul.mubr.msk.f32.gmra.mrb[212].mxu1 %vm689_vm1, %v12470_v28  ;;  %v9860_v36 = vld [vmem:[#allocation4 + $0xa8] sm:$0xff]  ;;  %v9859_v28 = vld [vmem:[#allocation4 + $0xa0] sm:$0xff] }
 0x5d0   : > { %v10232_v16 = vpop.f32.mrb[143].mxu0  ;;  %10421 = vst.msk [vmem:[#allocation4 + $0x40] sm:$0xff] %vm689_vm1, %v10385_v62  ;;  %v10352_v57 = vld [vmem:[#allocation4 + $0x58] sm:$0xff]  ;;  %v9889_v2 = vadd.f32 %v9853_v38, %v9730_v61  ;;  %16220 = vmatprep.mubr.msk.f32.mxu1 %vm689_vm1, %v12471_v17 }
 0x5d1   : > { %v10388_v12 = vadd.f32 %v15936_v6, %v10352_v57  ;;  %v10351_v18 = vld [vmem:[#allocation4 + $0x50] sm:$0xff]  ;;  %9926 = vst.msk [vmem:[#allocation4 + $0x78] sm:$0xff] %vm689_vm1, %v9890_v56  ;;  %v12477_v61 = vld [vmem:[#allocation3 + $0xc6] sm:$0xff] }
 0x5d2   : > { %v10387_v44 = vadd.f32 %v10351_v18, %v10212_v42  ;;  %9925 = vst.msk [vmem:[#allocation4 + $0x70] sm:$0xff] %vm689_vm1, %v9889_v2  ;;  %v15889_v59 = vpop.f32.mrb[108].mxu1  ;;  %v12476_v62 = vld [vmem:[#allocation3 + $0xbe] sm:$0xff] }
 0x5d3   : > { %v15945_v19 = vpop.f32.mrb[144].mxu0  ;;  %10424 = vst.msk [vmem:[#allocation4 + $0x58] sm:$0xff] %vm689_vm1, %v10388_v12  ;;  %v9892_v51 = vadd.f32 %v15889_v59, %v9856_v22  ;;  %v9740_v60 = vpop.f32.mrb[109].mxu1  ;;  %16221 = vmatmul.mubr.msk.f32.gmra.mrb[214].mxu1 %vm689_vm1, %v12472_v35  ;;  %v9862_v12 = vld [vmem:[#allocation4 + $0xb8] sm:$0xff]  ;;  %v9861_v35 = vld [vmem:[#allocation4 + $0xb0] sm:$0xff] }
 0x5d4   : > { %v10242_v8 = vpop.f32.mrb[145].mxu0  ;;  %10423 = vst.msk [vmem:[#allocation4 + $0x50] sm:$0xff] %vm689_vm1, %v10387_v44  ;;  %v10354_v6 = vld [vmem:[#allocation4 + $0x68] sm:$0xff]  ;;  %v9891_v25 = vadd.f32 %v9855_v32, %v9740_v60  ;;  %16223 = vmatprep.mubr.msk.f32.mxu1 %vm689_vm1, %v12473_v24 }
 0x5d5   : > { %v10390_v42 = vadd.f32 %v15939_v52, %v10354_v6  ;;  %v10353_v14 = vld [vmem:[#allocation4 + $0x60] sm:$0xff]  ;;  %9928 = vst.msk [vmem:[#allocation4 + $0x88] sm:$0xff] %vm689_vm1, %v9892_v51  ;;  %v12479_v60 = vld [vmem:[#allocation3 + $0xd6] sm:$0xff] }
 0x5d6   : > { %v10389_v20 = vadd.f32 %v10353_v14, %v10222_v1  ;;  %9927 = vst.msk [vmem:[#allocation4 + $0x80] sm:$0xff] %vm689_vm1, %v9891_v25  ;;  %v15892_v30 = vpop.f32.mrb[110].mxu1  ;;  %v12478_v44 = vld [vmem:[#allocation3 + $0xce] sm:$0xff] }
 0x5d7   : > { %v15948_v3 = vpop.f32.mrb[146].mxu0  ;;  %10426 = vst.msk [vmem:[#allocation4 + $0x68] sm:$0xff] %vm689_vm1, %v10390_v42  ;;  %v9894_v15 = vadd.f32 %v15892_v30, %v9858_v45  ;;  %v9750_v0 = vpop.f32.mrb[111].mxu1  ;;  %16224 = vmatmul.mubr.msk.f32.gmra.mrb[216].mxu1 %vm689_vm1, %v12474_v11  ;;  %v9864_v42 = vld [vmem:[#allocation4 + $0xc8] sm:$0xff]  ;;  %v9863_v11 = vld [vmem:[#allocation4 + $0xc0] sm:$0xff] }
 0x5d8   : > { %v10252_v49 = vpop.f32.mrb[147].mxu0  ;;  %10425 = vst.msk [vmem:[#allocation4 + $0x60] sm:$0xff] %vm689_vm1, %v10389_v20  ;;  %v10356_v52 = vld [vmem:[#allocation4 + $0x78] sm:$0xff]  ;;  %v9893_v41 = vadd.f32 %v9857_v37, %v9750_v0  ;;  %16226 = vmatprep.mubr.msk.f32.mxu1 %vm689_vm1, %v12475_v43 }
 0x5d9   : > { %v10392_v1 = vadd.f32 %v15942_v39, %v10356_v52  ;;  %v10355_v47 = vld [vmem:[#allocation4 + $0x70] sm:$0xff]  ;;  %9930 = vst.msk [vmem:[#allocation4 + $0x98] sm:$0xff] %vm689_vm1, %v9894_v15  ;;  %v12481_v0 = vld [vmem:[#allocation3 + $0xe6] sm:$0xff] }
 0x5da   : > { %v10391_v13 = vadd.f32 %v10355_v47, %v10232_v16  ;;  %9929 = vst.msk [vmem:[#allocation4 + $0x90] sm:$0xff] %vm689_vm1, %v9893_v41  ;;  %v15895_v27 = vpop.f32.mrb[112].mxu1  ;;  %v12480_v20 = vld [vmem:[#allocation3 + $0xde] sm:$0xff] }
 0x5db   : > { %v15951_v31 = vpop.f32.mrb[148].mxu0  ;;  %10428 = vst.msk [vmem:[#allocation4 + $0x78] sm:$0xff] %vm689_vm1, %v10392_v1  ;;  %v9896_v58 = vadd.f32 %v15895_v27, %v9860_v36  ;;  %v9760_v29 = vpop.f32.mrb[113].mxu1  ;;  %16227 = vmatmul.mubr.msk.f32.gmra.mrb[218].mxu1 %vm689_vm1, %v12476_v62  ;;  %v9866_v1 = vld [vmem:[#allocation4 + $0xd8] sm:$0xff]  ;;  %v9865_v62 = vld [vmem:[#allocation4 + $0xd0] sm:$0xff] }
 0x5dc   : > { %v10262_v56 = vpop.f32.mrb[149].mxu0  ;;  %10427 = vst.msk [vmem:[#allocation4 + $0x70] sm:$0xff] %vm689_vm1, %v10391_v13  ;;  %v10358_v39 = vld [vmem:[#allocation4 + $0x88] sm:$0xff]  ;;  %v9895_v38 = vadd.f32 %v9859_v28, %v9760_v29  ;;  %16229 = vmatprep.mubr.msk.f32.mxu1 %vm689_vm1, %v12477_v61 }
 0x5dd   : > { %v10394_v16 = vadd.f32 %v15945_v19, %v10358_v39  ;;  %v10357_v17 = vld [vmem:[#allocation4 + $0x80] sm:$0xff]  ;;  %9932 = vst.msk [vmem:[#allocation4 + $0xa8] sm:$0xff] %vm689_vm1, %v9896_v58  ;;  %v12483_v29 = vld [vmem:[#allocation3 + $0xf6] sm:$0xff] }
 0x5de   : > { %v10393_v57 = vadd.f32 %v10357_v17, %v10242_v8  ;;  %9931 = vst.msk [vmem:[#allocation4 + $0xa0] sm:$0xff] %vm689_vm1, %v9895_v38  ;;  %v15898_v2 = vpop.f32.mrb[114].mxu1  ;;  %v12482_v13 = vld [vmem:[#allocation3 + $0xee] sm:$0xff] }
 0x5df   : > { %v15954_v18 = vpop.f32.mrb[150].mxu0  ;;  %10430 = vst.msk [vmem:[#allocation4 + $0x88] sm:$0xff] %vm689_vm1, %v10394_v16  ;;  %v9898_v59 = vadd.f32 %v15898_v2, %v9862_v12  ;;  %v9770_v22 = vpop.f32.mrb[115].mxu1  ;;  %16230 = vmatmul.mubr.msk.f32.gmra.mrb[220].mxu1 %vm689_vm1, %v12478_v44  ;;  %v9868_v16 = vld [vmem:[#allocation4 + $0xe8] sm:$0xff]  ;;  %v9867_v44 = vld [vmem:[#allocation4 + $0xe0] sm:$0xff] }
 0x5e0   : > { %v10272_v51 = vpop.f32.mrb[151].mxu0  ;;  %10429 = vst.msk [vmem:[#allocation4 + $0x80] sm:$0xff] %vm689_vm1, %v10393_v57  ;;  %v10360_v19 = vld [vmem:[#allocation4 + $0x98] sm:$0xff]  ;;  %v9897_v32 = vadd.f32 %v9861_v35, %v9770_v22  ;;  %16232 = vmatprep.mubr.msk.f32.mxu1 %vm689_vm1, %v12479_v60 }
 0x5e1   : > { %v10396_v8 = vadd.f32 %v15948_v3, %v10360_v19  ;;  %v10359_v24 = vld [vmem:[#allocation4 + $0x90] sm:$0xff]  ;;  %9934 = vst.msk [vmem:[#allocation4 + $0xb8] sm:$0xff] %vm689_vm1, %v9898_v59  ;;  %v12485_v22 = vld [vmem:[#allocation3 + $0x106] sm:$0xff] }
 0x5e2   : > { %v10395_v6 = vadd.f32 %v10359_v24, %v10252_v49  ;;  %9933 = vst.msk [vmem:[#allocation4 + $0xb0] sm:$0xff] %vm689_vm1, %v9897_v32  ;;  %v15901_v25 = vpop.f32.mrb[116].mxu1  ;;  %v12484_v57 = vld [vmem:[#allocation3 + $0xfe] sm:$0xff] }
 0x5e3   : > { %v15957_v14 = vpop.f32.mrb[152].mxu0  ;;  %10432 = vst.msk [vmem:[#allocation4 + $0x98] sm:$0xff] %vm689_vm1, %v10396_v8  ;;  %v9900_v30 = vadd.f32 %v15901_v25, %v9864_v42  ;;  %v9780_v45 = vpop.f32.mrb[117].mxu1  ;;  %16233 = vmatmul.mubr.msk.f32.gmra.mrb[222].mxu1 %vm689_vm1, %v12480_v20  ;;  %v9870_v8 = vld [vmem:[#allocation4 + $0xf8] sm:$0xff]  ;;  %v9869_v20 = vld [vmem:[#allocation4 + $0xf0] sm:$0xff] }
 0x5e4   : > { %v10282_v15 = vpop.f32.mrb[153].mxu0  ;;  %10431 = vst.msk [vmem:[#allocation4 + $0x90] sm:$0xff] %vm689_vm1, %v10395_v6  ;;  %v10362_v3 = vld [vmem:[#allocation4 + $0xa8] sm:$0xff]  ;;  %v9899_v37 = vadd.f32 %v9863_v11, %v9780_v45  ;;  %16235 = vmatprep.mubr.msk.f32.mxu1 %vm689_vm1, %v12481_v0 }
 0x5e5   : > { %v10398_v49 = vadd.f32 %v15951_v31, %v10362_v3  ;;  %v10361_v43 = vld [vmem:[#allocation4 + $0xa0] sm:$0xff]  ;;  %9936 = vst.msk [vmem:[#allocation4 + $0xc8] sm:$0xff] %vm689_vm1, %v9900_v30  ;;  %v12487_v45 = vld [vmem:[#allocation3 + $0x116] sm:$0xff] }
 0x5e6   : > { %v10397_v52 = vadd.f32 %v10361_v43, %v10262_v56  ;;  %9935 = vst.msk [vmem:[#allocation4 + $0xc0] sm:$0xff] %vm689_vm1, %v9899_v37  ;;  %v15904_v41 = vpop.f32.mrb[118].mxu1  ;;  %v12486_v6 = vld [vmem:[#allocation3 + $0x10e] sm:$0xff] }
 0x5e7   : > { %v15960_v47 = vpop.f32.mrb[154].mxu0  ;;  %10434 = vst.msk [vmem:[#allocation4 + $0xa8] sm:$0xff] %vm689_vm1, %v10398_v49  ;;  %v9902_v27 = vadd.f32 %v15904_v41, %v9866_v1  ;;  %v9790_v36 = vpop.f32.mrb[119].mxu1  ;;  %16236 = vmatmul.mubr.msk.f32.gmra.mrb[224].mxu1 %vm689_vm1, %v12482_v13  ;;  %v9872_v49 = vld [vmem:[#allocation4 + $0x108] sm:$0xff]  ;;  %v9871_v13 = vld [vmem:[#allocation4 + $0x100] sm:$0xff] }
 0x5e8   : > { %v10292_v58 = vpop.f32.mrb[155].mxu0  ;;  %10433 = vst.msk [vmem:[#allocation4 + $0xa0] sm:$0xff] %vm689_vm1, %v10397_v52  ;;  %v10364_v31 = vld [vmem:[#allocation4 + $0xb8] sm:$0xff]  ;;  %v9901_v28 = vadd.f32 %v9865_v62, %v9790_v36  ;;  %16238 = vmatprep.mubr.msk.f32.mxu1 %vm689_vm1, %v12483_v29 }
 0x5e9   : > { %v10400_v56 = vadd.f32 %v15954_v18, %v10364_v31  ;;  %v10363_v61 = vld [vmem:[#allocation4 + $0xb0] sm:$0xff]  ;;  %9938 = vst.msk [vmem:[#allocation4 + $0xd8] sm:$0xff] %vm689_vm1, %v9902_v27  ;;  %v12489_v36 = vld [vmem:[#allocation3 + $0x126] sm:$0xff] }
 0x5ea   : > { %v10399_v39 = vadd.f32 %v10363_v61, %v10272_v51  ;;  %9937 = vst.msk [vmem:[#allocation4 + $0xd0] sm:$0xff] %vm689_vm1, %v9901_v28  ;;  %v15907_v38 = vpop.f32.mrb[120].mxu1  ;;  %v12488_v52 = vld [vmem:[#allocation3 + $0x11e] sm:$0xff]  ;;  %v12491_v31 = vld [vmem:[#allocation3 + $0x136] sm:$0xff] }
 0x5eb   : > { %v15963_v17 = vpop.f32.mrb[156].mxu0  ;;  %10436 = vst.msk [vmem:[#allocation4 + $0xb8] sm:$0xff] %vm689_vm1, %v10400_v56  ;;  %v9904_v2 = vadd.f32 %v15907_v38, %v9868_v16  ;;  %v9800_v12 = vpop.f32.mrb[121].mxu1  ;;  %16239 = vmatmul.mubr.msk.f32.gmra.mrb[226].mxu1 %vm689_vm1, %v12484_v57  ;;  %v9874_v61 = vld [vmem:[#allocation4 + $0x118] sm:$0xff]  ;;  %v12490_v38 = vld [vmem:[#allocation3 + $0x12e] sm:$0xff] }
 0x5ec   : > { %v10302_v59 = vpop.f32.mrb[157].mxu0  ;;  %10435 = vst.msk [vmem:[#allocation4 + $0xb0] sm:$0xff] %vm689_vm1, %v10399_v39  ;;  %v10366_v18 = vld [vmem:[#allocation4 + $0xc8] sm:$0xff]  ;;  %v9903_v35 = vadd.f32 %v9867_v44, %v9800_v12  ;;  %16241 = vmatprep.mubr.msk.f32.mxu1 %vm689_vm1, %v12485_v22 }
 0x5ed   : > { %v10402_v51 = vadd.f32 %v15957_v14, %v10366_v18  ;;  %v10365_v60 = vld [vmem:[#allocation4 + $0xc0] sm:$0xff]  ;;  %9940 = vst.msk [vmem:[#allocation4 + $0xe8] sm:$0xff] %vm689_vm1, %v9904_v2  ;;  %v9873_v2 = vld [vmem:[#allocation4 + $0x110] sm:$0xff] }
 0x5ee   : > { %v10401_v19 = vadd.f32 %v10365_v60, %v10282_v15  ;;  %9939 = vst.msk [vmem:[#allocation4 + $0xe0] sm:$0xff] %vm689_vm1, %v9903_v35  ;;  %v15910_v32 = vpop.f32.mrb[122].mxu1  ;;  %v10844_v60 = vld [vmem:[#allocation4 + $0x8] sm:$0xff] }
 0x5ef   : > { %v15966_v24 = vpop.f32.mrb[158].mxu0  ;;  %10438 = vst.msk [vmem:[#allocation4 + $0xc8] sm:$0xff] %vm689_vm1, %v10402_v51  ;;  %v9906_v25 = vadd.f32 %v15910_v32, %v9870_v8  ;;  %v9810_v42 = vpop.f32.mrb[123].mxu1  ;;  %16242 = vmatmul.mubr.msk.f32.gmra.mrb[228].mxu1 %vm689_vm1, %v12486_v6  ;;  %v10843_v6 = vld [vmem:[#allocation4] sm:$0xff] }
 0x5f0   : > { %v10312_v30 = vpop.f32.mrb[159].mxu0  ;;  %10437 = vst.msk [vmem:[#allocation4 + $0xc0] sm:$0xff] %vm689_vm1, %v10401_v19  ;;  %v10368_v14 = vld [vmem:[#allocation4 + $0xd8] sm:$0xff]  ;;  %v9905_v11 = vadd.f32 %v9869_v20, %v9810_v42  ;;  %16244 = vmatprep.mubr.msk.f32.mxu1 %vm689_vm1, %v12487_v45 }
 0x5f1   : > { %v10404_v15 = vadd.f32 %v15960_v47, %v10368_v14  ;;  %v10367_v0 = vld [vmem:[#allocation4 + $0xd0] sm:$0xff]  ;;  %9942 = vst.msk [vmem:[#allocation4 + $0xf8] sm:$0xff] %vm689_vm1, %v9906_v25 }
 0x5f2   : > { %v10403_v3 = vadd.f32 %v10367_v0, %v10292_v58  ;;  %9941 = vst.msk [vmem:[#allocation4 + $0xf0] sm:$0xff] %vm689_vm1, %v9905_v11  ;;  %v15913_v37 = vpop.f32.mrb[124].mxu1  ;;  %v10846_v11 = vld [vmem:[#allocation4 + $0x18] sm:$0xff] }
 0x5f3   : > { %v15969_v43 = vpop.f32.mrb[160].mxu0  ;;  %10440 = vst.msk [vmem:[#allocation4 + $0xd8] sm:$0xff] %vm689_vm1, %v10404_v15  ;;  %v9908_v41 = vadd.f32 %v15913_v37, %v9872_v49  ;;  %v9820_v1 = vpop.f32.mrb[125].mxu1  ;;  %16245 = vmatmul.mubr.msk.f32.gmra.mrb[230].mxu1 %vm689_vm1, %v12488_v52  ;;  %v10845_v37 = vld [vmem:[#allocation4 + $0x10] sm:$0xff] }
 0x5f4   : > { %v10322_v27 = vpop.f32.mrb[161].mxu0  ;;  %10439 = vst.msk [vmem:[#allocation4 + $0xd0] sm:$0xff] %vm689_vm1, %v10403_v3  ;;  %v10370_v47 = vld [vmem:[#allocation4 + $0xe8] sm:$0xff]  ;;  %v9907_v62 = vadd.f32 %v9871_v13, %v9820_v1  ;;  %16247 = vmatprep.mubr.msk.f32.mxu1 %vm689_vm1, %v12489_v36 }
 0x5f5   : > { %v10406_v58 = vadd.f32 %v15963_v17, %v10370_v47  ;;  %v10369_v29 = vld [vmem:[#allocation4 + $0xe0] sm:$0xff]  ;;  %9944 = vst.msk [vmem:[#allocation4 + $0x108] sm:$0xff] %vm689_vm1, %v9908_v41  ;;  %v10848_v36 = vld [vmem:[#allocation4 + $0x28] sm:$0xff] }
 0x5f6   : > { %v10405_v28 = vadd.f32 %v10369_v29, %v10302_v59  ;;  %9943 = vst.msk [vmem:[#allocation4 + $0x100] sm:$0xff] %vm689_vm1, %v9907_v62  ;;  %v15916_v56 = vpop.f32.mrb[126].mxu1  ;;  %v12492_v59 = vld [vmem:[#allocation3 + $0x13e] sm:$0xff]  ;;  %v10847_v29 = vld [vmem:[#allocation4 + $0x20] sm:$0xff] }
 0x5f7   : > { %v15972_v39 = vpop.f32.mrb[162].mxu0  ;;  %10442 = vst.msk [vmem:[#allocation4 + $0xe8] sm:$0xff] %vm689_vm1, %v10406_v58  ;;  %v9910_v16 = vadd.f32 %v15916_v56, %v9874_v61  ;;  %v9830_v57 = vpop.f32.mrb[127].mxu1  ;;  %16248 = vmatmul.mubr.msk.f32.gmra.mrb[232].mxu1 %vm689_vm1, %v12490_v38 }
 0x5f8   : > { %v10332_v12 = vpop.f32.mrb[163].mxu0  ;;  %10441 = vst.msk [vmem:[#allocation4 + $0xe0] sm:$0xff] %vm689_vm1, %v10405_v28  ;;  %v10372_v17 = vld [vmem:[#allocation4 + $0xf8] sm:$0xff]  ;;  %v9909_v44 = vadd.f32 %v9873_v2, %v9830_v57  ;;  %16250 = vmatprep.mubr.msk.f32.mxu1 %vm689_vm1, %v12491_v31 }
 0x5f9   : > { %v10408_v22 = vadd.f32 %v15966_v24, %v10372_v17  ;;  %v10371_v18 = vld [vmem:[#allocation4 + $0xf0] sm:$0xff]  ;;  %9946 = vst.msk [vmem:[#allocation4 + $0x118] sm:$0xff] %vm689_vm1, %v9910_v16  ;;  %v10850_v57 = vld [vmem:[#allocation4 + $0x38] sm:$0xff] }
 0x5fa   : > { %v10407_v35 = vadd.f32 %v10371_v18, %v10312_v30  ;;  %9945 = vst.msk [vmem:[#allocation4 + $0x110] sm:$0xff] %vm689_vm1, %v9909_v44  ;;  %v15977_v51 = vpop.f32.mrb[128].mxu1  ;;  %v10849_v44 = vld [vmem:[#allocation4 + $0x30] sm:$0xff] }
 0x5fb   : > { %v16033_v19 = vpop.f32.mrb[164].mxu0  ;;  %10444 = vst.msk [vmem:[#allocation4 + $0xf8] sm:$0xff] %vm689_vm1, %v10408_v22  ;;  %v10880_v32 = vadd.f32 %v15977_v51, %v10844_v60  ;;  %v10664_v8 = vpop.f32.mrb[129].mxu1  ;;  %16251 = vmatmul.mubr.msk.f32.gmra.mrb[234].mxu1 %vm689_vm1, %v12492_v59 }
 0x5fc   : > { %v11166_v25 = vpop.f32.mrb[165].mxu0  ;;  %10443 = vst.msk [vmem:[#allocation4 + $0xf0] sm:$0xff] %vm689_vm1, %v10407_v35  ;;  %v10374_v24 = vld [vmem:[#allocation4 + $0x108] sm:$0xff]  ;;  %v10879_v42 = vadd.f32 %v10843_v6, %v10664_v8 }
 0x5fd   : > { %v10410_v20 = vadd.f32 %v15969_v43, %v10374_v24  ;;  %v10373_v45 = vld [vmem:[#allocation4 + $0x100] sm:$0xff]  ;;  %10916 = vst.msk [vmem:[#allocation4 + $0x8] sm:$0xff] %vm689_vm1, %v10880_v32  ;;  %v10852_v32 = vld [vmem:[#allocation4 + $0x48] sm:$0xff] }
 0x5fe   : > { %v10409_v30 = vadd.f32 %v10373_v45, %v10322_v27  ;;  %10915 = vst.msk [vmem:[#allocation4] sm:$0xff] %vm689_vm1, %v10879_v42  ;;  %v15980_v14 = vpop.f32.mrb[130].mxu1  ;;  %v10851_v24 = vld [vmem:[#allocation4 + $0x40] sm:$0xff] }
 0x5ff   : > { %v16036_v15 = vpop.f32.mrb[166].mxu0  ;;  %10446 = vst.msk [vmem:[#allocation4 + $0x108] sm:$0xff] %vm689_vm1, %v10410_v20  ;;  %v10882_v0 = vadd.f32 %v15980_v14, %v10846_v11  ;;  %v10674_v3 = vpop.f32.mrb[131].mxu1 }
 0x600   : > { %v11176_v49 = vpop.f32.mrb[167].mxu0  ;;  %10445 = vst.msk [vmem:[#allocation4 + $0x100] sm:$0xff] %vm689_vm1, %v10409_v30  ;;  %v10376_v52 = vld [vmem:[#allocation4 + $0x118] sm:$0xff]  ;;  %v10881_v41 = vadd.f32 %v10845_v37, %v10674_v3 }
 0x601   : > { %v10412_v43 = vadd.f32 %v15972_v39, %v10376_v52  ;;  %v10375_v1 = vld [vmem:[#allocation4 + $0x110] sm:$0xff]  ;;  %10918 = vst.msk [vmem:[#allocation4 + $0x18] sm:$0xff] %vm689_vm1, %v10882_v0  ;;  %v10854_v0 = vld [vmem:[#allocation4 + $0x58] sm:$0xff] }
 0x602   : > { %v10411_v13 = vadd.f32 %v10375_v1, %v10332_v12  ;;  %10917 = vst.msk [vmem:[#allocation4 + $0x10] sm:$0xff] %vm689_vm1, %v10881_v41  ;;  %v15983_v27 = vpop.f32.mrb[132].mxu1  ;;  %v10853_v52 = vld [vmem:[#allocation4 + $0x50] sm:$0xff] }
 0x603   : > { %v16039_v47 = vpop.f32.mrb[168].mxu0  ;;  %10448 = vst.msk [vmem:[#allocation4 + $0x118] sm:$0xff] %vm689_vm1, %v10412_v43  ;;  %v10884_v62 = vadd.f32 %v15983_v27, %v10848_v36  ;;  %v10684_v58 = vpop.f32.mrb[133].mxu1 }
 0x604   : > { %v11186_v31 = vpop.f32.mrb[169].mxu0  ;;  %10447 = vst.msk [vmem:[#allocation4 + $0x110] sm:$0xff] %vm689_vm1, %v10411_v13  ;;  %v11346_v28 = vld [vmem:[#allocation4 + $0x8] sm:$0xff]  ;;  %v10883_v56 = vadd.f32 %v10847_v29, %v10684_v58 }
 0x605   : > { %v11382_v61 = vadd.f32 %v16033_v19, %v11346_v28  ;;  %v11345_v39 = vld [vmem:[#allocation4] sm:$0xff]  ;;  %10920 = vst.msk [vmem:[#allocation4 + $0x28] sm:$0xff] %vm689_vm1, %v10884_v62  ;;  %v10856_v62 = vld [vmem:[#allocation4 + $0x68] sm:$0xff] }
 0x606   : > { %v11381_v38 = vadd.f32 %v11345_v39, %v11166_v25  ;;  %10919 = vst.msk [vmem:[#allocation4 + $0x20] sm:$0xff] %vm689_vm1, %v10883_v56  ;;  %v15986_v16 = vpop.f32.mrb[134].mxu1  ;;  %v10855_v28 = vld [vmem:[#allocation4 + $0x60] sm:$0xff] }
 0x607   : > { %v16042_v2 = vpop.f32.mrb[170].mxu0  ;;  %11418 = vst.msk [vmem:[#allocation4 + $0x8] sm:$0xff] %vm689_vm1, %v11382_v61  ;;  %v10886_v12 = vadd.f32 %v15986_v16, %v10850_v57  ;;  %v10694_v17 = vpop.f32.mrb[135].mxu1 }
 0x608   : > { %v11196_v59 = vpop.f32.mrb[171].mxu0  ;;  %11417 = vst.msk [vmem:[#allocation4] sm:$0xff] %vm689_vm1, %v11381_v38  ;;  %v11348_v22 = vld [vmem:[#allocation4 + $0x18] sm:$0xff]  ;;  %v10885_v18 = vadd.f32 %v10849_v44, %v10694_v17 }
 0x609   : > { %v11384_v35 = vadd.f32 %v16036_v15, %v11348_v22  ;;  %v11347_v51 = vld [vmem:[#allocation4 + $0x10] sm:$0xff]  ;;  %10922 = vst.msk [vmem:[#allocation4 + $0x38] sm:$0xff] %vm689_vm1, %v10886_v12  ;;  %v10858_v12 = vld [vmem:[#allocation4 + $0x78] sm:$0xff] }
 0x60a   : > { %v11383_v60 = vadd.f32 %v11347_v51, %v11176_v49  ;;  %10921 = vst.msk [vmem:[#allocation4 + $0x30] sm:$0xff] %vm689_vm1, %v10885_v18  ;;  %v15989_v19 = vpop.f32.mrb[136].mxu1  ;;  %v10857_v22 = vld [vmem:[#allocation4 + $0x70] sm:$0xff] }
 0x60b   : > { %v16045_v8 = vpop.f32.mrb[172].mxu0  ;;  %11420 = vst.msk [vmem:[#allocation4 + $0x18] sm:$0xff] %vm689_vm1, %v11384_v35  ;;  %v10888_v6 = vadd.f32 %v15989_v19, %v10852_v32  ;;  %v10704_v25 = vpop.f32.mrb[137].mxu1 }
 0x60c   : > { %v11206_v42 = vpop.f32.mrb[173].mxu0  ;;  %11419 = vst.msk [vmem:[#allocation4 + $0x10] sm:$0xff] %vm689_vm1, %v11383_v60  ;;  %v11350_v20 = vld [vmem:[#allocation4 + $0x28] sm:$0xff]  ;;  %v10887_v45 = vadd.f32 %v10851_v24, %v10704_v25 }
 0x60d   : > { %v11386_v30 = vadd.f32 %v16039_v47, %v11350_v20  ;;  %v11349_v14 = vld [vmem:[#allocation4 + $0x20] sm:$0xff]  ;;  %10924 = vst.msk [vmem:[#allocation4 + $0x48] sm:$0xff] %vm689_vm1, %v10888_v6  ;;  %v10860_v6 = vld [vmem:[#allocation4 + $0x88] sm:$0xff] }
 0x60e   : > { %v11385_v11 = vadd.f32 %v11349_v14, %v11186_v31  ;;  %10923 = vst.msk [vmem:[#allocation4 + $0x40] sm:$0xff] %vm689_vm1, %v10887_v45  ;;  %v15992_v15 = vpop.f32.mrb[138].mxu1  ;;  %v10859_v20 = vld [vmem:[#allocation4 + $0x80] sm:$0xff] }
 0x60f   : > { %v16048_v3 = vpop.f32.mrb[174].mxu0  ;;  %11422 = vst.msk [vmem:[#allocation4 + $0x28] sm:$0xff] %vm689_vm1, %v11386_v30  ;;  %v10890_v37 = vadd.f32 %v15992_v15, %v10854_v0  ;;  %v10714_v49 = vpop.f32.mrb[139].mxu1 }
 0x610   : > { %v11216_v41 = vpop.f32.mrb[175].mxu0  ;;  %11421 = vst.msk [vmem:[#allocation4 + $0x20] sm:$0xff] %vm689_vm1, %v11385_v11  ;;  %v11352_v43 = vld [vmem:[#allocation4 + $0x38] sm:$0xff]  ;;  %v10889_v1 = vadd.f32 %v10853_v52, %v10714_v49 }
 0x611   : > { %v11388_v13 = vadd.f32 %v16042_v2, %v11352_v43  ;;  %v11351_v27 = vld [vmem:[#allocation4 + $0x30] sm:$0xff]  ;;  %10926 = vst.msk [vmem:[#allocation4 + $0x58] sm:$0xff] %vm689_vm1, %v10890_v37  ;;  %v10862_v37 = vld [vmem:[#allocation4 + $0x98] sm:$0xff] }
 0x612   : > { %v11387_v36 = vadd.f32 %v11351_v27, %v11196_v59  ;;  %10925 = vst.msk [vmem:[#allocation4 + $0x50] sm:$0xff] %vm689_vm1, %v10889_v1  ;;  %v15995_v47 = vpop.f32.mrb[140].mxu1  ;;  %v10861_v43 = vld [vmem:[#allocation4 + $0x90] sm:$0xff] }
 0x613   : > { %v16051_v58 = vpop.f32.mrb[176].mxu0  ;;  %11424 = vst.msk [vmem:[#allocation4 + $0x38] sm:$0xff] %vm689_vm1, %v11388_v13  ;;  %v10892_v29 = vadd.f32 %v15995_v47, %v10856_v62  ;;  %v10724_v31 = vpop.f32.mrb[141].mxu1 }
 0x614   : > { %v11226_v56 = vpop.f32.mrb[177].mxu0  ;;  %11423 = vst.msk [vmem:[#allocation4 + $0x30] sm:$0xff] %vm689_vm1, %v11387_v36  ;;  %v11354_v61 = vld [vmem:[#allocation4 + $0x48] sm:$0xff]  ;;  %v10891_v39 = vadd.f32 %v10855_v28, %v10724_v31 }
 0x615   : > { %v11390_v38 = vadd.f32 %v16045_v8, %v11354_v61  ;;  %v11353_v16 = vld [vmem:[#allocation4 + $0x40] sm:$0xff]  ;;  %10928 = vst.msk [vmem:[#allocation4 + $0x68] sm:$0xff] %vm689_vm1, %v10892_v29  ;;  %v10864_v29 = vld [vmem:[#allocation4 + $0xa8] sm:$0xff] }
 0x616   : > { %v11389_v57 = vadd.f32 %v11353_v16, %v11206_v42  ;;  %10927 = vst.msk [vmem:[#allocation4 + $0x60] sm:$0xff] %vm689_vm1, %v10891_v39  ;;  %v15998_v2 = vpop.f32.mrb[142].mxu1  ;;  %v10863_v61 = vld [vmem:[#allocation4 + $0xa0] sm:$0xff] }
 0x617   : > { %v16054_v17 = vpop.f32.mrb[178].mxu0  ;;  %11426 = vst.msk [vmem:[#allocation4 + $0x48] sm:$0xff] %vm689_vm1, %v11390_v38  ;;  %v10894_v44 = vadd.f32 %v15998_v2, %v10858_v12  ;;  %v10734_v59 = vpop.f32.mrb[143].mxu1 }
 0x618   : > { %v11236_v18 = vpop.f32.mrb[179].mxu0  ;;  %11425 = vst.msk [vmem:[#allocation4 + $0x40] sm:$0xff] %vm689_vm1, %v11389_v57  ;;  %v11356_v35 = vld [vmem:[#allocation4 + $0x58] sm:$0xff]  ;;  %v10893_v51 = vadd.f32 %v10857_v22, %v10734_v59 }
 0x619   : > { %v11392_v60 = vadd.f32 %v16048_v3, %v11356_v35  ;;  %v11355_v19 = vld [vmem:[#allocation4 + $0x50] sm:$0xff]  ;;  %10930 = vst.msk [vmem:[#allocation4 + $0x78] sm:$0xff] %vm689_vm1, %v10894_v44  ;;  %v10866_v44 = vld [vmem:[#allocation4 + $0xb8] sm:$0xff] }
 0x61a   : > { %v11391_v32 = vadd.f32 %v11355_v19, %v11216_v41  ;;  %10929 = vst.msk [vmem:[#allocation4 + $0x70] sm:$0xff] %vm689_vm1, %v10893_v51  ;;  %v16001_v8 = vpop.f32.mrb[144].mxu1  ;;  %v10865_v35 = vld [vmem:[#allocation4 + $0xb0] sm:$0xff] }
 0x61b   : > { %v16057_v25 = vpop.f32.mrb[180].mxu0  ;;  %11428 = vst.msk [vmem:[#allocation4 + $0x58] sm:$0xff] %vm689_vm1, %v11392_v60  ;;  %v10896_v24 = vadd.f32 %v16001_v8, %v10860_v6  ;;  %v10744_v42 = vpop.f32.mrb[145].mxu1 }
 0x61c   : > { %v11246_v45 = vpop.f32.mrb[181].mxu0  ;;  %11427 = vst.msk [vmem:[#allocation4 + $0x50] sm:$0xff] %vm689_vm1, %v11391_v32  ;;  %v11358_v30 = vld [vmem:[#allocation4 + $0x68] sm:$0xff]  ;;  %v10895_v14 = vadd.f32 %v10859_v20, %v10744_v42 }
 0x61d   : > { %v11394_v11 = vadd.f32 %v16051_v58, %v11358_v30  ;;  %v11357_v15 = vld [vmem:[#allocation4 + $0x60] sm:$0xff]  ;;  %10932 = vst.msk [vmem:[#allocation4 + $0x88] sm:$0xff] %vm689_vm1, %v10896_v24  ;;  %v10868_v24 = vld [vmem:[#allocation4 + $0xc8] sm:$0xff] }
 0x61e   : > { %v11393_v0 = vadd.f32 %v11357_v15, %v11226_v56  ;;  %10931 = vst.msk [vmem:[#allocation4 + $0x80] sm:$0xff] %vm689_vm1, %v10895_v14  ;;  %v16004_v3 = vpop.f32.mrb[146].mxu1  ;;  %v10867_v30 = vld [vmem:[#allocation4 + $0xc0] sm:$0xff] }
 0x61f   : > { %v16060_v49 = vpop.f32.mrb[182].mxu0  ;;  %11430 = vst.msk [vmem:[#allocation4 + $0x68] sm:$0xff] %vm689_vm1, %v11394_v11  ;;  %v10898_v52 = vadd.f32 %v16004_v3, %v10862_v37  ;;  %v10754_v41 = vpop.f32.mrb[147].mxu1 }
 0x620   : > { %v11256_v1 = vpop.f32.mrb[183].mxu0  ;;  %11429 = vst.msk [vmem:[#allocation4 + $0x60] sm:$0xff] %vm689_vm1, %v11393_v0  ;;  %v11360_v13 = vld [vmem:[#allocation4 + $0x78] sm:$0xff]  ;;  %v10897_v27 = vadd.f32 %v10861_v43, %v10754_v41 }
 0x621   : > { %v11396_v36 = vadd.f32 %v16054_v17, %v11360_v13  ;;  %v11359_v47 = vld [vmem:[#allocation4 + $0x70] sm:$0xff]  ;;  %10934 = vst.msk [vmem:[#allocation4 + $0x98] sm:$0xff] %vm689_vm1, %v10898_v52  ;;  %v10870_v52 = vld [vmem:[#allocation4 + $0xd8] sm:$0xff] }
 0x622   : > { %v11395_v62 = vadd.f32 %v11359_v47, %v11236_v18  ;;  %10933 = vst.msk [vmem:[#allocation4 + $0x90] sm:$0xff] %vm689_vm1, %v10897_v27  ;;  %v16007_v58 = vpop.f32.mrb[148].mxu1  ;;  %v10869_v13 = vld [vmem:[#allocation4 + $0xd0] sm:$0xff] }
 0x623   : > { %v16063_v31 = vpop.f32.mrb[184].mxu0  ;;  %11432 = vst.msk [vmem:[#allocation4 + $0x78] sm:$0xff] %vm689_vm1, %v11396_v36  ;;  %v10900_v28 = vadd.f32 %v16007_v58, %v10864_v29  ;;  %v10764_v56 = vpop.f32.mrb[149].mxu1 }
 0x624   : > { %v11266_v39 = vpop.f32.mrb[185].mxu0  ;;  %11431 = vst.msk [vmem:[#allocation4 + $0x70] sm:$0xff] %vm689_vm1, %v11395_v62  ;;  %v11362_v38 = vld [vmem:[#allocation4 + $0x88] sm:$0xff]  ;;  %v10899_v16 = vadd.f32 %v10863_v61, %v10764_v56 }
 0x625   : > { %v11398_v57 = vadd.f32 %v16057_v25, %v11362_v38  ;;  %v11361_v2 = vld [vmem:[#allocation4 + $0x80] sm:$0xff]  ;;  %10936 = vst.msk [vmem:[#allocation4 + $0xa8] sm:$0xff] %vm689_vm1, %v10900_v28  ;;  %v10872_v28 = vld [vmem:[#allocation4 + $0xe8] sm:$0xff] }
 0x626   : > { %v11397_v12 = vadd.f32 %v11361_v2, %v11246_v45  ;;  %10935 = vst.msk [vmem:[#allocation4 + $0xa0] sm:$0xff] %vm689_vm1, %v10899_v16  ;;  %v16010_v17 = vpop.f32.mrb[150].mxu1  ;;  %v10871_v38 = vld [vmem:[#allocation4 + $0xe0] sm:$0xff] }
 0x627   : > { %v16066_v59 = vpop.f32.mrb[186].mxu0  ;;  %11434 = vst.msk [vmem:[#allocation4 + $0x88] sm:$0xff] %vm689_vm1, %v11398_v57  ;;  %v10902_v22 = vadd.f32 %v16010_v17, %v10866_v44  ;;  %v10774_v18 = vpop.f32.mrb[151].mxu1 }
 0x628   : > { %v11276_v51 = vpop.f32.mrb[187].mxu0  ;;  %11433 = vst.msk [vmem:[#allocation4 + $0x80] sm:$0xff] %vm689_vm1, %v11397_v12  ;;  %v11364_v60 = vld [vmem:[#allocation4 + $0x98] sm:$0xff]  ;;  %v10901_v19 = vadd.f32 %v10865_v35, %v10774_v18 }
 0x629   : > { %v11400_v32 = vadd.f32 %v16060_v49, %v11364_v60  ;;  %v11363_v8 = vld [vmem:[#allocation4 + $0x90] sm:$0xff]  ;;  %10938 = vst.msk [vmem:[#allocation4 + $0xb8] sm:$0xff] %vm689_vm1, %v10902_v22  ;;  %v10874_v22 = vld [vmem:[#allocation4 + $0xf8] sm:$0xff] }
 0x62a   : > { %v11399_v6 = vadd.f32 %v11363_v8, %v11256_v1  ;;  %10937 = vst.msk [vmem:[#allocation4 + $0xb0] sm:$0xff] %vm689_vm1, %v10901_v19  ;;  %v16013_v25 = vpop.f32.mrb[152].mxu1  ;;  %v10873_v60 = vld [vmem:[#allocation4 + $0xf0] sm:$0xff] }
 0x62b   : > { %v16069_v42 = vpop.f32.mrb[188].mxu0  ;;  %11436 = vst.msk [vmem:[#allocation4 + $0x98] sm:$0xff] %vm689_vm1, %v11400_v32  ;;  %v10904_v20 = vadd.f32 %v16013_v25, %v10868_v24  ;;  %v10784_v45 = vpop.f32.mrb[153].mxu1 }
 0x62c   : > { %v11286_v14 = vpop.f32.mrb[189].mxu0  ;;  %11435 = vst.msk [vmem:[#allocation4 + $0x90] sm:$0xff] %vm689_vm1, %v11399_v6  ;;  %v11366_v11 = vld [vmem:[#allocation4 + $0xa8] sm:$0xff]  ;;  %v10903_v15 = vadd.f32 %v10867_v30, %v10784_v45 }
 0x62d   : > { %v11402_v0 = vadd.f32 %v16063_v31, %v11366_v11  ;;  %v11365_v3 = vld [vmem:[#allocation4 + $0xa0] sm:$0xff]  ;;  %10940 = vst.msk [vmem:[#allocation4 + $0xc8] sm:$0xff] %vm689_vm1, %v10904_v20  ;;  %v10876_v20 = vld [vmem:[#allocation4 + $0x108] sm:$0xff] }
 0x62e   : > { %v11401_v37 = vadd.f32 %v11365_v3, %v11266_v39  ;;  %10939 = vst.msk [vmem:[#allocation4 + $0xc0] sm:$0xff] %vm689_vm1, %v10903_v15  ;;  %v16016_v49 = vpop.f32.mrb[154].mxu1  ;;  %v10875_v11 = vld [vmem:[#allocation4 + $0x100] sm:$0xff] }
 0x62f   : > { %v16072_v41 = vpop.f32.mrb[190].mxu0  ;;  %11438 = vst.msk [vmem:[#allocation4 + $0xa8] sm:$0xff] %vm689_vm1, %v11402_v0  ;;  %v10906_v43 = vadd.f32 %v16016_v49, %v10870_v52  ;;  %v10794_v1 = vpop.f32.mrb[155].mxu1 }
 0x630   : > { %v11296_v27 = vpop.f32.mrb[191].mxu0  ;;  %11437 = vst.msk [vmem:[#allocation4 + $0xa0] sm:$0xff] %vm689_vm1, %v11401_v37  ;;  %v11368_v36 = vld [vmem:[#allocation4 + $0xb8] sm:$0xff]  ;;  %v10905_v47 = vadd.f32 %v10869_v13, %v10794_v1 }
 0x631   : > { %v11404_v62 = vadd.f32 %v16066_v59, %v11368_v36  ;;  %v11367_v58 = vld [vmem:[#allocation4 + $0xb0] sm:$0xff]  ;;  %10942 = vst.msk [vmem:[#allocation4 + $0xd8] sm:$0xff] %vm689_vm1, %v10906_v43  ;;  %v10878_v43 = vld [vmem:[#allocation4 + $0x118] sm:$0xff] }
 0x632   : > { %v11403_v29 = vadd.f32 %v11367_v58, %v11276_v51  ;;  %10941 = vst.msk [vmem:[#allocation4 + $0xd0] sm:$0xff] %vm689_vm1, %v10905_v47  ;;  %v16019_v31 = vpop.f32.mrb[156].mxu1  ;;  %v10877_v36 = vld [vmem:[#allocation4 + $0x110] sm:$0xff] }
 0x633   : > { %v16075_v56 = vpop.f32.mrb[192].mxu0  ;;  %11440 = vst.msk [vmem:[#allocation4 + $0xb8] sm:$0xff] %vm689_vm1, %v11404_v62  ;;  %v10908_v61 = vadd.f32 %v16019_v31, %v10872_v28  ;;  %v10804_v39 = vpop.f32.mrb[157].mxu1 }
 0x634   : > { %v11306_v16 = vpop.f32.mrb[193].mxu0  ;;  %11439 = vst.msk [vmem:[#allocation4 + $0xb0] sm:$0xff] %vm689_vm1, %v11403_v29  ;;  %v11370_v57 = vld [vmem:[#allocation4 + $0xc8] sm:$0xff]  ;;  %v10907_v2 = vadd.f32 %v10871_v38, %v10804_v39 }
 0x635   : > { %v11406_v12 = vadd.f32 %v16069_v42, %v11370_v57  ;;  %v11369_v17 = vld [vmem:[#allocation4 + $0xc0] sm:$0xff]  ;;  %10944 = vst.msk [vmem:[#allocation4 + $0xe8] sm:$0xff] %vm689_vm1, %v10908_v61  ;;  %v11848_v61 = vld [vmem:[#allocation4 + $0x8] sm:$0xff] }
 0x636   : > { %v11405_v44 = vadd.f32 %v11369_v17, %v11286_v14  ;;  %10943 = vst.msk [vmem:[#allocation4 + $0xe0] sm:$0xff] %vm689_vm1, %v10907_v2  ;;  %v16022_v59 = vpop.f32.mrb[158].mxu1  ;;  %v11847_v57 = vld [vmem:[#allocation4] sm:$0xff] }
 0x637   : > { %v16078_v18 = vpop.f32.mrb[194].mxu0  ;;  %11442 = vst.msk [vmem:[#allocation4 + $0xc8] sm:$0xff] %vm689_vm1, %v11406_v12  ;;  %v10910_v35 = vadd.f32 %v16022_v59, %v10874_v22  ;;  %v10814_v51 = vpop.f32.mrb[159].mxu1 }
 0x638   : > { %v11316_v19 = vpop.f32.mrb[195].mxu0  ;;  %11441 = vst.msk [vmem:[#allocation4 + $0xc0] sm:$0xff] %vm689_vm1, %v11405_v44  ;;  %v11372_v32 = vld [vmem:[#allocation4 + $0xd8] sm:$0xff]  ;;  %v10909_v8 = vadd.f32 %v10873_v60, %v10814_v51 }
 0x639   : > { %v11408_v6 = vadd.f32 %v16072_v41, %v11372_v32  ;;  %v11371_v25 = vld [vmem:[#allocation4 + $0xd0] sm:$0xff]  ;;  %10946 = vst.msk [vmem:[#allocation4 + $0xf8] sm:$0xff] %vm689_vm1, %v10910_v35  ;;  %v11850_v35 = vld [vmem:[#allocation4 + $0x18] sm:$0xff] }
 0x63a   : > { %v11407_v24 = vadd.f32 %v11371_v25, %v11296_v27  ;;  %10945 = vst.msk [vmem:[#allocation4 + $0xf0] sm:$0xff] %vm689_vm1, %v10909_v8  ;;  %v16025_v42 = vpop.f32.mrb[160].mxu1  ;;  %v11849_v32 = vld [vmem:[#allocation4 + $0x10] sm:$0xff] }
 0x63b   : > { %v16081_v45 = vpop.f32.mrb[196].mxu0  ;;  %11444 = vst.msk [vmem:[#allocation4 + $0xd8] sm:$0xff] %vm689_vm1, %v11408_v6  ;;  %v10912_v30 = vadd.f32 %v16025_v42, %v10876_v20  ;;  %v10824_v14 = vpop.f32.mrb[161].mxu1 }
 0x63c   : > { %v11326_v15 = vpop.f32.mrb[197].mxu0  ;;  %11443 = vst.msk [vmem:[#allocation4 + $0xd0] sm:$0xff] %vm689_vm1, %v11407_v24  ;;  %v11374_v0 = vld [vmem:[#allocation4 + $0xe8] sm:$0xff]  ;;  %v10911_v3 = vadd.f32 %v10875_v11, %v10824_v14 }
 0x63d   : > { %v11410_v37 = vadd.f32 %v16075_v56, %v11374_v0  ;;  %v11373_v49 = vld [vmem:[#allocation4 + $0xe0] sm:$0xff]  ;;  %10948 = vst.msk [vmem:[#allocation4 + $0x108] sm:$0xff] %vm689_vm1, %v10912_v30  ;;  %v11852_v30 = vld [vmem:[#allocation4 + $0x28] sm:$0xff] }
 0x63e   : > { %v11409_v52 = vadd.f32 %v11373_v49, %v11306_v16  ;;  %10947 = vst.msk [vmem:[#allocation4 + $0x100] sm:$0xff] %vm689_vm1, %v10911_v3  ;;  %v16028_v41 = vpop.f32.mrb[162].mxu1  ;;  %v11851_v0 = vld [vmem:[#allocation4 + $0x20] sm:$0xff] }
 0x63f   : > { %v16084_v1 = vpop.f32.mrb[198].mxu0  ;;  %11446 = vst.msk [vmem:[#allocation4 + $0xe8] sm:$0xff] %vm689_vm1, %v11410_v37  ;;  %v10914_v13 = vadd.f32 %v16028_v41, %v10878_v43  ;;  %v10834_v27 = vpop.f32.mrb[163].mxu1 }
 0x640   : > { %v11336_v47 = vpop.f32.mrb[199].mxu0  ;;  %11445 = vst.msk [vmem:[#allocation4 + $0xe0] sm:$0xff] %vm689_vm1, %v11409_v52  ;;  %v11376_v62 = vld [vmem:[#allocation4 + $0xf8] sm:$0xff]  ;;  %v10913_v58 = vadd.f32 %v10877_v36, %v10834_v27 }
 0x641   : > { %v11412_v29 = vadd.f32 %v16078_v18, %v11376_v62  ;;  %v11375_v31 = vld [vmem:[#allocation4 + $0xf0] sm:$0xff]  ;;  %10950 = vst.msk [vmem:[#allocation4 + $0x118] sm:$0xff] %vm689_vm1, %v10914_v13  ;;  %v11854_v13 = vld [vmem:[#allocation4 + $0x38] sm:$0xff] }
 0x642   : > { %v11411_v28 = vadd.f32 %v11375_v31, %v11316_v19  ;;  %10949 = vst.msk [vmem:[#allocation4 + $0x110] sm:$0xff] %vm689_vm1, %v10913_v58  ;;  %v16089_v56 = vpop.f32.mrb[164].mxu1  ;;  %v11853_v62 = vld [vmem:[#allocation4 + $0x30] sm:$0xff] }
 0x643   : > { %v16145_v39 = vpop.f32.mrb[200].mxu0  ;;  %11448 = vst.msk [vmem:[#allocation4 + $0xf8] sm:$0xff] %vm689_vm1, %v11412_v29  ;;  %v11884_v38 = vadd.f32 %v16089_v56, %v11848_v61  ;;  %v11668_v16 = vpop.f32.mrb[165].mxu1 }
 0x644   : > { %v12170_v2 = vpop.f32.mrb[201].mxu0  ;;  %11447 = vst.msk [vmem:[#allocation4 + $0xf0] sm:$0xff] %vm689_vm1, %v11411_v28  ;;  %v11378_v12 = vld [vmem:[#allocation4 + $0x108] sm:$0xff]  ;;  %v11883_v17 = vadd.f32 %v11847_v57, %v11668_v16 }
 0x645   : > { %v11414_v44 = vadd.f32 %v16081_v45, %v11378_v12  ;;  %v11377_v59 = vld [vmem:[#allocation4 + $0x100] sm:$0xff]  ;;  %11920 = vst.msk [vmem:[#allocation4 + $0x8] sm:$0xff] %vm689_vm1, %v11884_v38  ;;  %v11856_v38 = vld [vmem:[#allocation4 + $0x48] sm:$0xff] }
 0x646   : > { %v11413_v22 = vadd.f32 %v11377_v59, %v11326_v15  ;;  %11919 = vst.msk [vmem:[#allocation4] sm:$0xff] %vm689_vm1, %v11883_v17  ;;  %v16092_v18 = vpop.f32.mrb[166].mxu1  ;;  %v11855_v12 = vld [vmem:[#allocation4 + $0x40] sm:$0xff] }
 0x647   : > { %v16148_v51 = vpop.f32.mrb[202].mxu0  ;;  %11450 = vst.msk [vmem:[#allocation4 + $0x108] sm:$0xff] %vm689_vm1, %v11414_v44  ;;  %v11886_v60 = vadd.f32 %v16092_v18, %v11850_v35  ;;  %v11678_v19 = vpop.f32.mrb[167].mxu1 }
 0x648   : > { %v12180_v8 = vpop.f32.mrb[203].mxu0  ;;  %11449 = vst.msk [vmem:[#allocation4 + $0x100] sm:$0xff] %vm689_vm1, %v11413_v22  ;;  %v11380_v6 = vld [vmem:[#allocation4 + $0x118] sm:$0xff]  ;;  %v11885_v25 = vadd.f32 %v11849_v32, %v11678_v19 }
 0x649   : > { %v11416_v24 = vadd.f32 %v16084_v1, %v11380_v6  ;;  %v11379_v42 = vld [vmem:[#allocation4 + $0x110] sm:$0xff]  ;;  %11922 = vst.msk [vmem:[#allocation4 + $0x18] sm:$0xff] %vm689_vm1, %v11886_v60  ;;  %v11858_v60 = vld [vmem:[#allocation4 + $0x58] sm:$0xff] }
 0x64a   : > { %v11415_v20 = vadd.f32 %v11379_v42, %v11336_v47  ;;  %11921 = vst.msk [vmem:[#allocation4 + $0x10] sm:$0xff] %vm689_vm1, %v11885_v25  ;;  %v16095_v45 = vpop.f32.mrb[168].mxu1  ;;  %v11857_v6 = vld [vmem:[#allocation4 + $0x50] sm:$0xff] }
 0x64b   : > { %v16151_v14 = vpop.f32.mrb[204].mxu0  ;;  %11452 = vst.msk [vmem:[#allocation4 + $0x118] sm:$0xff] %vm689_vm1, %v11416_v24  ;;  %v11888_v11 = vadd.f32 %v16095_v45, %v11852_v30  ;;  %v11688_v15 = vpop.f32.mrb[169].mxu1 }
 0x64c   : > { %v12190_v3 = vpop.f32.mrb[205].mxu0  ;;  %11451 = vst.msk [vmem:[#allocation4 + $0x110] sm:$0xff] %vm689_vm1, %v11415_v20  ;;  %v12350_v37 = vld [vmem:[#allocation4 + $0x8] sm:$0xff]  ;;  %v11887_v49 = vadd.f32 %v11851_v0, %v11688_v15 }
 0x64d   : > { %v12386_v52 = vadd.f32 %v16145_v39, %v12350_v37  ;;  %v12349_v41 = vld [vmem:[#allocation4] sm:$0xff]  ;;  %11924 = vst.msk [vmem:[#allocation4 + $0x28] sm:$0xff] %vm689_vm1, %v11888_v11  ;;  %v11860_v11 = vld [vmem:[#allocation4 + $0x68] sm:$0xff] }
 0x64e   : > { %v12385_v43 = vadd.f32 %v12349_v41, %v12170_v2  ;;  %11923 = vst.msk [vmem:[#allocation4 + $0x20] sm:$0xff] %vm689_vm1, %v11887_v49  ;;  %v16098_v1 = vpop.f32.mrb[170].mxu1  ;;  %v11859_v37 = vld [vmem:[#allocation4 + $0x60] sm:$0xff] }
 0x64f   : > { %v16154_v27 = vpop.f32.mrb[206].mxu0  ;;  %12422 = vst.msk [vmem:[#allocation4 + $0x8] sm:$0xff] %vm689_vm1, %v12386_v52  ;;  %v11890_v36 = vadd.f32 %v16098_v1, %v11854_v13  ;;  %v11698_v47 = vpop.f32.mrb[171].mxu1 }
 0x650   : > { %v12200_v58 = vpop.f32.mrb[207].mxu0  ;;  %12421 = vst.msk [vmem:[#allocation4] sm:$0xff] %vm689_vm1, %v12385_v43  ;;  %v12352_v29 = vld [vmem:[#allocation4 + $0x18] sm:$0xff]  ;;  %v11889_v31 = vadd.f32 %v11853_v62, %v11698_v47 }
 0x651   : > { %v12388_v28 = vadd.f32 %v16148_v51, %v12352_v29  ;;  %v12351_v56 = vld [vmem:[#allocation4 + $0x10] sm:$0xff]  ;;  %11926 = vst.msk [vmem:[#allocation4 + $0x38] sm:$0xff] %vm689_vm1, %v11890_v36  ;;  %v11862_v36 = vld [vmem:[#allocation4 + $0x78] sm:$0xff] }
 0x652   : > { %v12387_v61 = vadd.f32 %v12351_v56, %v12180_v8  ;;  %11925 = vst.msk [vmem:[#allocation4 + $0x30] sm:$0xff] %vm689_vm1, %v11889_v31  ;;  %v16101_v39 = vpop.f32.mrb[172].mxu1  ;;  %v11861_v29 = vld [vmem:[#allocation4 + $0x70] sm:$0xff] }
 0x653   : > { %v16157_v16 = vpop.f32.mrb[208].mxu0  ;;  %12424 = vst.msk [vmem:[#allocation4 + $0x18] sm:$0xff] %vm689_vm1, %v12388_v28  ;;  %v11892_v57 = vadd.f32 %v16101_v39, %v11856_v38  ;;  %v11708_v2 = vpop.f32.mrb[173].mxu1 }
 0x654   : > { %v12210_v17 = vpop.f32.mrb[209].mxu0  ;;  %12423 = vst.msk [vmem:[#allocation4 + $0x10] sm:$0xff] %vm689_vm1, %v12387_v61  ;;  %v12354_v44 = vld [vmem:[#allocation4 + $0x28] sm:$0xff]  ;;  %v11891_v59 = vadd.f32 %v11855_v12, %v11708_v2 }
 0x655   : > { %v12390_v22 = vadd.f32 %v16151_v14, %v12354_v44  ;;  %v12353_v18 = vld [vmem:[#allocation4 + $0x20] sm:$0xff]  ;;  %11928 = vst.msk [vmem:[#allocation4 + $0x48] sm:$0xff] %vm689_vm1, %v11892_v57  ;;  %v11864_v57 = vld [vmem:[#allocation4 + $0x88] sm:$0xff] }
 0x656   : > { %v12389_v35 = vadd.f32 %v12353_v18, %v12190_v3  ;;  %11927 = vst.msk [vmem:[#allocation4 + $0x40] sm:$0xff] %vm689_vm1, %v11891_v59  ;;  %v16104_v51 = vpop.f32.mrb[174].mxu1  ;;  %v11863_v44 = vld [vmem:[#allocation4 + $0x80] sm:$0xff] }
 0x657   : > { %v16160_v19 = vpop.f32.mrb[210].mxu0  ;;  %12426 = vst.msk [vmem:[#allocation4 + $0x28] sm:$0xff] %vm689_vm1, %v12390_v22  ;;  %v11894_v32 = vadd.f32 %v16104_v51, %v11858_v60  ;;  %v11718_v8 = vpop.f32.mrb[175].mxu1 }
 0x658   : > { %v12220_v25 = vpop.f32.mrb[211].mxu0  ;;  %12425 = vst.msk [vmem:[#allocation4 + $0x20] sm:$0xff] %vm689_vm1, %v12389_v35  ;;  %v12356_v24 = vld [vmem:[#allocation4 + $0x38] sm:$0xff]  ;;  %v11893_v42 = vadd.f32 %v11857_v6, %v11718_v8 }
 0x659   : > { %v12392_v20 = vadd.f32 %v16154_v27, %v12356_v24  ;;  %v12355_v45 = vld [vmem:[#allocation4 + $0x30] sm:$0xff]  ;;  %11930 = vst.msk [vmem:[#allocation4 + $0x58] sm:$0xff] %vm689_vm1, %v11894_v32  ;;  %v11866_v32 = vld [vmem:[#allocation4 + $0x98] sm:$0xff] }
 0x65a   : > { %v12391_v30 = vadd.f32 %v12355_v45, %v12200_v58  ;;  %11929 = vst.msk [vmem:[#allocation4 + $0x50] sm:$0xff] %vm689_vm1, %v11893_v42  ;;  %v16107_v14 = vpop.f32.mrb[176].mxu1  ;;  %v11865_v24 = vld [vmem:[#allocation4 + $0x90] sm:$0xff] }
 0x65b   : > { %v16163_v15 = vpop.f32.mrb[212].mxu0  ;;  %12428 = vst.msk [vmem:[#allocation4 + $0x38] sm:$0xff] %vm689_vm1, %v12392_v20  ;;  %v11896_v0 = vadd.f32 %v16107_v14, %v11860_v11  ;;  %v11728_v3 = vpop.f32.mrb[177].mxu1 }
 0x65c   : > { %v12230_v49 = vpop.f32.mrb[213].mxu0  ;;  %12427 = vst.msk [vmem:[#allocation4 + $0x30] sm:$0xff] %vm689_vm1, %v12391_v30  ;;  %v12358_v52 = vld [vmem:[#allocation4 + $0x48] sm:$0xff]  ;;  %v11895_v41 = vadd.f32 %v11859_v37, %v11728_v3 }
 0x65d   : > { %v12394_v43 = vadd.f32 %v16157_v16, %v12358_v52  ;;  %v12357_v1 = vld [vmem:[#allocation4 + $0x40] sm:$0xff]  ;;  %11932 = vst.msk [vmem:[#allocation4 + $0x68] sm:$0xff] %vm689_vm1, %v11896_v0  ;;  %v11868_v0 = vld [vmem:[#allocation4 + $0xa8] sm:$0xff] }
 0x65e   : > { %v12393_v13 = vadd.f32 %v12357_v1, %v12210_v17  ;;  %11931 = vst.msk [vmem:[#allocation4 + $0x60] sm:$0xff] %vm689_vm1, %v11895_v41  ;;  %v16110_v27 = vpop.f32.mrb[178].mxu1  ;;  %v11867_v52 = vld [vmem:[#allocation4 + $0xa0] sm:$0xff] }
 0x65f   : > { %v16166_v47 = vpop.f32.mrb[214].mxu0  ;;  %12430 = vst.msk [vmem:[#allocation4 + $0x48] sm:$0xff] %vm689_vm1, %v12394_v43  ;;  %v11898_v62 = vadd.f32 %v16110_v27, %v11862_v36  ;;  %v11738_v58 = vpop.f32.mrb[179].mxu1 }
 0x660   : > { %v12240_v31 = vpop.f32.mrb[215].mxu0  ;;  %12429 = vst.msk [vmem:[#allocation4 + $0x40] sm:$0xff] %vm689_vm1, %v12393_v13  ;;  %v12360_v28 = vld [vmem:[#allocation4 + $0x58] sm:$0xff]  ;;  %v11897_v56 = vadd.f32 %v11861_v29, %v11738_v58 }
 0x661   : > { %v12396_v61 = vadd.f32 %v16160_v19, %v12360_v28  ;;  %v12359_v39 = vld [vmem:[#allocation4 + $0x50] sm:$0xff]  ;;  %11934 = vst.msk [vmem:[#allocation4 + $0x78] sm:$0xff] %vm689_vm1, %v11898_v62  ;;  %v11870_v62 = vld [vmem:[#allocation4 + $0xb8] sm:$0xff] }
 0x662   : > { %v12395_v38 = vadd.f32 %v12359_v39, %v12220_v25  ;;  %11933 = vst.msk [vmem:[#allocation4 + $0x70] sm:$0xff] %vm689_vm1, %v11897_v56  ;;  %v16113_v16 = vpop.f32.mrb[180].mxu1  ;;  %v11869_v28 = vld [vmem:[#allocation4 + $0xb0] sm:$0xff] }
 0x663   : > { %v16169_v2 = vpop.f32.mrb[216].mxu0  ;;  %12432 = vst.msk [vmem:[#allocation4 + $0x58] sm:$0xff] %vm689_vm1, %v12396_v61  ;;  %v11900_v12 = vadd.f32 %v16113_v16, %v11864_v57  ;;  %v11748_v17 = vpop.f32.mrb[181].mxu1 }
 0x664   : > { %v12250_v59 = vpop.f32.mrb[217].mxu0  ;;  %12431 = vst.msk [vmem:[#allocation4 + $0x50] sm:$0xff] %vm689_vm1, %v12395_v38  ;;  %v12362_v22 = vld [vmem:[#allocation4 + $0x68] sm:$0xff]  ;;  %v11899_v18 = vadd.f32 %v11863_v44, %v11748_v17 }
 0x665   : > { %v12398_v35 = vadd.f32 %v16163_v15, %v12362_v22  ;;  %v12361_v51 = vld [vmem:[#allocation4 + $0x60] sm:$0xff]  ;;  %11936 = vst.msk [vmem:[#allocation4 + $0x88] sm:$0xff] %vm689_vm1, %v11900_v12  ;;  %v11872_v12 = vld [vmem:[#allocation4 + $0xc8] sm:$0xff] }
 0x666   : > { %v12397_v60 = vadd.f32 %v12361_v51, %v12230_v49  ;;  %11935 = vst.msk [vmem:[#allocation4 + $0x80] sm:$0xff] %vm689_vm1, %v11899_v18  ;;  %v16116_v19 = vpop.f32.mrb[182].mxu1  ;;  %v11871_v22 = vld [vmem:[#allocation4 + $0xc0] sm:$0xff] }
 0x667   : > { %v16172_v8 = vpop.f32.mrb[218].mxu0  ;;  %12434 = vst.msk [vmem:[#allocation4 + $0x68] sm:$0xff] %vm689_vm1, %v12398_v35  ;;  %v11902_v6 = vadd.f32 %v16116_v19, %v11866_v32  ;;  %v11758_v25 = vpop.f32.mrb[183].mxu1 }
 0x668   : > { %v12260_v42 = vpop.f32.mrb[219].mxu0  ;;  %12433 = vst.msk [vmem:[#allocation4 + $0x60] sm:$0xff] %vm689_vm1, %v12397_v60  ;;  %v12364_v20 = vld [vmem:[#allocation4 + $0x78] sm:$0xff]  ;;  %v11901_v45 = vadd.f32 %v11865_v24, %v11758_v25 }
 0x669   : > { %v12400_v30 = vadd.f32 %v16166_v47, %v12364_v20  ;;  %v12363_v14 = vld [vmem:[#allocation4 + $0x70] sm:$0xff]  ;;  %11938 = vst.msk [vmem:[#allocation4 + $0x98] sm:$0xff] %vm689_vm1, %v11902_v6  ;;  %v11874_v6 = vld [vmem:[#allocation4 + $0xd8] sm:$0xff] }
 0x66a   : > { %v12399_v11 = vadd.f32 %v12363_v14, %v12240_v31  ;;  %11937 = vst.msk [vmem:[#allocation4 + $0x90] sm:$0xff] %vm689_vm1, %v11901_v45  ;;  %v16119_v15 = vpop.f32.mrb[184].mxu1  ;;  %v11873_v20 = vld [vmem:[#allocation4 + $0xd0] sm:$0xff] }
 0x66b   : > { %v16175_v3 = vpop.f32.mrb[220].mxu0  ;;  %12436 = vst.msk [vmem:[#allocation4 + $0x78] sm:$0xff] %vm689_vm1, %v12400_v30  ;;  %v11904_v37 = vadd.f32 %v16119_v15, %v11868_v0  ;;  %v11768_v49 = vpop.f32.mrb[185].mxu1 }
 0x66c   : > { %v12270_v41 = vpop.f32.mrb[221].mxu0  ;;  %12435 = vst.msk [vmem:[#allocation4 + $0x70] sm:$0xff] %vm689_vm1, %v12399_v11  ;;  %v12366_v43 = vld [vmem:[#allocation4 + $0x88] sm:$0xff]  ;;  %v11903_v1 = vadd.f32 %v11867_v52, %v11768_v49 }
 0x66d   : > { %v12402_v13 = vadd.f32 %v16169_v2, %v12366_v43  ;;  %v12365_v27 = vld [vmem:[#allocation4 + $0x80] sm:$0xff]  ;;  %11940 = vst.msk [vmem:[#allocation4 + $0xa8] sm:$0xff] %vm689_vm1, %v11904_v37  ;;  %v11876_v37 = vld [vmem:[#allocation4 + $0xe8] sm:$0xff] }
 0x66e   : > { %v12401_v36 = vadd.f32 %v12365_v27, %v12250_v59  ;;  %11939 = vst.msk [vmem:[#allocation4 + $0xa0] sm:$0xff] %vm689_vm1, %v11903_v1  ;;  %v16122_v47 = vpop.f32.mrb[186].mxu1  ;;  %v11875_v43 = vld [vmem:[#allocation4 + $0xe0] sm:$0xff] }
 0x66f   : > { %v16178_v58 = vpop.f32.mrb[222].mxu0  ;;  %12438 = vst.msk [vmem:[#allocation4 + $0x88] sm:$0xff] %vm689_vm1, %v12402_v13  ;;  %v11906_v29 = vadd.f32 %v16122_v47, %v11870_v62  ;;  %v11778_v31 = vpop.f32.mrb[187].mxu1 }
 0x670   : > { %v12280_v56 = vpop.f32.mrb[223].mxu0  ;;  %12437 = vst.msk [vmem:[#allocation4 + $0x80] sm:$0xff] %vm689_vm1, %v12401_v36  ;;  %v12368_v61 = vld [vmem:[#allocation4 + $0x98] sm:$0xff]  ;;  %v11905_v39 = vadd.f32 %v11869_v28, %v11778_v31 }
 0x671   : > { %v12404_v38 = vadd.f32 %v16172_v8, %v12368_v61  ;;  %v12367_v16 = vld [vmem:[#allocation4 + $0x90] sm:$0xff]  ;;  %11942 = vst.msk [vmem:[#allocation4 + $0xb8] sm:$0xff] %vm689_vm1, %v11906_v29  ;;  %v11878_v29 = vld [vmem:[#allocation4 + $0xf8] sm:$0xff] }
 0x672   : > { %v12403_v57 = vadd.f32 %v12367_v16, %v12260_v42  ;;  %11941 = vst.msk [vmem:[#allocation4 + $0xb0] sm:$0xff] %vm689_vm1, %v11905_v39  ;;  %v16125_v2 = vpop.f32.mrb[188].mxu1  ;;  %v11877_v61 = vld [vmem:[#allocation4 + $0xf0] sm:$0xff] }
 0x673   : > { %v16181_v17 = vpop.f32.mrb[224].mxu0  ;;  %12440 = vst.msk [vmem:[#allocation4 + $0x98] sm:$0xff] %vm689_vm1, %v12404_v38  ;;  %v11908_v44 = vadd.f32 %v16125_v2, %v11872_v12  ;;  %v11788_v59 = vpop.f32.mrb[189].mxu1 }
 0x674   : > { %v12290_v18 = vpop.f32.mrb[225].mxu0  ;;  %12439 = vst.msk [vmem:[#allocation4 + $0x90] sm:$0xff] %vm689_vm1, %v12403_v57  ;;  %v12370_v35 = vld [vmem:[#allocation4 + $0xa8] sm:$0xff]  ;;  %v11907_v51 = vadd.f32 %v11871_v22, %v11788_v59 }
 0x675   : > { %v12406_v60 = vadd.f32 %v16175_v3, %v12370_v35  ;;  %v12369_v19 = vld [vmem:[#allocation4 + $0xa0] sm:$0xff]  ;;  %11944 = vst.msk [vmem:[#allocation4 + $0xc8] sm:$0xff] %vm689_vm1, %v11908_v44  ;;  %v11880_v44 = vld [vmem:[#allocation4 + $0x108] sm:$0xff] }
 0x676   : > { %v12405_v32 = vadd.f32 %v12369_v19, %v12270_v41  ;;  %11943 = vst.msk [vmem:[#allocation4 + $0xc0] sm:$0xff] %vm689_vm1, %v11907_v51  ;;  %v16128_v8 = vpop.f32.mrb[190].mxu1  ;;  %v11879_v35 = vld [vmem:[#allocation4 + $0x100] sm:$0xff] }
 0x677   : > { %v16184_v25 = vpop.f32.mrb[226].mxu0  ;;  %12442 = vst.msk [vmem:[#allocation4 + $0xa8] sm:$0xff] %vm689_vm1, %v12406_v60  ;;  %v11910_v24 = vadd.f32 %v16128_v8, %v11874_v6  ;;  %v11798_v42 = vpop.f32.mrb[191].mxu1 }
 0x678   : > { %v12300_v45 = vpop.f32.mrb[227].mxu0  ;;  %12441 = vst.msk [vmem:[#allocation4 + $0xa0] sm:$0xff] %vm689_vm1, %v12405_v32  ;;  %v12372_v30 = vld [vmem:[#allocation4 + $0xb8] sm:$0xff]  ;;  %v11909_v14 = vadd.f32 %v11873_v20, %v11798_v42 }
 0x679   : > { %v12408_v11 = vadd.f32 %v16178_v58, %v12372_v30  ;;  %v12371_v15 = vld [vmem:[#allocation4 + $0xb0] sm:$0xff]  ;;  %11946 = vst.msk [vmem:[#allocation4 + $0xd8] sm:$0xff] %vm689_vm1, %v11910_v24  ;;  %v11882_v24 = vld [vmem:[#allocation4 + $0x118] sm:$0xff] }
 0x67a   : > { %v12407_v0 = vadd.f32 %v12371_v15, %v12280_v56  ;;  %11945 = vst.msk [vmem:[#allocation4 + $0xd0] sm:$0xff] %vm689_vm1, %v11909_v14  ;;  %v16131_v3 = vpop.f32.mrb[192].mxu1  ;;  %v11881_v30 = vld [vmem:[#allocation4 + $0x110] sm:$0xff] }
 0x67b   : > { %v16187_v49 = vpop.f32.mrb[228].mxu0  ;;  %12444 = vst.msk [vmem:[#allocation4 + $0xb8] sm:$0xff] %vm689_vm1, %v12408_v11  ;;  %v11912_v52 = vadd.f32 %v16131_v3, %v11876_v37  ;;  %v11808_v41 = vpop.f32.mrb[193].mxu1 }
 0x67c   : > { %v12310_v1 = vpop.f32.mrb[229].mxu0  ;;  %12443 = vst.msk [vmem:[#allocation4 + $0xb0] sm:$0xff] %vm689_vm1, %v12407_v0  ;;  %v12374_v13 = vld [vmem:[#allocation4 + $0xc8] sm:$0xff]  ;;  %v11911_v27 = vadd.f32 %v11875_v43, %v11808_v41 }
 0x67d   : > { %v12410_v36 = vadd.f32 %v16181_v17, %v12374_v13  ;;  %v12373_v47 = vld [vmem:[#allocation4 + $0xc0] sm:$0xff]  ;;  %11948 = vst.msk [vmem:[#allocation4 + $0xe8] sm:$0xff] %vm689_vm1, %v11912_v52  ;;  %v12852_v52 = vld [vmem:[#allocation4 + $0x8] sm:$0xff] }
 0x67e   : > { %v12409_v62 = vadd.f32 %v12373_v47, %v12290_v18  ;;  %11947 = vst.msk [vmem:[#allocation4 + $0xe0] sm:$0xff] %vm689_vm1, %v11911_v27  ;;  %v16134_v58 = vpop.f32.mrb[194].mxu1 }
 0x67f   : > { %v16190_v31 = vpop.f32.mrb[230].mxu0  ;;  %12446 = vst.msk [vmem:[#allocation4 + $0xc8] sm:$0xff] %vm689_vm1, %v12410_v36  ;;  %v11914_v28 = vadd.f32 %v16134_v58, %v11878_v29  ;;  %v11818_v56 = vpop.f32.mrb[195].mxu1  ;;  %v12854_v29 = vld [vmem:[#allocation4 + $0x18] sm:$0xff] }
 0x680   : > { %v12320_v39 = vpop.f32.mrb[231].mxu0  ;;  %12445 = vst.msk [vmem:[#allocation4 + $0xc0] sm:$0xff] %vm689_vm1, %v12409_v62  ;;  %v12376_v38 = vld [vmem:[#allocation4 + $0xd8] sm:$0xff]  ;;  %v11913_v16 = vadd.f32 %v11877_v61, %v11818_v56  ;;  %v12853_v56 = vld [vmem:[#allocation4 + $0x10] sm:$0xff] }
 0x681   : > { %v12412_v57 = vadd.f32 %v16184_v25, %v12376_v38  ;;  %v12375_v2 = vld [vmem:[#allocation4 + $0xd0] sm:$0xff]  ;;  %11950 = vst.msk [vmem:[#allocation4 + $0xf8] sm:$0xff] %vm689_vm1, %v11914_v28 }
 0x682   : > { %v12411_v12 = vadd.f32 %v12375_v2, %v12300_v45  ;;  %11949 = vst.msk [vmem:[#allocation4 + $0xf0] sm:$0xff] %vm689_vm1, %v11913_v16  ;;  %v16137_v17 = vpop.f32.mrb[196].mxu1 }
 0x683   : > { %v16193_v59 = vpop.f32.mrb[232].mxu0  ;;  %12448 = vst.msk [vmem:[#allocation4 + $0xd8] sm:$0xff] %vm689_vm1, %v12412_v57  ;;  %v11916_v22 = vadd.f32 %v16137_v17, %v11880_v44  ;;  %v11828_v18 = vpop.f32.mrb[197].mxu1  ;;  %v20686_v57 = vld [vmem:[%s20925_s8] ss:$0 sm:$0xff]  ;;  %v12856_v17 = vld [vmem:[#allocation4 + $0x28] sm:$0xff] }
 0x684   : > { %v12330_v51 = vpop.f32.mrb[233].mxu0  ;;  %12447 = vst.msk [vmem:[#allocation4 + $0xd0] sm:$0xff] %vm689_vm1, %v12411_v12  ;;  %v12378_v60 = vld [vmem:[#allocation4 + $0xe8] sm:$0xff]  ;;  %v11915_v19 = vadd.f32 %v11879_v35, %v11828_v18  ;;  %v20693_v35 = vld [vmem:[%s20925_s8 + $0x1] ss:$0 sm:$0xff] }
 0x685   : > { %v12414_v32 = vadd.f32 %v16187_v49, %v12378_v60  ;;  %v12377_v8 = vld [vmem:[#allocation4 + $0xe0] sm:$0xff]  ;;  %11952 = vst.msk [vmem:[#allocation4 + $0x108] sm:$0xff] %vm689_vm1, %v11916_v22 }
 0x686   : > { %v12413_v6 = vadd.f32 %v12377_v8, %v12310_v1  ;;  %11951 = vst.msk [vmem:[#allocation4 + $0x100] sm:$0xff] %vm689_vm1, %v11915_v19  ;;  %v16140_v25 = vpop.f32.mrb[198].mxu1  ;;  %v12851_v1 = vld [vmem:[#allocation4] sm:$0xff] }
 0x687   : > { %v16196_v42 = vpop.f32.mrb[234].mxu0  ;;  %12450 = vst.msk [vmem:[#allocation4 + $0xe8] sm:$0xff] %vm689_vm1, %v12414_v32  ;;  %v11918_v20 = vadd.f32 %v16140_v25, %v11882_v24  ;;  %v11838_v45 = vpop.f32.mrb[199].mxu1  ;;  %v12855_v22 = vld [vmem:[#allocation4 + $0x20] sm:$0xff] }
 0x688   : > { %v12340_v14 = vpop.f32.mrb[235].mxu0  ;;  %12449 = vst.msk [vmem:[#allocation4 + $0xe0] sm:$0xff] %vm689_vm1, %v12413_v6  ;;  %v12380_v11 = vld [vmem:[#allocation4 + $0xf8] sm:$0xff]  ;;  %v11917_v15 = vadd.f32 %v11881_v30, %v11838_v45 }
 0x689   : > { %v12416_v0 = vadd.f32 %v16190_v31, %v12380_v11  ;;  %v12379_v3 = vld [vmem:[#allocation4 + $0xf0] sm:$0xff]  ;;  %11954 = vst.msk [vmem:[#allocation4 + $0x118] sm:$0xff] %vm689_vm1, %v11918_v20  ;;  %v12858_v6 = vld [vmem:[#allocation4 + $0x38] sm:$0xff] }
 0x68a   : > { %v12415_v37 = vadd.f32 %v12379_v3, %v12320_v39  ;;  %11953 = vst.msk [vmem:[#allocation4 + $0x110] sm:$0xff] %vm689_vm1, %v11917_v15  ;;  %v16201_v49 = vpop.f32.mrb[200].mxu1  ;;  %v12857_v20 = vld [vmem:[#allocation4 + $0x30] sm:$0xff] }
 0x68b   : > { %12452 = vst.msk [vmem:[#allocation4 + $0xf8] sm:$0xff] %vm689_vm1, %v12416_v0  ;;  %v12888_v41 = vadd.f32 %v16201_v49, %v12852_v52  ;;  %v12672_v43 = vpop.f32.mrb[201].mxu1  ;;  %v12860_v52 = vld [vmem:[#allocation4 + $0x48] sm:$0xff] }
 0x68c   : > { %12451 = vst.msk [vmem:[#allocation4 + $0xf0] sm:$0xff] %vm689_vm1, %v12415_v37  ;;  %v12382_v13 = vld [vmem:[#allocation4 + $0x108] sm:$0xff]  ;;  %v12887_v27 = vadd.f32 %v12851_v1, %v12672_v43 }
 0x68d   : > { %v12418_v36 = vadd.f32 %v16193_v59, %v12382_v13  ;;  %v12381_v47 = vld [vmem:[#allocation4 + $0x100] sm:$0xff]  ;;  %12924 = vst.msk [vmem:[#allocation4 + $0x8] sm:$0xff] %vm689_vm1, %v12888_v41 }
 0x68e   : > { %v12417_v62 = vadd.f32 %v12381_v47, %v12330_v51  ;;  %12923 = vst.msk [vmem:[#allocation4] sm:$0xff] %vm689_vm1, %v12887_v27  ;;  %v16204_v58 = vpop.f32.mrb[202].mxu1  ;;  %v12859_v27 = vld [vmem:[#allocation4 + $0x40] sm:$0xff] }
 0x68f   : > { %12454 = vst.msk [vmem:[#allocation4 + $0x108] sm:$0xff] %vm689_vm1, %v12418_v36  ;;  %v12890_v31 = vadd.f32 %v16204_v58, %v12854_v29  ;;  %v12682_v28 = vpop.f32.mrb[203].mxu1 }
 0x690   : > { %12453 = vst.msk [vmem:[#allocation4 + $0x100] sm:$0xff] %vm689_vm1, %v12417_v62  ;;  %v12889_v61 = vadd.f32 %v12853_v56, %v12682_v28  ;;  %v12384_v39 = vld [vmem:[#allocation4 + $0x118] sm:$0xff] }
 0x691   : > { %12926 = vst.msk [vmem:[#allocation4 + $0x18] sm:$0xff] %vm689_vm1, %v12890_v31  ;;  %v12420_v38 = vadd.f32 %v16196_v42, %v12384_v39  ;;  %v12383_v16 = vld [vmem:[#allocation4 + $0x110] sm:$0xff] }
 0x692   : > { %12925 = vst.msk [vmem:[#allocation4 + $0x10] sm:$0xff] %vm689_vm1, %v12889_v61  ;;  %v12419_v2 = vadd.f32 %v12383_v16, %v12340_v14  ;;  %v16207_v12 = vpop.f32.mrb[204].mxu1  ;;  %v12862_v61 = vld [vmem:[#allocation4 + $0x58] sm:$0xff] }
 0x693   : > { %12456 = vst.msk [vmem:[#allocation4 + $0x118] sm:$0xff] %vm689_vm1, %v12420_v38  ;;  %v12892_v44 = vadd.f32 %v16207_v12, %v12856_v17  ;;  %v12692_v59 = vpop.f32.mrb[205].mxu1  ;;  %v12861_v12 = vld [vmem:[#allocation4 + $0x50] sm:$0xff] }
 0x694   : > { %v12960_v18 = vld [vmem:[#allocation4 + $0x8] sm:$0xff]  ;;  %12455 = vst.msk [vmem:[#allocation4 + $0x110] sm:$0xff] %vm689_vm1, %v12419_v2  ;;  %v12891_v51 = vadd.f32 %v12855_v22, %v12692_v59 }
 0x695   : > { %v13001_v60 = vmul.f32 %v20686_v57, %v12960_v18  ;;  %v12959_v19 = vld [vmem:[#allocation4] sm:$0xff]  ;;  %12928 = vst.msk [vmem:[#allocation4 + $0x28] sm:$0xff] %vm689_vm1, %v12892_v44 }
 0x696   : > { %v13000_v32 = vmul.f32 %v20686_v57, %v12959_v19  ;;  %12927 = vst.msk [vmem:[#allocation4 + $0x20] sm:$0xff] %vm689_vm1, %v12891_v51  ;;  %v16210_v8 = vpop.f32.mrb[206].mxu1 }
 0x697   : > { %v13042_v25 = vadd.f32 %v20693_v35, %v13001_v60  ;;  %v12894_v24 = vadd.f32 %v16210_v8, %v12858_v6  ;;  %v12702_v42 = vpop.f32.mrb[207].mxu1 }
 0x698   : > { %v13041_v45 = vadd.f32 %v20693_v35, %v13000_v32  ;;  %v12962_v30 = vld [vmem:[#allocation4 + $0x18] sm:$0xff]  ;;  %v12893_v14 = vadd.f32 %v12857_v20, %v12702_v42  ;;  %v12864_v32 = vld [vmem:[#allocation4 + $0x68] sm:$0xff]  ;;  %v12863_v42 = vld [vmem:[#allocation4 + $0x60] sm:$0xff] }
 0x699   : > { %v13078_v11 = vmax.f32 %v13042_v25, 0.0  ;;  %v13003_v15 = vmul.f32 %v20686_v57, %v12962_v30  ;;  %v12961_v0 = vld [vmem:[#allocation4 + $0x10] sm:$0xff]  ;;  %12930 = vst.msk [vmem:[#allocation4 + $0x38] sm:$0xff] %vm689_vm1, %v12894_v24 }
 0x69a   : > { %v13077_v3 = vmax.f32 %v13041_v45, 0.0  ;;  %v13002_v37 = vmul.f32 %v20686_v57, %v12961_v0  ;;  %12929 = vst.msk [vmem:[#allocation4 + $0x30] sm:$0xff] %vm689_vm1, %v12893_v14  ;;  %v16213_v49 = vpop.f32.mrb[208].mxu1 }
 0x69b   : > { %v13114_v41 = vmul.f32 %v13078_v11, %v19587_v50  ;;  %v13044_v43 = vadd.f32 %v20693_v35, %v13003_v15  ;;  %v12896_v1 = vadd.f32 %v16213_v49, %v12860_v52  ;;  %v12712_v13 = vpop.f32.mrb[209].mxu1 }
 0x69c   : > { %v13113_v36 = vmul.f32 %v13077_v3, %v19556_v55  ;;  %v13043_v47 = vadd.f32 %v20693_v35, %v13002_v37  ;;  %v12964_v62 = vld [vmem:[#allocation4 + $0x28] sm:$0xff]  ;;  %v12895_v58 = vadd.f32 %v12859_v27, %v12712_v13  ;;  %v12866_v37 = vld [vmem:[#allocation4 + $0x78] sm:$0xff] }
 0x69d   : > { %13150 = vst.msk [vmem:[%s20708_s18 + $0x8] sm:$0xff] %vm689_vm1, %v13114_v41  ;;  %v13080_v29 = vmax.f32 %v13044_v43, 0.0  ;;  %v13005_v31 = vmul.f32 %v20686_v57, %v12964_v62  ;;  %v12963_v28 = vld [vmem:[#allocation4 + $0x20] sm:$0xff]  ;;  %12932 = vst.msk [vmem:[#allocation4 + $0x48] sm:$0xff] %vm689_vm1, %v12896_v1  ;;  %v12865_v1 = vld [vmem:[#allocation4 + $0x70] sm:$0xff] }
 0x69e   : > { %13149 = vst.msk [vmem:[%s20708_s18] sm:$0xff] %vm689_vm1, %v13113_v36  ;;  %v13079_v50 = vmax.f32 %v13043_v47, 0.0  ;;  %v13004_v56 = vmul.f32 %v20686_v57, %v12963_v28  ;;  %12931 = vst.msk [vmem:[#allocation4 + $0x40] sm:$0xff] %vm689_vm1, %v12895_v58  ;;  %v16216_v55 = vpop.f32.mrb[210].mxu1  ;;  %v12868_v28 = vld [vmem:[#allocation4 + $0x88] sm:$0xff] }
 0x69f   : > { %v13116_v39 = vmul.f32 %v13080_v29, %v19585_v46  ;;  %v13046_v38 = vadd.f32 %v20693_v35, %v13005_v31  ;;  %v12898_v16 = vadd.f32 %v16216_v55, %v12862_v61  ;;  %v12722_v2 = vpop.f32.mrb[211].mxu1 }
 0x6a0   : > { %v13115_v17 = vmul.f32 %v13079_v50, %v19571_v4  ;;  %v13045_v44 = vadd.f32 %v20693_v35, %v13004_v56  ;;  %v12966_v59 = vld [vmem:[#allocation4 + $0x38] sm:$0xff]  ;;  %v12897_v22 = vadd.f32 %v12861_v12, %v12722_v2 }
 0x6a1   : > { %13152 = vst.msk [vmem:[%s20708_s18 + $0x18] sm:$0xff] %vm689_vm1, %v13116_v39  ;;  %v13082_v18 = vmax.f32 %v13046_v38, 0.0  ;;  %v13007_v51 = vmul.f32 %v20686_v57, %v12966_v59  ;;  %v12965_v60 = vld [vmem:[#allocation4 + $0x30] sm:$0xff]  ;;  %12934 = vst.msk [vmem:[#allocation4 + $0x58] sm:$0xff] %vm689_vm1, %v12898_v16  ;;  %v12867_v39 = vld [vmem:[#allocation4 + $0x80] sm:$0xff] }
 0x6a2   : > { %13151 = vst.msk [vmem:[%s20708_s18 + $0x10] sm:$0xff] %vm689_vm1, %v13115_v17  ;;  %v13081_v46 = vmax.f32 %v13045_v44, 0.0  ;;  %v13006_v19 = vmul.f32 %v20686_v57, %v12965_v60  ;;  %12933 = vst.msk [vmem:[#allocation4 + $0x50] sm:$0xff] %vm689_vm1, %v12897_v22  ;;  %v16219_v4 = vpop.f32.mrb[212].mxu1 }
 0x6a3   : > { %v13118_v8 = vmul.f32 %v13082_v18, %v19597_v7  ;;  %v13048_v6 = vadd.f32 %v20693_v35, %v13007_v51  ;;  %v12900_v25 = vadd.f32 %v16219_v4, %v12864_v32  ;;  %v12732_v24 = vpop.f32.mrb[213].mxu1  ;;  %v12870_v18 = vld [vmem:[#allocation4 + $0x98] sm:$0xff]  ;;  %v12869_v4 = vld [vmem:[#allocation4 + $0x90] sm:$0xff] }
 0x6a4   : > { %v13117_v20 = vmul.f32 %v13081_v46, %v19599_v48  ;;  %v13047_v45 = vadd.f32 %v20693_v35, %v13006_v19  ;;  %v12968_v30 = vld [vmem:[#allocation4 + $0x48] sm:$0xff]  ;;  %v12899_v14 = vadd.f32 %v12863_v42, %v12732_v24 }
 0x6a5   : > { %13154 = vst.msk [vmem:[%s20708_s18 + $0x28] sm:$0xff] %vm689_vm1, %v13118_v8  ;;  %v13084_v11 = vmax.f32 %v13048_v6, 0.0  ;;  %v13009_v15 = vmul.f32 %v20686_v57, %v12968_v30  ;;  %v12967_v0 = vld [vmem:[#allocation4 + $0x40] sm:$0xff]  ;;  %12936 = vst.msk [vmem:[#allocation4 + $0x68] sm:$0xff] %vm689_vm1, %v12900_v25  ;;  %v12872_v30 = vld [vmem:[#allocation4 + $0xa8] sm:$0xff] }
 0x6a6   : > { %13153 = vst.msk [vmem:[%s20708_s18 + $0x20] sm:$0xff] %vm689_vm1, %v13117_v20  ;;  %v13083_v7 = vmax.f32 %v13047_v45, 0.0  ;;  %v13008_v3 = vmul.f32 %v20686_v57, %v12967_v0  ;;  %12935 = vst.msk [vmem:[#allocation4 + $0x60] sm:$0xff] %vm689_vm1, %v12899_v14  ;;  %v16222_v48 = vpop.f32.mrb[214].mxu1 }
 0x6a7   : > { %v13120_v49 = vmul.f32 %v13084_v11, %v19609_v54  ;;  %v13050_v52 = vadd.f32 %v20693_v35, %v13009_v15  ;;  %v12902_v41 = vadd.f32 %v16222_v48, %v12866_v37  ;;  %v12742_v43 = vpop.f32.mrb[215].mxu1 }
 0x6a8   : > { %v13119_v13 = vmul.f32 %v13083_v7, %v19611_v10  ;;  %v13049_v27 = vadd.f32 %v20693_v35, %v13008_v3  ;;  %v12970_v36 = vld [vmem:[#allocation4 + $0x58] sm:$0xff]  ;;  %v12901_v47 = vadd.f32 %v12865_v1, %v12742_v43  ;;  %v12871_v7 = vld [vmem:[#allocation4 + $0xa0] sm:$0xff] }
 0x6a9   : > { %13156 = vst.msk [vmem:[%s20708_s18 + $0x38] sm:$0xff] %vm689_vm1, %v13120_v49  ;;  %v13086_v62 = vmax.f32 %v13050_v52, 0.0  ;;  %v13011_v58 = vmul.f32 %v20686_v57, %v12970_v36  ;;  %v12969_v29 = vld [vmem:[#allocation4 + $0x50] sm:$0xff]  ;;  %12938 = vst.msk [vmem:[#allocation4 + $0x78] sm:$0xff] %vm689_vm1, %v12902_v41 }
 0x6aa   : > { %13155 = vst.msk [vmem:[%s20708_s18 + $0x30] sm:$0xff] %vm689_vm1, %v13119_v13  ;;  %v13085_v54 = vmax.f32 %v13049_v27, 0.0  ;;  %v13010_v31 = vmul.f32 %v20686_v57, %v12969_v29  ;;  %12937 = vst.msk [vmem:[#allocation4 + $0x70] sm:$0xff] %vm689_vm1, %v12901_v47  ;;  %v16225_v10 = vpop.f32.mrb[216].mxu1  ;;  %v12874_v13 = vld [vmem:[#allocation4 + $0xb8] sm:$0xff] }
 0x6ab   : > { %v13122_v50 = vmul.f32 %v13086_v62, %v19621_v23  ;;  %v13052_v56 = vadd.f32 %v20693_v35, %v13011_v58  ;;  %v12904_v55 = vadd.f32 %v16225_v10, %v12868_v28  ;;  %v12752_v61 = vpop.f32.mrb[217].mxu1  ;;  %v12873_v58 = vld [vmem:[#allocation4 + $0xb0] sm:$0xff] }
 0x6ac   : > { %v13121_v38 = vmul.f32 %v13085_v54, %v19623_v34  ;;  %v13051_v16 = vadd.f32 %v20693_v35, %v13010_v31  ;;  %v12972_v2 = vld [vmem:[#allocation4 + $0x68] sm:$0xff]  ;;  %v12903_v12 = vadd.f32 %v12867_v39, %v12752_v61 }
 0x6ad   : > { %13158 = vst.msk [vmem:[%s20708_s18 + $0x48] sm:$0xff] %vm689_vm1, %v13122_v50  ;;  %v13088_v17 = vmax.f32 %v13052_v56, 0.0  ;;  %v13013_v44 = vmul.f32 %v20686_v57, %v12972_v2  ;;  %v12971_v59 = vld [vmem:[#allocation4 + $0x60] sm:$0xff]  ;;  %12940 = vst.msk [vmem:[#allocation4 + $0x88] sm:$0xff] %vm689_vm1, %v12904_v55  ;;  %v12876_v61 = vld [vmem:[#allocation4 + $0xc8] sm:$0xff] }
 0x6ae   : > { %13157 = vst.msk [vmem:[%s20708_s18 + $0x40] sm:$0xff] %vm689_vm1, %v13121_v38  ;;  %v13087_v23 = vmax.f32 %v13051_v16, 0.0  ;;  %v13012_v22 = vmul.f32 %v20686_v57, %v12971_v59  ;;  %12939 = vst.msk [vmem:[#allocation4 + $0x80] sm:$0xff] %vm689_vm1, %v12903_v12  ;;  %v16228_v34 = vpop.f32.mrb[218].mxu1  ;;  %v12875_v12 = vld [vmem:[#allocation4 + $0xc0] sm:$0xff] }
 0x6af   : > { %v13124_v51 = vmul.f32 %v13088_v17, %v19633_v21  ;;  %v13054_v60 = vadd.f32 %v20693_v35, %v13013_v44  ;;  %v12906_v46 = vadd.f32 %v16228_v34, %v12870_v18  ;;  %v12762_v19 = vpop.f32.mrb[219].mxu1 }
 0x6b0   : > { %v13123_v32 = vmul.f32 %v13087_v23, %v19635_v33  ;;  %v13053_v8 = vadd.f32 %v20693_v35, %v13012_v22  ;;  %v12974_v6 = vld [vmem:[#allocation4 + $0x78] sm:$0xff]  ;;  %v12905_v25 = vadd.f32 %v12869_v4, %v12762_v19 }
 0x6b1   : > { %13160 = vst.msk [vmem:[%s20708_s18 + $0x58] sm:$0xff] %vm689_vm1, %v13124_v51  ;;  %v13090_v24 = vmax.f32 %v13054_v60, 0.0  ;;  %v13015_v42 = vmul.f32 %v20686_v57, %v12974_v6  ;;  %v12973_v20 = vld [vmem:[#allocation4 + $0x70] sm:$0xff]  ;;  %12942 = vst.msk [vmem:[#allocation4 + $0x98] sm:$0xff] %vm689_vm1, %v12906_v46  ;;  %v12878_v60 = vld [vmem:[#allocation4 + $0xd8] sm:$0xff] }
 0x6b2   : > { %13159 = vst.msk [vmem:[%s20708_s18 + $0x50] sm:$0xff] %vm689_vm1, %v13123_v32  ;;  %v13089_v21 = vmax.f32 %v13053_v8, 0.0  ;;  %v13014_v45 = vmul.f32 %v20686_v57, %v12973_v20  ;;  %12941 = vst.msk [vmem:[#allocation4 + $0x90] sm:$0xff] %vm689_vm1, %v12905_v25  ;;  %v16231_v33 = vpop.f32.mrb[220].mxu1  ;;  %v21071_v46 = vld [vmem:[#allocation33_spill] sm:$0xff]  ;;  %v12877_v6 = vld [vmem:[#allocation4 + $0xd0] sm:$0xff] }
 0x6b3   : > { %v13126_v14 = vmul.f32 %v13090_v24, %v19655_v26  ;;  %v13056_v11 = vadd.f32 %v20693_v35, %v13015_v42  ;;  %v12908_v15 = vadd.f32 %v16231_v33, %v12872_v30  ;;  %v12772_v0 = vpop.f32.mrb[221].mxu1  ;;  %v21072_v25 = vld [vmem:[#allocation14_spill] sm:$0xff] }
 0x6b4   : > { %v13125_v3 = vmul.f32 %v13089_v21, %v19657_v53  ;;  %v13055_v48 = vadd.f32 %v20693_v35, %v13014_v45  ;;  %v12976_v37 = vld [vmem:[#allocation4 + $0x88] sm:$0xff]  ;;  %v12907_v49 = vadd.f32 %v12871_v7, %v12772_v0  ;;  %v21073_v7 = vld [vmem:[#allocation15_spill] sm:$0xff] }
 0x6b5   : > { %13162 = vst.msk [vmem:[%s20708_s18 + $0x68] sm:$0xff] %vm689_vm1, %v13126_v14  ;;  %v13092_v52 = vmax.f32 %v13056_v11, 0.0  ;;  %v13017_v41 = vmul.f32 %v20686_v57, %v12976_v37  ;;  %v12975_v43 = vld [vmem:[#allocation4 + $0x80] sm:$0xff]  ;;  %12944 = vst.msk [vmem:[#allocation4 + $0xa8] sm:$0xff] %vm689_vm1, %v12908_v15  ;;  %v12880_v0 = vld [vmem:[#allocation4 + $0xe8] sm:$0xff] }
 0x6b6   : > { %13161 = vst.msk [vmem:[%s20708_s18 + $0x60] sm:$0xff] %vm689_vm1, %v13125_v3  ;;  %v13091_v26 = vmax.f32 %v13055_v48, 0.0  ;;  %v13016_v1 = vmul.f32 %v20686_v57, %v12975_v43  ;;  %12943 = vst.msk [vmem:[#allocation4 + $0xa0] sm:$0xff] %vm689_vm1, %v12907_v49  ;;  %v16234_v53 = vpop.f32.mrb[222].mxu1 }
 0x6b7   : > { %v13128_v27 = vmul.f32 %v13092_v52, %v19677_v63  ;;  %v13058_v36 = vadd.f32 %v20693_v35, %v13017_v41  ;;  %v12910_v47 = vadd.f32 %v16234_v53, %v12874_v13  ;;  %v12782_v62 = vpop.f32.mrb[223].mxu1  ;;  %v12879_v52 = vld [vmem:[#allocation4 + $0xe0] sm:$0xff]  ;;  %v21074_v41 = vld [vmem:[#allocation6_spill] sm:$0xff] }
 0x6b8   : > { %v13127_v29 = vmul.f32 %v13091_v26, %v19679_v9  ;;  %v13057_v54 = vadd.f32 %v20693_v35, %v13016_v1  ;;  %v12978_v31 = vld [vmem:[#allocation4 + $0x98] sm:$0xff]  ;;  %v12909_v10 = vadd.f32 %v12873_v58, %v12782_v62 }
 0x6b9   : > { %13164 = vst.msk [vmem:[%s20708_s18 + $0x78] sm:$0xff] %vm689_vm1, %v13128_v27  ;;  %v13094_v28 = vmax.f32 %v13058_v36, 0.0  ;;  %v13019_v50 = vmul.f32 %v20686_v57, %v12978_v31  ;;  %v12977_v56 = vld [vmem:[#allocation4 + $0x90] sm:$0xff]  ;;  %12946 = vst.msk [vmem:[#allocation4 + $0xb8] sm:$0xff] %vm689_vm1, %v12910_v47 }
 0x6ba   : > { %13163 = vst.msk [vmem:[%s20708_s18 + $0x70] sm:$0xff] %vm689_vm1, %v13127_v29  ;;  %v13093_v63 = vmax.f32 %v13057_v54, 0.0  ;;  %v13018_v55 = vmul.f32 %v20686_v57, %v12977_v56  ;;  %12945 = vst.msk [vmem:[#allocation4 + $0xb0] sm:$0xff] %vm689_vm1, %v12909_v10  ;;  %v16237_v9 = vpop.f32.mrb[224].mxu1  ;;  %v12882_v29 = vld [vmem:[#allocation4 + $0xf8] sm:$0xff]  ;;  %v12881_v56 = vld [vmem:[#allocation4 + $0xf0] sm:$0xff] }
 0x6bb   : > { %v13130_v39 = vmul.f32 %v13094_v28, %v19705_v40  ;;  %v13060_v38 = vadd.f32 %v20693_v35, %v13019_v50  ;;  %v12912_v16 = vadd.f32 %v16237_v9, %v12876_v61  ;;  %v12792_v2 = vpop.f32.mrb[225].mxu1  ;;  %v21075_v54 = vld [vmem:[#allocation16_spill] sm:$0xff] }
 0x6bc   : > { %v13129_v17 = vmul.f32 %v13093_v63, %v19707_v5  ;;  %v13059_v44 = vadd.f32 %v20693_v35, %v13018_v55  ;;  %v12980_v59 = vld [vmem:[#allocation4 + $0xa8] sm:$0xff]  ;;  %v12911_v23 = vadd.f32 %v12875_v12, %v12792_v2 }
 0x6bd   : > { %13166 = vst.msk [vmem:[%s20708_s18 + $0x88] sm:$0xff] %vm689_vm1, %v13130_v39  ;;  %v13096_v22 = vmax.f32 %v13060_v38, 0.0  ;;  %v13021_v34 = vmul.f32 %v20686_v57, %v12980_v59  ;;  %v12979_v18 = vld [vmem:[#allocation4 + $0xa0] sm:$0xff]  ;;  %12948 = vst.msk [vmem:[#allocation4 + $0xc8] sm:$0xff] %vm689_vm1, %v12912_v16  ;;  %v21076_v63 = vld [vmem:[#allocation10_spill] sm:$0xff] }
 0x6be   : > { %13165 = vst.msk [vmem:[%s20708_s18 + $0x80] sm:$0xff] %vm689_vm1, %v13129_v17  ;;  %v13095_v40 = vmax.f32 %v13059_v44, 0.0  ;;  %v13020_v51 = vmul.f32 %v20686_v57, %v12979_v18  ;;  %12947 = vst.msk [vmem:[#allocation4 + $0xc0] sm:$0xff] %vm689_vm1, %v12911_v23  ;;  %v16240_v5 = vpop.f32.mrb[226].mxu1  ;;  %v12884_v59 = vld [vmem:[#allocation4 + $0x108] sm:$0xff]  ;;  %v21077_v23 = vld [vmem:[#allocation32_spill] sm:$0xff] }
 0x6bf   : > { %v13132_v19 = vmul.f32 %v13096_v22, %v21071_v46  ;;  %v13062_v4 = vadd.f32 %v20693_v35, %v13021_v34  ;;  %v12914_v32 = vadd.f32 %v16240_v5, %v12878_v60  ;;  %v12802_v8 = vpop.f32.mrb[227].mxu1  ;;  %v21078_v5 = vld [vmem:[#allocation17_spill] sm:$0xff] }
 0x6c0   : > { %v13131_v24 = vmul.f32 %v13095_v40, %v21072_v25  ;;  %v13061_v42 = vadd.f32 %v20693_v35, %v13020_v51  ;;  %v12982_v20 = vld [vmem:[#allocation4 + $0xb8] sm:$0xff]  ;;  %v12913_v21 = vadd.f32 %v12877_v6, %v12802_v8  ;;  %v12883_v51 = vld [vmem:[#allocation4 + $0x100] sm:$0xff] }
 0x6c1   : > { %13168 = vst.msk [vmem:[%s20708_s18 + $0x98] sm:$0xff] %vm689_vm1, %v13132_v19  ;;  %v13098_v45 = vmax.f32 %v13062_v4, 0.0  ;;  %v13023_v33 = vmul.f32 %v20686_v57, %v12982_v20  ;;  %v12981_v30 = vld [vmem:[#allocation4 + $0xb0] sm:$0xff]  ;;  %12950 = vst.msk [vmem:[#allocation4 + $0xd8] sm:$0xff] %vm689_vm1, %v12914_v32  ;;  %v12886_v20 = vld [vmem:[#allocation4 + $0x118] sm:$0xff] }
 0x6c2   : > { %13167 = vst.msk [vmem:[%s20708_s18 + $0x90] sm:$0xff] %vm689_vm1, %v13131_v24  ;;  %v13097_v14 = vmax.f32 %v13061_v42, 0.0  ;;  %v13022_v11 = vmul.f32 %v20686_v57, %v12981_v30  ;;  %12949 = vst.msk [vmem:[#allocation4 + $0xd0] sm:$0xff] %vm689_vm1, %v12913_v21  ;;  %v16243_v15 = vpop.f32.mrb[228].mxu1  ;;  %v21079_v21 = vld [vmem:[#allocation7_spill] sm:$0xff] }
 0x6c3   : > { %v13134_v3 = vmul.f32 %v13098_v45, %v21073_v7  ;;  %v13064_v48 = vadd.f32 %v20693_v35, %v13023_v33  ;;  %v12916_v37 = vadd.f32 %v16243_v15, %v12880_v0  ;;  %v12812_v49 = vpop.f32.mrb[229].mxu1  ;;  %v21080_v15 = vld [vmem:[#allocation43_spill] sm:$0xff] }
 0x6c4   : > { %v13133_v43 = vmul.f32 %v13097_v14, %v21074_v41  ;;  %v13063_v26 = vadd.f32 %v20693_v35, %v13022_v11  ;;  %v12984_v1 = vld [vmem:[#allocation4 + $0xc8] sm:$0xff]  ;;  %v12915_v53 = vadd.f32 %v12879_v52, %v12812_v49  ;;  %v12885_v11 = vld [vmem:[#allocation4 + $0x110] sm:$0xff] }
 0x6c5   : > { %13170 = vst.msk [vmem:[%s20708_s18 + $0xa8] sm:$0xff] %vm689_vm1, %v13134_v3  ;;  %v13100_v13 = vmax.f32 %v13064_v48, 0.0  ;;  %v13025_v27 = vmul.f32 %v20686_v57, %v12984_v1  ;;  %v12983_v36 = vld [vmem:[#allocation4 + $0xc0] sm:$0xff]  ;;  %12952 = vst.msk [vmem:[#allocation4 + $0xe8] sm:$0xff] %vm689_vm1, %v12916_v37 }
 0x6c6   : > { %13169 = vst.msk [vmem:[%s20708_s18 + $0xa0] sm:$0xff] %vm689_vm1, %v13133_v43  ;;  %v13099_v47 = vmax.f32 %v13063_v26, 0.0  ;;  %v13024_v62 = vmul.f32 %v20686_v57, %v12983_v36  ;;  %12951 = vst.msk [vmem:[#allocation4 + $0xe0] sm:$0xff] %vm689_vm1, %v12915_v53  ;;  %v16246_v58 = vpop.f32.mrb[230].mxu1  ;;  %v21081_v26 = vld [vmem:[#allocation11_spill] sm:$0xff] }
 0x6c7   : > { %v13136_v31 = vmul.f32 %v13100_v13, %v21075_v54  ;;  %v13066_v10 = vadd.f32 %v20693_v35, %v13025_v27  ;;  %v12918_v28 = vadd.f32 %v16246_v58, %v12882_v29  ;;  %v12822_v50 = vpop.f32.mrb[231].mxu1  ;;  %v21082_v13 = vld [vmem:[#allocation36_spill] sm:$0xff] }
 0x6c8   : > { %v13135_v55 = vmul.f32 %v13099_v47, %v21076_v63  ;;  %v13065_v9 = vadd.f32 %v20693_v35, %v13024_v62  ;;  %v12986_v61 = vld [vmem:[#allocation4 + $0xd8] sm:$0xff]  ;;  %v12917_v39 = vadd.f32 %v12881_v56, %v12822_v50  ;;  %v21084_v56 = vld [vmem:[#allocation18_spill] sm:$0xff] }
 0x6c9   : > { %13172 = vst.msk [vmem:[%s20708_s18 + $0xb8] sm:$0xff] %vm689_vm1, %v13136_v31  ;;  %v13102_v38 = vmax.f32 %v13066_v10, 0.0  ;;  %v13027_v16 = vmul.f32 %v20686_v57, %v12986_v61  ;;  %v12985_v2 = vld [vmem:[#allocation4 + $0xd0] sm:$0xff]  ;;  %12954 = vst.msk [vmem:[#allocation4 + $0xf8] sm:$0xff] %vm689_vm1, %v12918_v28  ;;  %v21083_v10 = vld [vmem:[#allocation37_spill] sm:$0xff] }
 0x6ca   : > { %13171 = vst.msk [vmem:[%s20708_s18 + $0xb0] sm:$0xff] %vm689_vm1, %v13135_v55  ;;  %v13101_v12 = vmax.f32 %v13065_v9, 0.0  ;;  %v13026_v17 = vmul.f32 %v20686_v57, %v12985_v2  ;;  %12953 = vst.msk [vmem:[#allocation4 + $0xf0] sm:$0xff] %vm689_vm1, %v12917_v39  ;;  %v16249_v44 = vpop.f32.mrb[232].mxu1 }
 0x6cb   : > { %v13138_v22 = vmul.f32 %v13102_v38, %v21077_v23  ;;  %v13068_v34 = vadd.f32 %v20693_v35, %v13027_v16  ;;  %v12920_v18 = vadd.f32 %v16249_v44, %v12884_v59  ;;  %v12832_v40 = vpop.f32.mrb[233].mxu1  ;;  %v21086_v59 = vld [vmem:[#allocation5_spill] sm:$0xff] }
 0x6cc   : > { %v13137_v60 = vmul.f32 %v13101_v12, %v21078_v5  ;;  %v13067_v46 = vadd.f32 %v20693_v35, %v13026_v17  ;;  %v12988_v19 = vld [vmem:[#allocation4 + $0xe8] sm:$0xff]  ;;  %v12919_v4 = vadd.f32 %v12883_v51, %v12832_v40  ;;  %v21085_v12 = vld [vmem:[#allocation27_spill] sm:$0xff]  ;;  %v21087_v40 = vld [vmem:[#allocation20_spill] sm:$0xff] }
 0x6cd   : > { %13174 = vst.msk [vmem:[%s20708_s18 + $0xc8] sm:$0xff] %vm689_vm1, %v13138_v22  ;;  %v13104_v32 = vmax.f32 %v13068_v34, 0.0  ;;  %v13029_v8 = vmul.f32 %v20686_v57, %v12988_v19  ;;  %v12987_v6 = vld [vmem:[#allocation4 + $0xe0] sm:$0xff]  ;;  %12956 = vst.msk [vmem:[#allocation4 + $0x108] sm:$0xff] %vm689_vm1, %v12920_v18  ;;  %v21088_v5 = vld [vmem:[#allocation12_spill] sm:$0xff] }
 0x6ce   : > { %13173 = vst.msk [vmem:[%s20708_s18 + $0xc0] sm:$0xff] %vm689_vm1, %v13137_v60  ;;  %v13103_v25 = vmax.f32 %v13067_v46, 0.0  ;;  %v13028_v24 = vmul.f32 %v20686_v57, %v12987_v6  ;;  %12955 = vst.msk [vmem:[#allocation4 + $0x100] sm:$0xff] %vm689_vm1, %v12919_v4  ;;  %v16252_v42 = vpop.f32.mrb[234].mxu1 }
 0x6cf   : > { %v13140_v45 = vmul.f32 %v13104_v32, %v21079_v21  ;;  %v13070_v33 = vadd.f32 %v20693_v35, %v13029_v8  ;;  %v12922_v30 = vadd.f32 %v16252_v42, %v12886_v20  ;;  %v12842_v14 = vpop.f32.mrb[235].mxu1 }
 0x6d0   : > { %v13139_v0 = vmul.f32 %v13103_v25, %v21080_v15  ;;  %v13069_v7 = vadd.f32 %v20693_v35, %v13028_v24  ;;  %v12990_v3 = vld [vmem:[#allocation4 + $0xf8] sm:$0xff]  ;;  %v12921_v48 = vadd.f32 %v12885_v11, %v12842_v14 }
 0x6d1   : > { %13176 = vst.msk [vmem:[%s20708_s18 + $0xd8] sm:$0xff] %vm689_vm1, %v13140_v45  ;;  %v13106_v37 = vmax.f32 %v13070_v33, 0.0  ;;  %v13031_v49 = vmul.f32 %v20686_v57, %v12990_v3  ;;  %v12989_v52 = vld [vmem:[#allocation4 + $0xf0] sm:$0xff]  ;;  %12958 = vst.msk [vmem:[#allocation4 + $0x118] sm:$0xff] %vm689_vm1, %v12922_v30 }
 0x6d2   : > { %13175 = vst.msk [vmem:[%s20708_s18 + $0xd0] sm:$0xff] %vm689_vm1, %v13139_v0  ;;  %v13105_v41 = vmax.f32 %v13069_v7, 0.0  ;;  %v13030_v43 = vmul.f32 %v20686_v57, %v12989_v52  ;;  %12957 = vst.msk [vmem:[#allocation4 + $0x110] sm:$0xff] %vm689_vm1, %v12921_v48 }
 0x6d3   : > { %v13142_v1 = vmul.f32 %v13106_v37, %v21081_v26  ;;  %v13072_v53 = vadd.f32 %v20693_v35, %v13031_v49 }
 0x6d4   : > { %v13141_v27 = vmul.f32 %v13105_v41, %v21082_v13  ;;  %v13071_v36 = vadd.f32 %v20693_v35, %v13030_v43  ;;  %v12992_v47 = vld [vmem:[#allocation4 + $0x108] sm:$0xff] }
 0x6d5   : > { %13178 = vst.msk [vmem:[%s20708_s18 + $0xe8] sm:$0xff] %vm689_vm1, %v13142_v1  ;;  %v13108_v62 = vmax.f32 %v13072_v53, 0.0  ;;  %v13033_v58 = vmul.f32 %v20686_v57, %v12992_v47  ;;  %v12991_v29 = vld [vmem:[#allocation4 + $0x100] sm:$0xff] }
 0x6d6   : > { %13177 = vst.msk [vmem:[%s20708_s18 + $0xe0] sm:$0xff] %vm689_vm1, %v13141_v27  ;;  %v13107_v54 = vmax.f32 %v13071_v36, 0.0  ;;  %v13032_v31 = vmul.f32 %v20686_v57, %v12991_v29 }
 0x6d7   : > { %v13144_v28 = vmul.f32 %v13108_v62, %v21083_v10  ;;  %v13074_v50 = vadd.f32 %v20693_v35, %v13033_v58 }
 0x6d8   : > { %v13143_v63 = vmul.f32 %v13107_v54, %v21084_v56  ;;  %v13073_v55 = vadd.f32 %v20693_v35, %v13032_v31  ;;  %v12994_v9 = vld [vmem:[#allocation4 + $0x118] sm:$0xff] }
 0x6d9   : > { %13180 = vst.msk [vmem:[%s20708_s18 + $0xf8] sm:$0xff] %vm689_vm1, %v13144_v28  ;;  %v13110_v61 = vmax.f32 %v13074_v50, 0.0  ;;  %v13035_v39 = vmul.f32 %v20686_v57, %v12994_v9  ;;  %v12993_v38 = vld [vmem:[#allocation4 + $0x110] sm:$0xff] }
 0x6da   : > { %13179 = vst.msk [vmem:[%s20708_s18 + $0xf0] sm:$0xff] %vm689_vm1, %v13143_v63  ;;  %v13109_v16 = vmax.f32 %v13073_v55, 0.0  ;;  %v13034_v2 = vmul.f32 %v20686_v57, %v12993_v38 }
 0x6db   : > { %v13146_v17 = vmul.f32 %v13110_v61, %v21085_v12  ;;  %v13076_v44 = vadd.f32 %v20693_v35, %v13035_v39 }
 0x6dc   : > { %v13145_v23 = vmul.f32 %v13109_v16, %v21086_v59  ;;  %v13075_v22 = vadd.f32 %v20693_v35, %v13034_v2 }
 0x6dd   : > { %13182 = vst.msk [vmem:[%s20708_s18 + $0x108] sm:$0xff] %vm689_vm1, %v13146_v17  ;;  %v13112_v34 = vmax.f32 %v13076_v44, 0.0 }
 0x6de   : > { %13181 = vst.msk [vmem:[%s20708_s18 + $0x100] sm:$0xff] %vm689_vm1, %v13145_v23  ;;  %v13111_v18 = vmax.f32 %v13075_v22, 0.0 }
 0x6df   : > { %v13148_v51 = vmul.f32 %v13112_v34, %v21087_v40 }
 0x6e0   : > { %v13147_v60 = vmul.f32 %v13111_v18, %v21088_v5 }
 0x6e1   : > { %13184 = vst.msk [vmem:[%s20708_s18 + $0x118] sm:$0xff] %vm689_vm1, %v13148_v51 }
 0x6e2   : > { %13183 = vst.msk [vmem:[%s20708_s18 + $0x110] sm:$0xff] %vm689_vm1, %v13147_v60 }
 0x6e3 PF: > { %s19_s30 = sadd.s32 1, %s16532_s30  }
 0x6e4   : > { %p16_p4 = scmp.ge.s32.totalorder %s19_s30, 4  }
 0x6e6   :  { %18 = sbr.rel (!%p16_p4) target bundleno = 1 (0x1), region = 108 }

</bundles_post_ra>
